<compile_context>
chip_gen: v7x
topology: tpu7x:2x2x1
jax: 0.10.0
libtpu: 0.0.40
codegen_flags: <defaults>
</compile_context>

<pallas_src>
import numpy as np
import jax
import jax.numpy as jnp
from jax.experimental import pallas as pl
from jax.experimental.pallas import tpu as pltpu

NUM_CLASSES = 8
BN_EPS = 1e-5


# ----------------------------------------------------------------------------
# Exact PyTorch bilinear interpolation weights (align_corners=False).
# Used only (a) offline to fold the upsample into W1 and (b) in the reference.
# ----------------------------------------------------------------------------
def _bilinear_weights_1d(in_size, out_size):
    scale = in_size / out_size
    W = np.zeros((out_size, in_size), dtype=np.float32)
    for d in range(out_size):
        src = (d + 0.5) * scale - 0.5
        src = max(src, 0.0)
        i0 = min(int(np.floor(src)), in_size - 1)
        i1 = min(i0 + 1, in_size - 1)
        lam = src - i0
        W[d, i0] += 1.0 - lam
        W[d, i1] += lam
    return W


# ----------------------------------------------------------------------------
# Kernel 1: fused (B, 21504) @ W1_folded (21504, 1024) + BN1 + ReLU -> h1 (B, 1024)
#   grid = (n_split=2  [parallel, N columns],  K//tk  [arbitrary, reduction])
#   W1 streamed as bf16; accumulation in f32 scratch; epilogue on last K step.
# ----------------------------------------------------------------------------
def _hidden1_kernel(x_ref, w1_ref, a1_ref, c1_ref, h1_ref, acc_ref):
    k = pl.program_id(1)

    @pl.when(k == 0)
    def _():
        acc_ref[...] = jnp.zeros_like(acc_ref)

    acc_ref[...] += jnp.dot(x_ref[...].astype(jnp.bfloat16), w1_ref[...],
                            preferred_element_type=jnp.float32)

    @pl.when(k == pl.num_programs(1) - 1)
    def _():
        # Linear bias + eval-BN folded into (a1, c1); Dropout = identity.
        h1_ref[...] = jnp.maximum(acc_ref[...] * a1_ref[...] + c1_ref[...], 0.0)


def classifier_hidden1_pallas(fused, w1f, a1, c1, *, tk=7168, n_split=2):
    B, K = fused.shape
    N = w1f.shape[1]
    assert K % tk == 0 and N % n_split == 0
    tn = N // n_split
    return pl.pallas_call(
        _hidden1_kernel,
        out_shape=jax.ShapeDtypeStruct((B, N), jnp.float32),
        grid_spec=pltpu.PrefetchScalarGridSpec(
            num_scalar_prefetch=0,
            grid=(n_split, K // tk),
            in_specs=[
                pl.BlockSpec((B, tk), lambda j, k: (0, k)),   # fused activations (f32)
                pl.BlockSpec((tk, tn), lambda j, k: (k, j)),  # W1 tile (bf16)
                pl.BlockSpec((1, tn), lambda j, k: (0, j)),   # BN1 scale
                pl.BlockSpec((1, tn), lambda j, k: (0, j)),   # BN1 shift (+bias1)
            ],
            out_specs=pl.BlockSpec((B, tn), lambda j, k: (0, j)),
            scratch_shapes=[pltpu.VMEM((B, tn), jnp.float32)],
        ),
        compiler_params=pltpu.CompilerParams(
            dimension_semantics=("parallel", "arbitrary"),
            vmem_limit_bytes=32 << 20),
    )(fused, w1f, a1, c1)


# ----------------------------------------------------------------------------
# Kernel 2 (tiny epilogue, single step):
#   h2 = ReLU(h1 @ W2 * a2 + c2) ;  out = h2 @ W3 + b3
# ----------------------------------------------------------------------------
def _head_kernel(h1_ref, w2_ref, a2_ref, c2_ref, w3_ref, b3_ref, o_ref):
    h2 = jnp.dot(h1_ref[...].astype(jnp.bfloat16), w2_ref[...],
                 preferred_element_type=jnp.float32)
    h2 = jnp.maximum(h2 * a2_ref[...] + c2_ref[...], 0.0)   # f32 epilogue (v5e-safe)
    o_ref[...] = (jnp.dot(h2, w3_ref[...], preferred_element_type=jnp.float32)
                  + b3_ref[...])


def classifier_head_pallas(h1, w2, a2, c2, w3, b3):
    B = h1.shape[0]
    nc = w3.shape[1]
    return pl.pallas_call(
        _head_kernel,
        out_shape=jax.ShapeDtypeStruct((B, nc), jnp.float32),
        grid=(1,),
        in_specs=[pl.BlockSpec(h1.shape, lambda i: (0, 0)),
                  pl.BlockSpec(w2.shape, lambda i: (0, 0)),
                  pl.BlockSpec(a2.shape, lambda i: (0, 0)),
                  pl.BlockSpec(c2.shape, lambda i: (0, 0)),
                  pl.BlockSpec(w3.shape, lambda i: (0, 0)),
                  pl.BlockSpec(b3.shape, lambda i: (0, 0))],
        out_specs=pl.BlockSpec((B, nc), lambda i: (0, 0)),
    )(h1, w2, a2, c2, w3, b3)


# ----------------------------------------------------------------------------
# Parameter construction (raw, PyTorch-style) and offline folding
# ----------------------------------------------------------------------------
def make_raw_classifier_params(key, num_classes):
    ks = jax.random.split(key, 14)
    w1 = jax.random.normal(ks[0], (256 * 3 * 8 * 8, 1024), jnp.float32) * 0.01
    b1 = jax.random.normal(ks[1], (1024,), jnp.float32) * 0.01
    g1 = 1.0 + 0.1 * jax.random.normal(ks[2], (1024,), jnp.float32)
    be1 = 0.01 * jax.random.normal(ks[3], (1024,), jnp.float32)
    m1 = 0.05 * jax.random.normal(ks[4], (1024,), jnp.float32)
    v1 = 1.0 + 0.1 * jax.random.uniform(ks[5], (1024,), jnp.float32)
    w2 = jax.random.normal(ks[6], (1024, 128), jnp.float32) * 0.02
    b2 = jax.random.normal(ks[7], (128,), jnp.float32) * 0.01
    g2 = 1.0 + 0.1 * jax.random.normal(ks[8], (128,), jnp.float32)
    be2 = 0.01 * jax.random.normal(ks[9], (128,), jnp.float32)
    m2 = 0.05 * jax.random.normal(ks[10], (128,), jnp.float32)
    v2 = 1.0 + 0.1 * jax.random.uniform(ks[11], (128,), jnp.float32)
    w3 = jax.random.normal(ks[12], (128, num_classes), jnp.float32) * 0.05
    b3 = jax.random.normal(ks[13], (num_classes,), jnp.float32) * 0.01
    return (w1, b1, g1, be1, m1, v1, w2, b2, g2, be2, m2, v2, w3, b3)


def fold_params(raw, p4_hw, p5_hw):
    """Fold (a) linear bias + eval-BN into per-feature affines and (b) the bilinear
    upsample of P4/P5 into W1.  Folding is done in f32, then W1/W2 are cast to bf16."""
    (w1, b1, g1, be1, m1, v1, w2, b2, g2, be2, m2, v2, w3, b3) = raw
    hi = jax.lax.Precision.HIGHEST

    s1 = g1 / jnp.sqrt(v1 + BN_EPS)
    a1 = s1.reshape(1, -1)
    c1 = ((b1 - m1) * s1 + be1).reshape(1, -1)
    s2 = g2 / jnp.sqrt(v2 + BN_EPS)
    a2 = s2.reshape(1, -1)
    c2 = ((b2 - m2) * s2 + be2).reshape(1, -1)

    C = 256
    n_blk = C * 8 * 8                      # 16384 rows per fused block of W1
    W1_p3 = w1[:n_blk]                                        # P3 rows: unchanged
    W1_p4 = w1[n_blk:2 * n_blk].reshape(C, 8, 8, -1)
    W1_p5 = w1[2 * n_blk:].reshape(C, 8, 8, -1)

    Wh4 = jnp.asarray(_bilinear_weights_1d(p4_hw[0], 8))
    Ww4 = jnp.asarray(_bilinear_weights_1d(p4_hw[1], 8))
    Wh5 = jnp.asarray(_bilinear_weights_1d(p5_hw[0], 8))
    Ww5 = jnp.asarray(_bilinear_weights_1d(p5_hw[1], 8))

    # folded[c, ih, iw, n] = sum_{oh,ow} Wh[oh,ih] Ww[ow,iw] W1[c, oh, ow, n]
    f_p4 = jnp.einsum('oi,pj,copn->cijn', Wh4, Ww4, W1_p4,
                      precision=hi).reshape(C * p4_hw[0] * p4_hw[1], -1)
    f_p5 = jnp.einsum('oi,pj,copn->cijn', Wh5, Ww5, W1_p5,
                      precision=hi).reshape(C * p5_hw[0] * p5_hw[1], -1)

    w1f = jnp.concatenate([W1_p3, f_p4, f_p5], axis=0).astype(jnp.bfloat16)
    return (w1f, a1, c1, w2.astype(jnp.bfloat16), a2, c2,
            w3, b3.reshape(1, -1))


# ----------------------------------------------------------------------------
# Forward (folded path) + pure-JAX reference of the original module semantics
# ----------------------------------------------------------------------------
def net_tail_forward(P3, P4, P5, params):
    w1f, a1, c1, w2, a2, c2, w3, b3 = params
    B = P3.shape[0]
    # Upsample + concat are folded into W1, so feed the raw feature maps directly.
    fused = jnp.concatenate(
        [P3.reshape(B, -1), P4.reshape(B, -1), P5.reshape(B, -1)], axis=1)
    h1 = classifier_hidden1_pallas(fused, w1f, a1, c1)
    return classifier_head_pallas(h1, w2, a2, c2, w3, b3)


def _reference(P3, P4, P5, raw):
    """Original (unfolded) semantics in pure JAX at HIGHEST precision."""
    (w1, b1, g1, be1, m1, v1, w2, b2, g2, be2, m2, v2, w3, b3) = raw
    hi = jax.lax.Precision.HIGHEST

    def up(x):
        _, _, H, W = x.shape
        Wh = jnp.asarray(_bilinear_weights_1d(H, 8))
        Ww = jnp.asarray(_bilinear_weights_1d(W, 8))
        return jnp.einsum('oi,bcij,pj->bcop', Wh, x, Ww, precision=hi)

    fused = jnp.concatenate([P3, up(P4), up(P5)], axis=1).reshape(P3.shape[0], -1)
    h = jnp.dot(fused, w1, precision=hi) + b1
    h = (h - m1) / jnp.sqrt(v1 + BN_EPS) * g1 + be1
    h = jnp.maximum(h, 0.0)                               # Dropout = identity (eval)
    h = jnp.dot(h, w2, precision=hi) + b2
    h = (h - m2) / jnp.sqrt(v2 + BN_EPS) * g2 + be2
    h = jnp.maximum(h, 0.0)
    return jnp.dot(h, w3, precision=hi) + b3


if __name__ == "__main__":
    key = jax.random.PRNGKey(0)
    k_p3, k_p4, k_p5, k_params = jax.random.split(key, 4)

    B = 2
    # FPN outputs (synthetic): P3 at 8x8, P4 at 4x4, P5 at 2x2, all 256 channels.
    P3 = jax.random.normal(k_p3, (B, 256, 8, 8), jnp.float32)
    P4 = jax.random.normal(k_p4, (B, 256, 4, 4), jnp.float32)
    P5 = jax.random.normal(k_p5, (B, 256, 2, 2), jnp.float32)

    raw_params = make_raw_classifier_params(k_params, NUM_CLASSES)
    folded_params = fold_params(raw_params, p4_hw=(4, 4), p5_hw=(2, 2))  # built once

    fwd = jax.jit(net_tail_forward)
    out = jax.block_until_ready(fwd(P3, P4, P5, folded_params))
    assert out.shape == (B, NUM_CLASSES) and out.dtype == jnp.float32

    ref = jax.block_until_ready(_reference(P3, P4, P5, raw_params))
    np.testing.assert_allclose(np.asarray(out), np.asarray(ref),
                               rtol=5e-2, atol=5e-2)

    print("KERNEL_OK")
</pallas_src>

<mosaic_0001>
module attributes {stable_mosaic.version = 11 : i64} {
  func.func @_hidden1_kernel(%arg0: i32, %arg1: i32, %arg2: memref<2x7168xf32, #tpu.memory_space<vmem>>, %arg3: memref<7168x512xbf16, #tpu.memory_space<vmem>>, %arg4: memref<1x512xf32, #tpu.memory_space<vmem>>, %arg5: memref<1x512xf32, #tpu.memory_space<vmem>>, %arg6: memref<2x512xf32, #tpu.memory_space<vmem>>, %arg7: memref<2x512xf32, #tpu.memory_space<vmem>>) attributes {dimension_semantics = [#tpu.dimension_semantics<parallel>, #tpu.dimension_semantics<arbitrary>], iteration_bounds = array<i64: 2, 3>, scalar_prefetch = 0 : i64, scratch_operands = 1 : i64, tpu.core_type = #tpu.core_type<tc>, window_params = [{transform_indices = @transform_0, window_bounds = array<i64: 2, 7168>}, {transform_indices = @transform_1, window_bounds = array<i64: 7168, 512>}, {transform_indices = @transform_2, window_bounds = array<i64: 1, 512>}, {transform_indices = @transform_3, window_bounds = array<i64: 1, 512>}, {transform_indices = @transform_4, window_bounds = array<i64: 2, 512>}]} {
    %c0_i32 = arith.constant 0 : i32
    %0 = arith.cmpi eq, %arg1, %c0_i32 : i32
    %1 = arith.extui %0 : i1 to i32
    %c0_i32_0 = arith.constant 0 : i32
    %2 = arith.cmpi ne, %1, %c0_i32_0 : i32
    scf.if %2 {
      %cst_9 = arith.constant 0.000000e+00 : f32
      %13 = vector.broadcast %cst_9 : f32 to vector<2x512xf32>
      %c0_10 = arith.constant 0 : index
      %c0_11 = arith.constant 0 : index
      %14 = vector.load %arg7[%c0_10, %c0_11] : memref<2x512xf32, #tpu.memory_space<vmem>>, vector<2x512xf32>
      tpu.vector_store %arg7[%c0_10, %c0_11], %13 {strides = array<i32>} : memref<2x512xf32, #tpu.memory_space<vmem>>, vector<2x512xf32>,
    } else {
    }
    %c0 = arith.constant 0 : index
    %c0_1 = arith.constant 0 : index
    %3 = vector.load %arg7[%c0, %c0_1] : memref<2x512xf32, #tpu.memory_space<vmem>>, vector<2x512xf32>
    %c0_2 = arith.constant 0 : index
    %c0_3 = arith.constant 0 : index
    %4 = vector.load %arg2[%c0_2, %c0_3] : memref<2x7168xf32, #tpu.memory_space<vmem>>, vector<2x7168xf32>
    %5 = arith.truncf %4 : vector<2x7168xf32> to vector<2x7168xbf16>
    %c0_4 = arith.constant 0 : index
    %c0_5 = arith.constant 0 : index
    %6 = vector.load %arg3[%c0_4, %c0_5] : memref<7168x512xbf16, #tpu.memory_space<vmem>>, vector<7168x512xbf16>
    %cst = arith.constant dense<0.000000e+00> : vector<2x512xf32>
    %7 = tpu.matmul %5, %6, %cst {dimension_numbers = #tpu.dot_dimension_numbers<[1], [0], [0], [1], [0, 0, 1, 1], [], []>} : vector<2x7168xbf16>, vector<7168x512xbf16>, vector<2x512xf32> -> vector<2x512xf32>
    %8 = arith.addf %3, %7 : vector<2x512xf32>
    %c0_6 = arith.constant 0 : index
    %c0_7 = arith.constant 0 : index
    %9 = vector.load %arg7[%c0_6, %c0_7] : memref<2x512xf32, #tpu.memory_space<vmem>>, vector<2x512xf32>
    tpu.vector_store %arg7[%c0_6, %c0_7], %8 {strides = array<i32>} : memref<2x512xf32, #tpu.memory_space<vmem>>, vector<2x512xf32>,
    %c2_i32 = arith.constant 2 : i32
    %10 = arith.cmpi eq, %arg1, %c2_i32 : i32
    %11 = arith.extui %10 : i1 to i32
    %c0_i32_8 = arith.constant 0 : i32
    %12 = arith.cmpi ne, %11, %c0_i32_8 : i32
    scf.if %12 {
      %c0_9 = arith.constant 0 : index
      %c0_10 = arith.constant 0 : index
      %13 = vector.load %arg7[%c0_9, %c0_10] : memref<2x512xf32, #tpu.memory_space<vmem>>, vector<2x512xf32>
      %c0_11 = arith.constant 0 : index
      %c0_12 = arith.constant 0 : index
      %14 = vector.load %arg4[%c0_11, %c0_12] : memref<1x512xf32, #tpu.memory_space<vmem>>, vector<1x512xf32>
      %15 = vector.broadcast %14 : vector<1x512xf32> to vector<2x512xf32>
      %16 = arith.mulf %13, %15 : vector<2x512xf32>
      %c0_13 = arith.constant 0 : index
      %c0_14 = arith.constant 0 : index
      %17 = vector.load %arg5[%c0_13, %c0_14] : memref<1x512xf32, #tpu.memory_space<vmem>>, vector<1x512xf32>
      %18 = vector.broadcast %17 : vector<1x512xf32> to vector<2x512xf32>
      %19 = arith.addf %16, %18 : vector<2x512xf32>
      %cst_15 = arith.constant 0.000000e+00 : f32
      %20 = vector.broadcast %cst_15 : f32 to vector<2x512xf32>
      %21 = arith.maximumf %19, %20 : vector<2x512xf32>
      %c0_16 = arith.constant 0 : index
      %c0_17 = arith.constant 0 : index
      %22 = vector.load %arg6[%c0_16, %c0_17] : memref<2x512xf32, #tpu.memory_space<vmem>>, vector<2x512xf32>
      tpu.vector_store %arg6[%c0_16, %c0_17], %21 {strides = array<i32>} : memref<2x512xf32, #tpu.memory_space<vmem>>, vector<2x512xf32>,
    } else {
    }
    return
  }
  func.func @transform_0(%arg0: i32, %arg1: i32) -> (i32, i32) {
    %c0_i32 = arith.constant 0 : i32
    %c0_i32_0 = arith.constant 0 : i32
    return %c0_i32, %arg1 : i32, i32
  }
  func.func @transform_1(%arg0: i32, %arg1: i32) -> (i32, i32) {
    %c0_i32 = arith.constant 0 : i32
    return %arg1, %arg0 : i32, i32
  }
  func.func @transform_2(%arg0: i32, %arg1: i32) -> (i32, i32) {
    %c0_i32 = arith.constant 0 : i32
    %c0_i32_0 = arith.constant 0 : i32
    return %c0_i32, %arg0 : i32, i32
  }
  func.func @transform_3(%arg0: i32, %arg1: i32) -> (i32, i32) {
    %c0_i32 = arith.constant 0 : i32
    %c0_i32_0 = arith.constant 0 : i32
    return %c0_i32, %arg0 : i32, i32
  }
  func.func @transform_4(%arg0: i32, %arg1: i32) -> (i32, i32) {
    %c0_i32 = arith.constant 0 : i32
    %c0_i32_0 = arith.constant 0 : i32
    return %c0_i32, %arg0 : i32, i32
  }
}

module attributes {stable_mosaic.version = 11 : i64} {
  func.func @_head_kernel(%arg0: i32, %arg1: memref<2x1024xf32, #tpu.memory_space<vmem>>, %arg2: memref<1024x128xbf16, #tpu.memory_space<vmem>>, %arg3: memref<1x128xf32, #tpu.memory_space<vmem>>, %arg4: memref<1x128xf32, #tpu.memory_space<vmem>>, %arg5: memref<128x8xf32, #tpu.memory_space<vmem>>, %arg6: memref<1x8xf32, #tpu.memory_space<vmem>>, %arg7: memref<2x8xf32, #tpu.memory_space<vmem>>) attributes {dimension_semantics = [#tpu.dimension_semantics<arbitrary>], iteration_bounds = array<i64: 1>, scalar_prefetch = 0 : i64, scratch_operands = 0 : i64, tpu.core_type = #tpu.core_type<tc>, window_params = [{pipeline_mode = #tpu.pipeline_mode<synchronous>, transform_indices = @transform_0, window_bounds = array<i64: 2, 1024>}, {pipeline_mode = #tpu.pipeline_mode<synchronous>, transform_indices = @transform_1, window_bounds = array<i64: 1024, 128>}, {pipeline_mode = #tpu.pipeline_mode<synchronous>, transform_indices = @transform_2, window_bounds = array<i64: 1, 128>}, {pipeline_mode = #tpu.pipeline_mode<synchronous>, transform_indices = @transform_3, window_bounds = array<i64: 1, 128>}, {pipeline_mode = #tpu.pipeline_mode<synchronous>, transform_indices = @transform_4, window_bounds = array<i64: 128, 8>}, {pipeline_mode = #tpu.pipeline_mode<synchronous>, transform_indices = @transform_5, window_bounds = array<i64: 1, 8>}, {pipeline_mode = #tpu.pipeline_mode<synchronous>, transform_indices = @transform_6, window_bounds = array<i64: 2, 8>}]} {
    %c0 = arith.constant 0 : index
    %c0_0 = arith.constant 0 : index
    %0 = vector.load %arg1[%c0, %c0_0] : memref<2x1024xf32, #tpu.memory_space<vmem>>, vector<2x1024xf32>
    %1 = arith.truncf %0 : vector<2x1024xf32> to vector<2x1024xbf16>
    %c0_1 = arith.constant 0 : index
    %c0_2 = arith.constant 0 : index
    %2 = vector.load %arg2[%c0_1, %c0_2] : memref<1024x128xbf16, #tpu.memory_space<vmem>>, vector<1024x128xbf16>
    %cst = arith.constant dense<0.000000e+00> : vector<2x128xf32>
    %3 = tpu.matmul %1, %2, %cst {dimension_numbers = #tpu.dot_dimension_numbers<[1], [0], [0], [1], [0, 0, 1, 1], [], []>} : vector<2x1024xbf16>, vector<1024x128xbf16>, vector<2x128xf32> -> vector<2x128xf32>
    %c0_3 = arith.constant 0 : index
    %c0_4 = arith.constant 0 : index
    %4 = vector.load %arg3[%c0_3, %c0_4] : memref<1x128xf32, #tpu.memory_space<vmem>>, vector<1x128xf32>
    %5 = vector.broadcast %4 : vector<1x128xf32> to vector<2x128xf32>
    %6 = arith.mulf %3, %5 : vector<2x128xf32>
    %c0_5 = arith.constant 0 : index
    %c0_6 = arith.constant 0 : index
    %7 = vector.load %arg4[%c0_5, %c0_6] : memref<1x128xf32, #tpu.memory_space<vmem>>, vector<1x128xf32>
    %8 = vector.broadcast %7 : vector<1x128xf32> to vector<2x128xf32>
    %9 = arith.addf %6, %8 : vector<2x128xf32>
    %cst_7 = arith.constant 0.000000e+00 : f32
    %10 = vector.broadcast %cst_7 : f32 to vector<2x128xf32>
    %11 = arith.maximumf %9, %10 : vector<2x128xf32>
    %c0_8 = arith.constant 0 : index
    %c0_9 = arith.constant 0 : index
    %12 = vector.load %arg5[%c0_8, %c0_9] : memref<128x8xf32, #tpu.memory_space<vmem>>, vector<128x8xf32>
    %cst_10 = arith.constant dense<0.000000e+00> : vector<2x8xf32>
    %13 = tpu.matmul %11, %12, %cst_10 {dimension_numbers = #tpu.dot_dimension_numbers<[1], [0], [0], [1], [0, 0, 1, 1], [], []>} : vector<2x128xf32>, vector<128x8xf32>, vector<2x8xf32> -> vector<2x8xf32>
    %c0_11 = arith.constant 0 : index
    %c0_12 = arith.constant 0 : index
    %14 = vector.load %arg6[%c0_11, %c0_12] : memref<1x8xf32, #tpu.memory_space<vmem>>, vector<1x8xf32>
    %15 = vector.broadcast %14 : vector<1x8xf32> to vector<2x8xf32>
    %16 = arith.addf %13, %15 : vector<2x8xf32>
    %c0_13 = arith.constant 0 : index
    %c0_14 = arith.constant 0 : index
    %17 = vector.load %arg7[%c0_13, %c0_14] : memref<2x8xf32, #tpu.memory_space<vmem>>, vector<2x8xf32>
    tpu.vector_store %arg7[%c0_13, %c0_14], %16 {strides = array<i32>} : memref<2x8xf32, #tpu.memory_space<vmem>>, vector<2x8xf32>,
    return
  }
  func.func @transform_0(%arg0: i32) -> (i32, i32) {
    %c0_i32 = arith.constant 0 : i32
    %c0_i32_0 = arith.constant 0 : i32
    %c0_i32_1 = arith.constant 0 : i32
    return %c0_i32, %c0_i32_0 : i32, i32
  }
  func.func @transform_1(%arg0: i32) -> (i32, i32) {
    %c0_i32 = arith.constant 0 : i32
    %c0_i32_0 = arith.constant 0 : i32
    %c0_i32_1 = arith.constant 0 : i32
    return %c0_i32, %c0_i32_0 : i32, i32
  }
  func.func @transform_2(%arg0: i32) -> (i32, i32) {
    %c0_i32 = arith.constant 0 : i32
    %c0_i32_0 = arith.constant 0 : i32
    %c0_i32_1 = arith.constant 0 : i32
    return %c0_i32, %c0_i32_0 : i32, i32
  }
  func.func @transform_3(%arg0: i32) -> (i32, i32) {
    %c0_i32 = arith.constant 0 : i32
    %c0_i32_0 = arith.constant 0 : i32
    %c0_i32_1 = arith.constant 0 : i32
    return %c0_i32, %c0_i32_0 : i32, i32
  }
  func.func @transform_4(%arg0: i32) -> (i32, i32) {
    %c0_i32 = arith.constant 0 : i32
    %c0_i32_0 = arith.constant 0 : i32
    %c0_i32_1 = arith.constant 0 : i32
    return %c0_i32, %c0_i32_0 : i32, i32
  }
  func.func @transform_5(%arg0: i32) -> (i32, i32) {
    %c0_i32 = arith.constant 0 : i32
    %c0_i32_0 = arith.constant 0 : i32
    %c0_i32_1 = arith.constant 0 : i32
    return %c0_i32, %c0_i32_0 : i32, i32
  }
  func.func @transform_6(%arg0: i32) -> (i32, i32) {
    %c0_i32 = arith.constant 0 : i32
    %c0_i32_0 = arith.constant 0 : i32
    %c0_i32_1 = arith.constant 0 : i32
    return %c0_i32, %c0_i32_0 : i32, i32
  }
}

</mosaic_0001>

<bundles_post_ra>
// kernel: net_tail_forward.3
= control target key start
LH: loop header
LB: loop body
LE: loop exit
PB: predicated region body
PF: predicated region fallthrough
CT: control target
= control target key end

     0   :  { %v33_v28 = vlaneseq  ;;  %v1203_v36 = vmov 1983009808   ;;  %s1516_s0 = inlined_call_operand.vmem [shape: f32[2,1024], index: 0, kind: input, shape index: {}]   ;;  %s1517_s1 = inlined_call_operand.vmem [shape: bf16[1024,128], index: 1, kind: input, shape index: {}]   ;;  %s1518_s2 = inlined_call_operand.vmem [shape: f32[1,128], index: 2, kind: input, shape index: {}]   ;;  %s1519_s3 = inlined_call_operand.vmem [shape: f32[1,128], index: 3, kind: input, shape index: {}]   ;;  %s1520_s4 = inlined_call_operand.vmem [shape: f32[128,8], index: 4, kind: input, shape index: {}]   ;;  %s1521_s5 = inlined_call_operand.vmem [shape: f32[1,8], index: 5, kind: input, shape index: {}]   ;;  %s1522_s6 = inlined_call_operand.hbm [shape: f32[2,8], index: 6, kind: output, shape index: {}]  }
   0x1   :  { %v1113_v0 = vld [vmem:[%s1517_s1 + $0x40] sm:$0xff]   ;;  %v1117_v4 = vld [vmem:[%s1517_s1 + $0x48] sm:$0xff]   ;;  %v1121_v8 = vld [vmem:[%s1517_s1 + $0x50] sm:$0xff]   ;;  %v31_v37 = vunpack.c.l.s4 %v1203_v36 }
   0x2   :  { %v1114_v1 = vld [vmem:[%s1517_s1 + $0xc0] sm:$0xff]   ;;  %944 = vmatprep.subr.bf16.mxu0 %v1113_v0  ;;  %v1118_v5 = vld [vmem:[%s1517_s1 + $0xc8] sm:$0xff]   ;;  %v1122_v9 = vld [vmem:[%s1517_s1 + $0xd0] sm:$0xff]   ;;  %v34_v33 = vshrl.u32 %v33_v28, 7 }
   0x3   :  { %v1115_v2 = vld [vmem:[%s1517_s1] sm:$0xff]   ;;  %966 = vmatprep.subr.bf16.mxu1 %v1114_v1  ;;  %v1119_v6 = vld [vmem:[%s1517_s1 + $0x8] sm:$0xff]   ;;  %v1123_v10 = vld [vmem:[%s1517_s1 + $0x10] sm:$0xff]   ;;  %v32_v39 = vunpack.c.0.s8 %v31_v37 }
   0x4   :  { %v1116_v3 = vld [vmem:[%s1517_s1 + $0x80] sm:$0xff]   ;;  %945 = vmatpush3.bf16.msra.mxu0 %v1115_v2  ;;  %v1120_v7 = vld [vmem:[%s1517_s1 + $0x88] sm:$0xff]   ;;  %v1124_v11 = vld [vmem:[%s1517_s1 + $0x90] sm:$0xff]  }
   0x5   :  { %967 = vmatpush3.bf16.msra.mxu1 %v1116_v3  ;;  %946 = vmatprep.subr.bf16.mxu0 %v1117_v4  ;;  %v1125_v12 = vld [vmem:[%s1517_s1 + $0x58] sm:$0xff]   ;;  %v1129_v16 = vld [vmem:[%s1517_s1 + $0x60] sm:$0xff]   ;;  %v1133_v20 = vld [vmem:[%s1517_s1 + $0x68] sm:$0xff]   ;;  %v1348_v41 = vsub.s32 %v32_v39, %v34_v33 }
   0x6   :  { %968 = vmatprep.subr.bf16.mxu1 %v1118_v5  ;;  %v1126_v13 = vld [vmem:[%s1517_s1 + $0xd8] sm:$0xff]   ;;  %v1130_v17 = vld [vmem:[%s1517_s1 + $0xe0] sm:$0xff]   ;;  %v1134_v21 = vld [vmem:[%s1517_s1 + $0xe8] sm:$0xff]  }
   0x7   :  { %v1127_v14 = vld [vmem:[%s1517_s1 + $0x18] sm:$0xff]   ;;  %v1131_v18 = vld [vmem:[%s1517_s1 + $0x20] sm:$0xff]   ;;  %v1135_v22 = vld [vmem:[%s1517_s1 + $0x28] sm:$0xff]  }
   0x8   :  { %947 = vmatpush3.bf16.msra.mxu0 %v1119_v6  ;;  %v1128_v15 = vld [vmem:[%s1517_s1 + $0x98] sm:$0xff]   ;;  %v1132_v19 = vld [vmem:[%s1517_s1 + $0xa0] sm:$0xff]   ;;  %v1136_v23 = vld [vmem:[%s1517_s1 + $0xa8] sm:$0xff]  }
   0x9   :  { %969 = vmatpush3.bf16.msra.mxu1 %v1120_v7  ;;  %948 = vmatprep.subr.bf16.mxu0 %v1121_v8  ;;  %v1137_v24 = vld [vmem:[%s1517_s1 + $0x70] sm:$0xff]   ;;  %v1141_v29 = vld [vmem:[%s1517_s1 + $0x78] sm:$0xff]   ;;  %v25_v34 = vld [vmem:[%s1516_s0] sm:$0xff] }
   0xa   :  { %970 = vmatprep.subr.bf16.mxu1 %v1122_v9  ;;  %v1138_v25 = vld [vmem:[%s1517_s1 + $0xf0] sm:$0xff]   ;;  %v1142_v30 = vld [vmem:[%s1517_s1 + $0xf8] sm:$0xff]   ;;  %v1146_v35 = vld [vmem:[%s1517_s1 + $0x140] sm:$0xff]   ;;  %v29_v40 = vcombine.high %v25_v34, %v25_v34  ;;  %v36_v42 = vrot.slane %v25_v34, %v1348_v41 }
   0xb   :  { %v1139_v26 = vld [vmem:[%s1517_s1 + $0x30] sm:$0xff]   ;;  %v1143_v31 = vld [vmem:[%s1517_s1 + $0x38] sm:$0xff]   ;;  %v1147_v38 = vld [vmem:[%s1517_s1 + $0x1c0] sm:$0xff]  }
   0xc   :  { %949 = vmatpush3.bf16.msra.mxu0 %v1123_v10  ;;  %v1140_v27 = vld [vmem:[%s1517_s1 + $0xb0] sm:$0xff]   ;;  %v1144_v32 = vld [vmem:[%s1517_s1 + $0xb8] sm:$0xff]   ;;  %v43_v43 = vrot.slane %v29_v40, %v1348_v41  ;;  %v44_v44 = vcombine.high %v36_v42, %v36_v42  ;;  %v1148_v46 = vld [vmem:[%s1517_s1 + $0x100] sm:$0xff]   ;;  %v71_v47 = vpack.c.bf16 %v36_v42, %v36_v42 }
   0xd   :  { %971 = vmatpush3.bf16.msra.mxu1 %v1124_v11  ;;  %950 = vmatprep.subr.bf16.mxu0 %v1125_v12  ;;  %v1149_v49 = vld [vmem:[%s1517_s1 + $0x180] sm:$0xff]   ;;  %v1150_v52 = vld [vmem:[%s1517_s1 + $0x148] sm:$0xff]   ;;  %v1154_v56 = vld [vmem:[%s1517_s1 + $0x150] sm:$0xff]  }
   0xe   :  { %972 = vmatprep.subr.bf16.mxu1 %v1126_v13  ;;  %v45_v45 = vcombine.high %v43_v43, %v43_v43  ;;  %v73_v48 = vpack.c.bf16 %v43_v43, %v43_v43  ;;  %v72_v50 = vpack.c.bf16 %v44_v44, %v44_v44  ;;  %v1151_v53 = vld [vmem:[%s1517_s1 + $0x1c8] sm:$0xff]   ;;  %v1155_v57 = vld [vmem:[%s1517_s1 + $0x1d0] sm:$0xff]   ;;  %v1158_v60 = vld [vmem:[%s1517_s1 + $0x158] sm:$0xff]  }
   0xf   :  { %v1152_v54 = vld [vmem:[%s1517_s1 + $0x108] sm:$0xff]   ;;  %v1156_v58 = vld [vmem:[%s1517_s1 + $0x110] sm:$0xff]   ;;  %v1159_v61 = vld [vmem:[%s1517_s1 + $0x1d8] sm:$0xff]  }
  0x10   :  { %951 = vmatpush3.bf16.msra.mxu0 %v1127_v14  ;;  %v74_v51 = vpack.c.bf16 %v45_v45, %v45_v45  ;;  %623 = vmatprep.mubr.bf16.mxu0 %v72_v50  ;;  %v1153_v55 = vld [vmem:[%s1517_s1 + $0x188] sm:$0xff]   ;;  %v1157_v59 = vld [vmem:[%s1517_s1 + $0x190] sm:$0xff]   ;;  %v1160_v62 = vld [vmem:[%s1517_s1 + $0x118] sm:$0xff]  }
  0x11   :  { %973 = vmatpush3.bf16.msra.mxu1 %v1128_v15  ;;  %952 = vmatprep.subr.bf16.mxu0 %v1129_v16  ;;  %v1161_v63 = vld [vmem:[%s1517_s1 + $0x198] sm:$0xff]   ;;  %v1162_v0 = vld [vmem:[%s1517_s1 + $0x160] sm:$0xff]   ;;  %v1166_v4 = vld [vmem:[%s1517_s1 + $0x168] sm:$0xff]  }
  0x12   :  { %974 = vmatprep.subr.bf16.mxu1 %v1130_v17  ;;  %663 = vmatprep.mubr.bf16.mxu1 %v74_v51  ;;  %v1163_v1 = vld [vmem:[%s1517_s1 + $0x1e0] sm:$0xff]   ;;  %v1167_v5 = vld [vmem:[%s1517_s1 + $0x1e8] sm:$0xff]   ;;  %v1170_v8 = vld [vmem:[%s1517_s1 + $0x170] sm:$0xff]  }
  0x13   :  { %v1164_v2 = vld [vmem:[%s1517_s1 + $0x120] sm:$0xff]   ;;  %v1168_v6 = vld [vmem:[%s1517_s1 + $0x128] sm:$0xff]   ;;  %v1171_v9 = vld [vmem:[%s1517_s1 + $0x1f0] sm:$0xff]  }
  0x14   :  { %953 = vmatpush3.bf16.msra.mxu0 %v1131_v18  ;;  %v1165_v3 = vld [vmem:[%s1517_s1 + $0x1a0] sm:$0xff]   ;;  %v1169_v7 = vld [vmem:[%s1517_s1 + $0x1a8] sm:$0xff]  }
  0x15   :  { %975 = vmatpush3.bf16.msra.mxu1 %v1132_v19  ;;  %954 = vmatprep.subr.bf16.mxu0 %v1133_v20  ;;  %v26_v10 = vld [vmem:[%s1516_s0 + $0x8] sm:$0xff] }
  0x16   :  { %976 = vmatprep.subr.bf16.mxu1 %v1134_v21 }
  0x18   :  { %955 = vmatpush3.bf16.msra.mxu0 %v1135_v22 }
  0x19   :  { %977 = vmatpush3.bf16.msra.mxu1 %v1136_v23  ;;  %956 = vmatprep.subr.bf16.mxu0 %v1137_v24 }
  0x1a   :  { %978 = vmatprep.subr.bf16.mxu1 %v1138_v25 }
  0x1c   :  { %957 = vmatpush3.bf16.msra.mxu0 %v1139_v26 }
  0x1d   :  { %979 = vmatpush3.bf16.msra.mxu1 %v1140_v27  ;;  %958 = vmatprep.subr.bf16.mxu0 %v1141_v29 }
  0x1e   :  { %980 = vmatprep.subr.bf16.mxu1 %v1142_v30 }
  0x20   :  { %959 = vmatpush3.bf16.msra.mxu0 %v1143_v31 }
  0x21   :  { %981 = vmatpush3.bf16.msra.mxu1 %v1144_v32  ;;  %988 = vmatprep.subr.bf16.mxu0 %v1146_v35 }
  0x22   :  { %1010 = vmatprep.subr.bf16.mxu1 %v1147_v38 }
  0x23   :  { %624 = vmatmul.mubr.bf16.vlgmr.msra.gmra.mrb[0].mxu0 %v71_v47 }
  0x24   :  { %664 = vmatmul.mubr.bf16.vlgmr.msra.gmra.mrb[0].mxu1 %v73_v48  ;;  %989 = vmatpush3.bf16.msra.mxu0 %v1148_v46 }
  0x25   :  { %1011 = vmatpush3.bf16.msra.mxu1 %v1149_v49  ;;  %990 = vmatprep.subr.bf16.mxu0 %v1150_v52 }
  0x26   :  { %1012 = vmatprep.subr.bf16.mxu1 %v1151_v53 }
  0x28   :  { %991 = vmatpush3.bf16.msra.mxu0 %v1152_v54 }
  0x29   :  { %1013 = vmatpush3.bf16.msra.mxu1 %v1153_v55  ;;  %992 = vmatprep.subr.bf16.mxu0 %v1154_v56 }
  0x2a   :  { %1014 = vmatprep.subr.bf16.mxu1 %v1155_v57 }
  0x2c   :  { %993 = vmatpush3.bf16.msra.mxu0 %v1156_v58 }
  0x2d   :  { %1015 = vmatpush3.bf16.msra.mxu1 %v1157_v59  ;;  %994 = vmatprep.subr.bf16.mxu0 %v1158_v60 }
  0x2e   :  { %1016 = vmatprep.subr.bf16.mxu1 %v1159_v61 }
  0x30   :  { %995 = vmatpush3.bf16.msra.mxu0 %v1160_v62 }
  0x31   :  { %1017 = vmatpush3.bf16.msra.mxu1 %v1161_v63  ;;  %996 = vmatprep.subr.bf16.mxu0 %v1162_v0 }
  0x32   :  { %1018 = vmatprep.subr.bf16.mxu1 %v1163_v1 }
  0x34   :  { %997 = vmatpush3.bf16.msra.mxu0 %v1164_v2 }
  0x35   :  { %1019 = vmatpush3.bf16.msra.mxu1 %v1165_v3  ;;  %998 = vmatprep.subr.bf16.mxu0 %v1166_v4 }
  0x36   :  { %1020 = vmatprep.subr.bf16.mxu1 %v1167_v5 }
  0x37   :  { %11 = vsyncpa [#allocation3], 0  ;;  %v53_v11 = vrot.slane %v26_v10, %v1348_v41  ;;  %v46_v12 = vcombine.high %v26_v10, %v26_v10  ;;  %v1172_v13 = vld [vmem:[%s1517_s1 + $0x130] sm:$0xff]   ;;  %v1174_v17 = vld [vmem:[%s1517_s1 + $0x178] sm:$0xff]   ;;  %v1204_v29 = vmov 0.0|0.0   ;;  %vm1205_vm0 = vmmov 0  }
  0x38   :  { %999 = vmatpush3.bf16.msra.mxu0 %v1168_v6  ;;  %v1173_v14 = vld [vmem:[%s1517_s1 + $0x1b0] sm:$0xff]   ;;  %v1175_v18 = vld [vmem:[%s1517_s1 + $0x1f8] sm:$0xff]   ;;  %v768_v26 = vld [vmem:[%s1520_s4] sm:$0xff]  ;;  %v1206_v51 = vmov 0.0   ;;  %s1207_s18 = smov [#allocation2]   ;;  %vm861_vm1 = vcmask 58368  }
  0x39   :  { %1021 = vmatpush3.bf16.msra.mxu1 %v1169_v7  ;;  %v61_v15 = vcombine.high %v53_v11, %v53_v11  ;;  %v60_v16 = vrot.slane %v46_v12, %v1348_v41  ;;  %1000 = vmatprep.subr.bf16.mxu0 %v1170_v8  ;;  %v1176_v21 = vld [vmem:[%s1517_s1 + $0x138] sm:$0xff]   ;;  %v75_v24 = vpack.c.bf16 %v53_v11, %v53_v11  ;;  %v769_v27 = vld [vmem:[%s1520_s4 + $0x8] sm:$0xff]  ;;  %v770_v28 = vld [vmem:[%s1520_s4 + $0x10] sm:$0xff]  ;;  %s869_s19 = sshll.u32 %s1207_s18, 4  ;;  %s870_s19 = int_to_ptr.vmem [resolvable:$true] %s869_s19 }
  0x3a   :  { %1022 = vmatprep.subr.bf16.mxu1 %v1171_v9  ;;  %v1177_v22 = vld [vmem:[%s1517_s1 + $0x1b8] sm:$0xff]   ;;  %v1085_v30 = vpack.c.bf16 %v769_v27, %v768_v26  ;;  %v772_v33 = vld [vmem:[%s1520_s4 + $0x20] sm:$0xff]  ;;  %v773_v34 = vld [vmem:[%s1520_s4 + $0x28] sm:$0xff]  ;;  %p1184_p1 = scmp.lt.s32.totalorder %s870_s19, %s870_s19 }
  0x3b   :  { %v76_v19 = vpack.c.bf16 %v61_v15, %v61_v15  ;;  %v62_v20 = vcombine.high %v60_v16, %v60_v16  ;;  %v77_v25 = vpack.c.bf16 %v60_v16, %v60_v16  ;;  %v771_v31 = vld [vmem:[%s1520_s4 + $0x18] sm:$0xff]  ;;  %v1091_v35 = vpack.c.bf16 %v773_v34, %v772_v33  ;;  %v774_v36 = vld [vmem:[%s1520_s4 + $0x30] sm:$0xff]  ;;  %v776_v39 = vld [vmem:[%s1520_s4 + $0x40] sm:$0xff] }
  0x3c   :  { %1001 = vmatpush3.bf16.msra.mxu0 %v1172_v13  ;;  %v1088_v32 = vpack.c.bf16 %v771_v31, %v770_v28  ;;  %v775_v37 = vld [vmem:[%s1520_s4 + $0x38] sm:$0xff]  ;;  %v777_v40 = vld [vmem:[%s1520_s4 + $0x48] sm:$0xff]  ;;  %v778_v42 = vld [vmem:[%s1520_s4 + $0x50] sm:$0xff] }
  0x3d   :  { %1023 = vmatpush3.bf16.msra.mxu1 %v1173_v14  ;;  %v78_v23 = vpack.c.bf16 %v62_v20, %v62_v20  ;;  %1002 = vmatprep.subr.bf16.mxu0 %v1174_v17  ;;  %v1094_v38 = vpack.c.bf16 %v775_v37, %v774_v36  ;;  %v1097_v41 = vpack.c.bf16 %v777_v40, %v776_v39  ;;  %v779_v43 = vld [vmem:[%s1520_s4 + $0x58] sm:$0xff]  ;;  %v780_v45 = vld [vmem:[%s1520_s4 + $0x60] sm:$0xff]  ;;  %v781_v46 = vld [vmem:[%s1520_s4 + $0x68] sm:$0xff] }
  0x3e   :  { %1024 = vmatprep.subr.bf16.mxu1 %v1175_v18  ;;  %703 = vmatprep.mubr.bf16.mxu0 %v76_v19  ;;  %v1100_v44 = vpack.c.bf16 %v779_v43, %v778_v42  ;;  %v1103_v47 = vpack.c.bf16 %v781_v46, %v780_v45  ;;  %v782_v48 = vld [vmem:[%s1520_s4 + $0x70] sm:$0xff]  ;;  %v783_v49 = vld [vmem:[%s1520_s4 + $0x78] sm:$0xff]  ;;  %v941_v10 = vld [vmem:[%s1518_s2] ss:$0 sm:$0xff]  ;;  %s1179_s2 = scalar_lea.vmem %s870_s19, 32 }
  0x3f   :  { %743 = vmatprep.mubr.bf16.mxu1 %v78_v23  ;;  %v1106_v50 = vpack.c.bf16 %v783_v49, %v782_v48  ;;  %v942_v12 = vld [vmem:[%s1519_s3] ss:$0 sm:$0xff]  ;;  %p1180_p0 = scmp.ne.s32.totalorder %s870_s19, %s1179_s2  ;;  %p1185_p2 = scmp.lt.s32.totalorder %s1179_s2, %s1179_s2 }
  0x40   :  { %1003 = vmatpush3.bf16.msra.mxu0 %v1176_v21  ;;  %v943_v16 = vld [vmem:[%s1521_s5] ss:$0 sm:$0xff] }
  0x41   :  { %1025 = vmatpush3.bf16.msra.mxu1 %v1177_v22  ;;  %1084 = vmatprep.subr.bf16.mxu0 %v1204_v29  ;;  %p1186_p3 = por %p1185_p2, %p1184_p1 }
  0x43   :  { %704 = vmatmul.mubr.bf16.vlgmr.msra.gmra.mrb[4].mxu0 %v75_v24  ;;  %p1187_p4 = pnand %p1186_p3, %p1180_p0 }
  0x44   :  { %744 = vmatmul.mubr.bf16.vlgmr.msra.gmra.mrb[4].mxu1 %v77_v25  ;;  %1086 = vmatpush3.bf16.msra.mxu0 %v1085_v30 }
  0x45   :  { %1087 = vmatprep.subr.bf16.mxu0 %v1204_v29  ;;  %1081 = vmatprep.mubr.msk.f32.mxu0 %vm1205_vm0, %v1206_v51 }
  0x48   :  { %1089 = vmatpush3.bf16.msra.mxu0 %v1088_v32 }
  0x49   :  { %1090 = vmatprep.subr.bf16.mxu0 %v1204_v29 }
  0x4c   :  { %1092 = vmatpush3.bf16.msra.mxu0 %v1091_v35 }
  0x4d   :  { %1093 = vmatprep.subr.bf16.mxu0 %v1204_v29 }
  0x50   :  { %1095 = vmatpush3.bf16.msra.mxu0 %v1094_v38 }
  0x51   :  { %1096 = vmatprep.subr.bf16.mxu0 %v1204_v29 }
  0x54   :  { %1098 = vmatpush3.bf16.msra.mxu0 %v1097_v41 }
  0x55   :  { %1099 = vmatprep.subr.bf16.mxu0 %v1204_v29 }
  0x58   :  { %1101 = vmatpush3.bf16.msra.mxu0 %v1100_v44 }
  0x59   :  { %1102 = vmatprep.subr.bf16.mxu0 %v1204_v29 }
  0x5c   :  { %1104 = vmatpush3.bf16.msra.mxu0 %v1103_v47 }
  0x5d   :  { %1105 = vmatprep.subr.bf16.mxu0 %v1204_v29 }
  0x60   :  { %1107 = vmatpush3.bf16.msra.mxu0 %v1106_v50 }
  0xf6   :  { %v960_v52 = vpop.f32.mrb[0].mxu0 }
  0xf7   :  { %v982_v53 = vpop.f32.mrb[0].mxu1  ;;  %v961_v54 = vpop.f32.mrb[1].mxu0 }
  0xf8   :  { %v983_v55 = vpop.f32.mrb[1].mxu1  ;;  %v962_v56 = vadd.f32 %v961_v54, %v960_v52  ;;  %v963_v58 = vpop.f32.mrb[2].mxu0 }
  0xf9   :  { %v984_v57 = vadd.f32 %v983_v55, %v982_v53  ;;  %v985_v59 = vpop.f32.mrb[2].mxu1  ;;  %v964_v60 = vpop.f32.mrb[3].mxu0 }
  0xfa   :  { %v986_v61 = vpop.f32.mrb[3].mxu1 }
  0xfb   :  { %v666_v62 = vadd.f32 %v984_v57, %v962_v56 }
 0x116   :  { %v1004_v63 = vpop.f32.mrb[4].mxu0 }
 0x117   :  { %v1026_v0 = vpop.f32.mrb[4].mxu1  ;;  %v1005_v1 = vpop.f32.mrb[5].mxu0 }
 0x118   :  { %v1027_v2 = vpop.f32.mrb[5].mxu1  ;;  %v1006_v3 = vadd.f32 %v1005_v1, %v1004_v63  ;;  %v1007_v5 = vpop.f32.mrb[6].mxu0 }
 0x119   :  { %v1028_v4 = vadd.f32 %v1027_v2, %v1026_v0  ;;  %v1029_v6 = vpop.f32.mrb[6].mxu1  ;;  %v1008_v7 = vpop.f32.mrb[7].mxu0 }
 0x11a   :  { %v1030_v8 = vpop.f32.mrb[7].mxu1  ;;  %v706_v9 = vadd.f32 %v1006_v3, %v666_v62 }
 0x11c   :  { %v746_v11 = vadd.f32 %v1028_v4, %v706_v9 }
 0x11e   :  { %v758_v13 = vmul.f32 %v941_v10, %v746_v11 }
 0x120   :  { %v766_v14 = vadd.f32 %v942_v12, %v758_v13 }
 0x122   :  { %v767_v15 = vmax.f32 %v766_v14, 0.0 }
 0x124   :  { %1082 = vmatmul.mubr.f32.vlgmr.msra.gmra.mrb[8].mxu0 %v767_v15 }
 0x1f7   :  { %v857_v17 = vpop.f32.mrb[8].mxu0 }
 0x1f8   :  { %v858_v18 = vadd.f32 %v943_v16, %v857_v17  ;;  %v1083_v19 = vpop.f32.mrb[9].mxu0 }
 0x1fa   :  { %862 = vst.msk [vmem:[#allocation2] sm:$0x3] %vm861_vm1, %v858_v18 }
 0x1fb   :  { %1190 = shalt.err (!%p1187_p4)
}
 0x1fc   :  { %s1191_s21 = scalar_lea.hbm %s1522_s6, 32 }
 0x1fd   :  { %p1192_p5 = scmp.ne.s32.totalorder %s1522_s6, %s1191_s21  ;;  %p1195_p6 = scmp.lt.u32.totalorder %s1191_s21, %s1522_s6 }
 0x1ff   :  { %p1197_p7 = pnand %p1195_p6, %p1192_p5 }
 0x201   :  { %1200 = shalt.err (!%p1197_p7)
}
 0x202   :  { %872 = dma.vmem_to_hbm [thread:$0]  %s870_s19, 32, %s1522_s6, [#allocation3]  }
 0x203   :  { %1201 = dma.done.wait [#allocation3], 32  }
 0x204   :  { %1202 = vsyncadd [#allocation3], 4294967264 }
 0x205   :  { %876 = vsyncpa [#allocation3], 1 }

// kernel: net_tail_forward.2
= control target key start
LH: loop header
LB: loop body
LE: loop exit
PB: predicated region body
PF: predicated region fallthrough
CT: control target
= control target key end

     0   :  { %s21461_s0 = inlined_call_operand.vmem [shape: f32[2,21504], index: 0, kind: input, shape index: {}]   ;;  %s21462_s1 = inlined_call_operand.hbm [shape: bf16[21504,1024], index: 1, kind: input, shape index: {}]   ;;  %s21463_s2 = inlined_call_operand.hbm [shape: f32[1,1024], index: 2, kind: input, shape index: {}]   ;;  %s21464_s3 = inlined_call_operand.hbm [shape: f32[1,1024], index: 3, kind: input, shape index: {}]   ;;  %s21465_s4 = inlined_call_operand.vmem [shape: f32[2,1024], index: 4, kind: output, shape index: {}]  }
   0x1   :  { %21474 = sst [smem:[#allocation16_spill]] %s21462_s1 }
   0x2   :  { %21475 = sst [smem:[#allocation17_spill]] %s21463_s2 }
   0x3   :  { %21476 = sst [smem:[#allocation18_spill]] %s21465_s4 }
   0x4   :  { %9 = vsyncpa [#allocation4], 0 }
   0x5   :  { %11 = vsyncpa [#allocation4 + $0x1], 0 }
   0x6   :  { %12 = vsyncpa [#allocation6], 0 }
   0x7   :  { %14 = vsyncpa [#allocation6 + $0x1], 0  ;;  %s19076_s15 = smov 0   ;;  %s19078_s16 = smov 0  }
   0x8   :  { %s19080_s17 = smov 0   ;;  %s19082_s18 = smov 0  }
   0x9   :  { %s19084_s19 = smov 0   ;;  %s19086_s20 = smov 0  }
   0xa   :  { %s19088_s21 = smov 0   ;;  %s19090_s22 = smov 0  }
   0xb   :  { %s19092_s23 = smov 0   ;;  %s19094_s24 = smov 0  }
   0xc   :  { %s19096_s25 = smov 0  }
   0xd LB: > { %21477 = sst [smem:[#allocation10_spill]] %s19009_s17  ;;  %s21466_s26 = sadd.s32 4294967295, %s19041_s25   ;;  %s19041_s25 = sphi %s19096_s25, %s20_s25   ;;  %s19037_s24 = sphi %s19094_s24, %s21506_s24   ;;  %s19033_s23 = sphi %s19092_s23, %s21514_s23   ;;  %s19029_s22 = sphi %s19090_s22, %s21513_s22   ;;  %s19025_s21 = sphi %s19088_s21, %s21512_s21   ;;  %s19021_s20 = sphi %s19086_s20, %s21511_s20   ;;  %s19017_s19 = sphi %s19084_s19, %s21510_s19   ;;  %s19013_s18 = sphi %s19082_s18, %s21509_s18   ;;  %s19009_s17 = sphi %s19080_s17, %s21502_s17   ;;  %s19005_s16 = sphi %s19078_s16, %s21508_s16   ;;  %s19001_s15 = sphi %s19076_s15, %s21507_s15  }
   0xe   : > { %21478 = sst [smem:[#allocation11_spill]] %s19037_s24  ;;  %s29_s27 = sadd.s32 1, %s19033_s23 }
   0xf   : > { %p30_p0 = scmp.ge.s32.totalorder %s29_s27, 3  ;;  %s32_s28 = sadd.s32 1, %s19037_s24 }
  0x10   : > { %s67_s29 = sadd.s32 1, %s19021_s20  ;;  %p74_p1 = scmp.ne.s32.totalorder %s19021_s20, %s19017_s19 }
  0x11   : > { %s21516_s27 = smov (%p30_p0, %s29_s27), 0  ;;  %s21518_s28 = smov (!%p30_p0, %s32_s28), %s19037_s24 }
  0x12   : > { %21479 = sst [smem:[#allocation12_spill]] %s21516_s27  ;;  %s62_s30 = ssub.s32 %s19033_s23, %s21516_s27 }
  0x13   : > { %p75_p2 = scmp.eq.s32.totalorder %s19041_s25, 0  ;;  %p34_p3 = scmp.ge.s32.totalorder %s21518_s28, 2 }
  0x14   : > { %p80_p4 = scmp.ne.s32.totalorder %s19017_s19, %s19013_s18  ;;  %p19150_p6 = scmp.eq.s32.totalorder %s21466_s26, 0 }
  0x15   : > { %p19144_p5 = por %p75_p2, %p74_p1  ;;  %s21520_s28 = smov (%p34_p3, %s21518_s28), 0 }
  0x16   : > { %21482 = sst [smem:[#allocation13_spill]] %s21520_s28  ;;  %p19158_p7 = por %p19150_p6, %p80_p4 }
  0x17   : > { %s93_s8 = sadd.s32 1, %s19009_s17  ;;  %s63_s9 = ssub.s32 %s19037_s24, %s21520_s28 }
  0x18   : > { %s21483_s7 = scalar_select %p19158_p7, 1, 0 }
  0x19   : > { %p100_p8 = scmp.ne.s32.totalorder %s19009_s17, %s19005_s16  ;;  %s64_s10 = sor.u32 %s63_s9, %s62_s30 }
  0x1a   : > { %p91_p9 = scmp.eq.s32.totalorder %s63_s9, 0  ;;  %p65_p10 = scmp.eq.s32.totalorder %s64_s10, 0 }
  0x1b   : > { %p19169_p11 = por %p100_p8, %p75_p2  ;;  %p106_p12 = scmp.ne.s32.totalorder %s19005_s16, %s19001_s15 }
  0x1c   : > { %s19174_s12 = scalar_select %p91_p9, %s19009_s17, %s93_s8  }
  0x1d   : > { %s19177_s13 = scalar_select %p65_p10, %s19021_s20, %s67_s29  }
  0x1e   : > { %21485 = sst [smem:[#allocation14_spill]] %s19174_s12  ;;  %p16061_p13 = scmp.lt.s32.totalorder %s19041_s25, 6 }
  0x1f   : > { %21486 = sst [smem:[#allocation15_spill]] %s19177_s13  ;;  %s215_s14 = sand.u32 1, %s19041_s25  }
  0x20   : > { %p19185_p0 = por %p106_p12, %p19150_p6  ;;  %p19191_p1 = pnand %p16061_p13, %p19144_p5 }
  0x21   : > { %s217_s9 = sand.u32 1, %s19009_s17   ;;  %s15825_s8 = sshll.u32 %s19037_s24, 6 }
  0x22   : > { %s21487_s18 = scalar_select %p19185_p0, 1, 0 }
  0x23   : > { %s19196_s10 = sshll.u32 %s217_s9, 2  ;;  %s21489_s2 = sld [smem:[#allocation17_spill]] }
  0x24   : > { %s219_s6 = scalar_lea.vmem [#allocation5], %s19196_s10  ;;  %p19209_p2 = pnand %p16061_p13, %p19169_p11 }
  0x25   : > { %s227_s5 = sshll.u32 %s219_s6, 4  ;;  %s19216_s26 = scalar_lea.hbm %s21464_s3, %s15825_s8  ;;  %s19205_s5 = int_to_ptr.vmem [resolvable:$true] %s227_s5 }
  0x26   : > { %s19219_s29 = scalar_lea.sflag [#allocation6], %s215_s14  ;;  %p21473_p5 = pneg %p19209_p2 }
  0x29   : > { %s19202_s15 = scalar_lea.hbm %s21489_s2, %s15825_s8  ;;  %s18862_s12 = scalar_lea.hbm %s21489_s2, 128 }
  0x2a   : > { %s18857_s13 = scalar_lea.hbm %s19202_s15, 64  ;;  %p18863_p9 = scmp.lt.u32.totalorder %s19202_s15, %s21489_s2 }
  0x2b   : > { %p18858_p4 = scmp.ne.s32.totalorder %s19202_s15, %s18857_s13  ;;  %p18864_p10 = scmp.lt.u32.totalorder %s18862_s12, %s18857_s13 }
  0x2c   : > { %p18866_p12 = scmp.lt.u32.totalorder %s18857_s13, %s19202_s15 }
  0x2d   : > { %p18860_p6 = pnand %p21473_p5, %p18858_p4  ;;  %p18865_p11 = por %p18864_p10, %p18863_p9 }
  0x2f   : > { %p18861_p8 = pneg %p18860_p6  ;;  %p18867_p13 = por %p18866_p12, %p18865_p11 }
  0x31   : > { %p18868_p3 = pnand %p18867_p13, %p18861_p8 }
  0x33   : > { %18871 = shalt.err (!%p18868_p3)
}
  0x34   : > { %s18872_s14 = scalar_lea.vmem %s19205_s5, 64  ;;  %s19043_s8 = smov [#allocation5]  }
  0x35   : > { %p18873_p4 = scmp.ne.s32.totalorder %s19205_s5, %s18872_s14  ;;  %s18877_s11 = sshll.u32 %s19043_s8, 4  ;;  %s18878_s11 = int_to_ptr.vmem [resolvable:$false] %s18877_s11 }
  0x36   : > { %s18879_s6 = scalar_lea.vmem %s18878_s11, 128  ;;  %p18880_p7 = scmp.lt.s32.totalorder %s19205_s5, %s18878_s11 }
  0x37   : > { %p18875_p6 = pnand %p18873_p4, %p21473_p5  ;;  %p18881_p9 = scmp.lt.s32.totalorder %s18879_s6, %s18872_s14 }
  0x39   : > { %p18876_p0 = pneg %p18875_p6  ;;  %p18882_p10 = por %p18881_p9, %p18880_p7 }
  0x3b   : > { %p18883_p11 = pnand %p18882_p10, %p18876_p0 }
  0x3d   : > { %18886 = shalt.err (!%p18883_p11)
}
  0x3e   : > { %16057 = dma.hbm_to_vmem [thread:$0]  (!%p19209_p2), %s19202_s15, 64, %s19205_s5, %s19219_s29  }
  0x3f   : > { %p251_p3 = scmp.lt.s32.totalorder %s19041_s25, 7  ;;  %p21491_p8 = scmp.ge.s32.totalorder %s19041_s25, 1 }
  0x40   : > { %s191_s13 = sand.u32 1, %s19021_s20   ;;  %s14013_s27 = sshll.u32 %s19037_s24, 2 }
  0x41   : > { %p19250_p12 = pnand %p21491_p8, %p251_p3  ;;  %s16043_s9 = smul.u32 14336, %s191_s13 }
  0x42   : > { %s15824_s14 = smul.u32 7168, %s19033_s23  ;;  %s21493_s1 = sld [smem:[#allocation16_spill]] }
  0x43   : > { %s21492_s12 = scalar_select %p19250_p12, 1, 0 }
  0x44   : > { %s202_s8 = sadd.s32 %s15824_s14, %s14013_s27  ;;  %s195_s11 = scalar_lea.vmem [#allocation3], %s16043_s9 }
  0x45   : > { %s205_s6 = sshll.u32 %s195_s11, 4  ;;  %s14015_s2 = sshll.u32 %s202_s8, 6  ;;  %s19257_s6 = int_to_ptr.vmem [resolvable:$true] %s205_s6 }
  0x46   : > { %s19264_s4 = scalar_lea.sflag [#allocation4], %s191_s13  ;;  %p18889_p0 = pneg %p19191_p1 }
  0x48   : > { %s19262_s5 = scalar_lea.hbm %s21493_s1, %s14015_s2  ;;  %s18892_s17 = scalar_lea.hbm %s21493_s1, 1376256 }
  0x49   : > { %s18887_s24 = scalar_lea.hbm %s19262_s5, 229376  ;;  %p18893_p6 = scmp.lt.u32.totalorder %s19262_s5, %s21493_s1 }
  0x4a   : > { %p18888_p7 = scmp.ne.s32.totalorder %s19262_s5, %s18887_s24  ;;  %p18894_p9 = scmp.lt.u32.totalorder %s18892_s17, %s18887_s24 }
  0x4b   : > { %p18896_p11 = scmp.lt.u32.totalorder %s18887_s24, %s19262_s5 }
  0x4c   : > { %p18890_p13 = pnand %p18889_p0, %p18888_p7  ;;  %p18895_p10 = por %p18894_p9, %p18893_p6 }
  0x4e   : > { %p18891_p4 = pneg %p18890_p13  ;;  %p18897_p3 = por %p18896_p11, %p18895_p10 }
  0x50   : > { %p18898_p8 = pnand %p18897_p3, %p18891_p4 }
  0x52   : > { %18901 = shalt.err (!%p18898_p8)
}
  0x53   : > { %s18902_s13 = scalar_lea.vmem %s19257_s6, 229376  ;;  %s19044_s8 = smov [#allocation3]  }
  0x54   : > { %p18903_p7 = scmp.ne.s32.totalorder %s19257_s6, %s18902_s13  ;;  %s18907_s11 = sshll.u32 %s19044_s8, 4  ;;  %s18908_s11 = int_to_ptr.vmem [resolvable:$false] %s18907_s11 }
  0x55   : > { %s18909_s15 = scalar_lea.vmem %s18908_s11, 458752  ;;  %p18910_p12 = scmp.lt.s32.totalorder %s19257_s6, %s18908_s11 }
  0x56   : > { %p18905_p13 = pnand %p18903_p7, %p18889_p0  ;;  %p18911_p6 = scmp.lt.s32.totalorder %s18909_s15, %s18902_s13 }
  0x58   : > { %p18906_p5 = pneg %p18905_p13  ;;  %p18912_p9 = por %p18911_p6, %p18910_p12 }
  0x5a   : > { %p18913_p10 = pnand %p18912_p9, %p18906_p5 }
  0x5c   : > { %18916 = shalt.err (!%p18913_p10)
}
  0x5d   : > { %s19045_s24 = smov 512   ;;  %s19046_s27 = smov 256  }
  0x5e   : > { %s19047_s9 = smov 16   ;;  %s238_s17 = scalar_lea.vmem [#allocation7], %s19196_s10 }
  0x5f   : > { %16054 = dma.hbm_to_vmem [thread:$0]  (!%p19191_p1), %s19262_s5, 229376, %s19257_s6, %s19264_s4, %s19045_s24, %s19046_s27, %s19047_s9  }
  0x60   : > { %s246_s2 = sshll.u32 %s238_s17, 4  ;;  %s18917_s14 = scalar_lea.hbm %s19216_s26, 64  ;;  %s247_s2 = int_to_ptr.vmem [resolvable:$true] %s246_s2 }
  0x61   : > { %p18918_p5 = scmp.ne.s32.totalorder %s19216_s26, %s18917_s14  ;;  %p21494_p12 = pneg %p19209_p2 }
  0x62   : > { %s18922_s11 = scalar_lea.hbm %s21464_s3, 128  ;;  %p18923_p11 = scmp.lt.u32.totalorder %s19216_s26, %s21464_s3 }
  0x63   : > { %p18920_p0 = pnand %p18918_p5, %p21494_p12  ;;  %p18924_p3 = scmp.lt.u32.totalorder %s18922_s11, %s18917_s14 }
  0x64   : > { %p18926_p1 = scmp.lt.u32.totalorder %s18917_s14, %s19216_s26 }
  0x65   : > { %p18921_p4 = pneg %p18920_p0  ;;  %p18925_p8 = por %p18924_p3, %p18923_p11 }
  0x67   : > { %p18927_p7 = por %p18926_p1, %p18925_p8 }
  0x69   : > { %p18928_p13 = pnand %p18927_p7, %p18921_p4 }
  0x6b   : > { %18931 = shalt.err (!%p18928_p13)
}
  0x6c   : > { %s18932_s4 = scalar_lea.vmem %s247_s2, 64  ;;  %p21495_p9 = pmov %p21494_p12 }
  0x6d   : > { %p18933_p6 = scmp.ne.s32.totalorder %s247_s2, %s18932_s4  ;;  %s19048_s30 = smov [#allocation7]  }
  0x6e   : > { %s18937_s10 = sshll.u32 %s19048_s30, 4  ;;  %s18938_s10 = int_to_ptr.vmem [resolvable:$false] %s18937_s10 }
  0x6f   : > { %p18935_p10 = pnand %p18933_p6, %p21495_p9  ;;  %s18939_s6 = scalar_lea.vmem %s18938_s10, 128 }
  0x70   : > { %p18940_p12 = scmp.lt.s32.totalorder %s247_s2, %s18938_s10  ;;  %p18941_p0 = scmp.lt.s32.totalorder %s18939_s6, %s18932_s4 }
  0x71   : > { %p18936_p5 = pneg %p18935_p10 }
  0x72   : > { %p18942_p3 = por %p18941_p0, %p18940_p12 }
  0x74   : > { %p18943_p11 = pnand %p18942_p3, %p18936_p5 }
  0x76   : > { %18946 = shalt.err (!%p18943_p11)
}
  0x77   : > { %16060 = dma.hbm_to_vmem [thread:$0]  (!%p19209_p2), %s19216_s26, 64, %s247_s2, %s19219_s29  }
  0x78   : > { %p21496_p4 = scmp.ne.s32.totalorder %s21492_s12, 0 }
  0x79   : > { %s257_s1 = sand.u32 (!%p21496_p4), 1, %s19017_s19   ;;  %p21497_p8 = scmp.ne.s32.totalorder (!%p21496_p4), %s21483_s7, 0 }
  0x7a   : > { %255 = sbr.rel (%p21496_p4) target bundleno = 2177 (0x881), region = 36  ;;  %s258_s24 = scalar_lea.sflag (!%p21496_p4), [#allocation4], %s257_s1 }
  0x7b   : > { %s16044_s5 = smul.u32 (!%p21496_p4), 14336, %s257_s1 }
  0x7d   : > { %s19316_s27 = scalar_lea.vmem (!%p21496_p4), [#allocation3], %s16044_s5 }
  0x81   : > { %18992 = dma.done.wait (%p21497_p8), %s258_s24, 229376  }
  0x82   : > { %18994 = vsyncadd (%p21497_p8), %s258_s24, 4294737920  ;;  %s21498_s28 = sadd.s32 4294967295, %s19041_s25   ;;  %s268_s29 = sand.u32 1, %s19005_s16  }
  0x83   : > { %s266_s26 = sand.u32 1, %s21498_s28   ;;  %s19325_s12 = sshll.u32 %s268_s29, 2 }
  0x84   : > { %s267_s9 = scalar_lea.sflag [#allocation6], %s266_s26  ;;  %s270_s17 = scalar_lea.vmem [#allocation5], %s19325_s12 }
  0x85   : > { %p21499_p2 = scmp.ne.s32.totalorder %s21487_s18, 0 }
  0x87   : > { %18996 = dma.done.wait (%p21499_p2), %s267_s9, 128  }
  0x88   : > { %18998 = vsyncadd (%p21499_p2), %s267_s9, 4294967168  ;;  %s319_s7 = smul.u32 56, %s19025_s21  ;;  %s14026_s2 = sshll.u32 %s19029_s22, 2 }
  0x89   : > { %p330_p7 = scmp.lt.s32.totalorder %s14026_s2, 7  ;;  %s21500_s18 = sld [smem:[#allocation18_spill]] }
  0x8a   : > { %p320_p1 = scmp.lt.s32.totalorder %s319_s7, 167  ;;  %s279_s6 = scalar_lea.vmem [#allocation7], %s19325_s12 }
  0x8b   : > { %s21524_s2 = smov (!%p330_p7, %s14026_s2), 7  ;;  %p14028_p13 = scmp.ne.s32.totalorder %s19025_s21, 0 }
  0x8c   : > { %s21522_s7 = smov (!%p320_p1, %s319_s7), 167  ;;  %s14027_s15 = sshll.u32 %s21524_s2, 1  ;;  %v19049_v0 = vmov (!%p14028_p13), 0.0  }
  0x8d   : > { %s14025_s14 = sshll.u32 %s21522_s7, 1  ;;  %338 = sbr.rel (%p14028_p13) target bundleno = 148 (0x94), region = 52  ;;  %339 = vst [vmem:[#allocation2] sm:$0xff] (!%p14028_p13), %v19049_v0 }
  0x8e   : > { %s19337_s11 = scalar_lea.vmem %s21461_s0, %s14025_s14 }
  0x8f   : > { %s19342_s10 = scalar_lea.vmem %s21500_s18, %s14027_s15 }
  0x94 PF: > { %v16155_v1 = vld [vmem:[%s19316_s27 + $0x4] ss:$16 sps:$4 sm:$0xff]   ;;  %v16157_v2 = vld [vmem:[%s19316_s27 + $0xc] ss:$16 sps:$4 sm:$0xff]   ;;  %v16159_v3 = vld [vmem:[%s19316_s27] ss:$16 sps:$4 sm:$0xff]   ;;  %v373_v39 = vlaneseq }
  0x95   : > { %11471 = vmatprep.subr.bf16.mxu0 %v16155_v1  ;;  %v16160_v4 = vld [vmem:[%s19316_s27 + $0x8] ss:$16 sps:$4 sm:$0xff]   ;;  %12619 = vmatprep.subr.bf16.mxu1 %v16157_v2  ;;  %v16161_v5 = vld [vmem:[%s19316_s27 + $0x24] ss:$16 sps:$4 sm:$0xff]   ;;  %v16163_v6 = vld [vmem:[%s19316_s27 + $0x2c] ss:$16 sps:$4 sm:$0xff]  }
  0x96   : > { %11472 = vmatpush1.bf16.msra.mxu0 %v16159_v3  ;;  %12620 = vmatpush1.bf16.msra.mxu1 %v16160_v4  ;;  %v16165_v7 = vld [vmem:[%s19316_s27 + $0x20] ss:$16 sps:$4 sm:$0xff]   ;;  %v16166_v8 = vld [vmem:[%s19316_s27 + $0x28] ss:$16 sps:$4 sm:$0xff]   ;;  %v16167_v9 = vld [vmem:[%s19316_s27 + $0x44] ss:$16 sps:$4 sm:$0xff]  }
  0x97   : > { %11473 = vmatprep.subr.bf16.mxu0 %v16161_v5  ;;  %12621 = vmatprep.subr.bf16.mxu1 %v16163_v6  ;;  %v16169_v10 = vld [vmem:[%s19316_s27 + $0x4c] ss:$16 sps:$4 sm:$0xff]   ;;  %v16171_v11 = vld [vmem:[%s19316_s27 + $0x40] ss:$16 sps:$4 sm:$0xff]   ;;  %v16172_v12 = vld [vmem:[%s19316_s27 + $0x48] ss:$16 sps:$4 sm:$0xff]  }
  0x98   : > { %v16173_v13 = vld [vmem:[%s19316_s27 + $0x64] ss:$16 sps:$4 sm:$0xff]   ;;  %v16175_v14 = vld [vmem:[%s19316_s27 + $0x6c] ss:$16 sps:$4 sm:$0xff]   ;;  %v16177_v15 = vld [vmem:[%s19316_s27 + $0x60] ss:$16 sps:$4 sm:$0xff]  }
  0x99   : > { %v16178_v16 = vld [vmem:[%s19316_s27 + $0x68] ss:$16 sps:$4 sm:$0xff]   ;;  %v16179_v17 = vld [vmem:[%s19316_s27 + $0x84] ss:$16 sps:$4 sm:$0xff]   ;;  %v16181_v18 = vld [vmem:[%s19316_s27 + $0x8c] ss:$16 sps:$4 sm:$0xff]  }
  0x9a   : > { %11474 = vmatpush1.bf16.msra.mxu0 %v16165_v7  ;;  %12622 = vmatpush1.bf16.msra.mxu1 %v16166_v8  ;;  %v16183_v19 = vld [vmem:[%s19316_s27 + $0x80] ss:$16 sps:$4 sm:$0xff]   ;;  %v16184_v20 = vld [vmem:[%s19316_s27 + $0x88] ss:$16 sps:$4 sm:$0xff]   ;;  %v16185_v21 = vld [vmem:[%s19316_s27 + $0xa4] ss:$16 sps:$4 sm:$0xff]  }
  0x9b   : > { %11475 = vmatprep.subr.bf16.mxu0 %v16167_v9  ;;  %12623 = vmatprep.subr.bf16.mxu1 %v16169_v10  ;;  %v16187_v22 = vld [vmem:[%s19316_s27 + $0xac] ss:$16 sps:$4 sm:$0xff]   ;;  %v16189_v23 = vld [vmem:[%s19316_s27 + $0xa0] ss:$16 sps:$4 sm:$0xff]   ;;  %v16190_v24 = vld [vmem:[%s19316_s27 + $0xa8] ss:$16 sps:$4 sm:$0xff]  }
  0x9c   : > { %v16191_v25 = vld [vmem:[%s19316_s27 + $0xc4] ss:$16 sps:$4 sm:$0xff]   ;;  %v16193_v26 = vld [vmem:[%s19316_s27 + $0xcc] ss:$16 sps:$4 sm:$0xff]   ;;  %v16195_v27 = vld [vmem:[%s19316_s27 + $0xc0] ss:$16 sps:$4 sm:$0xff]  }
  0x9d   : > { %v16196_v28 = vld [vmem:[%s19316_s27 + $0xc8] ss:$16 sps:$4 sm:$0xff]   ;;  %v16197_v29 = vld [vmem:[%s19316_s27 + $0xe4] ss:$16 sps:$4 sm:$0xff]   ;;  %v16199_v30 = vld [vmem:[%s19316_s27 + $0xec] ss:$16 sps:$4 sm:$0xff]  }
  0x9e   : > { %11476 = vmatpush1.bf16.msra.mxu0 %v16171_v11  ;;  %12624 = vmatpush1.bf16.msra.mxu1 %v16172_v12  ;;  %v16201_v31 = vld [vmem:[%s19316_s27 + $0xe0] ss:$16 sps:$4 sm:$0xff]   ;;  %v16202_v32 = vld [vmem:[%s19316_s27 + $0xe8] ss:$16 sps:$4 sm:$0xff]   ;;  %v16203_v33 = vld [vmem:[%s19316_s27 + $0x104] ss:$16 sps:$4 sm:$0xff]  }
  0x9f   : > { %11477 = vmatprep.subr.bf16.mxu0 %v16173_v13  ;;  %12625 = vmatprep.subr.bf16.mxu1 %v16175_v14  ;;  %v16205_v34 = vld [vmem:[%s19316_s27 + $0x10c] ss:$16 sps:$4 sm:$0xff]   ;;  %v16207_v35 = vld [vmem:[%s19316_s27 + $0x100] ss:$16 sps:$4 sm:$0xff]   ;;  %v16208_v36 = vld [vmem:[%s19316_s27 + $0x108] ss:$16 sps:$4 sm:$0xff]  }
  0xa0   : > { %v19050_v37 = vmov 1983009808   ;;  %v16209_v40 = vld [vmem:[%s19316_s27 + $0x124] ss:$16 sps:$4 sm:$0xff]   ;;  %v16211_v41 = vld [vmem:[%s19316_s27 + $0x12c] ss:$16 sps:$4 sm:$0xff]  }
  0xa1   : > { %v371_v38 = vunpack.c.l.s4 %v19050_v37  ;;  %v16213_v42 = vld [vmem:[%s19316_s27 + $0x120] ss:$16 sps:$4 sm:$0xff]   ;;  %v19385_v44 = vshrl.u32 %v373_v39, 7  ;;  %v16214_v45 = vld [vmem:[%s19316_s27 + $0x128] ss:$16 sps:$4 sm:$0xff]   ;;  %p15821_p6 = scmp.ne.s32.totalorder %s19025_s21, 2 }
  0xa2   : > { %11478 = vmatpush1.bf16.msra.mxu0 %v16177_v15  ;;  %12626 = vmatpush1.bf16.msra.mxu1 %v16178_v16  ;;  %v16215_v46 = vld [vmem:[%s19316_s27 + $0x144] ss:$16 sps:$4 sm:$0xff]   ;;  %v16217_v47 = vld [vmem:[%s19316_s27 + $0x14c] ss:$16 sps:$4 sm:$0xff]   ;;  %v16219_v48 = vld [vmem:[%s19316_s27 + $0x140] ss:$16 sps:$4 sm:$0xff]  }
  0xa3   : > { %11479 = vmatprep.subr.bf16.mxu0 %v16179_v17  ;;  %12627 = vmatprep.subr.bf16.mxu1 %v16181_v18  ;;  %v372_v43 = vunpack.c.0.s8 %v371_v38  ;;  %v16220_v49 = vld [vmem:[%s19316_s27 + $0x148] ss:$16 sps:$4 sm:$0xff]   ;;  %v16221_v51 = vld [vmem:[%s19316_s27 + $0x164] ss:$16 sps:$4 sm:$0xff]   ;;  %v16223_v52 = vld [vmem:[%s19316_s27 + $0x16c] ss:$16 sps:$4 sm:$0xff]  }
  0xa4   : > { %v341_v53 = vld [vmem:[%s19337_s11] sm:$0xff]  ;;  %v16225_v54 = vld [vmem:[%s19316_s27 + $0x160] ss:$16 sps:$4 sm:$0xff]   ;;  %v16227_v57 = vld [vmem:[%s19316_s27 + $0x184] ss:$16 sps:$4 sm:$0xff]  }
  0xa5   : > { %v19393_v50 = vsub.s32 %v372_v43, %v19385_v44  ;;  %v16226_v56 = vld [vmem:[%s19316_s27 + $0x168] ss:$16 sps:$4 sm:$0xff]   ;;  %v16229_v58 = vld [vmem:[%s19316_s27 + $0x18c] ss:$16 sps:$4 sm:$0xff]   ;;  %v16231_v60 = vld [vmem:[%s19316_s27 + $0x180] ss:$16 sps:$4 sm:$0xff]   ;;  %v369_v5 = vcombine.high %v341_v53, %v341_v53 }
  0xa6   : > { %11480 = vmatpush1.bf16.msra.mxu0 %v16183_v19  ;;  %12628 = vmatpush1.bf16.msra.mxu1 %v16184_v20  ;;  %v16232_v62 = vld [vmem:[%s19316_s27 + $0x188] ss:$16 sps:$4 sm:$0xff]   ;;  %v16233_v63 = vld [vmem:[%s19316_s27 + $0x1a4] ss:$16 sps:$4 sm:$0xff]   ;;  %v16235_v0 = vld [vmem:[%s19316_s27 + $0x1ac] ss:$16 sps:$4 sm:$0xff]  }
  0xa7   : > { %11481 = vmatprep.subr.bf16.mxu0 %v16185_v21  ;;  %12629 = vmatprep.subr.bf16.mxu1 %v16187_v22  ;;  %v376_v55 = vrot.slane %v341_v53, %v19393_v50  ;;  %v16237_v1 = vld [vmem:[%s19316_s27 + $0x1a0] ss:$16 sps:$4 sm:$0xff]   ;;  %v16238_v2 = vld [vmem:[%s19316_s27 + $0x1a8] ss:$16 sps:$4 sm:$0xff]   ;;  %v16239_v3 = vld [vmem:[%s19316_s27 + $0x1c4] ss:$16 sps:$4 sm:$0xff]   ;;  %v19416_v10 = vrot.slane %v369_v5, %v19393_v50 }
  0xa8   : > { %v16241_v4 = vld [vmem:[%s19316_s27 + $0x1cc] ss:$16 sps:$4 sm:$0xff]   ;;  %v16243_v6 = vld [vmem:[%s19316_s27 + $0x1c0] ss:$16 sps:$4 sm:$0xff]   ;;  %v16244_v7 = vld [vmem:[%s19316_s27 + $0x1c8] ss:$16 sps:$4 sm:$0xff]  }
  0xa9   : > { %v384_v59 = vcombine.high %v376_v55, %v376_v55  ;;  %v16245_v8 = vld [vmem:[%s19316_s27 + $0x1e4] ss:$16 sps:$4 sm:$0xff]   ;;  %v16247_v9 = vld [vmem:[%s19316_s27 + $0x1ec] ss:$16 sps:$4 sm:$0xff]   ;;  %v16249_v11 = vld [vmem:[%s19316_s27 + $0x1e0] ss:$16 sps:$4 sm:$0xff]   ;;  %v385_v15 = vcombine.high %v19416_v10, %v19416_v10  ;;  %v663_v17 = vpack.c.bf16 %v376_v55, %v376_v55 }
  0xaa   : > { %11482 = vmatpush1.bf16.msra.mxu0 %v16189_v23  ;;  %12630 = vmatpush1.bf16.msra.mxu1 %v16190_v24  ;;  %v16250_v12 = vld [vmem:[%s19316_s27 + $0x1e8] ss:$16 sps:$4 sm:$0xff]   ;;  %v16254_v13 = vld [vmem:[%s19316_s27 + $0x204] ss:$16 sps:$4 sm:$0xff]   ;;  %v16257_v14 = vld [vmem:[%s19316_s27 + $0x20c] ss:$16 sps:$4 sm:$0xff]  }
  0xab   : > { %11483 = vmatprep.subr.bf16.mxu0 %v16191_v25  ;;  %12631 = vmatprep.subr.bf16.mxu1 %v16193_v26  ;;  %v664_v61 = vpack.c.bf16 %v384_v59, %v384_v59  ;;  %v16252_v16 = vld [vmem:[%s19316_s27 + $0x200] ss:$16 sps:$4 sm:$0xff]   ;;  %v16255_v18 = vld [vmem:[%s19316_s27 + $0x208] ss:$16 sps:$4 sm:$0xff]   ;;  %v16260_v19 = vld [vmem:[%s19316_s27 + $0x224] ss:$16 sps:$4 sm:$0xff]   ;;  %v666_v21 = vpack.c.bf16 %v385_v15, %v385_v15 }
  0xac   : > { %v16263_v20 = vld [vmem:[%s19316_s27 + $0x22c] ss:$16 sps:$4 sm:$0xff]   ;;  %v16258_v22 = vld [vmem:[%s19316_s27 + $0x220] ss:$16 sps:$4 sm:$0xff]   ;;  %v16261_v23 = vld [vmem:[%s19316_s27 + $0x228] ss:$16 sps:$4 sm:$0xff]  }
  0xad   : > { %11503 = vmatprep.mubr.bf16.mxu0 %v664_v61  ;;  %12651 = vmatprep.mubr.bf16.mxu1 %v664_v61  ;;  %v16266_v24 = vld [vmem:[%s19316_s27 + $0x244] ss:$16 sps:$4 sm:$0xff]   ;;  %v16269_v25 = vld [vmem:[%s19316_s27 + $0x24c] ss:$16 sps:$4 sm:$0xff]   ;;  %v16264_v26 = vld [vmem:[%s19316_s27 + $0x240] ss:$16 sps:$4 sm:$0xff]  }
  0xae   : > { %11484 = vmatpush1.bf16.msra.mxu0 %v16195_v27  ;;  %12632 = vmatpush1.bf16.msra.mxu1 %v16196_v28  ;;  %v16267_v27 = vld [vmem:[%s19316_s27 + $0x248] ss:$16 sps:$4 sm:$0xff]   ;;  %v16272_v28 = vld [vmem:[%s19316_s27 + $0x264] ss:$16 sps:$4 sm:$0xff]   ;;  %v16287_v37 = vld [vmem:[%s19316_s27 + $0x2ac] ss:$16 sps:$4 sm:$0xff]  }
  0xaf   : > { %11485 = vmatprep.subr.bf16.mxu0 %v16197_v29  ;;  %12633 = vmatprep.subr.bf16.mxu1 %v16199_v30  ;;  %v16275_v29 = vld [vmem:[%s19316_s27 + $0x26c] ss:$16 sps:$4 sm:$0xff]   ;;  %v16270_v30 = vld [vmem:[%s19316_s27 + $0x260] ss:$16 sps:$4 sm:$0xff]   ;;  %v16285_v39 = vld [vmem:[%s19316_s27 + $0x2a8] ss:$16 sps:$4 sm:$0xff]  }
  0xb0   : > { %v16282_v38 = vld [vmem:[%s19316_s27 + $0x2a0] ss:$16 sps:$4 sm:$0xff]   ;;  %v16291_v43 = vld [vmem:[%s19316_s27 + $0x2c8] ss:$16 sps:$4 sm:$0xff]   ;;  %v16311_v55 = vld [vmem:[%s19316_s27 + $0x32c] ss:$16 sps:$4 sm:$0xff]  }
  0xb1   : > { %v16303_v53 = vld [vmem:[%s19316_s27 + $0x308] ss:$16 sps:$4 sm:$0xff]   ;;  %v16317_v59 = vld [vmem:[%s19316_s27 + $0x34c] ss:$16 sps:$4 sm:$0xff]   ;;  %v16344_v15 = vld [vmem:[%s19316_s27 + $0x3e4] ss:$16 sps:$4 sm:$0xff]  }
  0xb2   : > { %11486 = vmatpush1.bf16.msra.mxu0 %v16201_v31  ;;  %12634 = vmatpush1.bf16.msra.mxu1 %v16202_v32  ;;  %v16273_v31 = vld [vmem:[%s19316_s27 + $0x268] ss:$16 sps:$4 sm:$0xff]   ;;  %v16278_v32 = vld [vmem:[%s19316_s27 + $0x284] ss:$16 sps:$4 sm:$0xff]  }
  0xb3   : > { %11487 = vmatprep.subr.bf16.mxu0 %v16203_v33  ;;  %12635 = vmatprep.subr.bf16.mxu1 %v16205_v34  ;;  %v16281_v33 = vld [vmem:[%s19316_s27 + $0x28c] ss:$16 sps:$4 sm:$0xff]   ;;  %v16276_v34 = vld [vmem:[%s19316_s27 + $0x280] ss:$16 sps:$4 sm:$0xff]   ;;  %v16315_v61 = vld [vmem:[%s19316_s27 + $0x348] ss:$16 sps:$4 sm:$0xff]  }
  0xb4   : > { %v16327_v5 = vld [vmem:[%s19316_s27 + $0x388] ss:$16 sps:$4 sm:$0xff]  }
  0xb6   : > { %11488 = vmatpush1.bf16.msra.mxu0 %v16207_v35  ;;  %12636 = vmatpush1.bf16.msra.mxu1 %v16208_v36  ;;  %v16279_v35 = vld [vmem:[%s19316_s27 + $0x288] ss:$16 sps:$4 sm:$0xff]   ;;  %v16284_v36 = vld [vmem:[%s19316_s27 + $0x2a4] ss:$16 sps:$4 sm:$0xff]  }
  0xb7   : > { %11489 = vmatprep.subr.bf16.mxu0 %v16209_v40  ;;  %12637 = vmatprep.subr.bf16.mxu1 %v16211_v41  ;;  %v16290_v40 = vld [vmem:[%s19316_s27 + $0x2c4] ss:$16 sps:$4 sm:$0xff]   ;;  %v16293_v41 = vld [vmem:[%s19316_s27 + $0x2cc] ss:$16 sps:$4 sm:$0xff]  }
  0xba   : > { %11490 = vmatpush1.bf16.msra.mxu0 %v16213_v42  ;;  %12638 = vmatpush1.bf16.msra.mxu1 %v16214_v45  ;;  %v16288_v42 = vld [vmem:[%s19316_s27 + $0x2c0] ss:$16 sps:$4 sm:$0xff]   ;;  %v16296_v45 = vld [vmem:[%s19316_s27 + $0x2e4] ss:$16 sps:$4 sm:$0xff]  }
  0xbb   : > { %11491 = vmatprep.subr.bf16.mxu0 %v16215_v46  ;;  %12639 = vmatprep.subr.bf16.mxu1 %v16217_v47  ;;  %v16299_v46 = vld [vmem:[%s19316_s27 + $0x2ec] ss:$16 sps:$4 sm:$0xff]   ;;  %v16294_v47 = vld [vmem:[%s19316_s27 + $0x2e0] ss:$16 sps:$4 sm:$0xff]  }
  0xbe   : > { %11492 = vmatpush1.bf16.msra.mxu0 %v16219_v48  ;;  %12640 = vmatpush1.bf16.msra.mxu1 %v16220_v49  ;;  %v16297_v48 = vld [vmem:[%s19316_s27 + $0x2e8] ss:$16 sps:$4 sm:$0xff]   ;;  %v16302_v49 = vld [vmem:[%s19316_s27 + $0x304] ss:$16 sps:$4 sm:$0xff]  }
  0xbf   : > { %11493 = vmatprep.subr.bf16.mxu0 %v16221_v51  ;;  %12641 = vmatprep.subr.bf16.mxu1 %v16223_v52  ;;  %v16305_v51 = vld [vmem:[%s19316_s27 + $0x30c] ss:$16 sps:$4 sm:$0xff]   ;;  %v16300_v52 = vld [vmem:[%s19316_s27 + $0x300] ss:$16 sps:$4 sm:$0xff]  }
  0xc2   : > { %11494 = vmatpush1.bf16.msra.mxu0 %v16225_v54  ;;  %12642 = vmatpush1.bf16.msra.mxu1 %v16226_v56  ;;  %v16308_v54 = vld [vmem:[%s19316_s27 + $0x324] ss:$16 sps:$4 sm:$0xff]   ;;  %v16306_v56 = vld [vmem:[%s19316_s27 + $0x320] ss:$16 sps:$4 sm:$0xff]  }
  0xc3   : > { %11495 = vmatprep.subr.bf16.mxu0 %v16227_v57  ;;  %12643 = vmatprep.subr.bf16.mxu1 %v16229_v58  ;;  %v16309_v57 = vld [vmem:[%s19316_s27 + $0x328] ss:$16 sps:$4 sm:$0xff]   ;;  %v16314_v58 = vld [vmem:[%s19316_s27 + $0x344] ss:$16 sps:$4 sm:$0xff]  }
  0xc6   : > { %11496 = vmatpush1.bf16.msra.mxu0 %v16231_v60  ;;  %12644 = vmatpush1.bf16.msra.mxu1 %v16232_v62  ;;  %v16312_v60 = vld [vmem:[%s19316_s27 + $0x340] ss:$16 sps:$4 sm:$0xff]   ;;  %v16320_v62 = vld [vmem:[%s19316_s27 + $0x364] ss:$16 sps:$4 sm:$0xff]  }
  0xc7   : > { %11497 = vmatprep.subr.bf16.mxu0 %v16233_v63  ;;  %12645 = vmatprep.subr.bf16.mxu1 %v16235_v0  ;;  %v16323_v63 = vld [vmem:[%s19316_s27 + $0x36c] ss:$16 sps:$4 sm:$0xff]   ;;  %v16318_v0 = vld [vmem:[%s19316_s27 + $0x360] ss:$16 sps:$4 sm:$0xff]  }
  0xca   : > { %11498 = vmatpush1.bf16.msra.mxu0 %v16237_v1  ;;  %12646 = vmatpush1.bf16.msra.mxu1 %v16238_v2  ;;  %v16321_v1 = vld [vmem:[%s19316_s27 + $0x368] ss:$16 sps:$4 sm:$0xff]   ;;  %v16326_v2 = vld [vmem:[%s19316_s27 + $0x384] ss:$16 sps:$4 sm:$0xff]  }
  0xcb   : > { %11499 = vmatprep.subr.bf16.mxu0 %v16239_v3  ;;  %12647 = vmatprep.subr.bf16.mxu1 %v16241_v4  ;;  %v16329_v3 = vld [vmem:[%s19316_s27 + $0x38c] ss:$16 sps:$4 sm:$0xff]   ;;  %v16324_v4 = vld [vmem:[%s19316_s27 + $0x380] ss:$16 sps:$4 sm:$0xff]  }
  0xce   : > { %11500 = vmatpush1.bf16.msra.mxu0 %v16243_v6  ;;  %12648 = vmatpush1.bf16.msra.mxu1 %v16244_v7  ;;  %v16332_v6 = vld [vmem:[%s19316_s27 + $0x3a4] ss:$16 sps:$4 sm:$0xff]   ;;  %v16335_v7 = vld [vmem:[%s19316_s27 + $0x3ac] ss:$16 sps:$4 sm:$0xff]  }
  0xcf   : > { %11501 = vmatprep.subr.bf16.mxu0 %v16245_v8  ;;  %12649 = vmatprep.subr.bf16.mxu1 %v16247_v9  ;;  %v16330_v8 = vld [vmem:[%s19316_s27 + $0x3a0] ss:$16 sps:$4 sm:$0xff]   ;;  %v16333_v9 = vld [vmem:[%s19316_s27 + $0x3a8] ss:$16 sps:$4 sm:$0xff]  }
  0xd2   : > { %11502 = vmatpush1.bf16.msra.mxu0 %v16249_v11  ;;  %12650 = vmatpush1.bf16.msra.mxu1 %v16250_v12  ;;  %v16338_v11 = vld [vmem:[%s19316_s27 + $0x3c4] ss:$16 sps:$4 sm:$0xff]   ;;  %v16341_v12 = vld [vmem:[%s19316_s27 + $0x3cc] ss:$16 sps:$4 sm:$0xff]  }
  0xd3   : > { %11512 = vmatprep.subr.bf16.mxu0 %v16254_v13  ;;  %12660 = vmatprep.subr.bf16.mxu1 %v16257_v14  ;;  %v16336_v13 = vld [vmem:[%s19316_s27 + $0x3c0] ss:$16 sps:$4 sm:$0xff]   ;;  %v16339_v14 = vld [vmem:[%s19316_s27 + $0x3c8] ss:$16 sps:$4 sm:$0xff]  }
  0xd5   : > { %11504 = vmatmul.mubr.bf16.vlgmr.msra.gmra.mrb[0].mxu0 %v663_v17  ;;  %12652 = vmatmul.mubr.bf16.vlgmr.msra.gmra.mrb[0].mxu1 %v663_v17  ;;  %v16342_v17 = vld [vmem:[%s19316_s27 + $0x3e0] ss:$16 sps:$4 sm:$0xff]  }
  0xd6   : > { %11513 = vmatpush1.bf16.msra.mxu0 %v16252_v16  ;;  %12661 = vmatpush1.bf16.msra.mxu1 %v16255_v18  ;;  %v16347_v16 = vld [vmem:[%s19316_s27 + $0x3ec] ss:$16 sps:$4 sm:$0xff]   ;;  %v16345_v18 = vld [vmem:[%s19316_s27 + $0x3e8] ss:$16 sps:$4 sm:$0xff]  }
  0xd7   : > { %11514 = vmatprep.subr.bf16.mxu0 %v16260_v19  ;;  %12662 = vmatprep.subr.bf16.mxu1 %v16263_v20  ;;  %v16350_v19 = vld [vmem:[%s19316_s27 + $0x404] ss:$16 sps:$4 sm:$0xff]   ;;  %v16353_v20 = vld [vmem:[%s19316_s27 + $0x40c] ss:$16 sps:$4 sm:$0xff]  }
  0xd8   : > { %11544 = vmatprep.mubr.bf16.mxu0 %v666_v21  ;;  %12692 = vmatprep.mubr.bf16.mxu1 %v666_v21  ;;  %v16348_v21 = vld [vmem:[%s19316_s27 + $0x400] ss:$16 sps:$4 sm:$0xff]  }
  0xda   : > { %11515 = vmatpush1.bf16.msra.mxu0 %v16258_v22  ;;  %12663 = vmatpush1.bf16.msra.mxu1 %v16261_v23  ;;  %v665_v22 = vpack.c.bf16 %v19416_v10, %v19416_v10  ;;  %v16351_v23 = vld [vmem:[%s19316_s27 + $0x408] ss:$16 sps:$4 sm:$0xff]  }
  0xdb   : > { %11516 = vmatprep.subr.bf16.mxu0 %v16266_v24  ;;  %12664 = vmatprep.subr.bf16.mxu1 %v16269_v25  ;;  %v19493_v24 = vld [vmem:[%s19337_s11 + $0x8] sm:$0xff] }
  0xdc   : > { %v16356_v25 = vld [vmem:[%s19316_s27 + $0x424] ss:$16 sps:$4 sm:$0xff]  }
  0xde   : > { %11517 = vmatpush1.bf16.msra.mxu0 %v16264_v26  ;;  %12665 = vmatpush1.bf16.msra.mxu1 %v16267_v27  ;;  %v16359_v26 = vld [vmem:[%s19316_s27 + $0x42c] ss:$16 sps:$4 sm:$0xff]   ;;  %v19499_v27 = vrot.slane %v19493_v24, %v19393_v50 }
  0xdf   : > { %11518 = vmatprep.subr.bf16.mxu0 %v16272_v28  ;;  %12666 = vmatprep.subr.bf16.mxu1 %v16275_v29  ;;  %v16354_v28 = vld [vmem:[%s19316_s27 + $0x420] ss:$16 sps:$4 sm:$0xff]   ;;  %v16357_v29 = vld [vmem:[%s19316_s27 + $0x428] ss:$16 sps:$4 sm:$0xff]  }
  0xe0   : > { %v401_v10 = vcombine.high %v19499_v27, %v19499_v27 }
  0xe2   : > { %11519 = vmatpush1.bf16.msra.mxu0 %v16270_v30  ;;  %12667 = vmatpush1.bf16.msra.mxu1 %v16273_v31  ;;  %v16362_v30 = vld [vmem:[%s19316_s27 + $0x444] ss:$16 sps:$4 sm:$0xff]   ;;  %v16365_v31 = vld [vmem:[%s19316_s27 + $0x44c] ss:$16 sps:$4 sm:$0xff]  }
  0xe3   : > { %11520 = vmatprep.subr.bf16.mxu0 %v16278_v32  ;;  %12668 = vmatprep.subr.bf16.mxu1 %v16281_v33  ;;  %v668_v32 = vpack.c.bf16 %v401_v10, %v401_v10  ;;  %v16360_v33 = vld [vmem:[%s19316_s27 + $0x440] ss:$16 sps:$4 sm:$0xff]   ;;  %v16441_v10 = vld [vmem:[%s19316_s27 + $0x5e8] ss:$16 sps:$4 sm:$0xff]  }
  0xe6   : > { %11521 = vmatpush1.bf16.msra.mxu0 %v16276_v34  ;;  %12669 = vmatpush1.bf16.msra.mxu1 %v16279_v35  ;;  %v16363_v34 = vld [vmem:[%s19316_s27 + $0x448] ss:$16 sps:$4 sm:$0xff]   ;;  %v16368_v35 = vld [vmem:[%s19316_s27 + $0x464] ss:$16 sps:$4 sm:$0xff]  }
  0xe7   : > { %11522 = vmatprep.subr.bf16.mxu0 %v16284_v36  ;;  %12670 = vmatprep.subr.bf16.mxu1 %v16287_v37  ;;  %v16371_v36 = vld [vmem:[%s19316_s27 + $0x46c] ss:$16 sps:$4 sm:$0xff]   ;;  %v16366_v37 = vld [vmem:[%s19316_s27 + $0x460] ss:$16 sps:$4 sm:$0xff]  }
  0xea   : > { %11523 = vmatpush1.bf16.msra.mxu0 %v16282_v38  ;;  %12671 = vmatpush1.bf16.msra.mxu1 %v16285_v39  ;;  %v16369_v38 = vld [vmem:[%s19316_s27 + $0x468] ss:$16 sps:$4 sm:$0xff]   ;;  %v16374_v39 = vld [vmem:[%s19316_s27 + $0x484] ss:$16 sps:$4 sm:$0xff]  }
  0xeb   : > { %11524 = vmatprep.subr.bf16.mxu0 %v16290_v40  ;;  %12672 = vmatprep.subr.bf16.mxu1 %v16293_v41  ;;  %v16377_v40 = vld [vmem:[%s19316_s27 + $0x48c] ss:$16 sps:$4 sm:$0xff]   ;;  %v16372_v41 = vld [vmem:[%s19316_s27 + $0x480] ss:$16 sps:$4 sm:$0xff]  }
  0xee   : > { %11525 = vmatpush1.bf16.msra.mxu0 %v16288_v42  ;;  %12673 = vmatpush1.bf16.msra.mxu1 %v16291_v43  ;;  %v16375_v42 = vld [vmem:[%s19316_s27 + $0x488] ss:$16 sps:$4 sm:$0xff]   ;;  %v16380_v43 = vld [vmem:[%s19316_s27 + $0x4a4] ss:$16 sps:$4 sm:$0xff]  }
  0xef   : > { %11526 = vmatprep.subr.bf16.mxu0 %v16296_v45  ;;  %12674 = vmatprep.subr.bf16.mxu1 %v16299_v46  ;;  %v16383_v45 = vld [vmem:[%s19316_s27 + $0x4ac] ss:$16 sps:$4 sm:$0xff]   ;;  %v16378_v46 = vld [vmem:[%s19316_s27 + $0x4a0] ss:$16 sps:$4 sm:$0xff]  }
  0xf2   : > { %11527 = vmatpush1.bf16.msra.mxu0 %v16294_v47  ;;  %12675 = vmatpush1.bf16.msra.mxu1 %v16297_v48  ;;  %v16381_v47 = vld [vmem:[%s19316_s27 + $0x4a8] ss:$16 sps:$4 sm:$0xff]   ;;  %v16386_v48 = vld [vmem:[%s19316_s27 + $0x4c4] ss:$16 sps:$4 sm:$0xff]  }
  0xf3   : > { %11528 = vmatprep.subr.bf16.mxu0 %v16302_v49  ;;  %12676 = vmatprep.subr.bf16.mxu1 %v16305_v51  ;;  %v16389_v49 = vld [vmem:[%s19316_s27 + $0x4cc] ss:$16 sps:$4 sm:$0xff]   ;;  %v16384_v51 = vld [vmem:[%s19316_s27 + $0x4c0] ss:$16 sps:$4 sm:$0xff]  }
  0xf6   : > { %11529 = vmatpush1.bf16.msra.mxu0 %v16300_v52  ;;  %12677 = vmatpush1.bf16.msra.mxu1 %v16303_v53  ;;  %v16387_v52 = vld [vmem:[%s19316_s27 + $0x4c8] ss:$16 sps:$4 sm:$0xff]   ;;  %v16392_v53 = vld [vmem:[%s19316_s27 + $0x4e4] ss:$16 sps:$4 sm:$0xff]  }
  0xf7   : > { %11530 = vmatprep.subr.bf16.mxu0 %v16308_v54  ;;  %12678 = vmatprep.subr.bf16.mxu1 %v16311_v55  ;;  %v16395_v54 = vld [vmem:[%s19316_s27 + $0x4ec] ss:$16 sps:$4 sm:$0xff]   ;;  %v16390_v55 = vld [vmem:[%s19316_s27 + $0x4e0] ss:$16 sps:$4 sm:$0xff]  }
  0xfa   : > { %11531 = vmatpush1.bf16.msra.mxu0 %v16306_v56  ;;  %12679 = vmatpush1.bf16.msra.mxu1 %v16309_v57  ;;  %v16393_v56 = vld [vmem:[%s19316_s27 + $0x4e8] ss:$16 sps:$4 sm:$0xff]   ;;  %v16398_v57 = vld [vmem:[%s19316_s27 + $0x504] ss:$16 sps:$4 sm:$0xff]  }
  0xfb   : > { %11532 = vmatprep.subr.bf16.mxu0 %v16314_v58  ;;  %12680 = vmatprep.subr.bf16.mxu1 %v16317_v59  ;;  %v16401_v58 = vld [vmem:[%s19316_s27 + $0x50c] ss:$16 sps:$4 sm:$0xff]   ;;  %v16396_v59 = vld [vmem:[%s19316_s27 + $0x500] ss:$16 sps:$4 sm:$0xff]  }
  0xfe   : > { %11533 = vmatpush1.bf16.msra.mxu0 %v16312_v60  ;;  %12681 = vmatpush1.bf16.msra.mxu1 %v16315_v61  ;;  %v16399_v60 = vld [vmem:[%s19316_s27 + $0x508] ss:$16 sps:$4 sm:$0xff]   ;;  %v16404_v61 = vld [vmem:[%s19316_s27 + $0x524] ss:$16 sps:$4 sm:$0xff]  }
  0xff   : > { %11534 = vmatprep.subr.bf16.mxu0 %v16320_v62  ;;  %12682 = vmatprep.subr.bf16.mxu1 %v16323_v63  ;;  %v16407_v62 = vld [vmem:[%s19316_s27 + $0x52c] ss:$16 sps:$4 sm:$0xff]   ;;  %v16402_v63 = vld [vmem:[%s19316_s27 + $0x520] ss:$16 sps:$4 sm:$0xff]  }
 0x102   : > { %11535 = vmatpush1.bf16.msra.mxu0 %v16318_v0  ;;  %12683 = vmatpush1.bf16.msra.mxu1 %v16321_v1  ;;  %v16405_v0 = vld [vmem:[%s19316_s27 + $0x528] ss:$16 sps:$4 sm:$0xff]   ;;  %v16410_v1 = vld [vmem:[%s19316_s27 + $0x544] ss:$16 sps:$4 sm:$0xff]  }
 0x103   : > { %11536 = vmatprep.subr.bf16.mxu0 %v16326_v2  ;;  %12684 = vmatprep.subr.bf16.mxu1 %v16329_v3  ;;  %v16413_v2 = vld [vmem:[%s19316_s27 + $0x54c] ss:$16 sps:$4 sm:$0xff]   ;;  %v16408_v3 = vld [vmem:[%s19316_s27 + $0x540] ss:$16 sps:$4 sm:$0xff]  }
 0x106   : > { %11537 = vmatpush1.bf16.msra.mxu0 %v16324_v4  ;;  %12685 = vmatpush1.bf16.msra.mxu1 %v16327_v5  ;;  %v16411_v4 = vld [vmem:[%s19316_s27 + $0x548] ss:$16 sps:$4 sm:$0xff]   ;;  %v16416_v5 = vld [vmem:[%s19316_s27 + $0x564] ss:$16 sps:$4 sm:$0xff]  }
 0x107   : > { %11538 = vmatprep.subr.bf16.mxu0 %v16332_v6  ;;  %12686 = vmatprep.subr.bf16.mxu1 %v16335_v7  ;;  %v16419_v6 = vld [vmem:[%s19316_s27 + $0x56c] ss:$16 sps:$4 sm:$0xff]   ;;  %v16414_v7 = vld [vmem:[%s19316_s27 + $0x560] ss:$16 sps:$4 sm:$0xff]  }
 0x10a   : > { %11539 = vmatpush1.bf16.msra.mxu0 %v16330_v8  ;;  %12687 = vmatpush1.bf16.msra.mxu1 %v16333_v9  ;;  %v16417_v8 = vld [vmem:[%s19316_s27 + $0x568] ss:$16 sps:$4 sm:$0xff]   ;;  %v16422_v9 = vld [vmem:[%s19316_s27 + $0x584] ss:$16 sps:$4 sm:$0xff]  }
 0x10b   : > { %11540 = vmatprep.subr.bf16.mxu0 %v16338_v11  ;;  %12688 = vmatprep.subr.bf16.mxu1 %v16341_v12  ;;  %v16425_v11 = vld [vmem:[%s19316_s27 + $0x58c] ss:$16 sps:$4 sm:$0xff]   ;;  %v16420_v12 = vld [vmem:[%s19316_s27 + $0x580] ss:$16 sps:$4 sm:$0xff]  }
 0x10e   : > { %11541 = vmatpush1.bf16.msra.mxu0 %v16336_v13  ;;  %12689 = vmatpush1.bf16.msra.mxu1 %v16339_v14  ;;  %v16423_v13 = vld [vmem:[%s19316_s27 + $0x588] ss:$16 sps:$4 sm:$0xff]   ;;  %v16428_v14 = vld [vmem:[%s19316_s27 + $0x5a4] ss:$16 sps:$4 sm:$0xff]  }
 0x10f   : > { %11542 = vmatprep.subr.bf16.mxu0 %v16344_v15  ;;  %12690 = vmatprep.subr.bf16.mxu1 %v16347_v16  ;;  %v16431_v15 = vld [vmem:[%s19316_s27 + $0x5ac] ss:$16 sps:$4 sm:$0xff]   ;;  %v16426_v16 = vld [vmem:[%s19316_s27 + $0x5a0] ss:$16 sps:$4 sm:$0xff]  }
 0x112   : > { %11543 = vmatpush1.bf16.msra.mxu0 %v16342_v17  ;;  %12691 = vmatpush1.bf16.msra.mxu1 %v16345_v18  ;;  %v16429_v17 = vld [vmem:[%s19316_s27 + $0x5a8] ss:$16 sps:$4 sm:$0xff]   ;;  %v16434_v18 = vld [vmem:[%s19316_s27 + $0x5c4] ss:$16 sps:$4 sm:$0xff]  }
 0x113   : > { %11553 = vmatprep.subr.bf16.mxu0 %v16350_v19  ;;  %12701 = vmatprep.subr.bf16.mxu1 %v16353_v20  ;;  %v16437_v19 = vld [vmem:[%s19316_s27 + $0x5cc] ss:$16 sps:$4 sm:$0xff]   ;;  %v386_v20 = vcombine.high %v19493_v24, %v19493_v24  ;;  %v16438_v24 = vld [vmem:[%s19316_s27 + $0x5e0] ss:$16 sps:$4 sm:$0xff]  }
 0x115   : > { %11545 = vmatmul.mubr.bf16.vlgmr.msra.gmra.mrb[0].mxu0 %v665_v22  ;;  %12693 = vmatmul.mubr.bf16.vlgmr.msra.gmra.mrb[0].mxu1 %v665_v22  ;;  %v16435_v22 = vld [vmem:[%s19316_s27 + $0x5c8] ss:$16 sps:$4 sm:$0xff]  }
 0x116   : > { %11554 = vmatpush1.bf16.msra.mxu0 %v16348_v21  ;;  %12702 = vmatpush1.bf16.msra.mxu1 %v16351_v23  ;;  %v16432_v21 = vld [vmem:[%s19316_s27 + $0x5c0] ss:$16 sps:$4 sm:$0xff]   ;;  %v16440_v23 = vld [vmem:[%s19316_s27 + $0x5e4] ss:$16 sps:$4 sm:$0xff]  }
 0x117   : > { %11555 = vmatprep.subr.bf16.mxu0 %v16356_v25  ;;  %12703 = vmatprep.subr.bf16.mxu1 %v16359_v26  ;;  %v16443_v25 = vld [vmem:[%s19316_s27 + $0x5ec] ss:$16 sps:$4 sm:$0xff]   ;;  %v19562_v26 = vrot.slane %v386_v20, %v19393_v50  ;;  %v16519_v20 = vld [vmem:[%s19316_s27 + $0x788] ss:$16 sps:$4 sm:$0xff]  }
 0x118   : > { %11585 = vmatprep.mubr.bf16.mxu0 %v668_v32  ;;  %12733 = vmatprep.mubr.bf16.mxu1 %v668_v32  ;;  %v16444_v32 = vld [vmem:[%s19316_s27 + $0x600] ss:$16 sps:$4 sm:$0xff]  }
 0x11a   : > { %11556 = vmatpush1.bf16.msra.mxu0 %v16354_v28  ;;  %12704 = vmatpush1.bf16.msra.mxu1 %v16357_v29  ;;  %v16446_v28 = vld [vmem:[%s19316_s27 + $0x604] ss:$16 sps:$4 sm:$0xff]   ;;  %v16449_v29 = vld [vmem:[%s19316_s27 + $0x60c] ss:$16 sps:$4 sm:$0xff]  }
 0x11b   : > { %11557 = vmatprep.subr.bf16.mxu0 %v16362_v30  ;;  %12705 = vmatprep.subr.bf16.mxu1 %v16365_v31  ;;  %v402_v30 = vcombine.high %v19562_v26, %v19562_v26  ;;  %v667_v31 = vpack.c.bf16 %v19499_v27, %v19499_v27  ;;  %v16450_v27 = vld [vmem:[%s19316_s27 + $0x620] ss:$16 sps:$4 sm:$0xff]  }
 0x11e   : > { %11558 = vmatpush1.bf16.msra.mxu0 %v16360_v33  ;;  %12706 = vmatpush1.bf16.msra.mxu1 %v16363_v34  ;;  %v16447_v33 = vld [vmem:[%s19316_s27 + $0x608] ss:$16 sps:$4 sm:$0xff]   ;;  %v16452_v34 = vld [vmem:[%s19316_s27 + $0x624] ss:$16 sps:$4 sm:$0xff]  }
 0x11f   : > { %11559 = vmatprep.subr.bf16.mxu0 %v16368_v35  ;;  %12707 = vmatprep.subr.bf16.mxu1 %v16371_v36  ;;  %v16455_v35 = vld [vmem:[%s19316_s27 + $0x62c] ss:$16 sps:$4 sm:$0xff]   ;;  %v670_v36 = vpack.c.bf16 %v402_v30, %v402_v30  ;;  %v16531_v30 = vld [vmem:[%s19316_s27 + $0x7c8] ss:$16 sps:$4 sm:$0xff]  }
 0x122   : > { %11560 = vmatpush1.bf16.msra.mxu0 %v16366_v37  ;;  %12708 = vmatpush1.bf16.msra.mxu1 %v16369_v38  ;;  %v16453_v37 = vld [vmem:[%s19316_s27 + $0x628] ss:$16 sps:$4 sm:$0xff]   ;;  %v16458_v38 = vld [vmem:[%s19316_s27 + $0x644] ss:$16 sps:$4 sm:$0xff]  }
 0x123   : > { %11561 = vmatprep.subr.bf16.mxu0 %v16374_v39  ;;  %12709 = vmatprep.subr.bf16.mxu1 %v16377_v40  ;;  %v16461_v39 = vld [vmem:[%s19316_s27 + $0x64c] ss:$16 sps:$4 sm:$0xff]   ;;  %v16456_v40 = vld [vmem:[%s19316_s27 + $0x640] ss:$16 sps:$4 sm:$0xff]  }
 0x126   : > { %11562 = vmatpush1.bf16.msra.mxu0 %v16372_v41  ;;  %12710 = vmatpush1.bf16.msra.mxu1 %v16375_v42  ;;  %v16459_v41 = vld [vmem:[%s19316_s27 + $0x648] ss:$16 sps:$4 sm:$0xff]   ;;  %v16464_v42 = vld [vmem:[%s19316_s27 + $0x664] ss:$16 sps:$4 sm:$0xff]  }
 0x127   : > { %11563 = vmatprep.subr.bf16.mxu0 %v16380_v43  ;;  %12711 = vmatprep.subr.bf16.mxu1 %v16383_v45  ;;  %v16467_v43 = vld [vmem:[%s19316_s27 + $0x66c] ss:$16 sps:$4 sm:$0xff]   ;;  %v16462_v45 = vld [vmem:[%s19316_s27 + $0x660] ss:$16 sps:$4 sm:$0xff]  }
 0x12a   : > { %11564 = vmatpush1.bf16.msra.mxu0 %v16378_v46  ;;  %12712 = vmatpush1.bf16.msra.mxu1 %v16381_v47  ;;  %v16465_v46 = vld [vmem:[%s19316_s27 + $0x668] ss:$16 sps:$4 sm:$0xff]   ;;  %v16470_v47 = vld [vmem:[%s19316_s27 + $0x684] ss:$16 sps:$4 sm:$0xff]  }
 0x12b   : > { %11565 = vmatprep.subr.bf16.mxu0 %v16386_v48  ;;  %12713 = vmatprep.subr.bf16.mxu1 %v16389_v49  ;;  %v16473_v48 = vld [vmem:[%s19316_s27 + $0x68c] ss:$16 sps:$4 sm:$0xff]   ;;  %v16468_v49 = vld [vmem:[%s19316_s27 + $0x680] ss:$16 sps:$4 sm:$0xff]  }
 0x12e   : > { %11566 = vmatpush1.bf16.msra.mxu0 %v16384_v51  ;;  %12714 = vmatpush1.bf16.msra.mxu1 %v16387_v52  ;;  %v16471_v51 = vld [vmem:[%s19316_s27 + $0x688] ss:$16 sps:$4 sm:$0xff]   ;;  %v16476_v52 = vld [vmem:[%s19316_s27 + $0x6a4] ss:$16 sps:$4 sm:$0xff]  }
 0x12f   : > { %11567 = vmatprep.subr.bf16.mxu0 %v16392_v53  ;;  %12715 = vmatprep.subr.bf16.mxu1 %v16395_v54  ;;  %v16479_v53 = vld [vmem:[%s19316_s27 + $0x6ac] ss:$16 sps:$4 sm:$0xff]   ;;  %v16474_v54 = vld [vmem:[%s19316_s27 + $0x6a0] ss:$16 sps:$4 sm:$0xff]  }
 0x132   : > { %11568 = vmatpush1.bf16.msra.mxu0 %v16390_v55  ;;  %12716 = vmatpush1.bf16.msra.mxu1 %v16393_v56  ;;  %v16477_v55 = vld [vmem:[%s19316_s27 + $0x6a8] ss:$16 sps:$4 sm:$0xff]   ;;  %v16482_v56 = vld [vmem:[%s19316_s27 + $0x6c4] ss:$16 sps:$4 sm:$0xff]  }
 0x133   : > { %11569 = vmatprep.subr.bf16.mxu0 %v16398_v57  ;;  %12717 = vmatprep.subr.bf16.mxu1 %v16401_v58  ;;  %v16485_v57 = vld [vmem:[%s19316_s27 + $0x6cc] ss:$16 sps:$4 sm:$0xff]   ;;  %v16480_v58 = vld [vmem:[%s19316_s27 + $0x6c0] ss:$16 sps:$4 sm:$0xff]  }
 0x136   : > { %11570 = vmatpush1.bf16.msra.mxu0 %v16396_v59  ;;  %12718 = vmatpush1.bf16.msra.mxu1 %v16399_v60  ;;  %v16483_v59 = vld [vmem:[%s19316_s27 + $0x6c8] ss:$16 sps:$4 sm:$0xff]   ;;  %v16488_v60 = vld [vmem:[%s19316_s27 + $0x6e4] ss:$16 sps:$4 sm:$0xff]  }
 0x137   : > { %11571 = vmatprep.subr.bf16.mxu0 %v16404_v61  ;;  %12719 = vmatprep.subr.bf16.mxu1 %v16407_v62  ;;  %v16491_v61 = vld [vmem:[%s19316_s27 + $0x6ec] ss:$16 sps:$4 sm:$0xff]   ;;  %v16486_v62 = vld [vmem:[%s19316_s27 + $0x6e0] ss:$16 sps:$4 sm:$0xff]  }
 0x13a   : > { %11572 = vmatpush1.bf16.msra.mxu0 %v16402_v63  ;;  %12720 = vmatpush1.bf16.msra.mxu1 %v16405_v0  ;;  %v16489_v63 = vld [vmem:[%s19316_s27 + $0x6e8] ss:$16 sps:$4 sm:$0xff]   ;;  %v16494_v0 = vld [vmem:[%s19316_s27 + $0x704] ss:$16 sps:$4 sm:$0xff]  }
 0x13b   : > { %11573 = vmatprep.subr.bf16.mxu0 %v16410_v1  ;;  %12721 = vmatprep.subr.bf16.mxu1 %v16413_v2  ;;  %v16497_v1 = vld [vmem:[%s19316_s27 + $0x70c] ss:$16 sps:$4 sm:$0xff]   ;;  %v16492_v2 = vld [vmem:[%s19316_s27 + $0x700] ss:$16 sps:$4 sm:$0xff]  }
 0x13e   : > { %11574 = vmatpush1.bf16.msra.mxu0 %v16408_v3  ;;  %12722 = vmatpush1.bf16.msra.mxu1 %v16411_v4  ;;  %v16495_v3 = vld [vmem:[%s19316_s27 + $0x708] ss:$16 sps:$4 sm:$0xff]   ;;  %v16500_v4 = vld [vmem:[%s19316_s27 + $0x724] ss:$16 sps:$4 sm:$0xff]  }
 0x13f   : > { %11575 = vmatprep.subr.bf16.mxu0 %v16416_v5  ;;  %12723 = vmatprep.subr.bf16.mxu1 %v16419_v6  ;;  %v16503_v5 = vld [vmem:[%s19316_s27 + $0x72c] ss:$16 sps:$4 sm:$0xff]   ;;  %v16498_v6 = vld [vmem:[%s19316_s27 + $0x720] ss:$16 sps:$4 sm:$0xff]  }
 0x142   : > { %11576 = vmatpush1.bf16.msra.mxu0 %v16414_v7  ;;  %12724 = vmatpush1.bf16.msra.mxu1 %v16417_v8  ;;  %v16501_v7 = vld [vmem:[%s19316_s27 + $0x728] ss:$16 sps:$4 sm:$0xff]   ;;  %v16506_v8 = vld [vmem:[%s19316_s27 + $0x744] ss:$16 sps:$4 sm:$0xff]  }
 0x143   : > { %11577 = vmatprep.subr.bf16.mxu0 %v16422_v9  ;;  %12725 = vmatprep.subr.bf16.mxu1 %v16425_v11  ;;  %v16509_v9 = vld [vmem:[%s19316_s27 + $0x74c] ss:$16 sps:$4 sm:$0xff]   ;;  %v16504_v11 = vld [vmem:[%s19316_s27 + $0x740] ss:$16 sps:$4 sm:$0xff]  }
 0x146   : > { %11578 = vmatpush1.bf16.msra.mxu0 %v16420_v12  ;;  %12726 = vmatpush1.bf16.msra.mxu1 %v16423_v13  ;;  %v16507_v12 = vld [vmem:[%s19316_s27 + $0x748] ss:$16 sps:$4 sm:$0xff]   ;;  %v16512_v13 = vld [vmem:[%s19316_s27 + $0x764] ss:$16 sps:$4 sm:$0xff]  }
 0x147   : > { %11579 = vmatprep.subr.bf16.mxu0 %v16428_v14  ;;  %12727 = vmatprep.subr.bf16.mxu1 %v16431_v15  ;;  %v16515_v14 = vld [vmem:[%s19316_s27 + $0x76c] ss:$16 sps:$4 sm:$0xff]   ;;  %v16510_v15 = vld [vmem:[%s19316_s27 + $0x760] ss:$16 sps:$4 sm:$0xff]  }
 0x14a   : > { %11580 = vmatpush1.bf16.msra.mxu0 %v16426_v16  ;;  %12728 = vmatpush1.bf16.msra.mxu1 %v16429_v17  ;;  %v16513_v16 = vld [vmem:[%s19316_s27 + $0x768] ss:$16 sps:$4 sm:$0xff]   ;;  %v16518_v17 = vld [vmem:[%s19316_s27 + $0x784] ss:$16 sps:$4 sm:$0xff]  }
 0x14b   : > { %11581 = vmatprep.subr.bf16.mxu0 %v16434_v18  ;;  %12729 = vmatprep.subr.bf16.mxu1 %v16437_v19  ;;  %v16521_v18 = vld [vmem:[%s19316_s27 + $0x78c] ss:$16 sps:$4 sm:$0xff]   ;;  %v16516_v19 = vld [vmem:[%s19316_s27 + $0x780] ss:$16 sps:$4 sm:$0xff]  }
 0x14e   : > { %11582 = vmatpush1.bf16.msra.mxu0 %v16432_v21  ;;  %12730 = vmatpush1.bf16.msra.mxu1 %v16435_v22  ;;  %v16524_v21 = vld [vmem:[%s19316_s27 + $0x7a4] ss:$16 sps:$4 sm:$0xff]   ;;  %v16527_v22 = vld [vmem:[%s19316_s27 + $0x7ac] ss:$16 sps:$4 sm:$0xff]  }
 0x14f   : > { %11583 = vmatprep.subr.bf16.mxu0 %v16440_v23  ;;  %12731 = vmatprep.subr.bf16.mxu1 %v16443_v25  ;;  %v16522_v23 = vld [vmem:[%s19316_s27 + $0x7a0] ss:$16 sps:$4 sm:$0xff]   ;;  %v16525_v25 = vld [vmem:[%s19316_s27 + $0x7a8] ss:$16 sps:$4 sm:$0xff]  }
 0x152   : > { %11584 = vmatpush1.bf16.msra.mxu0 %v16438_v24  ;;  %12732 = vmatpush1.bf16.msra.mxu1 %v16441_v10  ;;  %v16530_v24 = vld [vmem:[%s19316_s27 + $0x7c4] ss:$16 sps:$4 sm:$0xff]   ;;  %v16533_v10 = vld [vmem:[%s19316_s27 + $0x7cc] ss:$16 sps:$4 sm:$0xff]  }
 0x153   : > { %11594 = vmatprep.subr.bf16.mxu0 %v16446_v28  ;;  %12742 = vmatprep.subr.bf16.mxu1 %v16449_v29  ;;  %v16528_v28 = vld [vmem:[%s19316_s27 + $0x7c0] ss:$16 sps:$4 sm:$0xff]   ;;  %v19630_v29 = vld [vmem:[%s19337_s11 + $0x10] sm:$0xff] }
 0x155   : > { %11586 = vmatmul.mubr.bf16.vlgmr.msra.gmra.mrb[0].mxu0 %v667_v31  ;;  %12734 = vmatmul.mubr.bf16.vlgmr.msra.gmra.mrb[0].mxu1 %v667_v31  ;;  %v16536_v31 = vld [vmem:[%s19316_s27 + $0x7e4] ss:$16 sps:$4 sm:$0xff]  }
 0x156   : > { %11595 = vmatpush1.bf16.msra.mxu0 %v16444_v32  ;;  %12743 = vmatpush1.bf16.msra.mxu1 %v16447_v33  ;;  %v16539_v32 = vld [vmem:[%s19316_s27 + $0x7ec] ss:$16 sps:$4 sm:$0xff]   ;;  %v19637_v33 = vrot.slane %v19630_v29, %v19393_v50 }
 0x157   : > { %11596 = vmatprep.subr.bf16.mxu0 %v16452_v34  ;;  %12744 = vmatprep.subr.bf16.mxu1 %v16455_v35  ;;  %v16534_v34 = vld [vmem:[%s19316_s27 + $0x7e0] ss:$16 sps:$4 sm:$0xff]   ;;  %v16537_v35 = vld [vmem:[%s19316_s27 + $0x7e8] ss:$16 sps:$4 sm:$0xff]  }
 0x158   : > { %11626 = vmatprep.mubr.bf16.mxu0 %v670_v36  ;;  %12774 = vmatprep.mubr.bf16.mxu1 %v670_v36  ;;  %v16543_v36 = vld [vmem:[%s19316_s27 + $0x804] ss:$16 sps:$4 sm:$0xff]  }
 0x15a   : > { %11597 = vmatpush1.bf16.msra.mxu0 %v16450_v27  ;;  %12745 = vmatpush1.bf16.msra.mxu1 %v16453_v37  ;;  %v16546_v27 = vld [vmem:[%s19316_s27 + $0x80c] ss:$16 sps:$4 sm:$0xff]   ;;  %v418_v37 = vcombine.high %v19637_v33, %v19637_v33 }
 0x15b   : > { %11598 = vmatprep.subr.bf16.mxu0 %v16458_v38  ;;  %12746 = vmatprep.subr.bf16.mxu1 %v16461_v39  ;;  %v16541_v38 = vld [vmem:[%s19316_s27 + $0x800] ss:$16 sps:$4 sm:$0xff]   ;;  %v669_v39 = vpack.c.bf16 %v19562_v26, %v19562_v26  ;;  %v16555_v26 = vld [vmem:[%s19316_s27 + $0x844] ss:$16 sps:$4 sm:$0xff]  }
 0x15e   : > { %11599 = vmatpush1.bf16.msra.mxu0 %v16456_v40  ;;  %12747 = vmatpush1.bf16.msra.mxu1 %v16459_v41  ;;  %v16544_v40 = vld [vmem:[%s19316_s27 + $0x808] ss:$16 sps:$4 sm:$0xff]   ;;  %v16549_v41 = vld [vmem:[%s19316_s27 + $0x824] ss:$16 sps:$4 sm:$0xff]  }
 0x15f   : > { %11600 = vmatprep.subr.bf16.mxu0 %v16464_v42  ;;  %12748 = vmatprep.subr.bf16.mxu1 %v16467_v43  ;;  %v16552_v42 = vld [vmem:[%s19316_s27 + $0x82c] ss:$16 sps:$4 sm:$0xff]   ;;  %v672_v43 = vpack.c.bf16 %v418_v37, %v418_v37  ;;  %v16625_v37 = vld [vmem:[%s19316_s27 + $0x9c0] ss:$16 sps:$4 sm:$0xff]  }
 0x162   : > { %11601 = vmatpush1.bf16.msra.mxu0 %v16462_v45  ;;  %12749 = vmatpush1.bf16.msra.mxu1 %v16465_v46  ;;  %v16547_v45 = vld [vmem:[%s19316_s27 + $0x820] ss:$16 sps:$4 sm:$0xff]   ;;  %v16550_v46 = vld [vmem:[%s19316_s27 + $0x828] ss:$16 sps:$4 sm:$0xff]  }
 0x163   : > { %11602 = vmatprep.subr.bf16.mxu0 %v16470_v47  ;;  %12750 = vmatprep.subr.bf16.mxu1 %v16473_v48  ;;  %v16558_v47 = vld [vmem:[%s19316_s27 + $0x84c] ss:$16 sps:$4 sm:$0xff]   ;;  %v16553_v48 = vld [vmem:[%s19316_s27 + $0x840] ss:$16 sps:$4 sm:$0xff]  }
 0x166   : > { %11603 = vmatpush1.bf16.msra.mxu0 %v16468_v49  ;;  %12751 = vmatpush1.bf16.msra.mxu1 %v16471_v51  ;;  %v16556_v49 = vld [vmem:[%s19316_s27 + $0x848] ss:$16 sps:$4 sm:$0xff]   ;;  %v16561_v51 = vld [vmem:[%s19316_s27 + $0x864] ss:$16 sps:$4 sm:$0xff]  }
 0x167   : > { %11604 = vmatprep.subr.bf16.mxu0 %v16476_v52  ;;  %12752 = vmatprep.subr.bf16.mxu1 %v16479_v53  ;;  %v16564_v52 = vld [vmem:[%s19316_s27 + $0x86c] ss:$16 sps:$4 sm:$0xff]   ;;  %v16559_v53 = vld [vmem:[%s19316_s27 + $0x860] ss:$16 sps:$4 sm:$0xff]  }
 0x16a   : > { %11605 = vmatpush1.bf16.msra.mxu0 %v16474_v54  ;;  %12753 = vmatpush1.bf16.msra.mxu1 %v16477_v55  ;;  %v16562_v54 = vld [vmem:[%s19316_s27 + $0x868] ss:$16 sps:$4 sm:$0xff]   ;;  %v16567_v55 = vld [vmem:[%s19316_s27 + $0x884] ss:$16 sps:$4 sm:$0xff]  }
 0x16b   : > { %11606 = vmatprep.subr.bf16.mxu0 %v16482_v56  ;;  %12754 = vmatprep.subr.bf16.mxu1 %v16485_v57  ;;  %v16570_v56 = vld [vmem:[%s19316_s27 + $0x88c] ss:$16 sps:$4 sm:$0xff]   ;;  %v16565_v57 = vld [vmem:[%s19316_s27 + $0x880] ss:$16 sps:$4 sm:$0xff]  }
 0x16e   : > { %11607 = vmatpush1.bf16.msra.mxu0 %v16480_v58  ;;  %12755 = vmatpush1.bf16.msra.mxu1 %v16483_v59  ;;  %v16568_v58 = vld [vmem:[%s19316_s27 + $0x888] ss:$16 sps:$4 sm:$0xff]   ;;  %v16573_v59 = vld [vmem:[%s19316_s27 + $0x8a4] ss:$16 sps:$4 sm:$0xff]  }
 0x16f   : > { %11608 = vmatprep.subr.bf16.mxu0 %v16488_v60  ;;  %12756 = vmatprep.subr.bf16.mxu1 %v16491_v61  ;;  %v16576_v60 = vld [vmem:[%s19316_s27 + $0x8ac] ss:$16 sps:$4 sm:$0xff]   ;;  %v16571_v61 = vld [vmem:[%s19316_s27 + $0x8a0] ss:$16 sps:$4 sm:$0xff]  }
 0x172   : > { %11609 = vmatpush1.bf16.msra.mxu0 %v16486_v62  ;;  %12757 = vmatpush1.bf16.msra.mxu1 %v16489_v63  ;;  %v16574_v62 = vld [vmem:[%s19316_s27 + $0x8a8] ss:$16 sps:$4 sm:$0xff]   ;;  %v16579_v63 = vld [vmem:[%s19316_s27 + $0x8c4] ss:$16 sps:$4 sm:$0xff]  }
 0x173   : > { %11610 = vmatprep.subr.bf16.mxu0 %v16494_v0  ;;  %12758 = vmatprep.subr.bf16.mxu1 %v16497_v1  ;;  %v16582_v0 = vld [vmem:[%s19316_s27 + $0x8cc] ss:$16 sps:$4 sm:$0xff]   ;;  %v16577_v1 = vld [vmem:[%s19316_s27 + $0x8c0] ss:$16 sps:$4 sm:$0xff]  }
 0x176   : > { %11611 = vmatpush1.bf16.msra.mxu0 %v16492_v2  ;;  %12759 = vmatpush1.bf16.msra.mxu1 %v16495_v3  ;;  %v16580_v2 = vld [vmem:[%s19316_s27 + $0x8c8] ss:$16 sps:$4 sm:$0xff]   ;;  %v16585_v3 = vld [vmem:[%s19316_s27 + $0x8e4] ss:$16 sps:$4 sm:$0xff]  }
 0x177   : > { %11612 = vmatprep.subr.bf16.mxu0 %v16500_v4  ;;  %12760 = vmatprep.subr.bf16.mxu1 %v16503_v5  ;;  %v16588_v4 = vld [vmem:[%s19316_s27 + $0x8ec] ss:$16 sps:$4 sm:$0xff]   ;;  %v16583_v5 = vld [vmem:[%s19316_s27 + $0x8e0] ss:$16 sps:$4 sm:$0xff]  }
 0x17a   : > { %11613 = vmatpush1.bf16.msra.mxu0 %v16498_v6  ;;  %12761 = vmatpush1.bf16.msra.mxu1 %v16501_v7  ;;  %v16586_v6 = vld [vmem:[%s19316_s27 + $0x8e8] ss:$16 sps:$4 sm:$0xff]   ;;  %v16591_v7 = vld [vmem:[%s19316_s27 + $0x904] ss:$16 sps:$4 sm:$0xff]  }
 0x17b   : > { %11614 = vmatprep.subr.bf16.mxu0 %v16506_v8  ;;  %12762 = vmatprep.subr.bf16.mxu1 %v16509_v9  ;;  %v16594_v8 = vld [vmem:[%s19316_s27 + $0x90c] ss:$16 sps:$4 sm:$0xff]   ;;  %v16589_v9 = vld [vmem:[%s19316_s27 + $0x900] ss:$16 sps:$4 sm:$0xff]  }
 0x17e   : > { %11615 = vmatpush1.bf16.msra.mxu0 %v16504_v11  ;;  %12763 = vmatpush1.bf16.msra.mxu1 %v16507_v12  ;;  %v16592_v11 = vld [vmem:[%s19316_s27 + $0x908] ss:$16 sps:$4 sm:$0xff]   ;;  %v16597_v12 = vld [vmem:[%s19316_s27 + $0x924] ss:$16 sps:$4 sm:$0xff]  }
 0x17f   : > { %11616 = vmatprep.subr.bf16.mxu0 %v16512_v13  ;;  %12764 = vmatprep.subr.bf16.mxu1 %v16515_v14  ;;  %v16600_v13 = vld [vmem:[%s19316_s27 + $0x92c] ss:$16 sps:$4 sm:$0xff]   ;;  %v16595_v14 = vld [vmem:[%s19316_s27 + $0x920] ss:$16 sps:$4 sm:$0xff]  }
 0x182   : > { %11617 = vmatpush1.bf16.msra.mxu0 %v16510_v15  ;;  %12765 = vmatpush1.bf16.msra.mxu1 %v16513_v16  ;;  %v16598_v15 = vld [vmem:[%s19316_s27 + $0x928] ss:$16 sps:$4 sm:$0xff]   ;;  %v16603_v16 = vld [vmem:[%s19316_s27 + $0x944] ss:$16 sps:$4 sm:$0xff]  }
 0x183   : > { %11618 = vmatprep.subr.bf16.mxu0 %v16518_v17  ;;  %12766 = vmatprep.subr.bf16.mxu1 %v16521_v18  ;;  %v16606_v17 = vld [vmem:[%s19316_s27 + $0x94c] ss:$16 sps:$4 sm:$0xff]   ;;  %v16601_v18 = vld [vmem:[%s19316_s27 + $0x940] ss:$16 sps:$4 sm:$0xff]  }
 0x186   : > { %11619 = vmatpush1.bf16.msra.mxu0 %v16516_v19  ;;  %12767 = vmatpush1.bf16.msra.mxu1 %v16519_v20  ;;  %v16604_v19 = vld [vmem:[%s19316_s27 + $0x948] ss:$16 sps:$4 sm:$0xff]   ;;  %v16609_v20 = vld [vmem:[%s19316_s27 + $0x964] ss:$16 sps:$4 sm:$0xff]  }
 0x187   : > { %11620 = vmatprep.subr.bf16.mxu0 %v16524_v21  ;;  %12768 = vmatprep.subr.bf16.mxu1 %v16527_v22  ;;  %v16612_v21 = vld [vmem:[%s19316_s27 + $0x96c] ss:$16 sps:$4 sm:$0xff]   ;;  %v16607_v22 = vld [vmem:[%s19316_s27 + $0x960] ss:$16 sps:$4 sm:$0xff]  }
 0x18a   : > { %11621 = vmatpush1.bf16.msra.mxu0 %v16522_v23  ;;  %12769 = vmatpush1.bf16.msra.mxu1 %v16525_v25  ;;  %v16610_v23 = vld [vmem:[%s19316_s27 + $0x968] ss:$16 sps:$4 sm:$0xff]   ;;  %v16615_v25 = vld [vmem:[%s19316_s27 + $0x984] ss:$16 sps:$4 sm:$0xff]  }
 0x18b   : > { %11622 = vmatprep.subr.bf16.mxu0 %v16530_v24  ;;  %12770 = vmatprep.subr.bf16.mxu1 %v16533_v10  ;;  %v16618_v24 = vld [vmem:[%s19316_s27 + $0x98c] ss:$16 sps:$4 sm:$0xff]   ;;  %v16613_v10 = vld [vmem:[%s19316_s27 + $0x980] ss:$16 sps:$4 sm:$0xff]  }
 0x18e   : > { %11623 = vmatpush1.bf16.msra.mxu0 %v16528_v28  ;;  %12771 = vmatpush1.bf16.msra.mxu1 %v16531_v30  ;;  %v16616_v28 = vld [vmem:[%s19316_s27 + $0x988] ss:$16 sps:$4 sm:$0xff]   ;;  %v16621_v30 = vld [vmem:[%s19316_s27 + $0x9a4] ss:$16 sps:$4 sm:$0xff]  }
 0x18f   : > { %11624 = vmatprep.subr.bf16.mxu0 %v16536_v31  ;;  %12772 = vmatprep.subr.bf16.mxu1 %v16539_v32  ;;  %v16624_v31 = vld [vmem:[%s19316_s27 + $0x9ac] ss:$16 sps:$4 sm:$0xff]   ;;  %v16619_v32 = vld [vmem:[%s19316_s27 + $0x9a0] ss:$16 sps:$4 sm:$0xff]  }
 0x192   : > { %11625 = vmatpush1.bf16.msra.mxu0 %v16534_v34  ;;  %12773 = vmatpush1.bf16.msra.mxu1 %v16537_v35  ;;  %v16622_v34 = vld [vmem:[%s19316_s27 + $0x9a8] ss:$16 sps:$4 sm:$0xff]   ;;  %v16627_v35 = vld [vmem:[%s19316_s27 + $0x9c4] ss:$16 sps:$4 sm:$0xff]  }
 0x193   : > { %11635 = vmatprep.subr.bf16.mxu0 %v16543_v36  ;;  %12783 = vmatprep.subr.bf16.mxu1 %v16546_v27  ;;  %v16630_v36 = vld [vmem:[%s19316_s27 + $0x9cc] ss:$16 sps:$4 sm:$0xff]   ;;  %v403_v27 = vcombine.high %v19630_v29, %v19630_v29  ;;  %v16631_v29 = vld [vmem:[%s19316_s27 + $0x9e0] ss:$16 sps:$4 sm:$0xff]  }
 0x195   : > { %11627 = vmatmul.mubr.bf16.vlgmr.msra.gmra.mrb[0].mxu0 %v669_v39  ;;  %12775 = vmatmul.mubr.bf16.vlgmr.msra.gmra.mrb[0].mxu1 %v669_v39  ;;  %v16633_v39 = vld [vmem:[%s19316_s27 + $0x9e4] ss:$16 sps:$4 sm:$0xff]  }
 0x196   : > { %11636 = vmatpush1.bf16.msra.mxu0 %v16541_v38  ;;  %12784 = vmatpush1.bf16.msra.mxu1 %v16544_v40  ;;  %v16628_v38 = vld [vmem:[%s19316_s27 + $0x9c8] ss:$16 sps:$4 sm:$0xff]   ;;  %v16636_v40 = vld [vmem:[%s19316_s27 + $0x9ec] ss:$16 sps:$4 sm:$0xff]  }
 0x197   : > { %11637 = vmatprep.subr.bf16.mxu0 %v16549_v41  ;;  %12785 = vmatprep.subr.bf16.mxu1 %v16552_v42  ;;  %v19710_v41 = vrot.slane %v403_v27, %v19393_v50  ;;  %v16634_v42 = vld [vmem:[%s19316_s27 + $0x9e8] ss:$16 sps:$4 sm:$0xff]  }
 0x198   : > { %11667 = vmatprep.mubr.bf16.mxu0 %v672_v43  ;;  %12815 = vmatprep.mubr.bf16.mxu1 %v672_v43  ;;  %v16639_v43 = vld [vmem:[%s19316_s27 + $0xa04] ss:$16 sps:$4 sm:$0xff]   ;;  %v16712_v27 = vld [vmem:[%s19316_s27 + $0xb88] ss:$16 sps:$4 sm:$0xff]  }
 0x19a   : > { %11638 = vmatpush1.bf16.msra.mxu0 %v16547_v45  ;;  %12786 = vmatpush1.bf16.msra.mxu1 %v16550_v46  ;;  %v16642_v45 = vld [vmem:[%s19316_s27 + $0xa0c] ss:$16 sps:$4 sm:$0xff]   ;;  %v419_v46 = vcombine.high %v19710_v41, %v19710_v41 }
 0x19b   : > { %11639 = vmatprep.subr.bf16.mxu0 %v16555_v26  ;;  %12787 = vmatprep.subr.bf16.mxu1 %v16558_v47  ;;  %v671_v26 = vpack.c.bf16 %v19637_v33, %v19637_v33  ;;  %v16637_v47 = vld [vmem:[%s19316_s27 + $0xa00] ss:$16 sps:$4 sm:$0xff]  }
 0x19c   : > { %v16643_v33 = vld [vmem:[%s19316_s27 + $0xa20] ss:$16 sps:$4 sm:$0xff]  }
 0x19e   : > { %11640 = vmatpush1.bf16.msra.mxu0 %v16553_v48  ;;  %12788 = vmatpush1.bf16.msra.mxu1 %v16556_v49  ;;  %v16640_v48 = vld [vmem:[%s19316_s27 + $0xa08] ss:$16 sps:$4 sm:$0xff]   ;;  %v16645_v49 = vld [vmem:[%s19316_s27 + $0xa24] ss:$16 sps:$4 sm:$0xff]  }
 0x19f   : > { %11641 = vmatprep.subr.bf16.mxu0 %v16561_v51  ;;  %12789 = vmatprep.subr.bf16.mxu1 %v16564_v52  ;;  %v16648_v51 = vld [vmem:[%s19316_s27 + $0xa2c] ss:$16 sps:$4 sm:$0xff]   ;;  %v674_v52 = vpack.c.bf16 %v419_v46, %v419_v46  ;;  %v16724_v46 = vld [vmem:[%s19316_s27 + $0xbc8] ss:$16 sps:$4 sm:$0xff]  }
 0x1a2   : > { %11642 = vmatpush1.bf16.msra.mxu0 %v16559_v53  ;;  %12790 = vmatpush1.bf16.msra.mxu1 %v16562_v54  ;;  %v16646_v53 = vld [vmem:[%s19316_s27 + $0xa28] ss:$16 sps:$4 sm:$0xff]   ;;  %v16651_v54 = vld [vmem:[%s19316_s27 + $0xa44] ss:$16 sps:$4 sm:$0xff]  }
 0x1a3   : > { %11643 = vmatprep.subr.bf16.mxu0 %v16567_v55  ;;  %12791 = vmatprep.subr.bf16.mxu1 %v16570_v56  ;;  %v16654_v55 = vld [vmem:[%s19316_s27 + $0xa4c] ss:$16 sps:$4 sm:$0xff]   ;;  %v16649_v56 = vld [vmem:[%s19316_s27 + $0xa40] ss:$16 sps:$4 sm:$0xff]  }
 0x1a6   : > { %11644 = vmatpush1.bf16.msra.mxu0 %v16565_v57  ;;  %12792 = vmatpush1.bf16.msra.mxu1 %v16568_v58  ;;  %v16652_v57 = vld [vmem:[%s19316_s27 + $0xa48] ss:$16 sps:$4 sm:$0xff]   ;;  %v16657_v58 = vld [vmem:[%s19316_s27 + $0xa64] ss:$16 sps:$4 sm:$0xff]  }
 0x1a7   : > { %11645 = vmatprep.subr.bf16.mxu0 %v16573_v59  ;;  %12793 = vmatprep.subr.bf16.mxu1 %v16576_v60  ;;  %v16660_v59 = vld [vmem:[%s19316_s27 + $0xa6c] ss:$16 sps:$4 sm:$0xff]   ;;  %v16655_v60 = vld [vmem:[%s19316_s27 + $0xa60] ss:$16 sps:$4 sm:$0xff]  }
 0x1aa   : > { %11646 = vmatpush1.bf16.msra.mxu0 %v16571_v61  ;;  %12794 = vmatpush1.bf16.msra.mxu1 %v16574_v62  ;;  %v16658_v61 = vld [vmem:[%s19316_s27 + $0xa68] ss:$16 sps:$4 sm:$0xff]   ;;  %v16663_v62 = vld [vmem:[%s19316_s27 + $0xa84] ss:$16 sps:$4 sm:$0xff]  }
 0x1ab   : > { %11647 = vmatprep.subr.bf16.mxu0 %v16579_v63  ;;  %12795 = vmatprep.subr.bf16.mxu1 %v16582_v0  ;;  %v16666_v63 = vld [vmem:[%s19316_s27 + $0xa8c] ss:$16 sps:$4 sm:$0xff]   ;;  %v16661_v0 = vld [vmem:[%s19316_s27 + $0xa80] ss:$16 sps:$4 sm:$0xff]  }
 0x1ae   : > { %11648 = vmatpush1.bf16.msra.mxu0 %v16577_v1  ;;  %12796 = vmatpush1.bf16.msra.mxu1 %v16580_v2  ;;  %v16664_v1 = vld [vmem:[%s19316_s27 + $0xa88] ss:$16 sps:$4 sm:$0xff]   ;;  %v16669_v2 = vld [vmem:[%s19316_s27 + $0xaa4] ss:$16 sps:$4 sm:$0xff]  }
 0x1af   : > { %11649 = vmatprep.subr.bf16.mxu0 %v16585_v3  ;;  %12797 = vmatprep.subr.bf16.mxu1 %v16588_v4  ;;  %v16672_v3 = vld [vmem:[%s19316_s27 + $0xaac] ss:$16 sps:$4 sm:$0xff]   ;;  %v16667_v4 = vld [vmem:[%s19316_s27 + $0xaa0] ss:$16 sps:$4 sm:$0xff]  }
 0x1b2   : > { %11650 = vmatpush1.bf16.msra.mxu0 %v16583_v5  ;;  %12798 = vmatpush1.bf16.msra.mxu1 %v16586_v6  ;;  %v16670_v5 = vld [vmem:[%s19316_s27 + $0xaa8] ss:$16 sps:$4 sm:$0xff]   ;;  %v16675_v6 = vld [vmem:[%s19316_s27 + $0xac4] ss:$16 sps:$4 sm:$0xff]  }
 0x1b3   : > { %11651 = vmatprep.subr.bf16.mxu0 %v16591_v7  ;;  %12799 = vmatprep.subr.bf16.mxu1 %v16594_v8  ;;  %v16678_v7 = vld [vmem:[%s19316_s27 + $0xacc] ss:$16 sps:$4 sm:$0xff]   ;;  %v16673_v8 = vld [vmem:[%s19316_s27 + $0xac0] ss:$16 sps:$4 sm:$0xff]  }
 0x1b6   : > { %11652 = vmatpush1.bf16.msra.mxu0 %v16589_v9  ;;  %12800 = vmatpush1.bf16.msra.mxu1 %v16592_v11  ;;  %v16676_v9 = vld [vmem:[%s19316_s27 + $0xac8] ss:$16 sps:$4 sm:$0xff]   ;;  %v16681_v11 = vld [vmem:[%s19316_s27 + $0xae4] ss:$16 sps:$4 sm:$0xff]  }
 0x1b7   : > { %11653 = vmatprep.subr.bf16.mxu0 %v16597_v12  ;;  %12801 = vmatprep.subr.bf16.mxu1 %v16600_v13  ;;  %v16684_v12 = vld [vmem:[%s19316_s27 + $0xaec] ss:$16 sps:$4 sm:$0xff]   ;;  %v16679_v13 = vld [vmem:[%s19316_s27 + $0xae0] ss:$16 sps:$4 sm:$0xff]  }
 0x1ba   : > { %11654 = vmatpush1.bf16.msra.mxu0 %v16595_v14  ;;  %12802 = vmatpush1.bf16.msra.mxu1 %v16598_v15  ;;  %v16682_v14 = vld [vmem:[%s19316_s27 + $0xae8] ss:$16 sps:$4 sm:$0xff]   ;;  %v16687_v15 = vld [vmem:[%s19316_s27 + $0xb04] ss:$16 sps:$4 sm:$0xff]  }
 0x1bb   : > { %11655 = vmatprep.subr.bf16.mxu0 %v16603_v16  ;;  %12803 = vmatprep.subr.bf16.mxu1 %v16606_v17  ;;  %v16690_v16 = vld [vmem:[%s19316_s27 + $0xb0c] ss:$16 sps:$4 sm:$0xff]   ;;  %v16685_v17 = vld [vmem:[%s19316_s27 + $0xb00] ss:$16 sps:$4 sm:$0xff]  }
 0x1be   : > { %11656 = vmatpush1.bf16.msra.mxu0 %v16601_v18  ;;  %12804 = vmatpush1.bf16.msra.mxu1 %v16604_v19  ;;  %v16688_v18 = vld [vmem:[%s19316_s27 + $0xb08] ss:$16 sps:$4 sm:$0xff]   ;;  %v16693_v19 = vld [vmem:[%s19316_s27 + $0xb24] ss:$16 sps:$4 sm:$0xff]  }
 0x1bf   : > { %11657 = vmatprep.subr.bf16.mxu0 %v16609_v20  ;;  %12805 = vmatprep.subr.bf16.mxu1 %v16612_v21  ;;  %v16696_v20 = vld [vmem:[%s19316_s27 + $0xb2c] ss:$16 sps:$4 sm:$0xff]   ;;  %v16691_v21 = vld [vmem:[%s19316_s27 + $0xb20] ss:$16 sps:$4 sm:$0xff]  }
 0x1c2   : > { %11658 = vmatpush1.bf16.msra.mxu0 %v16607_v22  ;;  %12806 = vmatpush1.bf16.msra.mxu1 %v16610_v23  ;;  %v16694_v22 = vld [vmem:[%s19316_s27 + $0xb28] ss:$16 sps:$4 sm:$0xff]   ;;  %v16699_v23 = vld [vmem:[%s19316_s27 + $0xb44] ss:$16 sps:$4 sm:$0xff]  }
 0x1c3   : > { %11659 = vmatprep.subr.bf16.mxu0 %v16615_v25  ;;  %12807 = vmatprep.subr.bf16.mxu1 %v16618_v24  ;;  %v16702_v25 = vld [vmem:[%s19316_s27 + $0xb4c] ss:$16 sps:$4 sm:$0xff]   ;;  %v16697_v24 = vld [vmem:[%s19316_s27 + $0xb40] ss:$16 sps:$4 sm:$0xff]  }
 0x1c6   : > { %11660 = vmatpush1.bf16.msra.mxu0 %v16613_v10  ;;  %12808 = vmatpush1.bf16.msra.mxu1 %v16616_v28  ;;  %v16700_v10 = vld [vmem:[%s19316_s27 + $0xb48] ss:$16 sps:$4 sm:$0xff]   ;;  %v16705_v28 = vld [vmem:[%s19316_s27 + $0xb64] ss:$16 sps:$4 sm:$0xff]  }
 0x1c7   : > { %11661 = vmatprep.subr.bf16.mxu0 %v16621_v30  ;;  %12809 = vmatprep.subr.bf16.mxu1 %v16624_v31  ;;  %v16708_v30 = vld [vmem:[%s19316_s27 + $0xb6c] ss:$16 sps:$4 sm:$0xff]   ;;  %v16703_v31 = vld [vmem:[%s19316_s27 + $0xb60] ss:$16 sps:$4 sm:$0xff]  }
 0x1ca   : > { %11662 = vmatpush1.bf16.msra.mxu0 %v16619_v32  ;;  %12810 = vmatpush1.bf16.msra.mxu1 %v16622_v34  ;;  %v16706_v32 = vld [vmem:[%s19316_s27 + $0xb68] ss:$16 sps:$4 sm:$0xff]   ;;  %v16711_v34 = vld [vmem:[%s19316_s27 + $0xb84] ss:$16 sps:$4 sm:$0xff]  }
 0x1cb   : > { %11663 = vmatprep.subr.bf16.mxu0 %v16627_v35  ;;  %12811 = vmatprep.subr.bf16.mxu1 %v16630_v36  ;;  %v16714_v35 = vld [vmem:[%s19316_s27 + $0xb8c] ss:$16 sps:$4 sm:$0xff]   ;;  %v16709_v36 = vld [vmem:[%s19316_s27 + $0xb80] ss:$16 sps:$4 sm:$0xff]  }
 0x1ce   : > { %11664 = vmatpush1.bf16.msra.mxu0 %v16625_v37  ;;  %12812 = vmatpush1.bf16.msra.mxu1 %v16628_v38  ;;  %v16717_v37 = vld [vmem:[%s19316_s27 + $0xba4] ss:$16 sps:$4 sm:$0xff]   ;;  %v16720_v38 = vld [vmem:[%s19316_s27 + $0xbac] ss:$16 sps:$4 sm:$0xff]  }
 0x1cf   : > { %11665 = vmatprep.subr.bf16.mxu0 %v16633_v39  ;;  %12813 = vmatprep.subr.bf16.mxu1 %v16636_v40  ;;  %v16715_v39 = vld [vmem:[%s19316_s27 + $0xba0] ss:$16 sps:$4 sm:$0xff]   ;;  %v16718_v40 = vld [vmem:[%s19316_s27 + $0xba8] ss:$16 sps:$4 sm:$0xff]  }
 0x1d2   : > { %11666 = vmatpush1.bf16.msra.mxu0 %v16631_v29  ;;  %12814 = vmatpush1.bf16.msra.mxu1 %v16634_v42  ;;  %v16723_v29 = vld [vmem:[%s19316_s27 + $0xbc4] ss:$16 sps:$4 sm:$0xff]   ;;  %v16726_v42 = vld [vmem:[%s19316_s27 + $0xbcc] ss:$16 sps:$4 sm:$0xff]  }
 0x1d3   : > { %11676 = vmatprep.subr.bf16.mxu0 %v16639_v43  ;;  %12824 = vmatprep.subr.bf16.mxu1 %v16642_v45  ;;  %v19777_v43 = vld [vmem:[%s19337_s11 + $0x18] sm:$0xff] }
 0x1d4   : > { %v16721_v45 = vld [vmem:[%s19316_s27 + $0xbc0] ss:$16 sps:$4 sm:$0xff]  }
 0x1d5   : > { %11668 = vmatmul.mubr.bf16.vlgmr.msra.gmra.mrb[0].mxu0 %v671_v26  ;;  %12816 = vmatmul.mubr.bf16.vlgmr.msra.gmra.mrb[0].mxu1 %v671_v26  ;;  %v16729_v26 = vld [vmem:[%s19316_s27 + $0xbe4] ss:$16 sps:$4 sm:$0xff]  }
 0x1d6   : > { %11677 = vmatpush1.bf16.msra.mxu0 %v16637_v47  ;;  %12825 = vmatpush1.bf16.msra.mxu1 %v16640_v48  ;;  %v16732_v47 = vld [vmem:[%s19316_s27 + $0xbec] ss:$16 sps:$4 sm:$0xff]   ;;  %v19785_v48 = vrot.slane %v19777_v43, %v19393_v50 }
 0x1d7   : > { %11678 = vmatprep.subr.bf16.mxu0 %v16645_v49  ;;  %12826 = vmatprep.subr.bf16.mxu1 %v16648_v51  ;;  %v16727_v49 = vld [vmem:[%s19316_s27 + $0xbe0] ss:$16 sps:$4 sm:$0xff]   ;;  %v16730_v51 = vld [vmem:[%s19316_s27 + $0xbe8] ss:$16 sps:$4 sm:$0xff]  }
 0x1d8   : > { %11708 = vmatprep.mubr.bf16.mxu0 %v674_v52  ;;  %12856 = vmatprep.mubr.bf16.mxu1 %v674_v52  ;;  %v16736_v52 = vld [vmem:[%s19316_s27 + $0xc04] ss:$16 sps:$4 sm:$0xff]  }
 0x1da   : > { %11679 = vmatpush1.bf16.msra.mxu0 %v16643_v33  ;;  %12827 = vmatpush1.bf16.msra.mxu1 %v16646_v53  ;;  %v16739_v33 = vld [vmem:[%s19316_s27 + $0xc0c] ss:$16 sps:$4 sm:$0xff]   ;;  %v435_v53 = vcombine.high %v19785_v48, %v19785_v48 }
 0x1db   : > { %11680 = vmatprep.subr.bf16.mxu0 %v16651_v54  ;;  %12828 = vmatprep.subr.bf16.mxu1 %v16654_v55  ;;  %v673_v54 = vpack.c.bf16 %v19710_v41, %v19710_v41  ;;  %v16734_v55 = vld [vmem:[%s19316_s27 + $0xc00] ss:$16 sps:$4 sm:$0xff]  }
 0x1dc   : > { %v16740_v41 = vld [vmem:[%s19316_s27 + $0xc20] ss:$16 sps:$4 sm:$0xff]  }
 0x1de   : > { %11681 = vmatpush1.bf16.msra.mxu0 %v16649_v56  ;;  %12829 = vmatpush1.bf16.msra.mxu1 %v16652_v57  ;;  %v16737_v56 = vld [vmem:[%s19316_s27 + $0xc08] ss:$16 sps:$4 sm:$0xff]   ;;  %v16742_v57 = vld [vmem:[%s19316_s27 + $0xc24] ss:$16 sps:$4 sm:$0xff]  }
 0x1df   : > { %11682 = vmatprep.subr.bf16.mxu0 %v16657_v58  ;;  %12830 = vmatprep.subr.bf16.mxu1 %v16660_v59  ;;  %v16745_v58 = vld [vmem:[%s19316_s27 + $0xc2c] ss:$16 sps:$4 sm:$0xff]   ;;  %v676_v59 = vpack.c.bf16 %v435_v53, %v435_v53  ;;  %v16818_v53 = vld [vmem:[%s19316_s27 + $0xdc0] ss:$16 sps:$4 sm:$0xff]  }
 0x1e2   : > { %11683 = vmatpush1.bf16.msra.mxu0 %v16655_v60  ;;  %12831 = vmatpush1.bf16.msra.mxu1 %v16658_v61  ;;  %v16743_v60 = vld [vmem:[%s19316_s27 + $0xc28] ss:$16 sps:$4 sm:$0xff]   ;;  %v16748_v61 = vld [vmem:[%s19316_s27 + $0xc44] ss:$16 sps:$4 sm:$0xff]  }
 0x1e3   : > { %11684 = vmatprep.subr.bf16.mxu0 %v16663_v62  ;;  %12832 = vmatprep.subr.bf16.mxu1 %v16666_v63  ;;  %v16751_v62 = vld [vmem:[%s19316_s27 + $0xc4c] ss:$16 sps:$4 sm:$0xff]   ;;  %v16746_v63 = vld [vmem:[%s19316_s27 + $0xc40] ss:$16 sps:$4 sm:$0xff]  }
 0x1e6   : > { %11685 = vmatpush1.bf16.msra.mxu0 %v16661_v0  ;;  %12833 = vmatpush1.bf16.msra.mxu1 %v16664_v1  ;;  %v16749_v0 = vld [vmem:[%s19316_s27 + $0xc48] ss:$16 sps:$4 sm:$0xff]   ;;  %v16754_v1 = vld [vmem:[%s19316_s27 + $0xc64] ss:$16 sps:$4 sm:$0xff]  }
 0x1e7   : > { %11686 = vmatprep.subr.bf16.mxu0 %v16669_v2  ;;  %12834 = vmatprep.subr.bf16.mxu1 %v16672_v3  ;;  %v16757_v2 = vld [vmem:[%s19316_s27 + $0xc6c] ss:$16 sps:$4 sm:$0xff]   ;;  %v16752_v3 = vld [vmem:[%s19316_s27 + $0xc60] ss:$16 sps:$4 sm:$0xff]  }
 0x1ea   : > { %11687 = vmatpush1.bf16.msra.mxu0 %v16667_v4  ;;  %12835 = vmatpush1.bf16.msra.mxu1 %v16670_v5  ;;  %v16755_v4 = vld [vmem:[%s19316_s27 + $0xc68] ss:$16 sps:$4 sm:$0xff]   ;;  %v16760_v5 = vld [vmem:[%s19316_s27 + $0xc84] ss:$16 sps:$4 sm:$0xff]  }
 0x1eb   : > { %11688 = vmatprep.subr.bf16.mxu0 %v16675_v6  ;;  %12836 = vmatprep.subr.bf16.mxu1 %v16678_v7  ;;  %v16763_v6 = vld [vmem:[%s19316_s27 + $0xc8c] ss:$16 sps:$4 sm:$0xff]   ;;  %v16758_v7 = vld [vmem:[%s19316_s27 + $0xc80] ss:$16 sps:$4 sm:$0xff]  }
 0x1ee   : > { %11689 = vmatpush1.bf16.msra.mxu0 %v16673_v8  ;;  %12837 = vmatpush1.bf16.msra.mxu1 %v16676_v9  ;;  %v16761_v8 = vld [vmem:[%s19316_s27 + $0xc88] ss:$16 sps:$4 sm:$0xff]   ;;  %v16766_v9 = vld [vmem:[%s19316_s27 + $0xca4] ss:$16 sps:$4 sm:$0xff]  }
 0x1ef   : > { %11690 = vmatprep.subr.bf16.mxu0 %v16681_v11  ;;  %12838 = vmatprep.subr.bf16.mxu1 %v16684_v12  ;;  %v16769_v11 = vld [vmem:[%s19316_s27 + $0xcac] ss:$16 sps:$4 sm:$0xff]   ;;  %v16764_v12 = vld [vmem:[%s19316_s27 + $0xca0] ss:$16 sps:$4 sm:$0xff]  }
 0x1f2   : > { %11691 = vmatpush1.bf16.msra.mxu0 %v16679_v13  ;;  %12839 = vmatpush1.bf16.msra.mxu1 %v16682_v14  ;;  %v16767_v13 = vld [vmem:[%s19316_s27 + $0xca8] ss:$16 sps:$4 sm:$0xff]   ;;  %v16772_v14 = vld [vmem:[%s19316_s27 + $0xcc4] ss:$16 sps:$4 sm:$0xff]  }
 0x1f3   : > { %11692 = vmatprep.subr.bf16.mxu0 %v16687_v15  ;;  %12840 = vmatprep.subr.bf16.mxu1 %v16690_v16  ;;  %v16775_v15 = vld [vmem:[%s19316_s27 + $0xccc] ss:$16 sps:$4 sm:$0xff]   ;;  %v16770_v16 = vld [vmem:[%s19316_s27 + $0xcc0] ss:$16 sps:$4 sm:$0xff]  }
 0x1f6   : > { %11693 = vmatpush1.bf16.msra.mxu0 %v16685_v17  ;;  %12841 = vmatpush1.bf16.msra.mxu1 %v16688_v18  ;;  %v16773_v17 = vld [vmem:[%s19316_s27 + $0xcc8] ss:$16 sps:$4 sm:$0xff]   ;;  %v16778_v18 = vld [vmem:[%s19316_s27 + $0xce4] ss:$16 sps:$4 sm:$0xff]  }
 0x1f7   : > { %11694 = vmatprep.subr.bf16.mxu0 %v16693_v19  ;;  %12842 = vmatprep.subr.bf16.mxu1 %v16696_v20  ;;  %v16781_v19 = vld [vmem:[%s19316_s27 + $0xcec] ss:$16 sps:$4 sm:$0xff]   ;;  %v16776_v20 = vld [vmem:[%s19316_s27 + $0xce0] ss:$16 sps:$4 sm:$0xff]  }
 0x1fa   : > { %11695 = vmatpush1.bf16.msra.mxu0 %v16691_v21  ;;  %12843 = vmatpush1.bf16.msra.mxu1 %v16694_v22  ;;  %v16779_v21 = vld [vmem:[%s19316_s27 + $0xce8] ss:$16 sps:$4 sm:$0xff]   ;;  %v16784_v22 = vld [vmem:[%s19316_s27 + $0xd04] ss:$16 sps:$4 sm:$0xff]  }
 0x1fb   : > { %11696 = vmatprep.subr.bf16.mxu0 %v16699_v23  ;;  %12844 = vmatprep.subr.bf16.mxu1 %v16702_v25  ;;  %v16787_v23 = vld [vmem:[%s19316_s27 + $0xd0c] ss:$16 sps:$4 sm:$0xff]   ;;  %v16782_v25 = vld [vmem:[%s19316_s27 + $0xd00] ss:$16 sps:$4 sm:$0xff]  }
 0x1fe   : > { %11697 = vmatpush1.bf16.msra.mxu0 %v16697_v24  ;;  %12845 = vmatpush1.bf16.msra.mxu1 %v16700_v10  ;;  %v16785_v24 = vld [vmem:[%s19316_s27 + $0xd08] ss:$16 sps:$4 sm:$0xff]   ;;  %v16790_v10 = vld [vmem:[%s19316_s27 + $0xd24] ss:$16 sps:$4 sm:$0xff]  }
 0x1ff   : > { %11698 = vmatprep.subr.bf16.mxu0 %v16705_v28  ;;  %12846 = vmatprep.subr.bf16.mxu1 %v16708_v30  ;;  %v16793_v28 = vld [vmem:[%s19316_s27 + $0xd2c] ss:$16 sps:$4 sm:$0xff]   ;;  %v16788_v30 = vld [vmem:[%s19316_s27 + $0xd20] ss:$16 sps:$4 sm:$0xff]  }
 0x202   : > { %11699 = vmatpush1.bf16.msra.mxu0 %v16703_v31  ;;  %12847 = vmatpush1.bf16.msra.mxu1 %v16706_v32  ;;  %v16791_v31 = vld [vmem:[%s19316_s27 + $0xd28] ss:$16 sps:$4 sm:$0xff]   ;;  %v16796_v32 = vld [vmem:[%s19316_s27 + $0xd44] ss:$16 sps:$4 sm:$0xff]  }
 0x203   : > { %11700 = vmatprep.subr.bf16.mxu0 %v16711_v34  ;;  %12848 = vmatprep.subr.bf16.mxu1 %v16714_v35  ;;  %v16799_v34 = vld [vmem:[%s19316_s27 + $0xd4c] ss:$16 sps:$4 sm:$0xff]   ;;  %v16794_v35 = vld [vmem:[%s19316_s27 + $0xd40] ss:$16 sps:$4 sm:$0xff]  }
 0x206   : > { %11701 = vmatpush1.bf16.msra.mxu0 %v16709_v36  ;;  %12849 = vmatpush1.bf16.msra.mxu1 %v16712_v27  ;;  %v16797_v36 = vld [vmem:[%s19316_s27 + $0xd48] ss:$16 sps:$4 sm:$0xff]   ;;  %v16802_v27 = vld [vmem:[%s19316_s27 + $0xd64] ss:$16 sps:$4 sm:$0xff]  }
 0x207   : > { %11702 = vmatprep.subr.bf16.mxu0 %v16717_v37  ;;  %12850 = vmatprep.subr.bf16.mxu1 %v16720_v38  ;;  %v16805_v37 = vld [vmem:[%s19316_s27 + $0xd6c] ss:$16 sps:$4 sm:$0xff]   ;;  %v16800_v38 = vld [vmem:[%s19316_s27 + $0xd60] ss:$16 sps:$4 sm:$0xff]  }
 0x20a   : > { %11703 = vmatpush1.bf16.msra.mxu0 %v16715_v39  ;;  %12851 = vmatpush1.bf16.msra.mxu1 %v16718_v40  ;;  %v16803_v39 = vld [vmem:[%s19316_s27 + $0xd68] ss:$16 sps:$4 sm:$0xff]   ;;  %v16808_v40 = vld [vmem:[%s19316_s27 + $0xd84] ss:$16 sps:$4 sm:$0xff]  }
 0x20b   : > { %11704 = vmatprep.subr.bf16.mxu0 %v16723_v29  ;;  %12852 = vmatprep.subr.bf16.mxu1 %v16726_v42  ;;  %v16811_v29 = vld [vmem:[%s19316_s27 + $0xd8c] ss:$16 sps:$4 sm:$0xff]   ;;  %v16806_v42 = vld [vmem:[%s19316_s27 + $0xd80] ss:$16 sps:$4 sm:$0xff]  }
 0x20e   : > { %11705 = vmatpush1.bf16.msra.mxu0 %v16721_v45  ;;  %12853 = vmatpush1.bf16.msra.mxu1 %v16724_v46  ;;  %v16809_v45 = vld [vmem:[%s19316_s27 + $0xd88] ss:$16 sps:$4 sm:$0xff]   ;;  %v16814_v46 = vld [vmem:[%s19316_s27 + $0xda4] ss:$16 sps:$4 sm:$0xff]  }
 0x20f   : > { %11706 = vmatprep.subr.bf16.mxu0 %v16729_v26  ;;  %12854 = vmatprep.subr.bf16.mxu1 %v16732_v47  ;;  %v16817_v26 = vld [vmem:[%s19316_s27 + $0xdac] ss:$16 sps:$4 sm:$0xff]   ;;  %v16812_v47 = vld [vmem:[%s19316_s27 + $0xda0] ss:$16 sps:$4 sm:$0xff]  }
 0x212   : > { %11707 = vmatpush1.bf16.msra.mxu0 %v16727_v49  ;;  %12855 = vmatpush1.bf16.msra.mxu1 %v16730_v51  ;;  %v16815_v49 = vld [vmem:[%s19316_s27 + $0xda8] ss:$16 sps:$4 sm:$0xff]   ;;  %v16820_v51 = vld [vmem:[%s19316_s27 + $0xdc4] ss:$16 sps:$4 sm:$0xff]  }
 0x213   : > { %11717 = vmatprep.subr.bf16.mxu0 %v16736_v52  ;;  %12865 = vmatprep.subr.bf16.mxu1 %v16739_v33  ;;  %v16823_v52 = vld [vmem:[%s19316_s27 + $0xdcc] ss:$16 sps:$4 sm:$0xff]   ;;  %v420_v33 = vcombine.high %v19777_v43, %v19777_v43  ;;  %v16824_v43 = vld [vmem:[%s19316_s27 + $0xde0] ss:$16 sps:$4 sm:$0xff]  }
 0x215   : > { %11709 = vmatmul.mubr.bf16.vlgmr.msra.gmra.mrb[0].mxu0 %v673_v54  ;;  %12857 = vmatmul.mubr.bf16.vlgmr.msra.gmra.mrb[0].mxu1 %v673_v54  ;;  %v16821_v54 = vld [vmem:[%s19316_s27 + $0xdc8] ss:$16 sps:$4 sm:$0xff]  }
 0x216   : > { %11718 = vmatpush1.bf16.msra.mxu0 %v16734_v55  ;;  %12866 = vmatpush1.bf16.msra.mxu1 %v16737_v56  ;;  %v16826_v55 = vld [vmem:[%s19316_s27 + $0xde4] ss:$16 sps:$4 sm:$0xff]   ;;  %v16829_v56 = vld [vmem:[%s19316_s27 + $0xdec] ss:$16 sps:$4 sm:$0xff]  }
 0x217   : > { %11719 = vmatprep.subr.bf16.mxu0 %v16742_v57  ;;  %12867 = vmatprep.subr.bf16.mxu1 %v16745_v58  ;;  %v19858_v57 = vrot.slane %v420_v33, %v19393_v50  ;;  %v16827_v58 = vld [vmem:[%s19316_s27 + $0xde8] ss:$16 sps:$4 sm:$0xff]  }
 0x218   : > { %11749 = vmatprep.mubr.bf16.mxu0 %v676_v59  ;;  %12897 = vmatprep.mubr.bf16.mxu1 %v676_v59  ;;  %v16832_v59 = vld [vmem:[%s19316_s27 + $0xe04] ss:$16 sps:$4 sm:$0xff]   ;;  %v16905_v33 = vld [vmem:[%s19316_s27 + $0xf88] ss:$16 sps:$4 sm:$0xff]  }
 0x21a   : > { %11720 = vmatpush1.bf16.msra.mxu0 %v16740_v41  ;;  %12868 = vmatpush1.bf16.msra.mxu1 %v16743_v60  ;;  %v16835_v41 = vld [vmem:[%s19316_s27 + $0xe0c] ss:$16 sps:$4 sm:$0xff]   ;;  %v436_v60 = vcombine.high %v19858_v57, %v19858_v57 }
 0x21b   : > { %11721 = vmatprep.subr.bf16.mxu0 %v16748_v61  ;;  %12869 = vmatprep.subr.bf16.mxu1 %v16751_v62  ;;  %v675_v61 = vpack.c.bf16 %v19785_v48, %v19785_v48  ;;  %v16830_v62 = vld [vmem:[%s19316_s27 + $0xe00] ss:$16 sps:$4 sm:$0xff]  }
 0x21c   : > { %v16836_v48 = vld [vmem:[%s19316_s27 + $0xe20] ss:$16 sps:$4 sm:$0xff]  }
 0x21e   : > { %11722 = vmatpush1.bf16.msra.mxu0 %v16746_v63  ;;  %12870 = vmatpush1.bf16.msra.mxu1 %v16749_v0  ;;  %v16833_v63 = vld [vmem:[%s19316_s27 + $0xe08] ss:$16 sps:$4 sm:$0xff]   ;;  %v16838_v0 = vld [vmem:[%s19316_s27 + $0xe24] ss:$16 sps:$4 sm:$0xff]  }
 0x21f   : > { %11723 = vmatprep.subr.bf16.mxu0 %v16754_v1  ;;  %12871 = vmatprep.subr.bf16.mxu1 %v16757_v2  ;;  %v16841_v1 = vld [vmem:[%s19316_s27 + $0xe2c] ss:$16 sps:$4 sm:$0xff]   ;;  %v678_v2 = vpack.c.bf16 %v436_v60, %v436_v60  ;;  %v16917_v60 = vld [vmem:[%s19316_s27 + $0xfc8] ss:$16 sps:$4 sm:$0xff]  }
 0x222   : > { %11724 = vmatpush1.bf16.msra.mxu0 %v16752_v3  ;;  %12872 = vmatpush1.bf16.msra.mxu1 %v16755_v4  ;;  %v16839_v3 = vld [vmem:[%s19316_s27 + $0xe28] ss:$16 sps:$4 sm:$0xff]   ;;  %v16844_v4 = vld [vmem:[%s19316_s27 + $0xe44] ss:$16 sps:$4 sm:$0xff]  }
 0x223   : > { %11725 = vmatprep.subr.bf16.mxu0 %v16760_v5  ;;  %12873 = vmatprep.subr.bf16.mxu1 %v16763_v6  ;;  %v16847_v5 = vld [vmem:[%s19316_s27 + $0xe4c] ss:$16 sps:$4 sm:$0xff]   ;;  %v16842_v6 = vld [vmem:[%s19316_s27 + $0xe40] ss:$16 sps:$4 sm:$0xff]  }
 0x226   : > { %11726 = vmatpush1.bf16.msra.mxu0 %v16758_v7  ;;  %12874 = vmatpush1.bf16.msra.mxu1 %v16761_v8  ;;  %v16845_v7 = vld [vmem:[%s19316_s27 + $0xe48] ss:$16 sps:$4 sm:$0xff]   ;;  %v16850_v8 = vld [vmem:[%s19316_s27 + $0xe64] ss:$16 sps:$4 sm:$0xff]  }
 0x227   : > { %11727 = vmatprep.subr.bf16.mxu0 %v16766_v9  ;;  %12875 = vmatprep.subr.bf16.mxu1 %v16769_v11  ;;  %v16853_v9 = vld [vmem:[%s19316_s27 + $0xe6c] ss:$16 sps:$4 sm:$0xff]   ;;  %v16848_v11 = vld [vmem:[%s19316_s27 + $0xe60] ss:$16 sps:$4 sm:$0xff]  }
 0x22a   : > { %11728 = vmatpush1.bf16.msra.mxu0 %v16764_v12  ;;  %12876 = vmatpush1.bf16.msra.mxu1 %v16767_v13  ;;  %v16851_v12 = vld [vmem:[%s19316_s27 + $0xe68] ss:$16 sps:$4 sm:$0xff]   ;;  %v16856_v13 = vld [vmem:[%s19316_s27 + $0xe84] ss:$16 sps:$4 sm:$0xff]  }
 0x22b   : > { %11729 = vmatprep.subr.bf16.mxu0 %v16772_v14  ;;  %12877 = vmatprep.subr.bf16.mxu1 %v16775_v15  ;;  %v16859_v14 = vld [vmem:[%s19316_s27 + $0xe8c] ss:$16 sps:$4 sm:$0xff]   ;;  %v16854_v15 = vld [vmem:[%s19316_s27 + $0xe80] ss:$16 sps:$4 sm:$0xff]  }
 0x22e   : > { %11730 = vmatpush1.bf16.msra.mxu0 %v16770_v16  ;;  %12878 = vmatpush1.bf16.msra.mxu1 %v16773_v17  ;;  %v16857_v16 = vld [vmem:[%s19316_s27 + $0xe88] ss:$16 sps:$4 sm:$0xff]   ;;  %v16862_v17 = vld [vmem:[%s19316_s27 + $0xea4] ss:$16 sps:$4 sm:$0xff]  }
 0x22f   : > { %11731 = vmatprep.subr.bf16.mxu0 %v16778_v18  ;;  %12879 = vmatprep.subr.bf16.mxu1 %v16781_v19  ;;  %v16865_v18 = vld [vmem:[%s19316_s27 + $0xeac] ss:$16 sps:$4 sm:$0xff]   ;;  %v16860_v19 = vld [vmem:[%s19316_s27 + $0xea0] ss:$16 sps:$4 sm:$0xff]  }
 0x232   : > { %11732 = vmatpush1.bf16.msra.mxu0 %v16776_v20  ;;  %12880 = vmatpush1.bf16.msra.mxu1 %v16779_v21  ;;  %v16863_v20 = vld [vmem:[%s19316_s27 + $0xea8] ss:$16 sps:$4 sm:$0xff]   ;;  %v16868_v21 = vld [vmem:[%s19316_s27 + $0xec4] ss:$16 sps:$4 sm:$0xff]  }
 0x233   : > { %11733 = vmatprep.subr.bf16.mxu0 %v16784_v22  ;;  %12881 = vmatprep.subr.bf16.mxu1 %v16787_v23  ;;  %v16871_v22 = vld [vmem:[%s19316_s27 + $0xecc] ss:$16 sps:$4 sm:$0xff]   ;;  %v16866_v23 = vld [vmem:[%s19316_s27 + $0xec0] ss:$16 sps:$4 sm:$0xff]  }
 0x236   : > { %11734 = vmatpush1.bf16.msra.mxu0 %v16782_v25  ;;  %12882 = vmatpush1.bf16.msra.mxu1 %v16785_v24  ;;  %v16869_v25 = vld [vmem:[%s19316_s27 + $0xec8] ss:$16 sps:$4 sm:$0xff]   ;;  %v16874_v24 = vld [vmem:[%s19316_s27 + $0xee4] ss:$16 sps:$4 sm:$0xff]  }
 0x237   : > { %11735 = vmatprep.subr.bf16.mxu0 %v16790_v10  ;;  %12883 = vmatprep.subr.bf16.mxu1 %v16793_v28  ;;  %v16877_v10 = vld [vmem:[%s19316_s27 + $0xeec] ss:$16 sps:$4 sm:$0xff]   ;;  %v16872_v28 = vld [vmem:[%s19316_s27 + $0xee0] ss:$16 sps:$4 sm:$0xff]  }
 0x23a   : > { %11736 = vmatpush1.bf16.msra.mxu0 %v16788_v30  ;;  %12884 = vmatpush1.bf16.msra.mxu1 %v16791_v31  ;;  %v16875_v30 = vld [vmem:[%s19316_s27 + $0xee8] ss:$16 sps:$4 sm:$0xff]   ;;  %v16880_v31 = vld [vmem:[%s19316_s27 + $0xf04] ss:$16 sps:$4 sm:$0xff]  }
 0x23b   : > { %11737 = vmatprep.subr.bf16.mxu0 %v16796_v32  ;;  %12885 = vmatprep.subr.bf16.mxu1 %v16799_v34  ;;  %v16883_v32 = vld [vmem:[%s19316_s27 + $0xf0c] ss:$16 sps:$4 sm:$0xff]   ;;  %v16878_v34 = vld [vmem:[%s19316_s27 + $0xf00] ss:$16 sps:$4 sm:$0xff]  }
 0x23e   : > { %11738 = vmatpush1.bf16.msra.mxu0 %v16794_v35  ;;  %12886 = vmatpush1.bf16.msra.mxu1 %v16797_v36  ;;  %v16881_v35 = vld [vmem:[%s19316_s27 + $0xf08] ss:$16 sps:$4 sm:$0xff]   ;;  %v16886_v36 = vld [vmem:[%s19316_s27 + $0xf24] ss:$16 sps:$4 sm:$0xff]  }
 0x23f   : > { %11739 = vmatprep.subr.bf16.mxu0 %v16802_v27  ;;  %12887 = vmatprep.subr.bf16.mxu1 %v16805_v37  ;;  %v16889_v27 = vld [vmem:[%s19316_s27 + $0xf2c] ss:$16 sps:$4 sm:$0xff]   ;;  %v16884_v37 = vld [vmem:[%s19316_s27 + $0xf20] ss:$16 sps:$4 sm:$0xff]  }
 0x242   : > { %11740 = vmatpush1.bf16.msra.mxu0 %v16800_v38  ;;  %12888 = vmatpush1.bf16.msra.mxu1 %v16803_v39  ;;  %v16887_v38 = vld [vmem:[%s19316_s27 + $0xf28] ss:$16 sps:$4 sm:$0xff]   ;;  %v16892_v39 = vld [vmem:[%s19316_s27 + $0xf44] ss:$16 sps:$4 sm:$0xff]  }
 0x243   : > { %11741 = vmatprep.subr.bf16.mxu0 %v16808_v40  ;;  %12889 = vmatprep.subr.bf16.mxu1 %v16811_v29  ;;  %v16895_v40 = vld [vmem:[%s19316_s27 + $0xf4c] ss:$16 sps:$4 sm:$0xff]   ;;  %v16890_v29 = vld [vmem:[%s19316_s27 + $0xf40] ss:$16 sps:$4 sm:$0xff]  }
 0x246   : > { %11742 = vmatpush1.bf16.msra.mxu0 %v16806_v42  ;;  %12890 = vmatpush1.bf16.msra.mxu1 %v16809_v45  ;;  %v16893_v42 = vld [vmem:[%s19316_s27 + $0xf48] ss:$16 sps:$4 sm:$0xff]   ;;  %v16898_v45 = vld [vmem:[%s19316_s27 + $0xf64] ss:$16 sps:$4 sm:$0xff]  }
 0x247   : > { %11743 = vmatprep.subr.bf16.mxu0 %v16814_v46  ;;  %12891 = vmatprep.subr.bf16.mxu1 %v16817_v26  ;;  %v16901_v46 = vld [vmem:[%s19316_s27 + $0xf6c] ss:$16 sps:$4 sm:$0xff]   ;;  %v16896_v26 = vld [vmem:[%s19316_s27 + $0xf60] ss:$16 sps:$4 sm:$0xff]  }
 0x24a   : > { %11744 = vmatpush1.bf16.msra.mxu0 %v16812_v47  ;;  %12892 = vmatpush1.bf16.msra.mxu1 %v16815_v49  ;;  %v16899_v47 = vld [vmem:[%s19316_s27 + $0xf68] ss:$16 sps:$4 sm:$0xff]   ;;  %v16904_v49 = vld [vmem:[%s19316_s27 + $0xf84] ss:$16 sps:$4 sm:$0xff]  }
 0x24b   : > { %11745 = vmatprep.subr.bf16.mxu0 %v16820_v51  ;;  %12893 = vmatprep.subr.bf16.mxu1 %v16823_v52  ;;  %v16907_v51 = vld [vmem:[%s19316_s27 + $0xf8c] ss:$16 sps:$4 sm:$0xff]   ;;  %v16902_v52 = vld [vmem:[%s19316_s27 + $0xf80] ss:$16 sps:$4 sm:$0xff]  }
 0x24e   : > { %11746 = vmatpush1.bf16.msra.mxu0 %v16818_v53  ;;  %12894 = vmatpush1.bf16.msra.mxu1 %v16821_v54  ;;  %v16910_v53 = vld [vmem:[%s19316_s27 + $0xfa4] ss:$16 sps:$4 sm:$0xff]   ;;  %v16913_v54 = vld [vmem:[%s19316_s27 + $0xfac] ss:$16 sps:$4 sm:$0xff]  }
 0x24f   : > { %11747 = vmatprep.subr.bf16.mxu0 %v16826_v55  ;;  %12895 = vmatprep.subr.bf16.mxu1 %v16829_v56  ;;  %v16908_v55 = vld [vmem:[%s19316_s27 + $0xfa0] ss:$16 sps:$4 sm:$0xff]   ;;  %v16911_v56 = vld [vmem:[%s19316_s27 + $0xfa8] ss:$16 sps:$4 sm:$0xff]  }
 0x252   : > { %11748 = vmatpush1.bf16.msra.mxu0 %v16824_v43  ;;  %12896 = vmatpush1.bf16.msra.mxu1 %v16827_v58  ;;  %v16916_v43 = vld [vmem:[%s19316_s27 + $0xfc4] ss:$16 sps:$4 sm:$0xff]   ;;  %v16919_v58 = vld [vmem:[%s19316_s27 + $0xfcc] ss:$16 sps:$4 sm:$0xff]  }
 0x253   : > { %11758 = vmatprep.subr.bf16.mxu0 %v16832_v59  ;;  %12906 = vmatprep.subr.bf16.mxu1 %v16835_v41  ;;  %v19925_v59 = vld [vmem:[%s19337_s11 + $0x20] sm:$0xff]  ;;  %v16914_v41 = vld [vmem:[%s19316_s27 + $0xfc0] ss:$16 sps:$4 sm:$0xff]  }
 0x255   : > { %11750 = vmatmul.mubr.bf16.vlgmr.msra.gmra.mrb[0].mxu0 %v675_v61  ;;  %12898 = vmatmul.mubr.bf16.vlgmr.msra.gmra.mrb[0].mxu1 %v675_v61  ;;  %v16922_v61 = vld [vmem:[%s19316_s27 + $0xfe4] ss:$16 sps:$4 sm:$0xff]  }
 0x256   : > { %11759 = vmatpush1.bf16.msra.mxu0 %v16830_v62  ;;  %12907 = vmatpush1.bf16.msra.mxu1 %v16833_v63  ;;  %v16925_v62 = vld [vmem:[%s19316_s27 + $0xfec] ss:$16 sps:$4 sm:$0xff]   ;;  %v19933_v63 = vrot.slane %v19925_v59, %v19393_v50 }
 0x257   : > { %11760 = vmatprep.subr.bf16.mxu0 %v16838_v0  ;;  %12908 = vmatprep.subr.bf16.mxu1 %v16841_v1  ;;  %v16920_v0 = vld [vmem:[%s19316_s27 + $0xfe0] ss:$16 sps:$4 sm:$0xff]   ;;  %v16923_v1 = vld [vmem:[%s19316_s27 + $0xfe8] ss:$16 sps:$4 sm:$0xff]  }
 0x258   : > { %11790 = vmatprep.mubr.bf16.mxu0 %v678_v2  ;;  %12938 = vmatprep.mubr.bf16.mxu1 %v678_v2  ;;  %v16929_v2 = vld [vmem:[%s19316_s27 + $0x1004] ss:$16 sps:$4 sm:$0xff]  }
 0x25a   : > { %11761 = vmatpush1.bf16.msra.mxu0 %v16836_v48  ;;  %12909 = vmatpush1.bf16.msra.mxu1 %v16839_v3  ;;  %v16932_v48 = vld [vmem:[%s19316_s27 + $0x100c] ss:$16 sps:$4 sm:$0xff]   ;;  %v452_v3 = vcombine.high %v19933_v63, %v19933_v63 }
 0x25b   : > { %11762 = vmatprep.subr.bf16.mxu0 %v16844_v4  ;;  %12910 = vmatprep.subr.bf16.mxu1 %v16847_v5  ;;  %v677_v4 = vpack.c.bf16 %v19858_v57, %v19858_v57  ;;  %v16927_v5 = vld [vmem:[%s19316_s27 + $0x1000] ss:$16 sps:$4 sm:$0xff]  }
 0x25c   : > { %v16933_v57 = vld [vmem:[%s19316_s27 + $0x1020] ss:$16 sps:$4 sm:$0xff]  }
 0x25e   : > { %11763 = vmatpush1.bf16.msra.mxu0 %v16842_v6  ;;  %12911 = vmatpush1.bf16.msra.mxu1 %v16845_v7  ;;  %v16930_v6 = vld [vmem:[%s19316_s27 + $0x1008] ss:$16 sps:$4 sm:$0xff]   ;;  %v16935_v7 = vld [vmem:[%s19316_s27 + $0x1024] ss:$16 sps:$4 sm:$0xff]  }
 0x25f   : > { %11764 = vmatprep.subr.bf16.mxu0 %v16850_v8  ;;  %12912 = vmatprep.subr.bf16.mxu1 %v16853_v9  ;;  %v16938_v8 = vld [vmem:[%s19316_s27 + $0x102c] ss:$16 sps:$4 sm:$0xff]   ;;  %v680_v9 = vpack.c.bf16 %v452_v3, %v452_v3  ;;  %v17011_v3 = vld [vmem:[%s19316_s27 + $0x11c0] ss:$16 sps:$4 sm:$0xff]  }
 0x262   : > { %11765 = vmatpush1.bf16.msra.mxu0 %v16848_v11  ;;  %12913 = vmatpush1.bf16.msra.mxu1 %v16851_v12  ;;  %v16936_v11 = vld [vmem:[%s19316_s27 + $0x1028] ss:$16 sps:$4 sm:$0xff]   ;;  %v16941_v12 = vld [vmem:[%s19316_s27 + $0x1044] ss:$16 sps:$4 sm:$0xff]  }
 0x263   : > { %11766 = vmatprep.subr.bf16.mxu0 %v16856_v13  ;;  %12914 = vmatprep.subr.bf16.mxu1 %v16859_v14  ;;  %v16944_v13 = vld [vmem:[%s19316_s27 + $0x104c] ss:$16 sps:$4 sm:$0xff]   ;;  %v16939_v14 = vld [vmem:[%s19316_s27 + $0x1040] ss:$16 sps:$4 sm:$0xff]  }
 0x266   : > { %11767 = vmatpush1.bf16.msra.mxu0 %v16854_v15  ;;  %12915 = vmatpush1.bf16.msra.mxu1 %v16857_v16  ;;  %v16942_v15 = vld [vmem:[%s19316_s27 + $0x1048] ss:$16 sps:$4 sm:$0xff]   ;;  %v16947_v16 = vld [vmem:[%s19316_s27 + $0x1064] ss:$16 sps:$4 sm:$0xff]  }
 0x267   : > { %11768 = vmatprep.subr.bf16.mxu0 %v16862_v17  ;;  %12916 = vmatprep.subr.bf16.mxu1 %v16865_v18  ;;  %v16950_v17 = vld [vmem:[%s19316_s27 + $0x106c] ss:$16 sps:$4 sm:$0xff]   ;;  %v16945_v18 = vld [vmem:[%s19316_s27 + $0x1060] ss:$16 sps:$4 sm:$0xff]  }
 0x26a   : > { %11769 = vmatpush1.bf16.msra.mxu0 %v16860_v19  ;;  %12917 = vmatpush1.bf16.msra.mxu1 %v16863_v20  ;;  %v16948_v19 = vld [vmem:[%s19316_s27 + $0x1068] ss:$16 sps:$4 sm:$0xff]   ;;  %v16953_v20 = vld [vmem:[%s19316_s27 + $0x1084] ss:$16 sps:$4 sm:$0xff]  }
 0x26b   : > { %11770 = vmatprep.subr.bf16.mxu0 %v16868_v21  ;;  %12918 = vmatprep.subr.bf16.mxu1 %v16871_v22  ;;  %v16956_v21 = vld [vmem:[%s19316_s27 + $0x108c] ss:$16 sps:$4 sm:$0xff]   ;;  %v16951_v22 = vld [vmem:[%s19316_s27 + $0x1080] ss:$16 sps:$4 sm:$0xff]  }
 0x26e   : > { %11771 = vmatpush1.bf16.msra.mxu0 %v16866_v23  ;;  %12919 = vmatpush1.bf16.msra.mxu1 %v16869_v25  ;;  %v16954_v23 = vld [vmem:[%s19316_s27 + $0x1088] ss:$16 sps:$4 sm:$0xff]   ;;  %v16959_v25 = vld [vmem:[%s19316_s27 + $0x10a4] ss:$16 sps:$4 sm:$0xff]  }
 0x26f   : > { %11772 = vmatprep.subr.bf16.mxu0 %v16874_v24  ;;  %12920 = vmatprep.subr.bf16.mxu1 %v16877_v10  ;;  %v16962_v24 = vld [vmem:[%s19316_s27 + $0x10ac] ss:$16 sps:$4 sm:$0xff]   ;;  %v16957_v10 = vld [vmem:[%s19316_s27 + $0x10a0] ss:$16 sps:$4 sm:$0xff]  }
 0x272   : > { %11773 = vmatpush1.bf16.msra.mxu0 %v16872_v28  ;;  %12921 = vmatpush1.bf16.msra.mxu1 %v16875_v30  ;;  %v16960_v28 = vld [vmem:[%s19316_s27 + $0x10a8] ss:$16 sps:$4 sm:$0xff]   ;;  %v16965_v30 = vld [vmem:[%s19316_s27 + $0x10c4] ss:$16 sps:$4 sm:$0xff]  }
 0x273   : > { %11774 = vmatprep.subr.bf16.mxu0 %v16880_v31  ;;  %12922 = vmatprep.subr.bf16.mxu1 %v16883_v32  ;;  %v16968_v31 = vld [vmem:[%s19316_s27 + $0x10cc] ss:$16 sps:$4 sm:$0xff]   ;;  %v16963_v32 = vld [vmem:[%s19316_s27 + $0x10c0] ss:$16 sps:$4 sm:$0xff]  }
 0x276   : > { %11775 = vmatpush1.bf16.msra.mxu0 %v16878_v34  ;;  %12923 = vmatpush1.bf16.msra.mxu1 %v16881_v35  ;;  %v16966_v34 = vld [vmem:[%s19316_s27 + $0x10c8] ss:$16 sps:$4 sm:$0xff]   ;;  %v16971_v35 = vld [vmem:[%s19316_s27 + $0x10e4] ss:$16 sps:$4 sm:$0xff]  }
 0x277   : > { %11776 = vmatprep.subr.bf16.mxu0 %v16886_v36  ;;  %12924 = vmatprep.subr.bf16.mxu1 %v16889_v27  ;;  %v16974_v36 = vld [vmem:[%s19316_s27 + $0x10ec] ss:$16 sps:$4 sm:$0xff]   ;;  %v16969_v27 = vld [vmem:[%s19316_s27 + $0x10e0] ss:$16 sps:$4 sm:$0xff]  }
 0x27a   : > { %11777 = vmatpush1.bf16.msra.mxu0 %v16884_v37  ;;  %12925 = vmatpush1.bf16.msra.mxu1 %v16887_v38  ;;  %v16972_v37 = vld [vmem:[%s19316_s27 + $0x10e8] ss:$16 sps:$4 sm:$0xff]   ;;  %v16977_v38 = vld [vmem:[%s19316_s27 + $0x1104] ss:$16 sps:$4 sm:$0xff]  }
 0x27b   : > { %11778 = vmatprep.subr.bf16.mxu0 %v16892_v39  ;;  %12926 = vmatprep.subr.bf16.mxu1 %v16895_v40  ;;  %v16980_v39 = vld [vmem:[%s19316_s27 + $0x110c] ss:$16 sps:$4 sm:$0xff]   ;;  %v16975_v40 = vld [vmem:[%s19316_s27 + $0x1100] ss:$16 sps:$4 sm:$0xff]  }
 0x27e   : > { %11779 = vmatpush1.bf16.msra.mxu0 %v16890_v29  ;;  %12927 = vmatpush1.bf16.msra.mxu1 %v16893_v42  ;;  %v16978_v29 = vld [vmem:[%s19316_s27 + $0x1108] ss:$16 sps:$4 sm:$0xff]   ;;  %v16983_v42 = vld [vmem:[%s19316_s27 + $0x1124] ss:$16 sps:$4 sm:$0xff]  }
 0x27f   : > { %11780 = vmatprep.subr.bf16.mxu0 %v16898_v45  ;;  %12928 = vmatprep.subr.bf16.mxu1 %v16901_v46  ;;  %v16986_v45 = vld [vmem:[%s19316_s27 + $0x112c] ss:$16 sps:$4 sm:$0xff]   ;;  %v16981_v46 = vld [vmem:[%s19316_s27 + $0x1120] ss:$16 sps:$4 sm:$0xff]  }
 0x282   : > { %11781 = vmatpush1.bf16.msra.mxu0 %v16896_v26  ;;  %12929 = vmatpush1.bf16.msra.mxu1 %v16899_v47  ;;  %v16984_v26 = vld [vmem:[%s19316_s27 + $0x1128] ss:$16 sps:$4 sm:$0xff]   ;;  %v16989_v47 = vld [vmem:[%s19316_s27 + $0x1144] ss:$16 sps:$4 sm:$0xff]  }
 0x283   : > { %11782 = vmatprep.subr.bf16.mxu0 %v16904_v49  ;;  %12930 = vmatprep.subr.bf16.mxu1 %v16907_v51  ;;  %v16992_v49 = vld [vmem:[%s19316_s27 + $0x114c] ss:$16 sps:$4 sm:$0xff]   ;;  %v16987_v51 = vld [vmem:[%s19316_s27 + $0x1140] ss:$16 sps:$4 sm:$0xff]  }
 0x286   : > { %11783 = vmatpush1.bf16.msra.mxu0 %v16902_v52  ;;  %12931 = vmatpush1.bf16.msra.mxu1 %v16905_v33  ;;  %v16990_v52 = vld [vmem:[%s19316_s27 + $0x1148] ss:$16 sps:$4 sm:$0xff]   ;;  %v16995_v33 = vld [vmem:[%s19316_s27 + $0x1164] ss:$16 sps:$4 sm:$0xff]  }
 0x287   : > { %11784 = vmatprep.subr.bf16.mxu0 %v16910_v53  ;;  %12932 = vmatprep.subr.bf16.mxu1 %v16913_v54  ;;  %v16998_v53 = vld [vmem:[%s19316_s27 + $0x116c] ss:$16 sps:$4 sm:$0xff]   ;;  %v16993_v54 = vld [vmem:[%s19316_s27 + $0x1160] ss:$16 sps:$4 sm:$0xff]  }
 0x28a   : > { %11785 = vmatpush1.bf16.msra.mxu0 %v16908_v55  ;;  %12933 = vmatpush1.bf16.msra.mxu1 %v16911_v56  ;;  %v16996_v55 = vld [vmem:[%s19316_s27 + $0x1168] ss:$16 sps:$4 sm:$0xff]   ;;  %v17001_v56 = vld [vmem:[%s19316_s27 + $0x1184] ss:$16 sps:$4 sm:$0xff]  }
 0x28b   : > { %11786 = vmatprep.subr.bf16.mxu0 %v16916_v43  ;;  %12934 = vmatprep.subr.bf16.mxu1 %v16919_v58  ;;  %v17004_v43 = vld [vmem:[%s19316_s27 + $0x118c] ss:$16 sps:$4 sm:$0xff]   ;;  %v16999_v58 = vld [vmem:[%s19316_s27 + $0x1180] ss:$16 sps:$4 sm:$0xff]  }
 0x28e   : > { %11787 = vmatpush1.bf16.msra.mxu0 %v16914_v41  ;;  %12935 = vmatpush1.bf16.msra.mxu1 %v16917_v60  ;;  %v17002_v41 = vld [vmem:[%s19316_s27 + $0x1188] ss:$16 sps:$4 sm:$0xff]   ;;  %v17007_v60 = vld [vmem:[%s19316_s27 + $0x11a4] ss:$16 sps:$4 sm:$0xff]  }
 0x28f   : > { %11788 = vmatprep.subr.bf16.mxu0 %v16922_v61  ;;  %12936 = vmatprep.subr.bf16.mxu1 %v16925_v62  ;;  %v17010_v61 = vld [vmem:[%s19316_s27 + $0x11ac] ss:$16 sps:$4 sm:$0xff]   ;;  %v17005_v62 = vld [vmem:[%s19316_s27 + $0x11a0] ss:$16 sps:$4 sm:$0xff]  }
 0x292   : > { %11789 = vmatpush1.bf16.msra.mxu0 %v16920_v0  ;;  %12937 = vmatpush1.bf16.msra.mxu1 %v16923_v1  ;;  %v17008_v0 = vld [vmem:[%s19316_s27 + $0x11a8] ss:$16 sps:$4 sm:$0xff]   ;;  %v17013_v1 = vld [vmem:[%s19316_s27 + $0x11c4] ss:$16 sps:$4 sm:$0xff]  }
 0x293   : > { %11799 = vmatprep.subr.bf16.mxu0 %v16929_v2  ;;  %12947 = vmatprep.subr.bf16.mxu1 %v16932_v48  ;;  %v17016_v2 = vld [vmem:[%s19316_s27 + $0x11cc] ss:$16 sps:$4 sm:$0xff]   ;;  %v437_v48 = vcombine.high %v19925_v59, %v19925_v59  ;;  %v17017_v59 = vld [vmem:[%s19316_s27 + $0x11e0] ss:$16 sps:$4 sm:$0xff]  }
 0x295   : > { %11791 = vmatmul.mubr.bf16.vlgmr.msra.gmra.mrb[0].mxu0 %v677_v4  ;;  %12939 = vmatmul.mubr.bf16.vlgmr.msra.gmra.mrb[0].mxu1 %v677_v4  ;;  %v17014_v4 = vld [vmem:[%s19316_s27 + $0x11c8] ss:$16 sps:$4 sm:$0xff]  }
 0x296   : > { %11800 = vmatpush1.bf16.msra.mxu0 %v16927_v5  ;;  %12948 = vmatpush1.bf16.msra.mxu1 %v16930_v6  ;;  %v17019_v5 = vld [vmem:[%s19316_s27 + $0x11e4] ss:$16 sps:$4 sm:$0xff]   ;;  %v17022_v6 = vld [vmem:[%s19316_s27 + $0x11ec] ss:$16 sps:$4 sm:$0xff]  }
 0x297   : > { %11801 = vmatprep.subr.bf16.mxu0 %v16935_v7  ;;  %12949 = vmatprep.subr.bf16.mxu1 %v16938_v8  ;;  %v20006_v7 = vrot.slane %v437_v48, %v19393_v50  ;;  %v17020_v8 = vld [vmem:[%s19316_s27 + $0x11e8] ss:$16 sps:$4 sm:$0xff]  }
 0x298   : > { %11831 = vmatprep.mubr.bf16.mxu0 %v680_v9  ;;  %12979 = vmatprep.mubr.bf16.mxu1 %v680_v9  ;;  %v17025_v9 = vld [vmem:[%s19316_s27 + $0x1204] ss:$16 sps:$4 sm:$0xff]   ;;  %v17098_v48 = vld [vmem:[%s19316_s27 + $0x1388] ss:$16 sps:$4 sm:$0xff]  }
 0x29a   : > { %11802 = vmatpush1.bf16.msra.mxu0 %v16933_v57  ;;  %12950 = vmatpush1.bf16.msra.mxu1 %v16936_v11  ;;  %v17028_v57 = vld [vmem:[%s19316_s27 + $0x120c] ss:$16 sps:$4 sm:$0xff]   ;;  %v453_v11 = vcombine.high %v20006_v7, %v20006_v7 }
 0x29b   : > { %11803 = vmatprep.subr.bf16.mxu0 %v16941_v12  ;;  %12951 = vmatprep.subr.bf16.mxu1 %v16944_v13  ;;  %v679_v12 = vpack.c.bf16 %v19933_v63, %v19933_v63  ;;  %v17023_v13 = vld [vmem:[%s19316_s27 + $0x1200] ss:$16 sps:$4 sm:$0xff]  }
 0x29c   : > { %v17029_v63 = vld [vmem:[%s19316_s27 + $0x1220] ss:$16 sps:$4 sm:$0xff]  }
 0x29e   : > { %11804 = vmatpush1.bf16.msra.mxu0 %v16939_v14  ;;  %12952 = vmatpush1.bf16.msra.mxu1 %v16942_v15  ;;  %v17026_v14 = vld [vmem:[%s19316_s27 + $0x1208] ss:$16 sps:$4 sm:$0xff]   ;;  %v17031_v15 = vld [vmem:[%s19316_s27 + $0x1224] ss:$16 sps:$4 sm:$0xff]  }
 0x29f   : > { %11805 = vmatprep.subr.bf16.mxu0 %v16947_v16  ;;  %12953 = vmatprep.subr.bf16.mxu1 %v16950_v17  ;;  %v17034_v16 = vld [vmem:[%s19316_s27 + $0x122c] ss:$16 sps:$4 sm:$0xff]   ;;  %v682_v17 = vpack.c.bf16 %v453_v11, %v453_v11  ;;  %v17110_v11 = vld [vmem:[%s19316_s27 + $0x13c8] ss:$16 sps:$4 sm:$0xff]  }
 0x2a2   : > { %11806 = vmatpush1.bf16.msra.mxu0 %v16945_v18  ;;  %12954 = vmatpush1.bf16.msra.mxu1 %v16948_v19  ;;  %v17032_v18 = vld [vmem:[%s19316_s27 + $0x1228] ss:$16 sps:$4 sm:$0xff]   ;;  %v17037_v19 = vld [vmem:[%s19316_s27 + $0x1244] ss:$16 sps:$4 sm:$0xff]  }
 0x2a3   : > { %11807 = vmatprep.subr.bf16.mxu0 %v16953_v20  ;;  %12955 = vmatprep.subr.bf16.mxu1 %v16956_v21  ;;  %v17040_v20 = vld [vmem:[%s19316_s27 + $0x124c] ss:$16 sps:$4 sm:$0xff]   ;;  %v17035_v21 = vld [vmem:[%s19316_s27 + $0x1240] ss:$16 sps:$4 sm:$0xff]  }
 0x2a6   : > { %11808 = vmatpush1.bf16.msra.mxu0 %v16951_v22  ;;  %12956 = vmatpush1.bf16.msra.mxu1 %v16954_v23  ;;  %v17038_v22 = vld [vmem:[%s19316_s27 + $0x1248] ss:$16 sps:$4 sm:$0xff]   ;;  %v17043_v23 = vld [vmem:[%s19316_s27 + $0x1264] ss:$16 sps:$4 sm:$0xff]  }
 0x2a7   : > { %11809 = vmatprep.subr.bf16.mxu0 %v16959_v25  ;;  %12957 = vmatprep.subr.bf16.mxu1 %v16962_v24  ;;  %v17046_v25 = vld [vmem:[%s19316_s27 + $0x126c] ss:$16 sps:$4 sm:$0xff]   ;;  %v17041_v24 = vld [vmem:[%s19316_s27 + $0x1260] ss:$16 sps:$4 sm:$0xff]  }
 0x2aa   : > { %11810 = vmatpush1.bf16.msra.mxu0 %v16957_v10  ;;  %12958 = vmatpush1.bf16.msra.mxu1 %v16960_v28  ;;  %v17044_v10 = vld [vmem:[%s19316_s27 + $0x1268] ss:$16 sps:$4 sm:$0xff]   ;;  %v17049_v28 = vld [vmem:[%s19316_s27 + $0x1284] ss:$16 sps:$4 sm:$0xff]  }
 0x2ab   : > { %11811 = vmatprep.subr.bf16.mxu0 %v16965_v30  ;;  %12959 = vmatprep.subr.bf16.mxu1 %v16968_v31  ;;  %v17052_v30 = vld [vmem:[%s19316_s27 + $0x128c] ss:$16 sps:$4 sm:$0xff]   ;;  %v17047_v31 = vld [vmem:[%s19316_s27 + $0x1280] ss:$16 sps:$4 sm:$0xff]  }
 0x2ae   : > { %11812 = vmatpush1.bf16.msra.mxu0 %v16963_v32  ;;  %12960 = vmatpush1.bf16.msra.mxu1 %v16966_v34  ;;  %v17050_v32 = vld [vmem:[%s19316_s27 + $0x1288] ss:$16 sps:$4 sm:$0xff]   ;;  %v17055_v34 = vld [vmem:[%s19316_s27 + $0x12a4] ss:$16 sps:$4 sm:$0xff]  }
 0x2af   : > { %11813 = vmatprep.subr.bf16.mxu0 %v16971_v35  ;;  %12961 = vmatprep.subr.bf16.mxu1 %v16974_v36  ;;  %v17058_v35 = vld [vmem:[%s19316_s27 + $0x12ac] ss:$16 sps:$4 sm:$0xff]   ;;  %v17053_v36 = vld [vmem:[%s19316_s27 + $0x12a0] ss:$16 sps:$4 sm:$0xff]  }
 0x2b2   : > { %11814 = vmatpush1.bf16.msra.mxu0 %v16969_v27  ;;  %12962 = vmatpush1.bf16.msra.mxu1 %v16972_v37  ;;  %v17056_v27 = vld [vmem:[%s19316_s27 + $0x12a8] ss:$16 sps:$4 sm:$0xff]   ;;  %v17061_v37 = vld [vmem:[%s19316_s27 + $0x12c4] ss:$16 sps:$4 sm:$0xff]  }
 0x2b3   : > { %11815 = vmatprep.subr.bf16.mxu0 %v16977_v38  ;;  %12963 = vmatprep.subr.bf16.mxu1 %v16980_v39  ;;  %v17064_v38 = vld [vmem:[%s19316_s27 + $0x12cc] ss:$16 sps:$4 sm:$0xff]   ;;  %v17059_v39 = vld [vmem:[%s19316_s27 + $0x12c0] ss:$16 sps:$4 sm:$0xff]  }
 0x2b6   : > { %11816 = vmatpush1.bf16.msra.mxu0 %v16975_v40  ;;  %12964 = vmatpush1.bf16.msra.mxu1 %v16978_v29  ;;  %v17062_v40 = vld [vmem:[%s19316_s27 + $0x12c8] ss:$16 sps:$4 sm:$0xff]   ;;  %v17067_v29 = vld [vmem:[%s19316_s27 + $0x12e4] ss:$16 sps:$4 sm:$0xff]  }
 0x2b7   : > { %11817 = vmatprep.subr.bf16.mxu0 %v16983_v42  ;;  %12965 = vmatprep.subr.bf16.mxu1 %v16986_v45  ;;  %v17070_v42 = vld [vmem:[%s19316_s27 + $0x12ec] ss:$16 sps:$4 sm:$0xff]   ;;  %v17065_v45 = vld [vmem:[%s19316_s27 + $0x12e0] ss:$16 sps:$4 sm:$0xff]  }
 0x2ba   : > { %11818 = vmatpush1.bf16.msra.mxu0 %v16981_v46  ;;  %12966 = vmatpush1.bf16.msra.mxu1 %v16984_v26  ;;  %v17068_v46 = vld [vmem:[%s19316_s27 + $0x12e8] ss:$16 sps:$4 sm:$0xff]   ;;  %v17073_v26 = vld [vmem:[%s19316_s27 + $0x1304] ss:$16 sps:$4 sm:$0xff]  }
 0x2bb   : > { %11819 = vmatprep.subr.bf16.mxu0 %v16989_v47  ;;  %12967 = vmatprep.subr.bf16.mxu1 %v16992_v49  ;;  %v17076_v47 = vld [vmem:[%s19316_s27 + $0x130c] ss:$16 sps:$4 sm:$0xff]   ;;  %v17071_v49 = vld [vmem:[%s19316_s27 + $0x1300] ss:$16 sps:$4 sm:$0xff]  }
 0x2be   : > { %11820 = vmatpush1.bf16.msra.mxu0 %v16987_v51  ;;  %12968 = vmatpush1.bf16.msra.mxu1 %v16990_v52  ;;  %v17074_v51 = vld [vmem:[%s19316_s27 + $0x1308] ss:$16 sps:$4 sm:$0xff]   ;;  %v17079_v52 = vld [vmem:[%s19316_s27 + $0x1324] ss:$16 sps:$4 sm:$0xff]  }
 0x2bf   : > { %11821 = vmatprep.subr.bf16.mxu0 %v16995_v33  ;;  %12969 = vmatprep.subr.bf16.mxu1 %v16998_v53  ;;  %v17082_v33 = vld [vmem:[%s19316_s27 + $0x132c] ss:$16 sps:$4 sm:$0xff]   ;;  %v17077_v53 = vld [vmem:[%s19316_s27 + $0x1320] ss:$16 sps:$4 sm:$0xff]  }
 0x2c2   : > { %11822 = vmatpush1.bf16.msra.mxu0 %v16993_v54  ;;  %12970 = vmatpush1.bf16.msra.mxu1 %v16996_v55  ;;  %v17080_v54 = vld [vmem:[%s19316_s27 + $0x1328] ss:$16 sps:$4 sm:$0xff]   ;;  %v17085_v55 = vld [vmem:[%s19316_s27 + $0x1344] ss:$16 sps:$4 sm:$0xff]  }
 0x2c3   : > { %11823 = vmatprep.subr.bf16.mxu0 %v17001_v56  ;;  %12971 = vmatprep.subr.bf16.mxu1 %v17004_v43  ;;  %v17088_v56 = vld [vmem:[%s19316_s27 + $0x134c] ss:$16 sps:$4 sm:$0xff]   ;;  %v17083_v43 = vld [vmem:[%s19316_s27 + $0x1340] ss:$16 sps:$4 sm:$0xff]  }
 0x2c6   : > { %11824 = vmatpush1.bf16.msra.mxu0 %v16999_v58  ;;  %12972 = vmatpush1.bf16.msra.mxu1 %v17002_v41  ;;  %v17086_v58 = vld [vmem:[%s19316_s27 + $0x1348] ss:$16 sps:$4 sm:$0xff]   ;;  %v17091_v41 = vld [vmem:[%s19316_s27 + $0x1364] ss:$16 sps:$4 sm:$0xff]  }
 0x2c7   : > { %11825 = vmatprep.subr.bf16.mxu0 %v17007_v60  ;;  %12973 = vmatprep.subr.bf16.mxu1 %v17010_v61  ;;  %v17094_v60 = vld [vmem:[%s19316_s27 + $0x136c] ss:$16 sps:$4 sm:$0xff]   ;;  %v17089_v61 = vld [vmem:[%s19316_s27 + $0x1360] ss:$16 sps:$4 sm:$0xff]  }
 0x2ca   : > { %11826 = vmatpush1.bf16.msra.mxu0 %v17005_v62  ;;  %12974 = vmatpush1.bf16.msra.mxu1 %v17008_v0  ;;  %v17092_v62 = vld [vmem:[%s19316_s27 + $0x1368] ss:$16 sps:$4 sm:$0xff]   ;;  %v17097_v0 = vld [vmem:[%s19316_s27 + $0x1384] ss:$16 sps:$4 sm:$0xff]  }
 0x2cb   : > { %11827 = vmatprep.subr.bf16.mxu0 %v17013_v1  ;;  %12975 = vmatprep.subr.bf16.mxu1 %v17016_v2  ;;  %v17100_v1 = vld [vmem:[%s19316_s27 + $0x138c] ss:$16 sps:$4 sm:$0xff]   ;;  %v17095_v2 = vld [vmem:[%s19316_s27 + $0x1380] ss:$16 sps:$4 sm:$0xff]  }
 0x2ce   : > { %11828 = vmatpush1.bf16.msra.mxu0 %v17011_v3  ;;  %12976 = vmatpush1.bf16.msra.mxu1 %v17014_v4  ;;  %v17103_v3 = vld [vmem:[%s19316_s27 + $0x13a4] ss:$16 sps:$4 sm:$0xff]   ;;  %v17106_v4 = vld [vmem:[%s19316_s27 + $0x13ac] ss:$16 sps:$4 sm:$0xff]  }
 0x2cf   : > { %11829 = vmatprep.subr.bf16.mxu0 %v17019_v5  ;;  %12977 = vmatprep.subr.bf16.mxu1 %v17022_v6  ;;  %v17101_v5 = vld [vmem:[%s19316_s27 + $0x13a0] ss:$16 sps:$4 sm:$0xff]   ;;  %v17104_v6 = vld [vmem:[%s19316_s27 + $0x13a8] ss:$16 sps:$4 sm:$0xff]  }
 0x2d2   : > { %11830 = vmatpush1.bf16.msra.mxu0 %v17017_v59  ;;  %12978 = vmatpush1.bf16.msra.mxu1 %v17020_v8  ;;  %v17109_v59 = vld [vmem:[%s19316_s27 + $0x13c4] ss:$16 sps:$4 sm:$0xff]   ;;  %v17112_v8 = vld [vmem:[%s19316_s27 + $0x13cc] ss:$16 sps:$4 sm:$0xff]  }
 0x2d3   : > { %11840 = vmatprep.subr.bf16.mxu0 %v17025_v9  ;;  %12988 = vmatprep.subr.bf16.mxu1 %v17028_v57  ;;  %v20073_v9 = vld [vmem:[%s19337_s11 + $0x28] sm:$0xff] }
 0x2d4   : > { %v17107_v57 = vld [vmem:[%s19316_s27 + $0x13c0] ss:$16 sps:$4 sm:$0xff]  }
 0x2d5   : > { %11832 = vmatmul.mubr.bf16.vlgmr.msra.gmra.mrb[0].mxu0 %v679_v12  ;;  %12980 = vmatmul.mubr.bf16.vlgmr.msra.gmra.mrb[0].mxu1 %v679_v12  ;;  %v17115_v12 = vld [vmem:[%s19316_s27 + $0x13e4] ss:$16 sps:$4 sm:$0xff]  }
 0x2d6   : > { %11841 = vmatpush1.bf16.msra.mxu0 %v17023_v13  ;;  %12989 = vmatpush1.bf16.msra.mxu1 %v17026_v14  ;;  %v17118_v13 = vld [vmem:[%s19316_s27 + $0x13ec] ss:$16 sps:$4 sm:$0xff]   ;;  %v20081_v14 = vrot.slane %v20073_v9, %v19393_v50 }
 0x2d7   : > { %11842 = vmatprep.subr.bf16.mxu0 %v17031_v15  ;;  %12990 = vmatprep.subr.bf16.mxu1 %v17034_v16  ;;  %v17113_v15 = vld [vmem:[%s19316_s27 + $0x13e0] ss:$16 sps:$4 sm:$0xff]   ;;  %v17116_v16 = vld [vmem:[%s19316_s27 + $0x13e8] ss:$16 sps:$4 sm:$0xff]  }
 0x2d8   : > { %11872 = vmatprep.mubr.bf16.mxu0 %v682_v17  ;;  %13020 = vmatprep.mubr.bf16.mxu1 %v682_v17  ;;  %v17122_v17 = vld [vmem:[%s19316_s27 + $0x1404] ss:$16 sps:$4 sm:$0xff]  }
 0x2da   : > { %11843 = vmatpush1.bf16.msra.mxu0 %v17029_v63  ;;  %12991 = vmatpush1.bf16.msra.mxu1 %v17032_v18  ;;  %v17125_v63 = vld [vmem:[%s19316_s27 + $0x140c] ss:$16 sps:$4 sm:$0xff]   ;;  %v469_v18 = vcombine.high %v20081_v14, %v20081_v14 }
 0x2db   : > { %11844 = vmatprep.subr.bf16.mxu0 %v17037_v19  ;;  %12992 = vmatprep.subr.bf16.mxu1 %v17040_v20  ;;  %v681_v19 = vpack.c.bf16 %v20006_v7, %v20006_v7  ;;  %v17120_v20 = vld [vmem:[%s19316_s27 + $0x1400] ss:$16 sps:$4 sm:$0xff]  }
 0x2dc   : > { %v17126_v7 = vld [vmem:[%s19316_s27 + $0x1420] ss:$16 sps:$4 sm:$0xff]  }
 0x2de   : > { %11845 = vmatpush1.bf16.msra.mxu0 %v17035_v21  ;;  %12993 = vmatpush1.bf16.msra.mxu1 %v17038_v22  ;;  %v17123_v21 = vld [vmem:[%s19316_s27 + $0x1408] ss:$16 sps:$4 sm:$0xff]   ;;  %v17128_v22 = vld [vmem:[%s19316_s27 + $0x1424] ss:$16 sps:$4 sm:$0xff]  }
 0x2df   : > { %11846 = vmatprep.subr.bf16.mxu0 %v17043_v23  ;;  %12994 = vmatprep.subr.bf16.mxu1 %v17046_v25  ;;  %v17131_v23 = vld [vmem:[%s19316_s27 + $0x142c] ss:$16 sps:$4 sm:$0xff]   ;;  %v684_v25 = vpack.c.bf16 %v469_v18, %v469_v18  ;;  %v17204_v18 = vld [vmem:[%s19316_s27 + $0x15c0] ss:$16 sps:$4 sm:$0xff]  }
 0x2e2   : > { %11847 = vmatpush1.bf16.msra.mxu0 %v17041_v24  ;;  %12995 = vmatpush1.bf16.msra.mxu1 %v17044_v10  ;;  %v17129_v24 = vld [vmem:[%s19316_s27 + $0x1428] ss:$16 sps:$4 sm:$0xff]   ;;  %v17134_v10 = vld [vmem:[%s19316_s27 + $0x1444] ss:$16 sps:$4 sm:$0xff]  }
 0x2e3   : > { %11848 = vmatprep.subr.bf16.mxu0 %v17049_v28  ;;  %12996 = vmatprep.subr.bf16.mxu1 %v17052_v30  ;;  %v17137_v28 = vld [vmem:[%s19316_s27 + $0x144c] ss:$16 sps:$4 sm:$0xff]   ;;  %v17132_v30 = vld [vmem:[%s19316_s27 + $0x1440] ss:$16 sps:$4 sm:$0xff]  }
 0x2e6   : > { %11849 = vmatpush1.bf16.msra.mxu0 %v17047_v31  ;;  %12997 = vmatpush1.bf16.msra.mxu1 %v17050_v32  ;;  %v17135_v31 = vld [vmem:[%s19316_s27 + $0x1448] ss:$16 sps:$4 sm:$0xff]   ;;  %v17140_v32 = vld [vmem:[%s19316_s27 + $0x1464] ss:$16 sps:$4 sm:$0xff]  }
 0x2e7   : > { %11850 = vmatprep.subr.bf16.mxu0 %v17055_v34  ;;  %12998 = vmatprep.subr.bf16.mxu1 %v17058_v35  ;;  %v17143_v34 = vld [vmem:[%s19316_s27 + $0x146c] ss:$16 sps:$4 sm:$0xff]   ;;  %v17138_v35 = vld [vmem:[%s19316_s27 + $0x1460] ss:$16 sps:$4 sm:$0xff]  }
 0x2ea   : > { %11851 = vmatpush1.bf16.msra.mxu0 %v17053_v36  ;;  %12999 = vmatpush1.bf16.msra.mxu1 %v17056_v27  ;;  %v17141_v36 = vld [vmem:[%s19316_s27 + $0x1468] ss:$16 sps:$4 sm:$0xff]   ;;  %v17146_v27 = vld [vmem:[%s19316_s27 + $0x1484] ss:$16 sps:$4 sm:$0xff]  }
 0x2eb   : > { %11852 = vmatprep.subr.bf16.mxu0 %v17061_v37  ;;  %13000 = vmatprep.subr.bf16.mxu1 %v17064_v38  ;;  %v17149_v37 = vld [vmem:[%s19316_s27 + $0x148c] ss:$16 sps:$4 sm:$0xff]   ;;  %v17144_v38 = vld [vmem:[%s19316_s27 + $0x1480] ss:$16 sps:$4 sm:$0xff]  }
 0x2ee   : > { %11853 = vmatpush1.bf16.msra.mxu0 %v17059_v39  ;;  %13001 = vmatpush1.bf16.msra.mxu1 %v17062_v40  ;;  %v17147_v39 = vld [vmem:[%s19316_s27 + $0x1488] ss:$16 sps:$4 sm:$0xff]   ;;  %v17152_v40 = vld [vmem:[%s19316_s27 + $0x14a4] ss:$16 sps:$4 sm:$0xff]  }
 0x2ef   : > { %11854 = vmatprep.subr.bf16.mxu0 %v17067_v29  ;;  %13002 = vmatprep.subr.bf16.mxu1 %v17070_v42  ;;  %v17155_v29 = vld [vmem:[%s19316_s27 + $0x14ac] ss:$16 sps:$4 sm:$0xff]   ;;  %v17150_v42 = vld [vmem:[%s19316_s27 + $0x14a0] ss:$16 sps:$4 sm:$0xff]  }
 0x2f2   : > { %11855 = vmatpush1.bf16.msra.mxu0 %v17065_v45  ;;  %13003 = vmatpush1.bf16.msra.mxu1 %v17068_v46  ;;  %v17153_v45 = vld [vmem:[%s19316_s27 + $0x14a8] ss:$16 sps:$4 sm:$0xff]   ;;  %v17158_v46 = vld [vmem:[%s19316_s27 + $0x14c4] ss:$16 sps:$4 sm:$0xff]  }
 0x2f3   : > { %11856 = vmatprep.subr.bf16.mxu0 %v17073_v26  ;;  %13004 = vmatprep.subr.bf16.mxu1 %v17076_v47  ;;  %v17161_v26 = vld [vmem:[%s19316_s27 + $0x14cc] ss:$16 sps:$4 sm:$0xff]   ;;  %v17156_v47 = vld [vmem:[%s19316_s27 + $0x14c0] ss:$16 sps:$4 sm:$0xff]  }
 0x2f6   : > { %11857 = vmatpush1.bf16.msra.mxu0 %v17071_v49  ;;  %13005 = vmatpush1.bf16.msra.mxu1 %v17074_v51  ;;  %v17159_v49 = vld [vmem:[%s19316_s27 + $0x14c8] ss:$16 sps:$4 sm:$0xff]   ;;  %v17164_v51 = vld [vmem:[%s19316_s27 + $0x14e4] ss:$16 sps:$4 sm:$0xff]  }
 0x2f7   : > { %11858 = vmatprep.subr.bf16.mxu0 %v17079_v52  ;;  %13006 = vmatprep.subr.bf16.mxu1 %v17082_v33  ;;  %v17167_v52 = vld [vmem:[%s19316_s27 + $0x14ec] ss:$16 sps:$4 sm:$0xff]   ;;  %v17162_v33 = vld [vmem:[%s19316_s27 + $0x14e0] ss:$16 sps:$4 sm:$0xff]  }
 0x2fa   : > { %11859 = vmatpush1.bf16.msra.mxu0 %v17077_v53  ;;  %13007 = vmatpush1.bf16.msra.mxu1 %v17080_v54  ;;  %v17165_v53 = vld [vmem:[%s19316_s27 + $0x14e8] ss:$16 sps:$4 sm:$0xff]   ;;  %v17170_v54 = vld [vmem:[%s19316_s27 + $0x1504] ss:$16 sps:$4 sm:$0xff]  }
 0x2fb   : > { %11860 = vmatprep.subr.bf16.mxu0 %v17085_v55  ;;  %13008 = vmatprep.subr.bf16.mxu1 %v17088_v56  ;;  %v17173_v55 = vld [vmem:[%s19316_s27 + $0x150c] ss:$16 sps:$4 sm:$0xff]   ;;  %v17168_v56 = vld [vmem:[%s19316_s27 + $0x1500] ss:$16 sps:$4 sm:$0xff]  }
 0x2fe   : > { %11861 = vmatpush1.bf16.msra.mxu0 %v17083_v43  ;;  %13009 = vmatpush1.bf16.msra.mxu1 %v17086_v58  ;;  %v17171_v43 = vld [vmem:[%s19316_s27 + $0x1508] ss:$16 sps:$4 sm:$0xff]   ;;  %v17176_v58 = vld [vmem:[%s19316_s27 + $0x1524] ss:$16 sps:$4 sm:$0xff]  }
 0x2ff   : > { %11862 = vmatprep.subr.bf16.mxu0 %v17091_v41  ;;  %13010 = vmatprep.subr.bf16.mxu1 %v17094_v60  ;;  %v17179_v41 = vld [vmem:[%s19316_s27 + $0x152c] ss:$16 sps:$4 sm:$0xff]   ;;  %v17174_v60 = vld [vmem:[%s19316_s27 + $0x1520] ss:$16 sps:$4 sm:$0xff]  }
 0x302   : > { %11863 = vmatpush1.bf16.msra.mxu0 %v17089_v61  ;;  %13011 = vmatpush1.bf16.msra.mxu1 %v17092_v62  ;;  %v17177_v61 = vld [vmem:[%s19316_s27 + $0x1528] ss:$16 sps:$4 sm:$0xff]   ;;  %v17182_v62 = vld [vmem:[%s19316_s27 + $0x1544] ss:$16 sps:$4 sm:$0xff]  }
 0x303   : > { %11864 = vmatprep.subr.bf16.mxu0 %v17097_v0  ;;  %13012 = vmatprep.subr.bf16.mxu1 %v17100_v1  ;;  %v17185_v0 = vld [vmem:[%s19316_s27 + $0x154c] ss:$16 sps:$4 sm:$0xff]   ;;  %v17180_v1 = vld [vmem:[%s19316_s27 + $0x1540] ss:$16 sps:$4 sm:$0xff]  }
 0x306   : > { %11865 = vmatpush1.bf16.msra.mxu0 %v17095_v2  ;;  %13013 = vmatpush1.bf16.msra.mxu1 %v17098_v48  ;;  %v17183_v2 = vld [vmem:[%s19316_s27 + $0x1548] ss:$16 sps:$4 sm:$0xff]   ;;  %v17188_v48 = vld [vmem:[%s19316_s27 + $0x1564] ss:$16 sps:$4 sm:$0xff]  }
 0x307   : > { %11866 = vmatprep.subr.bf16.mxu0 %v17103_v3  ;;  %13014 = vmatprep.subr.bf16.mxu1 %v17106_v4  ;;  %v17191_v3 = vld [vmem:[%s19316_s27 + $0x156c] ss:$16 sps:$4 sm:$0xff]   ;;  %v17186_v4 = vld [vmem:[%s19316_s27 + $0x1560] ss:$16 sps:$4 sm:$0xff]  }
 0x30a   : > { %11867 = vmatpush1.bf16.msra.mxu0 %v17101_v5  ;;  %13015 = vmatpush1.bf16.msra.mxu1 %v17104_v6  ;;  %v17189_v5 = vld [vmem:[%s19316_s27 + $0x1568] ss:$16 sps:$4 sm:$0xff]   ;;  %v17194_v6 = vld [vmem:[%s19316_s27 + $0x1584] ss:$16 sps:$4 sm:$0xff]  }
 0x30b   : > { %11868 = vmatprep.subr.bf16.mxu0 %v17109_v59  ;;  %13016 = vmatprep.subr.bf16.mxu1 %v17112_v8  ;;  %v17197_v59 = vld [vmem:[%s19316_s27 + $0x158c] ss:$16 sps:$4 sm:$0xff]   ;;  %v17192_v8 = vld [vmem:[%s19316_s27 + $0x1580] ss:$16 sps:$4 sm:$0xff]  }
 0x30e   : > { %11869 = vmatpush1.bf16.msra.mxu0 %v17107_v57  ;;  %13017 = vmatpush1.bf16.msra.mxu1 %v17110_v11  ;;  %v17195_v57 = vld [vmem:[%s19316_s27 + $0x1588] ss:$16 sps:$4 sm:$0xff]   ;;  %v17200_v11 = vld [vmem:[%s19316_s27 + $0x15a4] ss:$16 sps:$4 sm:$0xff]  }
 0x30f   : > { %11870 = vmatprep.subr.bf16.mxu0 %v17115_v12  ;;  %13018 = vmatprep.subr.bf16.mxu1 %v17118_v13  ;;  %v17203_v12 = vld [vmem:[%s19316_s27 + $0x15ac] ss:$16 sps:$4 sm:$0xff]   ;;  %v17198_v13 = vld [vmem:[%s19316_s27 + $0x15a0] ss:$16 sps:$4 sm:$0xff]  }
 0x312   : > { %11871 = vmatpush1.bf16.msra.mxu0 %v17113_v15  ;;  %13019 = vmatpush1.bf16.msra.mxu1 %v17116_v16  ;;  %v17201_v15 = vld [vmem:[%s19316_s27 + $0x15a8] ss:$16 sps:$4 sm:$0xff]   ;;  %v17206_v16 = vld [vmem:[%s19316_s27 + $0x15c4] ss:$16 sps:$4 sm:$0xff]  }
 0x313   : > { %11881 = vmatprep.subr.bf16.mxu0 %v17122_v17  ;;  %13029 = vmatprep.subr.bf16.mxu1 %v17125_v63  ;;  %v17209_v17 = vld [vmem:[%s19316_s27 + $0x15cc] ss:$16 sps:$4 sm:$0xff]   ;;  %v454_v63 = vcombine.high %v20073_v9, %v20073_v9  ;;  %v17210_v9 = vld [vmem:[%s19316_s27 + $0x15e0] ss:$16 sps:$4 sm:$0xff]  }
 0x315   : > { %11873 = vmatmul.mubr.bf16.vlgmr.msra.gmra.mrb[0].mxu0 %v681_v19  ;;  %13021 = vmatmul.mubr.bf16.vlgmr.msra.gmra.mrb[0].mxu1 %v681_v19  ;;  %v17207_v19 = vld [vmem:[%s19316_s27 + $0x15c8] ss:$16 sps:$4 sm:$0xff]  }
 0x316   : > { %11882 = vmatpush1.bf16.msra.mxu0 %v17120_v20  ;;  %13030 = vmatpush1.bf16.msra.mxu1 %v17123_v21  ;;  %v17212_v20 = vld [vmem:[%s19316_s27 + $0x15e4] ss:$16 sps:$4 sm:$0xff]   ;;  %v17215_v21 = vld [vmem:[%s19316_s27 + $0x15ec] ss:$16 sps:$4 sm:$0xff]  }
 0x317   : > { %11883 = vmatprep.subr.bf16.mxu0 %v17128_v22  ;;  %13031 = vmatprep.subr.bf16.mxu1 %v17131_v23  ;;  %v20154_v22 = vrot.slane %v454_v63, %v19393_v50  ;;  %v17213_v23 = vld [vmem:[%s19316_s27 + $0x15e8] ss:$16 sps:$4 sm:$0xff]  }
 0x318   : > { %11913 = vmatprep.mubr.bf16.mxu0 %v684_v25  ;;  %13061 = vmatprep.mubr.bf16.mxu1 %v684_v25  ;;  %v17218_v25 = vld [vmem:[%s19316_s27 + $0x1604] ss:$16 sps:$4 sm:$0xff]   ;;  %v17291_v63 = vld [vmem:[%s19316_s27 + $0x1788] ss:$16 sps:$4 sm:$0xff]  }
 0x31a   : > { %11884 = vmatpush1.bf16.msra.mxu0 %v17126_v7  ;;  %13032 = vmatpush1.bf16.msra.mxu1 %v17129_v24  ;;  %v17221_v7 = vld [vmem:[%s19316_s27 + $0x160c] ss:$16 sps:$4 sm:$0xff]   ;;  %v470_v24 = vcombine.high %v20154_v22, %v20154_v22 }
 0x31b   : > { %11885 = vmatprep.subr.bf16.mxu0 %v17134_v10  ;;  %13033 = vmatprep.subr.bf16.mxu1 %v17137_v28  ;;  %v683_v10 = vpack.c.bf16 %v20081_v14, %v20081_v14  ;;  %v17216_v28 = vld [vmem:[%s19316_s27 + $0x1600] ss:$16 sps:$4 sm:$0xff]  }
 0x31c   : > { %v17222_v14 = vld [vmem:[%s19316_s27 + $0x1620] ss:$16 sps:$4 sm:$0xff]  }
 0x31e   : > { %11886 = vmatpush1.bf16.msra.mxu0 %v17132_v30  ;;  %13034 = vmatpush1.bf16.msra.mxu1 %v17135_v31  ;;  %v17219_v30 = vld [vmem:[%s19316_s27 + $0x1608] ss:$16 sps:$4 sm:$0xff]   ;;  %v17224_v31 = vld [vmem:[%s19316_s27 + $0x1624] ss:$16 sps:$4 sm:$0xff]  }
 0x31f   : > { %11887 = vmatprep.subr.bf16.mxu0 %v17140_v32  ;;  %13035 = vmatprep.subr.bf16.mxu1 %v17143_v34  ;;  %v17227_v32 = vld [vmem:[%s19316_s27 + $0x162c] ss:$16 sps:$4 sm:$0xff]   ;;  %v686_v34 = vpack.c.bf16 %v470_v24, %v470_v24  ;;  %v17303_v24 = vld [vmem:[%s19316_s27 + $0x17c8] ss:$16 sps:$4 sm:$0xff]  }
 0x322   : > { %11888 = vmatpush1.bf16.msra.mxu0 %v17138_v35  ;;  %13036 = vmatpush1.bf16.msra.mxu1 %v17141_v36  ;;  %v17225_v35 = vld [vmem:[%s19316_s27 + $0x1628] ss:$16 sps:$4 sm:$0xff]   ;;  %v17230_v36 = vld [vmem:[%s19316_s27 + $0x1644] ss:$16 sps:$4 sm:$0xff]  }
 0x323   : > { %11889 = vmatprep.subr.bf16.mxu0 %v17146_v27  ;;  %13037 = vmatprep.subr.bf16.mxu1 %v17149_v37  ;;  %v17233_v27 = vld [vmem:[%s19316_s27 + $0x164c] ss:$16 sps:$4 sm:$0xff]   ;;  %v17228_v37 = vld [vmem:[%s19316_s27 + $0x1640] ss:$16 sps:$4 sm:$0xff]  }
 0x326   : > { %11890 = vmatpush1.bf16.msra.mxu0 %v17144_v38  ;;  %13038 = vmatpush1.bf16.msra.mxu1 %v17147_v39  ;;  %v17231_v38 = vld [vmem:[%s19316_s27 + $0x1648] ss:$16 sps:$4 sm:$0xff]   ;;  %v17236_v39 = vld [vmem:[%s19316_s27 + $0x1664] ss:$16 sps:$4 sm:$0xff]  }
 0x327   : > { %11891 = vmatprep.subr.bf16.mxu0 %v17152_v40  ;;  %13039 = vmatprep.subr.bf16.mxu1 %v17155_v29  ;;  %v17239_v40 = vld [vmem:[%s19316_s27 + $0x166c] ss:$16 sps:$4 sm:$0xff]   ;;  %v17234_v29 = vld [vmem:[%s19316_s27 + $0x1660] ss:$16 sps:$4 sm:$0xff]  }
 0x32a   : > { %11892 = vmatpush1.bf16.msra.mxu0 %v17150_v42  ;;  %13040 = vmatpush1.bf16.msra.mxu1 %v17153_v45  ;;  %v17237_v42 = vld [vmem:[%s19316_s27 + $0x1668] ss:$16 sps:$4 sm:$0xff]   ;;  %v17242_v45 = vld [vmem:[%s19316_s27 + $0x1684] ss:$16 sps:$4 sm:$0xff]  }
 0x32b   : > { %11893 = vmatprep.subr.bf16.mxu0 %v17158_v46  ;;  %13041 = vmatprep.subr.bf16.mxu1 %v17161_v26  ;;  %v17245_v46 = vld [vmem:[%s19316_s27 + $0x168c] ss:$16 sps:$4 sm:$0xff]   ;;  %v17240_v26 = vld [vmem:[%s19316_s27 + $0x1680] ss:$16 sps:$4 sm:$0xff]  }
 0x32e   : > { %11894 = vmatpush1.bf16.msra.mxu0 %v17156_v47  ;;  %13042 = vmatpush1.bf16.msra.mxu1 %v17159_v49  ;;  %v17243_v47 = vld [vmem:[%s19316_s27 + $0x1688] ss:$16 sps:$4 sm:$0xff]   ;;  %v17248_v49 = vld [vmem:[%s19316_s27 + $0x16a4] ss:$16 sps:$4 sm:$0xff]  }
 0x32f   : > { %11895 = vmatprep.subr.bf16.mxu0 %v17164_v51  ;;  %13043 = vmatprep.subr.bf16.mxu1 %v17167_v52  ;;  %v17251_v51 = vld [vmem:[%s19316_s27 + $0x16ac] ss:$16 sps:$4 sm:$0xff]   ;;  %v17246_v52 = vld [vmem:[%s19316_s27 + $0x16a0] ss:$16 sps:$4 sm:$0xff]  }
 0x332   : > { %11896 = vmatpush1.bf16.msra.mxu0 %v17162_v33  ;;  %13044 = vmatpush1.bf16.msra.mxu1 %v17165_v53  ;;  %v17249_v33 = vld [vmem:[%s19316_s27 + $0x16a8] ss:$16 sps:$4 sm:$0xff]   ;;  %v17254_v53 = vld [vmem:[%s19316_s27 + $0x16c4] ss:$16 sps:$4 sm:$0xff]  }
 0x333   : > { %11897 = vmatprep.subr.bf16.mxu0 %v17170_v54  ;;  %13045 = vmatprep.subr.bf16.mxu1 %v17173_v55  ;;  %v17257_v54 = vld [vmem:[%s19316_s27 + $0x16cc] ss:$16 sps:$4 sm:$0xff]   ;;  %v17252_v55 = vld [vmem:[%s19316_s27 + $0x16c0] ss:$16 sps:$4 sm:$0xff]  }
 0x336   : > { %11898 = vmatpush1.bf16.msra.mxu0 %v17168_v56  ;;  %13046 = vmatpush1.bf16.msra.mxu1 %v17171_v43  ;;  %v17255_v56 = vld [vmem:[%s19316_s27 + $0x16c8] ss:$16 sps:$4 sm:$0xff]   ;;  %v17260_v43 = vld [vmem:[%s19316_s27 + $0x16e4] ss:$16 sps:$4 sm:$0xff]  }
 0x337   : > { %11899 = vmatprep.subr.bf16.mxu0 %v17176_v58  ;;  %13047 = vmatprep.subr.bf16.mxu1 %v17179_v41  ;;  %v17263_v58 = vld [vmem:[%s19316_s27 + $0x16ec] ss:$16 sps:$4 sm:$0xff]   ;;  %v17258_v41 = vld [vmem:[%s19316_s27 + $0x16e0] ss:$16 sps:$4 sm:$0xff]  }
 0x33a   : > { %11900 = vmatpush1.bf16.msra.mxu0 %v17174_v60  ;;  %13048 = vmatpush1.bf16.msra.mxu1 %v17177_v61  ;;  %v17261_v60 = vld [vmem:[%s19316_s27 + $0x16e8] ss:$16 sps:$4 sm:$0xff]   ;;  %v17266_v61 = vld [vmem:[%s19316_s27 + $0x1704] ss:$16 sps:$4 sm:$0xff]  }
 0x33b   : > { %11901 = vmatprep.subr.bf16.mxu0 %v17182_v62  ;;  %13049 = vmatprep.subr.bf16.mxu1 %v17185_v0  ;;  %v17269_v62 = vld [vmem:[%s19316_s27 + $0x170c] ss:$16 sps:$4 sm:$0xff]   ;;  %v17264_v0 = vld [vmem:[%s19316_s27 + $0x1700] ss:$16 sps:$4 sm:$0xff]  }
 0x33e   : > { %11902 = vmatpush1.bf16.msra.mxu0 %v17180_v1  ;;  %13050 = vmatpush1.bf16.msra.mxu1 %v17183_v2  ;;  %v17267_v1 = vld [vmem:[%s19316_s27 + $0x1708] ss:$16 sps:$4 sm:$0xff]   ;;  %v17272_v2 = vld [vmem:[%s19316_s27 + $0x1724] ss:$16 sps:$4 sm:$0xff]  }
 0x33f   : > { %11903 = vmatprep.subr.bf16.mxu0 %v17188_v48  ;;  %13051 = vmatprep.subr.bf16.mxu1 %v17191_v3  ;;  %v17275_v48 = vld [vmem:[%s19316_s27 + $0x172c] ss:$16 sps:$4 sm:$0xff]   ;;  %v17270_v3 = vld [vmem:[%s19316_s27 + $0x1720] ss:$16 sps:$4 sm:$0xff]  }
 0x342   : > { %11904 = vmatpush1.bf16.msra.mxu0 %v17186_v4  ;;  %13052 = vmatpush1.bf16.msra.mxu1 %v17189_v5  ;;  %v17273_v4 = vld [vmem:[%s19316_s27 + $0x1728] ss:$16 sps:$4 sm:$0xff]   ;;  %v17278_v5 = vld [vmem:[%s19316_s27 + $0x1744] ss:$16 sps:$4 sm:$0xff]  }
 0x343   : > { %11905 = vmatprep.subr.bf16.mxu0 %v17194_v6  ;;  %13053 = vmatprep.subr.bf16.mxu1 %v17197_v59  ;;  %v17281_v6 = vld [vmem:[%s19316_s27 + $0x174c] ss:$16 sps:$4 sm:$0xff]   ;;  %v17276_v59 = vld [vmem:[%s19316_s27 + $0x1740] ss:$16 sps:$4 sm:$0xff]  }
 0x346   : > { %11906 = vmatpush1.bf16.msra.mxu0 %v17192_v8  ;;  %13054 = vmatpush1.bf16.msra.mxu1 %v17195_v57  ;;  %v17279_v8 = vld [vmem:[%s19316_s27 + $0x1748] ss:$16 sps:$4 sm:$0xff]   ;;  %v17284_v57 = vld [vmem:[%s19316_s27 + $0x1764] ss:$16 sps:$4 sm:$0xff]  }
 0x347   : > { %11907 = vmatprep.subr.bf16.mxu0 %v17200_v11  ;;  %13055 = vmatprep.subr.bf16.mxu1 %v17203_v12  ;;  %v17287_v11 = vld [vmem:[%s19316_s27 + $0x176c] ss:$16 sps:$4 sm:$0xff]   ;;  %v17282_v12 = vld [vmem:[%s19316_s27 + $0x1760] ss:$16 sps:$4 sm:$0xff]  }
 0x34a   : > { %11908 = vmatpush1.bf16.msra.mxu0 %v17198_v13  ;;  %13056 = vmatpush1.bf16.msra.mxu1 %v17201_v15  ;;  %v17285_v13 = vld [vmem:[%s19316_s27 + $0x1768] ss:$16 sps:$4 sm:$0xff]   ;;  %v17290_v15 = vld [vmem:[%s19316_s27 + $0x1784] ss:$16 sps:$4 sm:$0xff]  }
 0x34b   : > { %11909 = vmatprep.subr.bf16.mxu0 %v17206_v16  ;;  %13057 = vmatprep.subr.bf16.mxu1 %v17209_v17  ;;  %v17293_v16 = vld [vmem:[%s19316_s27 + $0x178c] ss:$16 sps:$4 sm:$0xff]   ;;  %v17288_v17 = vld [vmem:[%s19316_s27 + $0x1780] ss:$16 sps:$4 sm:$0xff]  }
 0x34e   : > { %11910 = vmatpush1.bf16.msra.mxu0 %v17204_v18  ;;  %13058 = vmatpush1.bf16.msra.mxu1 %v17207_v19  ;;  %v17296_v18 = vld [vmem:[%s19316_s27 + $0x17a4] ss:$16 sps:$4 sm:$0xff]   ;;  %v17299_v19 = vld [vmem:[%s19316_s27 + $0x17ac] ss:$16 sps:$4 sm:$0xff]  }
 0x34f   : > { %11911 = vmatprep.subr.bf16.mxu0 %v17212_v20  ;;  %13059 = vmatprep.subr.bf16.mxu1 %v17215_v21  ;;  %v17294_v20 = vld [vmem:[%s19316_s27 + $0x17a0] ss:$16 sps:$4 sm:$0xff]   ;;  %v17297_v21 = vld [vmem:[%s19316_s27 + $0x17a8] ss:$16 sps:$4 sm:$0xff]  }
 0x352   : > { %11912 = vmatpush1.bf16.msra.mxu0 %v17210_v9  ;;  %13060 = vmatpush1.bf16.msra.mxu1 %v17213_v23  ;;  %v17302_v9 = vld [vmem:[%s19316_s27 + $0x17c4] ss:$16 sps:$4 sm:$0xff]   ;;  %v17305_v23 = vld [vmem:[%s19316_s27 + $0x17cc] ss:$16 sps:$4 sm:$0xff]  }
 0x353   : > { %11922 = vmatprep.subr.bf16.mxu0 %v17218_v25  ;;  %13070 = vmatprep.subr.bf16.mxu1 %v17221_v7  ;;  %v20221_v25 = vld [vmem:[%s19337_s11 + $0x30] sm:$0xff]  ;;  %v17300_v7 = vld [vmem:[%s19316_s27 + $0x17c0] ss:$16 sps:$4 sm:$0xff]  }
 0x355   : > { %11914 = vmatmul.mubr.bf16.vlgmr.msra.gmra.mrb[0].mxu0 %v683_v10  ;;  %13062 = vmatmul.mubr.bf16.vlgmr.msra.gmra.mrb[0].mxu1 %v683_v10  ;;  %v17308_v10 = vld [vmem:[%s19316_s27 + $0x17e4] ss:$16 sps:$4 sm:$0xff]  }
 0x356   : > { %11923 = vmatpush1.bf16.msra.mxu0 %v17216_v28  ;;  %13071 = vmatpush1.bf16.msra.mxu1 %v17219_v30  ;;  %v17311_v28 = vld [vmem:[%s19316_s27 + $0x17ec] ss:$16 sps:$4 sm:$0xff]   ;;  %v20229_v30 = vrot.slane %v20221_v25, %v19393_v50 }
 0x357   : > { %11924 = vmatprep.subr.bf16.mxu0 %v17224_v31  ;;  %13072 = vmatprep.subr.bf16.mxu1 %v17227_v32  ;;  %v17306_v31 = vld [vmem:[%s19316_s27 + $0x17e0] ss:$16 sps:$4 sm:$0xff]   ;;  %v17309_v32 = vld [vmem:[%s19316_s27 + $0x17e8] ss:$16 sps:$4 sm:$0xff]  }
 0x358   : > { %11954 = vmatprep.mubr.bf16.mxu0 %v686_v34  ;;  %13102 = vmatprep.mubr.bf16.mxu1 %v686_v34  ;;  %v17315_v34 = vld [vmem:[%s19316_s27 + $0x1804] ss:$16 sps:$4 sm:$0xff]  }
 0x35a   : > { %11925 = vmatpush1.bf16.msra.mxu0 %v17222_v14  ;;  %13073 = vmatpush1.bf16.msra.mxu1 %v17225_v35  ;;  %v17318_v14 = vld [vmem:[%s19316_s27 + $0x180c] ss:$16 sps:$4 sm:$0xff]   ;;  %v486_v35 = vcombine.high %v20229_v30, %v20229_v30 }
 0x35b   : > { %11926 = vmatprep.subr.bf16.mxu0 %v17230_v36  ;;  %13074 = vmatprep.subr.bf16.mxu1 %v17233_v27  ;;  %v685_v36 = vpack.c.bf16 %v20154_v22, %v20154_v22  ;;  %v17313_v27 = vld [vmem:[%s19316_s27 + $0x1800] ss:$16 sps:$4 sm:$0xff]  }
 0x35c   : > { %v17319_v22 = vld [vmem:[%s19316_s27 + $0x1820] ss:$16 sps:$4 sm:$0xff]  }
 0x35e   : > { %11927 = vmatpush1.bf16.msra.mxu0 %v17228_v37  ;;  %13075 = vmatpush1.bf16.msra.mxu1 %v17231_v38  ;;  %v17316_v37 = vld [vmem:[%s19316_s27 + $0x1808] ss:$16 sps:$4 sm:$0xff]   ;;  %v17321_v38 = vld [vmem:[%s19316_s27 + $0x1824] ss:$16 sps:$4 sm:$0xff]  }
 0x35f   : > { %11928 = vmatprep.subr.bf16.mxu0 %v17236_v39  ;;  %13076 = vmatprep.subr.bf16.mxu1 %v17239_v40  ;;  %v17324_v39 = vld [vmem:[%s19316_s27 + $0x182c] ss:$16 sps:$4 sm:$0xff]   ;;  %v688_v40 = vpack.c.bf16 %v486_v35, %v486_v35  ;;  %v17397_v35 = vld [vmem:[%s19316_s27 + $0x19c0] ss:$16 sps:$4 sm:$0xff]  }
 0x362   : > { %11929 = vmatpush1.bf16.msra.mxu0 %v17234_v29  ;;  %13077 = vmatpush1.bf16.msra.mxu1 %v17237_v42  ;;  %v17322_v29 = vld [vmem:[%s19316_s27 + $0x1828] ss:$16 sps:$4 sm:$0xff]   ;;  %v17327_v42 = vld [vmem:[%s19316_s27 + $0x1844] ss:$16 sps:$4 sm:$0xff]  }
 0x363   : > { %11930 = vmatprep.subr.bf16.mxu0 %v17242_v45  ;;  %13078 = vmatprep.subr.bf16.mxu1 %v17245_v46  ;;  %v17330_v45 = vld [vmem:[%s19316_s27 + $0x184c] ss:$16 sps:$4 sm:$0xff]   ;;  %v17325_v46 = vld [vmem:[%s19316_s27 + $0x1840] ss:$16 sps:$4 sm:$0xff]  }
 0x366   : > { %11931 = vmatpush1.bf16.msra.mxu0 %v17240_v26  ;;  %13079 = vmatpush1.bf16.msra.mxu1 %v17243_v47  ;;  %v17328_v26 = vld [vmem:[%s19316_s27 + $0x1848] ss:$16 sps:$4 sm:$0xff]   ;;  %v17333_v47 = vld [vmem:[%s19316_s27 + $0x1864] ss:$16 sps:$4 sm:$0xff]  }
 0x367   : > { %11932 = vmatprep.subr.bf16.mxu0 %v17248_v49  ;;  %13080 = vmatprep.subr.bf16.mxu1 %v17251_v51  ;;  %v17336_v49 = vld [vmem:[%s19316_s27 + $0x186c] ss:$16 sps:$4 sm:$0xff]   ;;  %v17331_v51 = vld [vmem:[%s19316_s27 + $0x1860] ss:$16 sps:$4 sm:$0xff]  }
 0x36a   : > { %11933 = vmatpush1.bf16.msra.mxu0 %v17246_v52  ;;  %13081 = vmatpush1.bf16.msra.mxu1 %v17249_v33  ;;  %v17334_v52 = vld [vmem:[%s19316_s27 + $0x1868] ss:$16 sps:$4 sm:$0xff]   ;;  %v17339_v33 = vld [vmem:[%s19316_s27 + $0x1884] ss:$16 sps:$4 sm:$0xff]  }
 0x36b   : > { %11934 = vmatprep.subr.bf16.mxu0 %v17254_v53  ;;  %13082 = vmatprep.subr.bf16.mxu1 %v17257_v54  ;;  %v17342_v53 = vld [vmem:[%s19316_s27 + $0x188c] ss:$16 sps:$4 sm:$0xff]   ;;  %v17337_v54 = vld [vmem:[%s19316_s27 + $0x1880] ss:$16 sps:$4 sm:$0xff]  }
 0x36e   : > { %11935 = vmatpush1.bf16.msra.mxu0 %v17252_v55  ;;  %13083 = vmatpush1.bf16.msra.mxu1 %v17255_v56  ;;  %v17340_v55 = vld [vmem:[%s19316_s27 + $0x1888] ss:$16 sps:$4 sm:$0xff]   ;;  %v17345_v56 = vld [vmem:[%s19316_s27 + $0x18a4] ss:$16 sps:$4 sm:$0xff]  }
 0x36f   : > { %11936 = vmatprep.subr.bf16.mxu0 %v17260_v43  ;;  %13084 = vmatprep.subr.bf16.mxu1 %v17263_v58  ;;  %v17348_v43 = vld [vmem:[%s19316_s27 + $0x18ac] ss:$16 sps:$4 sm:$0xff]   ;;  %v17343_v58 = vld [vmem:[%s19316_s27 + $0x18a0] ss:$16 sps:$4 sm:$0xff]  }
 0x372   : > { %11937 = vmatpush1.bf16.msra.mxu0 %v17258_v41  ;;  %13085 = vmatpush1.bf16.msra.mxu1 %v17261_v60  ;;  %v17346_v41 = vld [vmem:[%s19316_s27 + $0x18a8] ss:$16 sps:$4 sm:$0xff]   ;;  %v17351_v60 = vld [vmem:[%s19316_s27 + $0x18c4] ss:$16 sps:$4 sm:$0xff]  }
 0x373   : > { %11938 = vmatprep.subr.bf16.mxu0 %v17266_v61  ;;  %13086 = vmatprep.subr.bf16.mxu1 %v17269_v62  ;;  %v17354_v61 = vld [vmem:[%s19316_s27 + $0x18cc] ss:$16 sps:$4 sm:$0xff]   ;;  %v17349_v62 = vld [vmem:[%s19316_s27 + $0x18c0] ss:$16 sps:$4 sm:$0xff]  }
 0x376   : > { %11939 = vmatpush1.bf16.msra.mxu0 %v17264_v0  ;;  %13087 = vmatpush1.bf16.msra.mxu1 %v17267_v1  ;;  %v17352_v0 = vld [vmem:[%s19316_s27 + $0x18c8] ss:$16 sps:$4 sm:$0xff]   ;;  %v17357_v1 = vld [vmem:[%s19316_s27 + $0x18e4] ss:$16 sps:$4 sm:$0xff]  }
 0x377   : > { %11940 = vmatprep.subr.bf16.mxu0 %v17272_v2  ;;  %13088 = vmatprep.subr.bf16.mxu1 %v17275_v48  ;;  %v17360_v2 = vld [vmem:[%s19316_s27 + $0x18ec] ss:$16 sps:$4 sm:$0xff]   ;;  %v17355_v48 = vld [vmem:[%s19316_s27 + $0x18e0] ss:$16 sps:$4 sm:$0xff]  }
 0x37a   : > { %11941 = vmatpush1.bf16.msra.mxu0 %v17270_v3  ;;  %13089 = vmatpush1.bf16.msra.mxu1 %v17273_v4  ;;  %v17358_v3 = vld [vmem:[%s19316_s27 + $0x18e8] ss:$16 sps:$4 sm:$0xff]   ;;  %v17363_v4 = vld [vmem:[%s19316_s27 + $0x1904] ss:$16 sps:$4 sm:$0xff]  }
 0x37b   : > { %11942 = vmatprep.subr.bf16.mxu0 %v17278_v5  ;;  %13090 = vmatprep.subr.bf16.mxu1 %v17281_v6  ;;  %v17366_v5 = vld [vmem:[%s19316_s27 + $0x190c] ss:$16 sps:$4 sm:$0xff]   ;;  %v17361_v6 = vld [vmem:[%s19316_s27 + $0x1900] ss:$16 sps:$4 sm:$0xff]  }
 0x37e   : > { %11943 = vmatpush1.bf16.msra.mxu0 %v17276_v59  ;;  %13091 = vmatpush1.bf16.msra.mxu1 %v17279_v8  ;;  %v17364_v59 = vld [vmem:[%s19316_s27 + $0x1908] ss:$16 sps:$4 sm:$0xff]   ;;  %v17369_v8 = vld [vmem:[%s19316_s27 + $0x1924] ss:$16 sps:$4 sm:$0xff]  }
 0x37f   : > { %11944 = vmatprep.subr.bf16.mxu0 %v17284_v57  ;;  %13092 = vmatprep.subr.bf16.mxu1 %v17287_v11  ;;  %v17372_v57 = vld [vmem:[%s19316_s27 + $0x192c] ss:$16 sps:$4 sm:$0xff]   ;;  %v17367_v11 = vld [vmem:[%s19316_s27 + $0x1920] ss:$16 sps:$4 sm:$0xff]  }
 0x382   : > { %11945 = vmatpush1.bf16.msra.mxu0 %v17282_v12  ;;  %13093 = vmatpush1.bf16.msra.mxu1 %v17285_v13  ;;  %v17370_v12 = vld [vmem:[%s19316_s27 + $0x1928] ss:$16 sps:$4 sm:$0xff]   ;;  %v17375_v13 = vld [vmem:[%s19316_s27 + $0x1944] ss:$16 sps:$4 sm:$0xff]  }
 0x383   : > { %11946 = vmatprep.subr.bf16.mxu0 %v17290_v15  ;;  %13094 = vmatprep.subr.bf16.mxu1 %v17293_v16  ;;  %v17378_v15 = vld [vmem:[%s19316_s27 + $0x194c] ss:$16 sps:$4 sm:$0xff]   ;;  %v17373_v16 = vld [vmem:[%s19316_s27 + $0x1940] ss:$16 sps:$4 sm:$0xff]  }
 0x386   : > { %11947 = vmatpush1.bf16.msra.mxu0 %v17288_v17  ;;  %13095 = vmatpush1.bf16.msra.mxu1 %v17291_v63  ;;  %v17376_v17 = vld [vmem:[%s19316_s27 + $0x1948] ss:$16 sps:$4 sm:$0xff]   ;;  %v17381_v63 = vld [vmem:[%s19316_s27 + $0x1964] ss:$16 sps:$4 sm:$0xff]  }
 0x387   : > { %11948 = vmatprep.subr.bf16.mxu0 %v17296_v18  ;;  %13096 = vmatprep.subr.bf16.mxu1 %v17299_v19  ;;  %v17384_v18 = vld [vmem:[%s19316_s27 + $0x196c] ss:$16 sps:$4 sm:$0xff]   ;;  %v17379_v19 = vld [vmem:[%s19316_s27 + $0x1960] ss:$16 sps:$4 sm:$0xff]  }
 0x38a   : > { %11949 = vmatpush1.bf16.msra.mxu0 %v17294_v20  ;;  %13097 = vmatpush1.bf16.msra.mxu1 %v17297_v21  ;;  %v17382_v20 = vld [vmem:[%s19316_s27 + $0x1968] ss:$16 sps:$4 sm:$0xff]   ;;  %v17387_v21 = vld [vmem:[%s19316_s27 + $0x1984] ss:$16 sps:$4 sm:$0xff]  }
 0x38b   : > { %11950 = vmatprep.subr.bf16.mxu0 %v17302_v9  ;;  %13098 = vmatprep.subr.bf16.mxu1 %v17305_v23  ;;  %v17390_v9 = vld [vmem:[%s19316_s27 + $0x198c] ss:$16 sps:$4 sm:$0xff]   ;;  %v17385_v23 = vld [vmem:[%s19316_s27 + $0x1980] ss:$16 sps:$4 sm:$0xff]  }
 0x38e   : > { %11951 = vmatpush1.bf16.msra.mxu0 %v17300_v7  ;;  %13099 = vmatpush1.bf16.msra.mxu1 %v17303_v24  ;;  %v17388_v7 = vld [vmem:[%s19316_s27 + $0x1988] ss:$16 sps:$4 sm:$0xff]   ;;  %v17393_v24 = vld [vmem:[%s19316_s27 + $0x19a4] ss:$16 sps:$4 sm:$0xff]  }
 0x38f   : > { %11952 = vmatprep.subr.bf16.mxu0 %v17308_v10  ;;  %13100 = vmatprep.subr.bf16.mxu1 %v17311_v28  ;;  %v17396_v10 = vld [vmem:[%s19316_s27 + $0x19ac] ss:$16 sps:$4 sm:$0xff]   ;;  %v17391_v28 = vld [vmem:[%s19316_s27 + $0x19a0] ss:$16 sps:$4 sm:$0xff]  }
 0x392   : > { %11953 = vmatpush1.bf16.msra.mxu0 %v17306_v31  ;;  %13101 = vmatpush1.bf16.msra.mxu1 %v17309_v32  ;;  %v17394_v31 = vld [vmem:[%s19316_s27 + $0x19a8] ss:$16 sps:$4 sm:$0xff]   ;;  %v17399_v32 = vld [vmem:[%s19316_s27 + $0x19c4] ss:$16 sps:$4 sm:$0xff]  }
 0x393   : > { %11963 = vmatprep.subr.bf16.mxu0 %v17315_v34  ;;  %13111 = vmatprep.subr.bf16.mxu1 %v17318_v14  ;;  %v17402_v34 = vld [vmem:[%s19316_s27 + $0x19cc] ss:$16 sps:$4 sm:$0xff]   ;;  %v471_v14 = vcombine.high %v20221_v25, %v20221_v25  ;;  %v17403_v25 = vld [vmem:[%s19316_s27 + $0x19e0] ss:$16 sps:$4 sm:$0xff]  }
 0x395   : > { %11955 = vmatmul.mubr.bf16.vlgmr.msra.gmra.mrb[0].mxu0 %v685_v36  ;;  %13103 = vmatmul.mubr.bf16.vlgmr.msra.gmra.mrb[0].mxu1 %v685_v36  ;;  %v17400_v36 = vld [vmem:[%s19316_s27 + $0x19c8] ss:$16 sps:$4 sm:$0xff]  }
 0x396   : > { %11964 = vmatpush1.bf16.msra.mxu0 %v17313_v27  ;;  %13112 = vmatpush1.bf16.msra.mxu1 %v17316_v37  ;;  %v17405_v27 = vld [vmem:[%s19316_s27 + $0x19e4] ss:$16 sps:$4 sm:$0xff]   ;;  %v17408_v37 = vld [vmem:[%s19316_s27 + $0x19ec] ss:$16 sps:$4 sm:$0xff]  }
 0x397   : > { %11965 = vmatprep.subr.bf16.mxu0 %v17321_v38  ;;  %13113 = vmatprep.subr.bf16.mxu1 %v17324_v39  ;;  %v20302_v38 = vrot.slane %v471_v14, %v19393_v50  ;;  %v17406_v39 = vld [vmem:[%s19316_s27 + $0x19e8] ss:$16 sps:$4 sm:$0xff]  }
 0x398   : > { %11995 = vmatprep.mubr.bf16.mxu0 %v688_v40  ;;  %13143 = vmatprep.mubr.bf16.mxu1 %v688_v40  ;;  %v17411_v40 = vld [vmem:[%s19316_s27 + $0x1a04] ss:$16 sps:$4 sm:$0xff]   ;;  %v17484_v14 = vld [vmem:[%s19316_s27 + $0x1b88] ss:$16 sps:$4 sm:$0xff]  }
 0x39a   : > { %11966 = vmatpush1.bf16.msra.mxu0 %v17319_v22  ;;  %13114 = vmatpush1.bf16.msra.mxu1 %v17322_v29  ;;  %v17414_v22 = vld [vmem:[%s19316_s27 + $0x1a0c] ss:$16 sps:$4 sm:$0xff]   ;;  %v487_v29 = vcombine.high %v20302_v38, %v20302_v38 }
 0x39b   : > { %11967 = vmatprep.subr.bf16.mxu0 %v17327_v42  ;;  %13115 = vmatprep.subr.bf16.mxu1 %v17330_v45  ;;  %v687_v42 = vpack.c.bf16 %v20229_v30, %v20229_v30  ;;  %v17409_v45 = vld [vmem:[%s19316_s27 + $0x1a00] ss:$16 sps:$4 sm:$0xff]  }
 0x39c   : > { %v17415_v30 = vld [vmem:[%s19316_s27 + $0x1a20] ss:$16 sps:$4 sm:$0xff]  }
 0x39e   : > { %11968 = vmatpush1.bf16.msra.mxu0 %v17325_v46  ;;  %13116 = vmatpush1.bf16.msra.mxu1 %v17328_v26  ;;  %v17412_v46 = vld [vmem:[%s19316_s27 + $0x1a08] ss:$16 sps:$4 sm:$0xff]   ;;  %v17417_v26 = vld [vmem:[%s19316_s27 + $0x1a24] ss:$16 sps:$4 sm:$0xff]  }
 0x39f   : > { %11969 = vmatprep.subr.bf16.mxu0 %v17333_v47  ;;  %13117 = vmatprep.subr.bf16.mxu1 %v17336_v49  ;;  %v17420_v47 = vld [vmem:[%s19316_s27 + $0x1a2c] ss:$16 sps:$4 sm:$0xff]   ;;  %v690_v49 = vpack.c.bf16 %v487_v29, %v487_v29  ;;  %v17496_v29 = vld [vmem:[%s19316_s27 + $0x1bc8] ss:$16 sps:$4 sm:$0xff]  }
 0x3a2   : > { %11970 = vmatpush1.bf16.msra.mxu0 %v17331_v51  ;;  %13118 = vmatpush1.bf16.msra.mxu1 %v17334_v52  ;;  %v17418_v51 = vld [vmem:[%s19316_s27 + $0x1a28] ss:$16 sps:$4 sm:$0xff]   ;;  %v17423_v52 = vld [vmem:[%s19316_s27 + $0x1a44] ss:$16 sps:$4 sm:$0xff]  }
 0x3a3   : > { %11971 = vmatprep.subr.bf16.mxu0 %v17339_v33  ;;  %13119 = vmatprep.subr.bf16.mxu1 %v17342_v53  ;;  %v17426_v33 = vld [vmem:[%s19316_s27 + $0x1a4c] ss:$16 sps:$4 sm:$0xff]   ;;  %v17421_v53 = vld [vmem:[%s19316_s27 + $0x1a40] ss:$16 sps:$4 sm:$0xff]  }
 0x3a6   : > { %11972 = vmatpush1.bf16.msra.mxu0 %v17337_v54  ;;  %13120 = vmatpush1.bf16.msra.mxu1 %v17340_v55  ;;  %v17424_v54 = vld [vmem:[%s19316_s27 + $0x1a48] ss:$16 sps:$4 sm:$0xff]   ;;  %v17429_v55 = vld [vmem:[%s19316_s27 + $0x1a64] ss:$16 sps:$4 sm:$0xff]  }
 0x3a7   : > { %11973 = vmatprep.subr.bf16.mxu0 %v17345_v56  ;;  %13121 = vmatprep.subr.bf16.mxu1 %v17348_v43  ;;  %v17432_v56 = vld [vmem:[%s19316_s27 + $0x1a6c] ss:$16 sps:$4 sm:$0xff]   ;;  %v17427_v43 = vld [vmem:[%s19316_s27 + $0x1a60] ss:$16 sps:$4 sm:$0xff]  }
 0x3aa   : > { %11974 = vmatpush1.bf16.msra.mxu0 %v17343_v58  ;;  %13122 = vmatpush1.bf16.msra.mxu1 %v17346_v41  ;;  %v17430_v58 = vld [vmem:[%s19316_s27 + $0x1a68] ss:$16 sps:$4 sm:$0xff]   ;;  %v17435_v41 = vld [vmem:[%s19316_s27 + $0x1a84] ss:$16 sps:$4 sm:$0xff]  }
 0x3ab   : > { %11975 = vmatprep.subr.bf16.mxu0 %v17351_v60  ;;  %13123 = vmatprep.subr.bf16.mxu1 %v17354_v61  ;;  %v17438_v60 = vld [vmem:[%s19316_s27 + $0x1a8c] ss:$16 sps:$4 sm:$0xff]   ;;  %v17433_v61 = vld [vmem:[%s19316_s27 + $0x1a80] ss:$16 sps:$4 sm:$0xff]  }
 0x3ae   : > { %11976 = vmatpush1.bf16.msra.mxu0 %v17349_v62  ;;  %13124 = vmatpush1.bf16.msra.mxu1 %v17352_v0  ;;  %v17436_v62 = vld [vmem:[%s19316_s27 + $0x1a88] ss:$16 sps:$4 sm:$0xff]   ;;  %v17441_v0 = vld [vmem:[%s19316_s27 + $0x1aa4] ss:$16 sps:$4 sm:$0xff]  }
 0x3af   : > { %11977 = vmatprep.subr.bf16.mxu0 %v17357_v1  ;;  %13125 = vmatprep.subr.bf16.mxu1 %v17360_v2  ;;  %v17444_v1 = vld [vmem:[%s19316_s27 + $0x1aac] ss:$16 sps:$4 sm:$0xff]   ;;  %v17439_v2 = vld [vmem:[%s19316_s27 + $0x1aa0] ss:$16 sps:$4 sm:$0xff]  }
 0x3b2   : > { %11978 = vmatpush1.bf16.msra.mxu0 %v17355_v48  ;;  %13126 = vmatpush1.bf16.msra.mxu1 %v17358_v3  ;;  %v17442_v48 = vld [vmem:[%s19316_s27 + $0x1aa8] ss:$16 sps:$4 sm:$0xff]   ;;  %v17447_v3 = vld [vmem:[%s19316_s27 + $0x1ac4] ss:$16 sps:$4 sm:$0xff]  }
 0x3b3   : > { %11979 = vmatprep.subr.bf16.mxu0 %v17363_v4  ;;  %13127 = vmatprep.subr.bf16.mxu1 %v17366_v5  ;;  %v17450_v4 = vld [vmem:[%s19316_s27 + $0x1acc] ss:$16 sps:$4 sm:$0xff]   ;;  %v17445_v5 = vld [vmem:[%s19316_s27 + $0x1ac0] ss:$16 sps:$4 sm:$0xff]  }
 0x3b6   : > { %11980 = vmatpush1.bf16.msra.mxu0 %v17361_v6  ;;  %13128 = vmatpush1.bf16.msra.mxu1 %v17364_v59  ;;  %v17448_v6 = vld [vmem:[%s19316_s27 + $0x1ac8] ss:$16 sps:$4 sm:$0xff]   ;;  %v17453_v59 = vld [vmem:[%s19316_s27 + $0x1ae4] ss:$16 sps:$4 sm:$0xff]  }
 0x3b7   : > { %11981 = vmatprep.subr.bf16.mxu0 %v17369_v8  ;;  %13129 = vmatprep.subr.bf16.mxu1 %v17372_v57  ;;  %v17456_v8 = vld [vmem:[%s19316_s27 + $0x1aec] ss:$16 sps:$4 sm:$0xff]   ;;  %v17451_v57 = vld [vmem:[%s19316_s27 + $0x1ae0] ss:$16 sps:$4 sm:$0xff]  }
 0x3ba   : > { %11982 = vmatpush1.bf16.msra.mxu0 %v17367_v11  ;;  %13130 = vmatpush1.bf16.msra.mxu1 %v17370_v12  ;;  %v17454_v11 = vld [vmem:[%s19316_s27 + $0x1ae8] ss:$16 sps:$4 sm:$0xff]   ;;  %v17459_v12 = vld [vmem:[%s19316_s27 + $0x1b04] ss:$16 sps:$4 sm:$0xff]  }
 0x3bb   : > { %11983 = vmatprep.subr.bf16.mxu0 %v17375_v13  ;;  %13131 = vmatprep.subr.bf16.mxu1 %v17378_v15  ;;  %v17462_v13 = vld [vmem:[%s19316_s27 + $0x1b0c] ss:$16 sps:$4 sm:$0xff]   ;;  %v17457_v15 = vld [vmem:[%s19316_s27 + $0x1b00] ss:$16 sps:$4 sm:$0xff]  }
 0x3be   : > { %11984 = vmatpush1.bf16.msra.mxu0 %v17373_v16  ;;  %13132 = vmatpush1.bf16.msra.mxu1 %v17376_v17  ;;  %v17460_v16 = vld [vmem:[%s19316_s27 + $0x1b08] ss:$16 sps:$4 sm:$0xff]   ;;  %v17465_v17 = vld [vmem:[%s19316_s27 + $0x1b24] ss:$16 sps:$4 sm:$0xff]  }
 0x3bf   : > { %11985 = vmatprep.subr.bf16.mxu0 %v17381_v63  ;;  %13133 = vmatprep.subr.bf16.mxu1 %v17384_v18  ;;  %v17468_v63 = vld [vmem:[%s19316_s27 + $0x1b2c] ss:$16 sps:$4 sm:$0xff]   ;;  %v17463_v18 = vld [vmem:[%s19316_s27 + $0x1b20] ss:$16 sps:$4 sm:$0xff]  }
 0x3c2   : > { %11986 = vmatpush1.bf16.msra.mxu0 %v17379_v19  ;;  %13134 = vmatpush1.bf16.msra.mxu1 %v17382_v20  ;;  %v17466_v19 = vld [vmem:[%s19316_s27 + $0x1b28] ss:$16 sps:$4 sm:$0xff]   ;;  %v17471_v20 = vld [vmem:[%s19316_s27 + $0x1b44] ss:$16 sps:$4 sm:$0xff]  }
 0x3c3   : > { %11987 = vmatprep.subr.bf16.mxu0 %v17387_v21  ;;  %13135 = vmatprep.subr.bf16.mxu1 %v17390_v9  ;;  %v17474_v21 = vld [vmem:[%s19316_s27 + $0x1b4c] ss:$16 sps:$4 sm:$0xff]   ;;  %v17469_v9 = vld [vmem:[%s19316_s27 + $0x1b40] ss:$16 sps:$4 sm:$0xff]  }
 0x3c6   : > { %11988 = vmatpush1.bf16.msra.mxu0 %v17385_v23  ;;  %13136 = vmatpush1.bf16.msra.mxu1 %v17388_v7  ;;  %v17472_v23 = vld [vmem:[%s19316_s27 + $0x1b48] ss:$16 sps:$4 sm:$0xff]   ;;  %v17477_v7 = vld [vmem:[%s19316_s27 + $0x1b64] ss:$16 sps:$4 sm:$0xff]  }
 0x3c7   : > { %11989 = vmatprep.subr.bf16.mxu0 %v17393_v24  ;;  %13137 = vmatprep.subr.bf16.mxu1 %v17396_v10  ;;  %v17480_v24 = vld [vmem:[%s19316_s27 + $0x1b6c] ss:$16 sps:$4 sm:$0xff]   ;;  %v17475_v10 = vld [vmem:[%s19316_s27 + $0x1b60] ss:$16 sps:$4 sm:$0xff]  }
 0x3ca   : > { %11990 = vmatpush1.bf16.msra.mxu0 %v17391_v28  ;;  %13138 = vmatpush1.bf16.msra.mxu1 %v17394_v31  ;;  %v17478_v28 = vld [vmem:[%s19316_s27 + $0x1b68] ss:$16 sps:$4 sm:$0xff]   ;;  %v17483_v31 = vld [vmem:[%s19316_s27 + $0x1b84] ss:$16 sps:$4 sm:$0xff]  }
 0x3cb   : > { %11991 = vmatprep.subr.bf16.mxu0 %v17399_v32  ;;  %13139 = vmatprep.subr.bf16.mxu1 %v17402_v34  ;;  %v17486_v32 = vld [vmem:[%s19316_s27 + $0x1b8c] ss:$16 sps:$4 sm:$0xff]   ;;  %v17481_v34 = vld [vmem:[%s19316_s27 + $0x1b80] ss:$16 sps:$4 sm:$0xff]  }
 0x3ce   : > { %11992 = vmatpush1.bf16.msra.mxu0 %v17397_v35  ;;  %13140 = vmatpush1.bf16.msra.mxu1 %v17400_v36  ;;  %v17489_v35 = vld [vmem:[%s19316_s27 + $0x1ba4] ss:$16 sps:$4 sm:$0xff]   ;;  %v17492_v36 = vld [vmem:[%s19316_s27 + $0x1bac] ss:$16 sps:$4 sm:$0xff]  }
 0x3cf   : > { %11993 = vmatprep.subr.bf16.mxu0 %v17405_v27  ;;  %13141 = vmatprep.subr.bf16.mxu1 %v17408_v37  ;;  %v17487_v27 = vld [vmem:[%s19316_s27 + $0x1ba0] ss:$16 sps:$4 sm:$0xff]   ;;  %v17490_v37 = vld [vmem:[%s19316_s27 + $0x1ba8] ss:$16 sps:$4 sm:$0xff]  }
 0x3d2   : > { %11994 = vmatpush1.bf16.msra.mxu0 %v17403_v25  ;;  %13142 = vmatpush1.bf16.msra.mxu1 %v17406_v39  ;;  %v17495_v25 = vld [vmem:[%s19316_s27 + $0x1bc4] ss:$16 sps:$4 sm:$0xff]   ;;  %v17498_v39 = vld [vmem:[%s19316_s27 + $0x1bcc] ss:$16 sps:$4 sm:$0xff]  }
 0x3d3   : > { %12004 = vmatprep.subr.bf16.mxu0 %v17411_v40  ;;  %13152 = vmatprep.subr.bf16.mxu1 %v17414_v22  ;;  %v20369_v40 = vld [vmem:[%s19337_s11 + $0x38] sm:$0xff] }
 0x3d4   : > { %v17493_v22 = vld [vmem:[%s19316_s27 + $0x1bc0] ss:$16 sps:$4 sm:$0xff]  }
 0x3d5   : > { %11996 = vmatmul.mubr.bf16.vlgmr.msra.gmra.mrb[0].mxu0 %v687_v42  ;;  %13144 = vmatmul.mubr.bf16.vlgmr.msra.gmra.mrb[0].mxu1 %v687_v42  ;;  %v17501_v42 = vld [vmem:[%s19316_s27 + $0x1be4] ss:$16 sps:$4 sm:$0xff]  }
 0x3d6   : > { %12005 = vmatpush1.bf16.msra.mxu0 %v17409_v45  ;;  %13153 = vmatpush1.bf16.msra.mxu1 %v17412_v46  ;;  %v17504_v45 = vld [vmem:[%s19316_s27 + $0x1bec] ss:$16 sps:$4 sm:$0xff]   ;;  %v20377_v46 = vrot.slane %v20369_v40, %v19393_v50 }
 0x3d7   : > { %12006 = vmatprep.subr.bf16.mxu0 %v17417_v26  ;;  %13154 = vmatprep.subr.bf16.mxu1 %v17420_v47  ;;  %v17499_v26 = vld [vmem:[%s19316_s27 + $0x1be0] ss:$16 sps:$4 sm:$0xff]   ;;  %v17502_v47 = vld [vmem:[%s19316_s27 + $0x1be8] ss:$16 sps:$4 sm:$0xff]  }
 0x3d8   : > { %12036 = vmatprep.mubr.bf16.mxu0 %v690_v49  ;;  %13184 = vmatprep.mubr.bf16.mxu1 %v690_v49  ;;  %v17508_v49 = vld [vmem:[%s19316_s27 + $0x1c04] ss:$16 sps:$4 sm:$0xff]  }
 0x3da   : > { %12007 = vmatpush1.bf16.msra.mxu0 %v17415_v30  ;;  %13155 = vmatpush1.bf16.msra.mxu1 %v17418_v51  ;;  %v17511_v30 = vld [vmem:[%s19316_s27 + $0x1c0c] ss:$16 sps:$4 sm:$0xff]   ;;  %v503_v51 = vcombine.high %v20377_v46, %v20377_v46 }
 0x3db   : > { %12008 = vmatprep.subr.bf16.mxu0 %v17423_v52  ;;  %13156 = vmatprep.subr.bf16.mxu1 %v17426_v33  ;;  %v689_v52 = vpack.c.bf16 %v20302_v38, %v20302_v38  ;;  %v17506_v33 = vld [vmem:[%s19316_s27 + $0x1c00] ss:$16 sps:$4 sm:$0xff]  }
 0x3dc   : > { %v17512_v38 = vld [vmem:[%s19316_s27 + $0x1c20] ss:$16 sps:$4 sm:$0xff]  }
 0x3de   : > { %12009 = vmatpush1.bf16.msra.mxu0 %v17421_v53  ;;  %13157 = vmatpush1.bf16.msra.mxu1 %v17424_v54  ;;  %v17509_v53 = vld [vmem:[%s19316_s27 + $0x1c08] ss:$16 sps:$4 sm:$0xff]   ;;  %v17514_v54 = vld [vmem:[%s19316_s27 + $0x1c24] ss:$16 sps:$4 sm:$0xff]  }
 0x3df   : > { %12010 = vmatprep.subr.bf16.mxu0 %v17429_v55  ;;  %13158 = vmatprep.subr.bf16.mxu1 %v17432_v56  ;;  %v17517_v55 = vld [vmem:[%s19316_s27 + $0x1c2c] ss:$16 sps:$4 sm:$0xff]   ;;  %v692_v56 = vpack.c.bf16 %v503_v51, %v503_v51  ;;  %v17590_v51 = vld [vmem:[%s19316_s27 + $0x1dc0] ss:$16 sps:$4 sm:$0xff]  }
 0x3e2   : > { %12011 = vmatpush1.bf16.msra.mxu0 %v17427_v43  ;;  %13159 = vmatpush1.bf16.msra.mxu1 %v17430_v58  ;;  %v17515_v43 = vld [vmem:[%s19316_s27 + $0x1c28] ss:$16 sps:$4 sm:$0xff]   ;;  %v17520_v58 = vld [vmem:[%s19316_s27 + $0x1c44] ss:$16 sps:$4 sm:$0xff]  }
 0x3e3   : > { %12012 = vmatprep.subr.bf16.mxu0 %v17435_v41  ;;  %13160 = vmatprep.subr.bf16.mxu1 %v17438_v60  ;;  %v17523_v41 = vld [vmem:[%s19316_s27 + $0x1c4c] ss:$16 sps:$4 sm:$0xff]   ;;  %v17518_v60 = vld [vmem:[%s19316_s27 + $0x1c40] ss:$16 sps:$4 sm:$0xff]  }
 0x3e6   : > { %12013 = vmatpush1.bf16.msra.mxu0 %v17433_v61  ;;  %13161 = vmatpush1.bf16.msra.mxu1 %v17436_v62  ;;  %v17521_v61 = vld [vmem:[%s19316_s27 + $0x1c48] ss:$16 sps:$4 sm:$0xff]   ;;  %v17526_v62 = vld [vmem:[%s19316_s27 + $0x1c64] ss:$16 sps:$4 sm:$0xff]  }
 0x3e7   : > { %12014 = vmatprep.subr.bf16.mxu0 %v17441_v0  ;;  %13162 = vmatprep.subr.bf16.mxu1 %v17444_v1  ;;  %v17529_v0 = vld [vmem:[%s19316_s27 + $0x1c6c] ss:$16 sps:$4 sm:$0xff]   ;;  %v17524_v1 = vld [vmem:[%s19316_s27 + $0x1c60] ss:$16 sps:$4 sm:$0xff]  }
 0x3ea   : > { %12015 = vmatpush1.bf16.msra.mxu0 %v17439_v2  ;;  %13163 = vmatpush1.bf16.msra.mxu1 %v17442_v48  ;;  %v17527_v2 = vld [vmem:[%s19316_s27 + $0x1c68] ss:$16 sps:$4 sm:$0xff]   ;;  %v17532_v48 = vld [vmem:[%s19316_s27 + $0x1c84] ss:$16 sps:$4 sm:$0xff]  }
 0x3eb   : > { %12016 = vmatprep.subr.bf16.mxu0 %v17447_v3  ;;  %13164 = vmatprep.subr.bf16.mxu1 %v17450_v4  ;;  %v17535_v3 = vld [vmem:[%s19316_s27 + $0x1c8c] ss:$16 sps:$4 sm:$0xff]   ;;  %v17530_v4 = vld [vmem:[%s19316_s27 + $0x1c80] ss:$16 sps:$4 sm:$0xff]  }
 0x3ee   : > { %12017 = vmatpush1.bf16.msra.mxu0 %v17445_v5  ;;  %13165 = vmatpush1.bf16.msra.mxu1 %v17448_v6  ;;  %v17533_v5 = vld [vmem:[%s19316_s27 + $0x1c88] ss:$16 sps:$4 sm:$0xff]   ;;  %v17538_v6 = vld [vmem:[%s19316_s27 + $0x1ca4] ss:$16 sps:$4 sm:$0xff]  }
 0x3ef   : > { %12018 = vmatprep.subr.bf16.mxu0 %v17453_v59  ;;  %13166 = vmatprep.subr.bf16.mxu1 %v17456_v8  ;;  %v17541_v59 = vld [vmem:[%s19316_s27 + $0x1cac] ss:$16 sps:$4 sm:$0xff]   ;;  %v17536_v8 = vld [vmem:[%s19316_s27 + $0x1ca0] ss:$16 sps:$4 sm:$0xff]  }
 0x3f2   : > { %12019 = vmatpush1.bf16.msra.mxu0 %v17451_v57  ;;  %13167 = vmatpush1.bf16.msra.mxu1 %v17454_v11  ;;  %v17539_v57 = vld [vmem:[%s19316_s27 + $0x1ca8] ss:$16 sps:$4 sm:$0xff]   ;;  %v17544_v11 = vld [vmem:[%s19316_s27 + $0x1cc4] ss:$16 sps:$4 sm:$0xff]  }
 0x3f3   : > { %12020 = vmatprep.subr.bf16.mxu0 %v17459_v12  ;;  %13168 = vmatprep.subr.bf16.mxu1 %v17462_v13  ;;  %v17547_v12 = vld [vmem:[%s19316_s27 + $0x1ccc] ss:$16 sps:$4 sm:$0xff]   ;;  %v17542_v13 = vld [vmem:[%s19316_s27 + $0x1cc0] ss:$16 sps:$4 sm:$0xff]  }
 0x3f6   : > { %12021 = vmatpush1.bf16.msra.mxu0 %v17457_v15  ;;  %13169 = vmatpush1.bf16.msra.mxu1 %v17460_v16  ;;  %v17545_v15 = vld [vmem:[%s19316_s27 + $0x1cc8] ss:$16 sps:$4 sm:$0xff]   ;;  %v17550_v16 = vld [vmem:[%s19316_s27 + $0x1ce4] ss:$16 sps:$4 sm:$0xff]  }
 0x3f7   : > { %12022 = vmatprep.subr.bf16.mxu0 %v17465_v17  ;;  %13170 = vmatprep.subr.bf16.mxu1 %v17468_v63  ;;  %v17553_v17 = vld [vmem:[%s19316_s27 + $0x1cec] ss:$16 sps:$4 sm:$0xff]   ;;  %v17548_v63 = vld [vmem:[%s19316_s27 + $0x1ce0] ss:$16 sps:$4 sm:$0xff]  }
 0x3fa   : > { %12023 = vmatpush1.bf16.msra.mxu0 %v17463_v18  ;;  %13171 = vmatpush1.bf16.msra.mxu1 %v17466_v19  ;;  %v17551_v18 = vld [vmem:[%s19316_s27 + $0x1ce8] ss:$16 sps:$4 sm:$0xff]   ;;  %v17556_v19 = vld [vmem:[%s19316_s27 + $0x1d04] ss:$16 sps:$4 sm:$0xff]  }
 0x3fb   : > { %12024 = vmatprep.subr.bf16.mxu0 %v17471_v20  ;;  %13172 = vmatprep.subr.bf16.mxu1 %v17474_v21  ;;  %v17559_v20 = vld [vmem:[%s19316_s27 + $0x1d0c] ss:$16 sps:$4 sm:$0xff]   ;;  %v17554_v21 = vld [vmem:[%s19316_s27 + $0x1d00] ss:$16 sps:$4 sm:$0xff]  }
 0x3fe   : > { %12025 = vmatpush1.bf16.msra.mxu0 %v17469_v9  ;;  %13173 = vmatpush1.bf16.msra.mxu1 %v17472_v23  ;;  %v17557_v9 = vld [vmem:[%s19316_s27 + $0x1d08] ss:$16 sps:$4 sm:$0xff]   ;;  %v17562_v23 = vld [vmem:[%s19316_s27 + $0x1d24] ss:$16 sps:$4 sm:$0xff]  }
 0x3ff   : > { %12026 = vmatprep.subr.bf16.mxu0 %v17477_v7  ;;  %13174 = vmatprep.subr.bf16.mxu1 %v17480_v24  ;;  %v17565_v7 = vld [vmem:[%s19316_s27 + $0x1d2c] ss:$16 sps:$4 sm:$0xff]   ;;  %v17560_v24 = vld [vmem:[%s19316_s27 + $0x1d20] ss:$16 sps:$4 sm:$0xff]  }
 0x402   : > { %12027 = vmatpush1.bf16.msra.mxu0 %v17475_v10  ;;  %13175 = vmatpush1.bf16.msra.mxu1 %v17478_v28  ;;  %v17563_v10 = vld [vmem:[%s19316_s27 + $0x1d28] ss:$16 sps:$4 sm:$0xff]   ;;  %v17568_v28 = vld [vmem:[%s19316_s27 + $0x1d44] ss:$16 sps:$4 sm:$0xff]  }
 0x403   : > { %12028 = vmatprep.subr.bf16.mxu0 %v17483_v31  ;;  %13176 = vmatprep.subr.bf16.mxu1 %v17486_v32  ;;  %v17571_v31 = vld [vmem:[%s19316_s27 + $0x1d4c] ss:$16 sps:$4 sm:$0xff]   ;;  %v17566_v32 = vld [vmem:[%s19316_s27 + $0x1d40] ss:$16 sps:$4 sm:$0xff]  }
 0x406   : > { %12029 = vmatpush1.bf16.msra.mxu0 %v17481_v34  ;;  %13177 = vmatpush1.bf16.msra.mxu1 %v17484_v14  ;;  %v17569_v34 = vld [vmem:[%s19316_s27 + $0x1d48] ss:$16 sps:$4 sm:$0xff]   ;;  %v17574_v14 = vld [vmem:[%s19316_s27 + $0x1d64] ss:$16 sps:$4 sm:$0xff]  }
 0x407   : > { %12030 = vmatprep.subr.bf16.mxu0 %v17489_v35  ;;  %13178 = vmatprep.subr.bf16.mxu1 %v17492_v36  ;;  %v17577_v35 = vld [vmem:[%s19316_s27 + $0x1d6c] ss:$16 sps:$4 sm:$0xff]   ;;  %v17572_v36 = vld [vmem:[%s19316_s27 + $0x1d60] ss:$16 sps:$4 sm:$0xff]  }
 0x40a   : > { %12031 = vmatpush1.bf16.msra.mxu0 %v17487_v27  ;;  %13179 = vmatpush1.bf16.msra.mxu1 %v17490_v37  ;;  %v17575_v27 = vld [vmem:[%s19316_s27 + $0x1d68] ss:$16 sps:$4 sm:$0xff]   ;;  %v17580_v37 = vld [vmem:[%s19316_s27 + $0x1d84] ss:$16 sps:$4 sm:$0xff]  }
 0x40b   : > { %12032 = vmatprep.subr.bf16.mxu0 %v17495_v25  ;;  %13180 = vmatprep.subr.bf16.mxu1 %v17498_v39  ;;  %v17583_v25 = vld [vmem:[%s19316_s27 + $0x1d8c] ss:$16 sps:$4 sm:$0xff]   ;;  %v17578_v39 = vld [vmem:[%s19316_s27 + $0x1d80] ss:$16 sps:$4 sm:$0xff]  }
 0x40e   : > { %12033 = vmatpush1.bf16.msra.mxu0 %v17493_v22  ;;  %13181 = vmatpush1.bf16.msra.mxu1 %v17496_v29  ;;  %v17581_v22 = vld [vmem:[%s19316_s27 + $0x1d88] ss:$16 sps:$4 sm:$0xff]   ;;  %v17586_v29 = vld [vmem:[%s19316_s27 + $0x1da4] ss:$16 sps:$4 sm:$0xff]  }
 0x40f   : > { %12034 = vmatprep.subr.bf16.mxu0 %v17501_v42  ;;  %13182 = vmatprep.subr.bf16.mxu1 %v17504_v45  ;;  %v17589_v42 = vld [vmem:[%s19316_s27 + $0x1dac] ss:$16 sps:$4 sm:$0xff]   ;;  %v17584_v45 = vld [vmem:[%s19316_s27 + $0x1da0] ss:$16 sps:$4 sm:$0xff]  }
 0x412   : > { %12035 = vmatpush1.bf16.msra.mxu0 %v17499_v26  ;;  %13183 = vmatpush1.bf16.msra.mxu1 %v17502_v47  ;;  %v17587_v26 = vld [vmem:[%s19316_s27 + $0x1da8] ss:$16 sps:$4 sm:$0xff]   ;;  %v17592_v47 = vld [vmem:[%s19316_s27 + $0x1dc4] ss:$16 sps:$4 sm:$0xff]  }
 0x413   : > { %12045 = vmatprep.subr.bf16.mxu0 %v17508_v49  ;;  %13193 = vmatprep.subr.bf16.mxu1 %v17511_v30  ;;  %v17595_v49 = vld [vmem:[%s19316_s27 + $0x1dcc] ss:$16 sps:$4 sm:$0xff]   ;;  %v488_v30 = vcombine.high %v20369_v40, %v20369_v40  ;;  %v17596_v40 = vld [vmem:[%s19316_s27 + $0x1de0] ss:$16 sps:$4 sm:$0xff]  }
 0x415   : > { %12037 = vmatmul.mubr.bf16.vlgmr.msra.gmra.mrb[0].mxu0 %v689_v52  ;;  %13185 = vmatmul.mubr.bf16.vlgmr.msra.gmra.mrb[0].mxu1 %v689_v52  ;;  %v17593_v52 = vld [vmem:[%s19316_s27 + $0x1dc8] ss:$16 sps:$4 sm:$0xff]  }
 0x416   : > { %12046 = vmatpush1.bf16.msra.mxu0 %v17506_v33  ;;  %13194 = vmatpush1.bf16.msra.mxu1 %v17509_v53  ;;  %v17598_v33 = vld [vmem:[%s19316_s27 + $0x1de4] ss:$16 sps:$4 sm:$0xff]   ;;  %v17601_v53 = vld [vmem:[%s19316_s27 + $0x1dec] ss:$16 sps:$4 sm:$0xff]  }
 0x417   : > { %12047 = vmatprep.subr.bf16.mxu0 %v17514_v54  ;;  %13195 = vmatprep.subr.bf16.mxu1 %v17517_v55  ;;  %v20450_v54 = vrot.slane %v488_v30, %v19393_v50  ;;  %v17599_v55 = vld [vmem:[%s19316_s27 + $0x1de8] ss:$16 sps:$4 sm:$0xff]  }
 0x418   : > { %12077 = vmatprep.mubr.bf16.mxu0 %v692_v56  ;;  %13225 = vmatprep.mubr.bf16.mxu1 %v692_v56  ;;  %v17604_v56 = vld [vmem:[%s19316_s27 + $0x1e04] ss:$16 sps:$4 sm:$0xff]   ;;  %v17677_v30 = vld [vmem:[%s19316_s27 + $0x1f88] ss:$16 sps:$4 sm:$0xff]  }
 0x41a   : > { %12048 = vmatpush1.bf16.msra.mxu0 %v17512_v38  ;;  %13196 = vmatpush1.bf16.msra.mxu1 %v17515_v43  ;;  %v17607_v38 = vld [vmem:[%s19316_s27 + $0x1e0c] ss:$16 sps:$4 sm:$0xff]   ;;  %v504_v43 = vcombine.high %v20450_v54, %v20450_v54 }
 0x41b   : > { %12049 = vmatprep.subr.bf16.mxu0 %v17520_v58  ;;  %13197 = vmatprep.subr.bf16.mxu1 %v17523_v41  ;;  %v691_v58 = vpack.c.bf16 %v20377_v46, %v20377_v46  ;;  %v17602_v41 = vld [vmem:[%s19316_s27 + $0x1e00] ss:$16 sps:$4 sm:$0xff]  }
 0x41c   : > { %v17608_v46 = vld [vmem:[%s19316_s27 + $0x1e20] ss:$16 sps:$4 sm:$0xff]  }
 0x41e   : > { %12050 = vmatpush1.bf16.msra.mxu0 %v17518_v60  ;;  %13198 = vmatpush1.bf16.msra.mxu1 %v17521_v61  ;;  %v17605_v60 = vld [vmem:[%s19316_s27 + $0x1e08] ss:$16 sps:$4 sm:$0xff]   ;;  %v17610_v61 = vld [vmem:[%s19316_s27 + $0x1e24] ss:$16 sps:$4 sm:$0xff]  }
 0x41f   : > { %12051 = vmatprep.subr.bf16.mxu0 %v17526_v62  ;;  %13199 = vmatprep.subr.bf16.mxu1 %v17529_v0  ;;  %v17613_v62 = vld [vmem:[%s19316_s27 + $0x1e2c] ss:$16 sps:$4 sm:$0xff]   ;;  %v694_v0 = vpack.c.bf16 %v504_v43, %v504_v43  ;;  %v17689_v43 = vld [vmem:[%s19316_s27 + $0x1fc8] ss:$16 sps:$4 sm:$0xff]  }
 0x422   : > { %12052 = vmatpush1.bf16.msra.mxu0 %v17524_v1  ;;  %13200 = vmatpush1.bf16.msra.mxu1 %v17527_v2  ;;  %v17611_v1 = vld [vmem:[%s19316_s27 + $0x1e28] ss:$16 sps:$4 sm:$0xff]   ;;  %v17616_v2 = vld [vmem:[%s19316_s27 + $0x1e44] ss:$16 sps:$4 sm:$0xff]  }
 0x423   : > { %12053 = vmatprep.subr.bf16.mxu0 %v17532_v48  ;;  %13201 = vmatprep.subr.bf16.mxu1 %v17535_v3  ;;  %v17619_v48 = vld [vmem:[%s19316_s27 + $0x1e4c] ss:$16 sps:$4 sm:$0xff]   ;;  %v17614_v3 = vld [vmem:[%s19316_s27 + $0x1e40] ss:$16 sps:$4 sm:$0xff]  }
 0x426   : > { %12054 = vmatpush1.bf16.msra.mxu0 %v17530_v4  ;;  %13202 = vmatpush1.bf16.msra.mxu1 %v17533_v5  ;;  %v17617_v4 = vld [vmem:[%s19316_s27 + $0x1e48] ss:$16 sps:$4 sm:$0xff]   ;;  %v17622_v5 = vld [vmem:[%s19316_s27 + $0x1e64] ss:$16 sps:$4 sm:$0xff]  }
 0x427   : > { %12055 = vmatprep.subr.bf16.mxu0 %v17538_v6  ;;  %13203 = vmatprep.subr.bf16.mxu1 %v17541_v59  ;;  %v17625_v6 = vld [vmem:[%s19316_s27 + $0x1e6c] ss:$16 sps:$4 sm:$0xff]   ;;  %v17620_v59 = vld [vmem:[%s19316_s27 + $0x1e60] ss:$16 sps:$4 sm:$0xff]  }
 0x42a   : > { %12056 = vmatpush1.bf16.msra.mxu0 %v17536_v8  ;;  %13204 = vmatpush1.bf16.msra.mxu1 %v17539_v57  ;;  %v17623_v8 = vld [vmem:[%s19316_s27 + $0x1e68] ss:$16 sps:$4 sm:$0xff]   ;;  %v17628_v57 = vld [vmem:[%s19316_s27 + $0x1e84] ss:$16 sps:$4 sm:$0xff]  }
 0x42b   : > { %12057 = vmatprep.subr.bf16.mxu0 %v17544_v11  ;;  %13205 = vmatprep.subr.bf16.mxu1 %v17547_v12  ;;  %v17631_v11 = vld [vmem:[%s19316_s27 + $0x1e8c] ss:$16 sps:$4 sm:$0xff]   ;;  %v17626_v12 = vld [vmem:[%s19316_s27 + $0x1e80] ss:$16 sps:$4 sm:$0xff]  }
 0x42e   : > { %12058 = vmatpush1.bf16.msra.mxu0 %v17542_v13  ;;  %13206 = vmatpush1.bf16.msra.mxu1 %v17545_v15  ;;  %v17629_v13 = vld [vmem:[%s19316_s27 + $0x1e88] ss:$16 sps:$4 sm:$0xff]   ;;  %v17634_v15 = vld [vmem:[%s19316_s27 + $0x1ea4] ss:$16 sps:$4 sm:$0xff]  }
 0x42f   : > { %12059 = vmatprep.subr.bf16.mxu0 %v17550_v16  ;;  %13207 = vmatprep.subr.bf16.mxu1 %v17553_v17  ;;  %v17637_v16 = vld [vmem:[%s19316_s27 + $0x1eac] ss:$16 sps:$4 sm:$0xff]   ;;  %v17632_v17 = vld [vmem:[%s19316_s27 + $0x1ea0] ss:$16 sps:$4 sm:$0xff]  }
 0x432   : > { %12060 = vmatpush1.bf16.msra.mxu0 %v17548_v63  ;;  %13208 = vmatpush1.bf16.msra.mxu1 %v17551_v18  ;;  %v17635_v63 = vld [vmem:[%s19316_s27 + $0x1ea8] ss:$16 sps:$4 sm:$0xff]   ;;  %v17640_v18 = vld [vmem:[%s19316_s27 + $0x1ec4] ss:$16 sps:$4 sm:$0xff]  }
 0x433   : > { %12061 = vmatprep.subr.bf16.mxu0 %v17556_v19  ;;  %13209 = vmatprep.subr.bf16.mxu1 %v17559_v20  ;;  %v17643_v19 = vld [vmem:[%s19316_s27 + $0x1ecc] ss:$16 sps:$4 sm:$0xff]   ;;  %v17638_v20 = vld [vmem:[%s19316_s27 + $0x1ec0] ss:$16 sps:$4 sm:$0xff]  }
 0x436   : > { %12062 = vmatpush1.bf16.msra.mxu0 %v17554_v21  ;;  %13210 = vmatpush1.bf16.msra.mxu1 %v17557_v9  ;;  %v17641_v21 = vld [vmem:[%s19316_s27 + $0x1ec8] ss:$16 sps:$4 sm:$0xff]   ;;  %v17646_v9 = vld [vmem:[%s19316_s27 + $0x1ee4] ss:$16 sps:$4 sm:$0xff]  }
 0x437   : > { %12063 = vmatprep.subr.bf16.mxu0 %v17562_v23  ;;  %13211 = vmatprep.subr.bf16.mxu1 %v17565_v7  ;;  %v17649_v23 = vld [vmem:[%s19316_s27 + $0x1eec] ss:$16 sps:$4 sm:$0xff]   ;;  %v17644_v7 = vld [vmem:[%s19316_s27 + $0x1ee0] ss:$16 sps:$4 sm:$0xff]  }
 0x43a   : > { %12064 = vmatpush1.bf16.msra.mxu0 %v17560_v24  ;;  %13212 = vmatpush1.bf16.msra.mxu1 %v17563_v10  ;;  %v17647_v24 = vld [vmem:[%s19316_s27 + $0x1ee8] ss:$16 sps:$4 sm:$0xff]   ;;  %v17652_v10 = vld [vmem:[%s19316_s27 + $0x1f04] ss:$16 sps:$4 sm:$0xff]  }
 0x43b   : > { %12065 = vmatprep.subr.bf16.mxu0 %v17568_v28  ;;  %13213 = vmatprep.subr.bf16.mxu1 %v17571_v31  ;;  %v17655_v28 = vld [vmem:[%s19316_s27 + $0x1f0c] ss:$16 sps:$4 sm:$0xff]   ;;  %v17650_v31 = vld [vmem:[%s19316_s27 + $0x1f00] ss:$16 sps:$4 sm:$0xff]  }
 0x43e   : > { %12066 = vmatpush1.bf16.msra.mxu0 %v17566_v32  ;;  %13214 = vmatpush1.bf16.msra.mxu1 %v17569_v34  ;;  %v17653_v32 = vld [vmem:[%s19316_s27 + $0x1f08] ss:$16 sps:$4 sm:$0xff]   ;;  %v17658_v34 = vld [vmem:[%s19316_s27 + $0x1f24] ss:$16 sps:$4 sm:$0xff]  }
 0x43f   : > { %12067 = vmatprep.subr.bf16.mxu0 %v17574_v14  ;;  %13215 = vmatprep.subr.bf16.mxu1 %v17577_v35  ;;  %v17661_v14 = vld [vmem:[%s19316_s27 + $0x1f2c] ss:$16 sps:$4 sm:$0xff]   ;;  %v17656_v35 = vld [vmem:[%s19316_s27 + $0x1f20] ss:$16 sps:$4 sm:$0xff]  }
 0x442   : > { %12068 = vmatpush1.bf16.msra.mxu0 %v17572_v36  ;;  %13216 = vmatpush1.bf16.msra.mxu1 %v17575_v27  ;;  %v17659_v36 = vld [vmem:[%s19316_s27 + $0x1f28] ss:$16 sps:$4 sm:$0xff]   ;;  %v17664_v27 = vld [vmem:[%s19316_s27 + $0x1f44] ss:$16 sps:$4 sm:$0xff]  }
 0x443   : > { %12069 = vmatprep.subr.bf16.mxu0 %v17580_v37  ;;  %13217 = vmatprep.subr.bf16.mxu1 %v17583_v25  ;;  %v17667_v37 = vld [vmem:[%s19316_s27 + $0x1f4c] ss:$16 sps:$4 sm:$0xff]   ;;  %v17662_v25 = vld [vmem:[%s19316_s27 + $0x1f40] ss:$16 sps:$4 sm:$0xff]  }
 0x446   : > { %12070 = vmatpush1.bf16.msra.mxu0 %v17578_v39  ;;  %13218 = vmatpush1.bf16.msra.mxu1 %v17581_v22  ;;  %v17665_v39 = vld [vmem:[%s19316_s27 + $0x1f48] ss:$16 sps:$4 sm:$0xff]   ;;  %v17670_v22 = vld [vmem:[%s19316_s27 + $0x1f64] ss:$16 sps:$4 sm:$0xff]  }
 0x447   : > { %12071 = vmatprep.subr.bf16.mxu0 %v17586_v29  ;;  %13219 = vmatprep.subr.bf16.mxu1 %v17589_v42  ;;  %v17673_v29 = vld [vmem:[%s19316_s27 + $0x1f6c] ss:$16 sps:$4 sm:$0xff]   ;;  %v17668_v42 = vld [vmem:[%s19316_s27 + $0x1f60] ss:$16 sps:$4 sm:$0xff]  }
 0x44a   : > { %12072 = vmatpush1.bf16.msra.mxu0 %v17584_v45  ;;  %13220 = vmatpush1.bf16.msra.mxu1 %v17587_v26  ;;  %v17671_v45 = vld [vmem:[%s19316_s27 + $0x1f68] ss:$16 sps:$4 sm:$0xff]   ;;  %v17676_v26 = vld [vmem:[%s19316_s27 + $0x1f84] ss:$16 sps:$4 sm:$0xff]  }
 0x44b   : > { %12073 = vmatprep.subr.bf16.mxu0 %v17592_v47  ;;  %13221 = vmatprep.subr.bf16.mxu1 %v17595_v49  ;;  %v17679_v47 = vld [vmem:[%s19316_s27 + $0x1f8c] ss:$16 sps:$4 sm:$0xff]   ;;  %v17674_v49 = vld [vmem:[%s19316_s27 + $0x1f80] ss:$16 sps:$4 sm:$0xff]  }
 0x44e   : > { %12074 = vmatpush1.bf16.msra.mxu0 %v17590_v51  ;;  %13222 = vmatpush1.bf16.msra.mxu1 %v17593_v52  ;;  %v17682_v51 = vld [vmem:[%s19316_s27 + $0x1fa4] ss:$16 sps:$4 sm:$0xff]   ;;  %v17685_v52 = vld [vmem:[%s19316_s27 + $0x1fac] ss:$16 sps:$4 sm:$0xff]  }
 0x44f   : > { %12075 = vmatprep.subr.bf16.mxu0 %v17598_v33  ;;  %13223 = vmatprep.subr.bf16.mxu1 %v17601_v53  ;;  %v17680_v33 = vld [vmem:[%s19316_s27 + $0x1fa0] ss:$16 sps:$4 sm:$0xff]   ;;  %v17683_v53 = vld [vmem:[%s19316_s27 + $0x1fa8] ss:$16 sps:$4 sm:$0xff]  }
 0x452   : > { %12076 = vmatpush1.bf16.msra.mxu0 %v17596_v40  ;;  %13224 = vmatpush1.bf16.msra.mxu1 %v17599_v55  ;;  %v17688_v40 = vld [vmem:[%s19316_s27 + $0x1fc4] ss:$16 sps:$4 sm:$0xff]   ;;  %v17691_v55 = vld [vmem:[%s19316_s27 + $0x1fcc] ss:$16 sps:$4 sm:$0xff]  }
 0x453   : > { %12086 = vmatprep.subr.bf16.mxu0 %v17604_v56  ;;  %13234 = vmatprep.subr.bf16.mxu1 %v17607_v38  ;;  %v20517_v56 = vld [vmem:[%s19337_s11 + $0x40] sm:$0xff]  ;;  %v17686_v38 = vld [vmem:[%s19316_s27 + $0x1fc0] ss:$16 sps:$4 sm:$0xff]  }
 0x455   : > { %12078 = vmatmul.mubr.bf16.vlgmr.msra.gmra.mrb[0].mxu0 %v691_v58  ;;  %13226 = vmatmul.mubr.bf16.vlgmr.msra.gmra.mrb[0].mxu1 %v691_v58  ;;  %v17694_v58 = vld [vmem:[%s19316_s27 + $0x1fe4] ss:$16 sps:$4 sm:$0xff]  }
 0x456   : > { %12087 = vmatpush1.bf16.msra.mxu0 %v17602_v41  ;;  %13235 = vmatpush1.bf16.msra.mxu1 %v17605_v60  ;;  %v17697_v41 = vld [vmem:[%s19316_s27 + $0x1fec] ss:$16 sps:$4 sm:$0xff]   ;;  %v20525_v60 = vrot.slane %v20517_v56, %v19393_v50 }
 0x457   : > { %12088 = vmatprep.subr.bf16.mxu0 %v17610_v61  ;;  %13236 = vmatprep.subr.bf16.mxu1 %v17613_v62  ;;  %v17692_v61 = vld [vmem:[%s19316_s27 + $0x1fe0] ss:$16 sps:$4 sm:$0xff]   ;;  %v17695_v62 = vld [vmem:[%s19316_s27 + $0x1fe8] ss:$16 sps:$4 sm:$0xff]  }
 0x458   : > { %12118 = vmatprep.mubr.bf16.mxu0 %v694_v0  ;;  %13266 = vmatprep.mubr.bf16.mxu1 %v694_v0  ;;  %v17701_v0 = vld [vmem:[%s19316_s27 + $0x2004] ss:$16 sps:$4 sm:$0xff]  }
 0x45a   : > { %12089 = vmatpush1.bf16.msra.mxu0 %v17608_v46  ;;  %13237 = vmatpush1.bf16.msra.mxu1 %v17611_v1  ;;  %v17704_v46 = vld [vmem:[%s19316_s27 + $0x200c] ss:$16 sps:$4 sm:$0xff]   ;;  %v520_v1 = vcombine.high %v20525_v60, %v20525_v60 }
 0x45b   : > { %12090 = vmatprep.subr.bf16.mxu0 %v17616_v2  ;;  %13238 = vmatprep.subr.bf16.mxu1 %v17619_v48  ;;  %v693_v2 = vpack.c.bf16 %v20450_v54, %v20450_v54  ;;  %v17699_v48 = vld [vmem:[%s19316_s27 + $0x2000] ss:$16 sps:$4 sm:$0xff]  }
 0x45c   : > { %v17705_v54 = vld [vmem:[%s19316_s27 + $0x2020] ss:$16 sps:$4 sm:$0xff]  }
 0x45e   : > { %12091 = vmatpush1.bf16.msra.mxu0 %v17614_v3  ;;  %13239 = vmatpush1.bf16.msra.mxu1 %v17617_v4  ;;  %v17702_v3 = vld [vmem:[%s19316_s27 + $0x2008] ss:$16 sps:$4 sm:$0xff]   ;;  %v17707_v4 = vld [vmem:[%s19316_s27 + $0x2024] ss:$16 sps:$4 sm:$0xff]  }
 0x45f   : > { %12092 = vmatprep.subr.bf16.mxu0 %v17622_v5  ;;  %13240 = vmatprep.subr.bf16.mxu1 %v17625_v6  ;;  %v17710_v5 = vld [vmem:[%s19316_s27 + $0x202c] ss:$16 sps:$4 sm:$0xff]   ;;  %v696_v6 = vpack.c.bf16 %v520_v1, %v520_v1  ;;  %v17783_v1 = vld [vmem:[%s19316_s27 + $0x21c0] ss:$16 sps:$4 sm:$0xff]  }
 0x462   : > { %12093 = vmatpush1.bf16.msra.mxu0 %v17620_v59  ;;  %13241 = vmatpush1.bf16.msra.mxu1 %v17623_v8  ;;  %v17708_v59 = vld [vmem:[%s19316_s27 + $0x2028] ss:$16 sps:$4 sm:$0xff]   ;;  %v17713_v8 = vld [vmem:[%s19316_s27 + $0x2044] ss:$16 sps:$4 sm:$0xff]  }
 0x463   : > { %12094 = vmatprep.subr.bf16.mxu0 %v17628_v57  ;;  %13242 = vmatprep.subr.bf16.mxu1 %v17631_v11  ;;  %v17716_v57 = vld [vmem:[%s19316_s27 + $0x204c] ss:$16 sps:$4 sm:$0xff]   ;;  %v17711_v11 = vld [vmem:[%s19316_s27 + $0x2040] ss:$16 sps:$4 sm:$0xff]  }
 0x466   : > { %12095 = vmatpush1.bf16.msra.mxu0 %v17626_v12  ;;  %13243 = vmatpush1.bf16.msra.mxu1 %v17629_v13  ;;  %v17714_v12 = vld [vmem:[%s19316_s27 + $0x2048] ss:$16 sps:$4 sm:$0xff]   ;;  %v17719_v13 = vld [vmem:[%s19316_s27 + $0x2064] ss:$16 sps:$4 sm:$0xff]  }
 0x467   : > { %12096 = vmatprep.subr.bf16.mxu0 %v17634_v15  ;;  %13244 = vmatprep.subr.bf16.mxu1 %v17637_v16  ;;  %v17722_v15 = vld [vmem:[%s19316_s27 + $0x206c] ss:$16 sps:$4 sm:$0xff]   ;;  %v17717_v16 = vld [vmem:[%s19316_s27 + $0x2060] ss:$16 sps:$4 sm:$0xff]  }
 0x46a   : > { %12097 = vmatpush1.bf16.msra.mxu0 %v17632_v17  ;;  %13245 = vmatpush1.bf16.msra.mxu1 %v17635_v63  ;;  %v17720_v17 = vld [vmem:[%s19316_s27 + $0x2068] ss:$16 sps:$4 sm:$0xff]   ;;  %v17725_v63 = vld [vmem:[%s19316_s27 + $0x2084] ss:$16 sps:$4 sm:$0xff]  }
 0x46b   : > { %12098 = vmatprep.subr.bf16.mxu0 %v17640_v18  ;;  %13246 = vmatprep.subr.bf16.mxu1 %v17643_v19  ;;  %v17728_v18 = vld [vmem:[%s19316_s27 + $0x208c] ss:$16 sps:$4 sm:$0xff]   ;;  %v17723_v19 = vld [vmem:[%s19316_s27 + $0x2080] ss:$16 sps:$4 sm:$0xff]  }
 0x46e   : > { %12099 = vmatpush1.bf16.msra.mxu0 %v17638_v20  ;;  %13247 = vmatpush1.bf16.msra.mxu1 %v17641_v21  ;;  %v17726_v20 = vld [vmem:[%s19316_s27 + $0x2088] ss:$16 sps:$4 sm:$0xff]   ;;  %v17731_v21 = vld [vmem:[%s19316_s27 + $0x20a4] ss:$16 sps:$4 sm:$0xff]  }
 0x46f   : > { %12100 = vmatprep.subr.bf16.mxu0 %v17646_v9  ;;  %13248 = vmatprep.subr.bf16.mxu1 %v17649_v23  ;;  %v17734_v9 = vld [vmem:[%s19316_s27 + $0x20ac] ss:$16 sps:$4 sm:$0xff]   ;;  %v17729_v23 = vld [vmem:[%s19316_s27 + $0x20a0] ss:$16 sps:$4 sm:$0xff]  }
 0x472   : > { %12101 = vmatpush1.bf16.msra.mxu0 %v17644_v7  ;;  %13249 = vmatpush1.bf16.msra.mxu1 %v17647_v24  ;;  %v17732_v7 = vld [vmem:[%s19316_s27 + $0x20a8] ss:$16 sps:$4 sm:$0xff]   ;;  %v17737_v24 = vld [vmem:[%s19316_s27 + $0x20c4] ss:$16 sps:$4 sm:$0xff]  }
 0x473   : > { %12102 = vmatprep.subr.bf16.mxu0 %v17652_v10  ;;  %13250 = vmatprep.subr.bf16.mxu1 %v17655_v28  ;;  %v17740_v10 = vld [vmem:[%s19316_s27 + $0x20cc] ss:$16 sps:$4 sm:$0xff]   ;;  %v17735_v28 = vld [vmem:[%s19316_s27 + $0x20c0] ss:$16 sps:$4 sm:$0xff]  }
 0x476   : > { %12103 = vmatpush1.bf16.msra.mxu0 %v17650_v31  ;;  %13251 = vmatpush1.bf16.msra.mxu1 %v17653_v32  ;;  %v17738_v31 = vld [vmem:[%s19316_s27 + $0x20c8] ss:$16 sps:$4 sm:$0xff]   ;;  %v17743_v32 = vld [vmem:[%s19316_s27 + $0x20e4] ss:$16 sps:$4 sm:$0xff]  }
 0x477   : > { %12104 = vmatprep.subr.bf16.mxu0 %v17658_v34  ;;  %13252 = vmatprep.subr.bf16.mxu1 %v17661_v14  ;;  %v17746_v34 = vld [vmem:[%s19316_s27 + $0x20ec] ss:$16 sps:$4 sm:$0xff]   ;;  %v17741_v14 = vld [vmem:[%s19316_s27 + $0x20e0] ss:$16 sps:$4 sm:$0xff]  }
 0x47a   : > { %12105 = vmatpush1.bf16.msra.mxu0 %v17656_v35  ;;  %13253 = vmatpush1.bf16.msra.mxu1 %v17659_v36  ;;  %v17744_v35 = vld [vmem:[%s19316_s27 + $0x20e8] ss:$16 sps:$4 sm:$0xff]   ;;  %v17749_v36 = vld [vmem:[%s19316_s27 + $0x2104] ss:$16 sps:$4 sm:$0xff]  }
 0x47b   : > { %12106 = vmatprep.subr.bf16.mxu0 %v17664_v27  ;;  %13254 = vmatprep.subr.bf16.mxu1 %v17667_v37  ;;  %v17752_v27 = vld [vmem:[%s19316_s27 + $0x210c] ss:$16 sps:$4 sm:$0xff]   ;;  %v17747_v37 = vld [vmem:[%s19316_s27 + $0x2100] ss:$16 sps:$4 sm:$0xff]  }
 0x47e   : > { %12107 = vmatpush1.bf16.msra.mxu0 %v17662_v25  ;;  %13255 = vmatpush1.bf16.msra.mxu1 %v17665_v39  ;;  %v17750_v25 = vld [vmem:[%s19316_s27 + $0x2108] ss:$16 sps:$4 sm:$0xff]   ;;  %v17755_v39 = vld [vmem:[%s19316_s27 + $0x2124] ss:$16 sps:$4 sm:$0xff]  }
 0x47f   : > { %12108 = vmatprep.subr.bf16.mxu0 %v17670_v22  ;;  %13256 = vmatprep.subr.bf16.mxu1 %v17673_v29  ;;  %v17758_v22 = vld [vmem:[%s19316_s27 + $0x212c] ss:$16 sps:$4 sm:$0xff]   ;;  %v17753_v29 = vld [vmem:[%s19316_s27 + $0x2120] ss:$16 sps:$4 sm:$0xff]  }
 0x482   : > { %12109 = vmatpush1.bf16.msra.mxu0 %v17668_v42  ;;  %13257 = vmatpush1.bf16.msra.mxu1 %v17671_v45  ;;  %v17756_v42 = vld [vmem:[%s19316_s27 + $0x2128] ss:$16 sps:$4 sm:$0xff]   ;;  %v17761_v45 = vld [vmem:[%s19316_s27 + $0x2144] ss:$16 sps:$4 sm:$0xff]  }
 0x483   : > { %12110 = vmatprep.subr.bf16.mxu0 %v17676_v26  ;;  %13258 = vmatprep.subr.bf16.mxu1 %v17679_v47  ;;  %v17764_v26 = vld [vmem:[%s19316_s27 + $0x214c] ss:$16 sps:$4 sm:$0xff]   ;;  %v17759_v47 = vld [vmem:[%s19316_s27 + $0x2140] ss:$16 sps:$4 sm:$0xff]  }
 0x486   : > { %12111 = vmatpush1.bf16.msra.mxu0 %v17674_v49  ;;  %13259 = vmatpush1.bf16.msra.mxu1 %v17677_v30  ;;  %v17762_v49 = vld [vmem:[%s19316_s27 + $0x2148] ss:$16 sps:$4 sm:$0xff]   ;;  %v17767_v30 = vld [vmem:[%s19316_s27 + $0x2164] ss:$16 sps:$4 sm:$0xff]  }
 0x487   : > { %12112 = vmatprep.subr.bf16.mxu0 %v17682_v51  ;;  %13260 = vmatprep.subr.bf16.mxu1 %v17685_v52  ;;  %v17770_v51 = vld [vmem:[%s19316_s27 + $0x216c] ss:$16 sps:$4 sm:$0xff]   ;;  %v17765_v52 = vld [vmem:[%s19316_s27 + $0x2160] ss:$16 sps:$4 sm:$0xff]  }
 0x48a   : > { %12113 = vmatpush1.bf16.msra.mxu0 %v17680_v33  ;;  %13261 = vmatpush1.bf16.msra.mxu1 %v17683_v53  ;;  %v17768_v33 = vld [vmem:[%s19316_s27 + $0x2168] ss:$16 sps:$4 sm:$0xff]   ;;  %v17773_v53 = vld [vmem:[%s19316_s27 + $0x2184] ss:$16 sps:$4 sm:$0xff]  }
 0x48b   : > { %12114 = vmatprep.subr.bf16.mxu0 %v17688_v40  ;;  %13262 = vmatprep.subr.bf16.mxu1 %v17691_v55  ;;  %v17776_v40 = vld [vmem:[%s19316_s27 + $0x218c] ss:$16 sps:$4 sm:$0xff]   ;;  %v17771_v55 = vld [vmem:[%s19316_s27 + $0x2180] ss:$16 sps:$4 sm:$0xff]  }
 0x48e   : > { %12115 = vmatpush1.bf16.msra.mxu0 %v17686_v38  ;;  %13263 = vmatpush1.bf16.msra.mxu1 %v17689_v43  ;;  %v17774_v38 = vld [vmem:[%s19316_s27 + $0x2188] ss:$16 sps:$4 sm:$0xff]   ;;  %v17779_v43 = vld [vmem:[%s19316_s27 + $0x21a4] ss:$16 sps:$4 sm:$0xff]  }
 0x48f   : > { %12116 = vmatprep.subr.bf16.mxu0 %v17694_v58  ;;  %13264 = vmatprep.subr.bf16.mxu1 %v17697_v41  ;;  %v17782_v58 = vld [vmem:[%s19316_s27 + $0x21ac] ss:$16 sps:$4 sm:$0xff]   ;;  %v17777_v41 = vld [vmem:[%s19316_s27 + $0x21a0] ss:$16 sps:$4 sm:$0xff]  }
 0x492   : > { %12117 = vmatpush1.bf16.msra.mxu0 %v17692_v61  ;;  %13265 = vmatpush1.bf16.msra.mxu1 %v17695_v62  ;;  %v17780_v61 = vld [vmem:[%s19316_s27 + $0x21a8] ss:$16 sps:$4 sm:$0xff]   ;;  %v17785_v62 = vld [vmem:[%s19316_s27 + $0x21c4] ss:$16 sps:$4 sm:$0xff]  }
 0x493   : > { %12127 = vmatprep.subr.bf16.mxu0 %v17701_v0  ;;  %13275 = vmatprep.subr.bf16.mxu1 %v17704_v46  ;;  %v17788_v0 = vld [vmem:[%s19316_s27 + $0x21cc] ss:$16 sps:$4 sm:$0xff]   ;;  %v505_v46 = vcombine.high %v20517_v56, %v20517_v56  ;;  %v17789_v56 = vld [vmem:[%s19316_s27 + $0x21e0] ss:$16 sps:$4 sm:$0xff]  }
 0x495   : > { %12119 = vmatmul.mubr.bf16.vlgmr.msra.gmra.mrb[0].mxu0 %v693_v2  ;;  %13267 = vmatmul.mubr.bf16.vlgmr.msra.gmra.mrb[0].mxu1 %v693_v2  ;;  %v17786_v2 = vld [vmem:[%s19316_s27 + $0x21c8] ss:$16 sps:$4 sm:$0xff]  }
 0x496   : > { %12128 = vmatpush1.bf16.msra.mxu0 %v17699_v48  ;;  %13276 = vmatpush1.bf16.msra.mxu1 %v17702_v3  ;;  %v17791_v48 = vld [vmem:[%s19316_s27 + $0x21e4] ss:$16 sps:$4 sm:$0xff]   ;;  %v17794_v3 = vld [vmem:[%s19316_s27 + $0x21ec] ss:$16 sps:$4 sm:$0xff]  }
 0x497   : > { %12129 = vmatprep.subr.bf16.mxu0 %v17707_v4  ;;  %13277 = vmatprep.subr.bf16.mxu1 %v17710_v5  ;;  %v20598_v4 = vrot.slane %v505_v46, %v19393_v50  ;;  %v17792_v5 = vld [vmem:[%s19316_s27 + $0x21e8] ss:$16 sps:$4 sm:$0xff]  }
 0x498   : > { %12159 = vmatprep.mubr.bf16.mxu0 %v696_v6  ;;  %13307 = vmatprep.mubr.bf16.mxu1 %v696_v6  ;;  %v17797_v6 = vld [vmem:[%s19316_s27 + $0x2204] ss:$16 sps:$4 sm:$0xff]   ;;  %v17870_v46 = vld [vmem:[%s19316_s27 + $0x2388] ss:$16 sps:$4 sm:$0xff]  }
 0x49a   : > { %12130 = vmatpush1.bf16.msra.mxu0 %v17705_v54  ;;  %13278 = vmatpush1.bf16.msra.mxu1 %v17708_v59  ;;  %v17800_v54 = vld [vmem:[%s19316_s27 + $0x220c] ss:$16 sps:$4 sm:$0xff]   ;;  %v521_v59 = vcombine.high %v20598_v4, %v20598_v4 }
 0x49b   : > { %12131 = vmatprep.subr.bf16.mxu0 %v17713_v8  ;;  %13279 = vmatprep.subr.bf16.mxu1 %v17716_v57  ;;  %v695_v8 = vpack.c.bf16 %v20525_v60, %v20525_v60  ;;  %v17795_v57 = vld [vmem:[%s19316_s27 + $0x2200] ss:$16 sps:$4 sm:$0xff]  }
 0x49c   : > { %v17801_v60 = vld [vmem:[%s19316_s27 + $0x2220] ss:$16 sps:$4 sm:$0xff]  }
 0x49e   : > { %12132 = vmatpush1.bf16.msra.mxu0 %v17711_v11  ;;  %13280 = vmatpush1.bf16.msra.mxu1 %v17714_v12  ;;  %v17798_v11 = vld [vmem:[%s19316_s27 + $0x2208] ss:$16 sps:$4 sm:$0xff]   ;;  %v17803_v12 = vld [vmem:[%s19316_s27 + $0x2224] ss:$16 sps:$4 sm:$0xff]  }
 0x49f   : > { %12133 = vmatprep.subr.bf16.mxu0 %v17719_v13  ;;  %13281 = vmatprep.subr.bf16.mxu1 %v17722_v15  ;;  %v17806_v13 = vld [vmem:[%s19316_s27 + $0x222c] ss:$16 sps:$4 sm:$0xff]   ;;  %v698_v15 = vpack.c.bf16 %v521_v59, %v521_v59  ;;  %v17882_v59 = vld [vmem:[%s19316_s27 + $0x23c8] ss:$16 sps:$4 sm:$0xff]  }
 0x4a2   : > { %12134 = vmatpush1.bf16.msra.mxu0 %v17717_v16  ;;  %13282 = vmatpush1.bf16.msra.mxu1 %v17720_v17  ;;  %v17804_v16 = vld [vmem:[%s19316_s27 + $0x2228] ss:$16 sps:$4 sm:$0xff]   ;;  %v17809_v17 = vld [vmem:[%s19316_s27 + $0x2244] ss:$16 sps:$4 sm:$0xff]  }
 0x4a3   : > { %12135 = vmatprep.subr.bf16.mxu0 %v17725_v63  ;;  %13283 = vmatprep.subr.bf16.mxu1 %v17728_v18  ;;  %v17812_v63 = vld [vmem:[%s19316_s27 + $0x224c] ss:$16 sps:$4 sm:$0xff]   ;;  %v17807_v18 = vld [vmem:[%s19316_s27 + $0x2240] ss:$16 sps:$4 sm:$0xff]  }
 0x4a6   : > { %12136 = vmatpush1.bf16.msra.mxu0 %v17723_v19  ;;  %13284 = vmatpush1.bf16.msra.mxu1 %v17726_v20  ;;  %v17810_v19 = vld [vmem:[%s19316_s27 + $0x2248] ss:$16 sps:$4 sm:$0xff]   ;;  %v17815_v20 = vld [vmem:[%s19316_s27 + $0x2264] ss:$16 sps:$4 sm:$0xff]  }
 0x4a7   : > { %12137 = vmatprep.subr.bf16.mxu0 %v17731_v21  ;;  %13285 = vmatprep.subr.bf16.mxu1 %v17734_v9  ;;  %v17818_v21 = vld [vmem:[%s19316_s27 + $0x226c] ss:$16 sps:$4 sm:$0xff]   ;;  %v17813_v9 = vld [vmem:[%s19316_s27 + $0x2260] ss:$16 sps:$4 sm:$0xff]  }
 0x4aa   : > { %12138 = vmatpush1.bf16.msra.mxu0 %v17729_v23  ;;  %13286 = vmatpush1.bf16.msra.mxu1 %v17732_v7  ;;  %v17816_v23 = vld [vmem:[%s19316_s27 + $0x2268] ss:$16 sps:$4 sm:$0xff]   ;;  %v17821_v7 = vld [vmem:[%s19316_s27 + $0x2284] ss:$16 sps:$4 sm:$0xff]  }
 0x4ab   : > { %12139 = vmatprep.subr.bf16.mxu0 %v17737_v24  ;;  %13287 = vmatprep.subr.bf16.mxu1 %v17740_v10  ;;  %v17824_v24 = vld [vmem:[%s19316_s27 + $0x228c] ss:$16 sps:$4 sm:$0xff]   ;;  %v17819_v10 = vld [vmem:[%s19316_s27 + $0x2280] ss:$16 sps:$4 sm:$0xff]  }
 0x4ae   : > { %12140 = vmatpush1.bf16.msra.mxu0 %v17735_v28  ;;  %13288 = vmatpush1.bf16.msra.mxu1 %v17738_v31  ;;  %v17822_v28 = vld [vmem:[%s19316_s27 + $0x2288] ss:$16 sps:$4 sm:$0xff]   ;;  %v17827_v31 = vld [vmem:[%s19316_s27 + $0x22a4] ss:$16 sps:$4 sm:$0xff]  }
 0x4af   : > { %12141 = vmatprep.subr.bf16.mxu0 %v17743_v32  ;;  %13289 = vmatprep.subr.bf16.mxu1 %v17746_v34  ;;  %v17830_v32 = vld [vmem:[%s19316_s27 + $0x22ac] ss:$16 sps:$4 sm:$0xff]   ;;  %v17825_v34 = vld [vmem:[%s19316_s27 + $0x22a0] ss:$16 sps:$4 sm:$0xff]  }
 0x4b2   : > { %12142 = vmatpush1.bf16.msra.mxu0 %v17741_v14  ;;  %13290 = vmatpush1.bf16.msra.mxu1 %v17744_v35  ;;  %v17828_v14 = vld [vmem:[%s19316_s27 + $0x22a8] ss:$16 sps:$4 sm:$0xff]   ;;  %v17833_v35 = vld [vmem:[%s19316_s27 + $0x22c4] ss:$16 sps:$4 sm:$0xff]  }
 0x4b3   : > { %12143 = vmatprep.subr.bf16.mxu0 %v17749_v36  ;;  %13291 = vmatprep.subr.bf16.mxu1 %v17752_v27  ;;  %v17836_v36 = vld [vmem:[%s19316_s27 + $0x22cc] ss:$16 sps:$4 sm:$0xff]   ;;  %v17831_v27 = vld [vmem:[%s19316_s27 + $0x22c0] ss:$16 sps:$4 sm:$0xff]  }
 0x4b6   : > { %12144 = vmatpush1.bf16.msra.mxu0 %v17747_v37  ;;  %13292 = vmatpush1.bf16.msra.mxu1 %v17750_v25  ;;  %v17834_v37 = vld [vmem:[%s19316_s27 + $0x22c8] ss:$16 sps:$4 sm:$0xff]   ;;  %v17839_v25 = vld [vmem:[%s19316_s27 + $0x22e4] ss:$16 sps:$4 sm:$0xff]  }
 0x4b7   : > { %12145 = vmatprep.subr.bf16.mxu0 %v17755_v39  ;;  %13293 = vmatprep.subr.bf16.mxu1 %v17758_v22  ;;  %v17842_v39 = vld [vmem:[%s19316_s27 + $0x22ec] ss:$16 sps:$4 sm:$0xff]   ;;  %v17837_v22 = vld [vmem:[%s19316_s27 + $0x22e0] ss:$16 sps:$4 sm:$0xff]  }
 0x4ba   : > { %12146 = vmatpush1.bf16.msra.mxu0 %v17753_v29  ;;  %13294 = vmatpush1.bf16.msra.mxu1 %v17756_v42  ;;  %v17840_v29 = vld [vmem:[%s19316_s27 + $0x22e8] ss:$16 sps:$4 sm:$0xff]   ;;  %v17845_v42 = vld [vmem:[%s19316_s27 + $0x2304] ss:$16 sps:$4 sm:$0xff]  }
 0x4bb   : > { %12147 = vmatprep.subr.bf16.mxu0 %v17761_v45  ;;  %13295 = vmatprep.subr.bf16.mxu1 %v17764_v26  ;;  %v17848_v45 = vld [vmem:[%s19316_s27 + $0x230c] ss:$16 sps:$4 sm:$0xff]   ;;  %v17843_v26 = vld [vmem:[%s19316_s27 + $0x2300] ss:$16 sps:$4 sm:$0xff]  }
 0x4be   : > { %12148 = vmatpush1.bf16.msra.mxu0 %v17759_v47  ;;  %13296 = vmatpush1.bf16.msra.mxu1 %v17762_v49  ;;  %v17846_v47 = vld [vmem:[%s19316_s27 + $0x2308] ss:$16 sps:$4 sm:$0xff]   ;;  %v17851_v49 = vld [vmem:[%s19316_s27 + $0x2324] ss:$16 sps:$4 sm:$0xff]  }
 0x4bf   : > { %12149 = vmatprep.subr.bf16.mxu0 %v17767_v30  ;;  %13297 = vmatprep.subr.bf16.mxu1 %v17770_v51  ;;  %v17854_v30 = vld [vmem:[%s19316_s27 + $0x232c] ss:$16 sps:$4 sm:$0xff]   ;;  %v17849_v51 = vld [vmem:[%s19316_s27 + $0x2320] ss:$16 sps:$4 sm:$0xff]  }
 0x4c2   : > { %12150 = vmatpush1.bf16.msra.mxu0 %v17765_v52  ;;  %13298 = vmatpush1.bf16.msra.mxu1 %v17768_v33  ;;  %v17852_v52 = vld [vmem:[%s19316_s27 + $0x2328] ss:$16 sps:$4 sm:$0xff]   ;;  %v17857_v33 = vld [vmem:[%s19316_s27 + $0x2344] ss:$16 sps:$4 sm:$0xff]  }
 0x4c3   : > { %12151 = vmatprep.subr.bf16.mxu0 %v17773_v53  ;;  %13299 = vmatprep.subr.bf16.mxu1 %v17776_v40  ;;  %v17860_v53 = vld [vmem:[%s19316_s27 + $0x234c] ss:$16 sps:$4 sm:$0xff]   ;;  %v17855_v40 = vld [vmem:[%s19316_s27 + $0x2340] ss:$16 sps:$4 sm:$0xff]  }
 0x4c6   : > { %12152 = vmatpush1.bf16.msra.mxu0 %v17771_v55  ;;  %13300 = vmatpush1.bf16.msra.mxu1 %v17774_v38  ;;  %v17858_v55 = vld [vmem:[%s19316_s27 + $0x2348] ss:$16 sps:$4 sm:$0xff]   ;;  %v17863_v38 = vld [vmem:[%s19316_s27 + $0x2364] ss:$16 sps:$4 sm:$0xff]  }
 0x4c7   : > { %12153 = vmatprep.subr.bf16.mxu0 %v17779_v43  ;;  %13301 = vmatprep.subr.bf16.mxu1 %v17782_v58  ;;  %v17866_v43 = vld [vmem:[%s19316_s27 + $0x236c] ss:$16 sps:$4 sm:$0xff]   ;;  %v17861_v58 = vld [vmem:[%s19316_s27 + $0x2360] ss:$16 sps:$4 sm:$0xff]  }
 0x4ca   : > { %12154 = vmatpush1.bf16.msra.mxu0 %v17777_v41  ;;  %13302 = vmatpush1.bf16.msra.mxu1 %v17780_v61  ;;  %v17864_v41 = vld [vmem:[%s19316_s27 + $0x2368] ss:$16 sps:$4 sm:$0xff]   ;;  %v17869_v61 = vld [vmem:[%s19316_s27 + $0x2384] ss:$16 sps:$4 sm:$0xff]  }
 0x4cb   : > { %12155 = vmatprep.subr.bf16.mxu0 %v17785_v62  ;;  %13303 = vmatprep.subr.bf16.mxu1 %v17788_v0  ;;  %v17872_v62 = vld [vmem:[%s19316_s27 + $0x238c] ss:$16 sps:$4 sm:$0xff]   ;;  %v17867_v0 = vld [vmem:[%s19316_s27 + $0x2380] ss:$16 sps:$4 sm:$0xff]  }
 0x4ce   : > { %12156 = vmatpush1.bf16.msra.mxu0 %v17783_v1  ;;  %13304 = vmatpush1.bf16.msra.mxu1 %v17786_v2  ;;  %v17875_v1 = vld [vmem:[%s19316_s27 + $0x23a4] ss:$16 sps:$4 sm:$0xff]   ;;  %v17878_v2 = vld [vmem:[%s19316_s27 + $0x23ac] ss:$16 sps:$4 sm:$0xff]  }
 0x4cf   : > { %12157 = vmatprep.subr.bf16.mxu0 %v17791_v48  ;;  %13305 = vmatprep.subr.bf16.mxu1 %v17794_v3  ;;  %v17873_v48 = vld [vmem:[%s19316_s27 + $0x23a0] ss:$16 sps:$4 sm:$0xff]   ;;  %v17876_v3 = vld [vmem:[%s19316_s27 + $0x23a8] ss:$16 sps:$4 sm:$0xff]  }
 0x4d2   : > { %12158 = vmatpush1.bf16.msra.mxu0 %v17789_v56  ;;  %13306 = vmatpush1.bf16.msra.mxu1 %v17792_v5  ;;  %v17881_v56 = vld [vmem:[%s19316_s27 + $0x23c4] ss:$16 sps:$4 sm:$0xff]   ;;  %v17884_v5 = vld [vmem:[%s19316_s27 + $0x23cc] ss:$16 sps:$4 sm:$0xff]  }
 0x4d3   : > { %12168 = vmatprep.subr.bf16.mxu0 %v17797_v6  ;;  %13316 = vmatprep.subr.bf16.mxu1 %v17800_v54  ;;  %v20665_v6 = vld [vmem:[%s19337_s11 + $0x48] sm:$0xff] }
 0x4d4   : > { %v17879_v54 = vld [vmem:[%s19316_s27 + $0x23c0] ss:$16 sps:$4 sm:$0xff]  }
 0x4d5   : > { %12160 = vmatmul.mubr.bf16.vlgmr.msra.gmra.mrb[0].mxu0 %v695_v8  ;;  %13308 = vmatmul.mubr.bf16.vlgmr.msra.gmra.mrb[0].mxu1 %v695_v8  ;;  %v17887_v8 = vld [vmem:[%s19316_s27 + $0x23e4] ss:$16 sps:$4 sm:$0xff]  }
 0x4d6   : > { %12169 = vmatpush1.bf16.msra.mxu0 %v17795_v57  ;;  %13317 = vmatpush1.bf16.msra.mxu1 %v17798_v11  ;;  %v17890_v57 = vld [vmem:[%s19316_s27 + $0x23ec] ss:$16 sps:$4 sm:$0xff]   ;;  %v20673_v11 = vrot.slane %v20665_v6, %v19393_v50 }
 0x4d7   : > { %12170 = vmatprep.subr.bf16.mxu0 %v17803_v12  ;;  %13318 = vmatprep.subr.bf16.mxu1 %v17806_v13  ;;  %v17885_v12 = vld [vmem:[%s19316_s27 + $0x23e0] ss:$16 sps:$4 sm:$0xff]   ;;  %v17888_v13 = vld [vmem:[%s19316_s27 + $0x23e8] ss:$16 sps:$4 sm:$0xff]  }
 0x4d8   : > { %12200 = vmatprep.mubr.bf16.mxu0 %v698_v15  ;;  %13348 = vmatprep.mubr.bf16.mxu1 %v698_v15  ;;  %v17894_v15 = vld [vmem:[%s19316_s27 + $0x2404] ss:$16 sps:$4 sm:$0xff]  }
 0x4da   : > { %12171 = vmatpush1.bf16.msra.mxu0 %v17801_v60  ;;  %13319 = vmatpush1.bf16.msra.mxu1 %v17804_v16  ;;  %v17897_v60 = vld [vmem:[%s19316_s27 + $0x240c] ss:$16 sps:$4 sm:$0xff]   ;;  %v537_v16 = vcombine.high %v20673_v11, %v20673_v11 }
 0x4db   : > { %12172 = vmatprep.subr.bf16.mxu0 %v17809_v17  ;;  %13320 = vmatprep.subr.bf16.mxu1 %v17812_v63  ;;  %v697_v17 = vpack.c.bf16 %v20598_v4, %v20598_v4  ;;  %v17892_v63 = vld [vmem:[%s19316_s27 + $0x2400] ss:$16 sps:$4 sm:$0xff]  }
 0x4dc   : > { %v17898_v4 = vld [vmem:[%s19316_s27 + $0x2420] ss:$16 sps:$4 sm:$0xff]  }
 0x4de   : > { %12173 = vmatpush1.bf16.msra.mxu0 %v17807_v18  ;;  %13321 = vmatpush1.bf16.msra.mxu1 %v17810_v19  ;;  %v17895_v18 = vld [vmem:[%s19316_s27 + $0x2408] ss:$16 sps:$4 sm:$0xff]   ;;  %v17900_v19 = vld [vmem:[%s19316_s27 + $0x2424] ss:$16 sps:$4 sm:$0xff]  }
 0x4df   : > { %12174 = vmatprep.subr.bf16.mxu0 %v17815_v20  ;;  %13322 = vmatprep.subr.bf16.mxu1 %v17818_v21  ;;  %v17903_v20 = vld [vmem:[%s19316_s27 + $0x242c] ss:$16 sps:$4 sm:$0xff]   ;;  %v700_v21 = vpack.c.bf16 %v537_v16, %v537_v16  ;;  %v17976_v16 = vld [vmem:[%s19316_s27 + $0x25c0] ss:$16 sps:$4 sm:$0xff]  }
 0x4e2   : > { %12175 = vmatpush1.bf16.msra.mxu0 %v17813_v9  ;;  %13323 = vmatpush1.bf16.msra.mxu1 %v17816_v23  ;;  %v17901_v9 = vld [vmem:[%s19316_s27 + $0x2428] ss:$16 sps:$4 sm:$0xff]   ;;  %v17906_v23 = vld [vmem:[%s19316_s27 + $0x2444] ss:$16 sps:$4 sm:$0xff]  }
 0x4e3   : > { %12176 = vmatprep.subr.bf16.mxu0 %v17821_v7  ;;  %13324 = vmatprep.subr.bf16.mxu1 %v17824_v24  ;;  %v17909_v7 = vld [vmem:[%s19316_s27 + $0x244c] ss:$16 sps:$4 sm:$0xff]   ;;  %v17904_v24 = vld [vmem:[%s19316_s27 + $0x2440] ss:$16 sps:$4 sm:$0xff]  }
 0x4e6   : > { %12177 = vmatpush1.bf16.msra.mxu0 %v17819_v10  ;;  %13325 = vmatpush1.bf16.msra.mxu1 %v17822_v28  ;;  %v17907_v10 = vld [vmem:[%s19316_s27 + $0x2448] ss:$16 sps:$4 sm:$0xff]   ;;  %v17912_v28 = vld [vmem:[%s19316_s27 + $0x2464] ss:$16 sps:$4 sm:$0xff]  }
 0x4e7   : > { %12178 = vmatprep.subr.bf16.mxu0 %v17827_v31  ;;  %13326 = vmatprep.subr.bf16.mxu1 %v17830_v32  ;;  %v17915_v31 = vld [vmem:[%s19316_s27 + $0x246c] ss:$16 sps:$4 sm:$0xff]   ;;  %v17910_v32 = vld [vmem:[%s19316_s27 + $0x2460] ss:$16 sps:$4 sm:$0xff]  }
 0x4ea   : > { %12179 = vmatpush1.bf16.msra.mxu0 %v17825_v34  ;;  %13327 = vmatpush1.bf16.msra.mxu1 %v17828_v14  ;;  %v17913_v34 = vld [vmem:[%s19316_s27 + $0x2468] ss:$16 sps:$4 sm:$0xff]   ;;  %v17918_v14 = vld [vmem:[%s19316_s27 + $0x2484] ss:$16 sps:$4 sm:$0xff]  }
 0x4eb   : > { %12180 = vmatprep.subr.bf16.mxu0 %v17833_v35  ;;  %13328 = vmatprep.subr.bf16.mxu1 %v17836_v36  ;;  %v17921_v35 = vld [vmem:[%s19316_s27 + $0x248c] ss:$16 sps:$4 sm:$0xff]   ;;  %v17916_v36 = vld [vmem:[%s19316_s27 + $0x2480] ss:$16 sps:$4 sm:$0xff]  }
 0x4ee   : > { %12181 = vmatpush1.bf16.msra.mxu0 %v17831_v27  ;;  %13329 = vmatpush1.bf16.msra.mxu1 %v17834_v37  ;;  %v17919_v27 = vld [vmem:[%s19316_s27 + $0x2488] ss:$16 sps:$4 sm:$0xff]   ;;  %v17924_v37 = vld [vmem:[%s19316_s27 + $0x24a4] ss:$16 sps:$4 sm:$0xff]  }
 0x4ef   : > { %12182 = vmatprep.subr.bf16.mxu0 %v17839_v25  ;;  %13330 = vmatprep.subr.bf16.mxu1 %v17842_v39  ;;  %v17927_v25 = vld [vmem:[%s19316_s27 + $0x24ac] ss:$16 sps:$4 sm:$0xff]   ;;  %v17922_v39 = vld [vmem:[%s19316_s27 + $0x24a0] ss:$16 sps:$4 sm:$0xff]  }
 0x4f2   : > { %12183 = vmatpush1.bf16.msra.mxu0 %v17837_v22  ;;  %13331 = vmatpush1.bf16.msra.mxu1 %v17840_v29  ;;  %v17925_v22 = vld [vmem:[%s19316_s27 + $0x24a8] ss:$16 sps:$4 sm:$0xff]   ;;  %v17930_v29 = vld [vmem:[%s19316_s27 + $0x24c4] ss:$16 sps:$4 sm:$0xff]  }
 0x4f3   : > { %12184 = vmatprep.subr.bf16.mxu0 %v17845_v42  ;;  %13332 = vmatprep.subr.bf16.mxu1 %v17848_v45  ;;  %v17933_v42 = vld [vmem:[%s19316_s27 + $0x24cc] ss:$16 sps:$4 sm:$0xff]   ;;  %v17928_v45 = vld [vmem:[%s19316_s27 + $0x24c0] ss:$16 sps:$4 sm:$0xff]  }
 0x4f6   : > { %12185 = vmatpush1.bf16.msra.mxu0 %v17843_v26  ;;  %13333 = vmatpush1.bf16.msra.mxu1 %v17846_v47  ;;  %v17931_v26 = vld [vmem:[%s19316_s27 + $0x24c8] ss:$16 sps:$4 sm:$0xff]   ;;  %v17936_v47 = vld [vmem:[%s19316_s27 + $0x24e4] ss:$16 sps:$4 sm:$0xff]  }
 0x4f7   : > { %12186 = vmatprep.subr.bf16.mxu0 %v17851_v49  ;;  %13334 = vmatprep.subr.bf16.mxu1 %v17854_v30  ;;  %v17939_v49 = vld [vmem:[%s19316_s27 + $0x24ec] ss:$16 sps:$4 sm:$0xff]   ;;  %v17934_v30 = vld [vmem:[%s19316_s27 + $0x24e0] ss:$16 sps:$4 sm:$0xff]  }
 0x4fa   : > { %12187 = vmatpush1.bf16.msra.mxu0 %v17849_v51  ;;  %13335 = vmatpush1.bf16.msra.mxu1 %v17852_v52  ;;  %v17937_v51 = vld [vmem:[%s19316_s27 + $0x24e8] ss:$16 sps:$4 sm:$0xff]   ;;  %v17942_v52 = vld [vmem:[%s19316_s27 + $0x2504] ss:$16 sps:$4 sm:$0xff]  }
 0x4fb   : > { %12188 = vmatprep.subr.bf16.mxu0 %v17857_v33  ;;  %13336 = vmatprep.subr.bf16.mxu1 %v17860_v53  ;;  %v17945_v33 = vld [vmem:[%s19316_s27 + $0x250c] ss:$16 sps:$4 sm:$0xff]   ;;  %v17940_v53 = vld [vmem:[%s19316_s27 + $0x2500] ss:$16 sps:$4 sm:$0xff]  }
 0x4fe   : > { %12189 = vmatpush1.bf16.msra.mxu0 %v17855_v40  ;;  %13337 = vmatpush1.bf16.msra.mxu1 %v17858_v55  ;;  %v17943_v40 = vld [vmem:[%s19316_s27 + $0x2508] ss:$16 sps:$4 sm:$0xff]   ;;  %v17948_v55 = vld [vmem:[%s19316_s27 + $0x2524] ss:$16 sps:$4 sm:$0xff]  }
 0x4ff   : > { %12190 = vmatprep.subr.bf16.mxu0 %v17863_v38  ;;  %13338 = vmatprep.subr.bf16.mxu1 %v17866_v43  ;;  %v17951_v38 = vld [vmem:[%s19316_s27 + $0x252c] ss:$16 sps:$4 sm:$0xff]   ;;  %v17946_v43 = vld [vmem:[%s19316_s27 + $0x2520] ss:$16 sps:$4 sm:$0xff]  }
 0x502   : > { %12191 = vmatpush1.bf16.msra.mxu0 %v17861_v58  ;;  %13339 = vmatpush1.bf16.msra.mxu1 %v17864_v41  ;;  %v17949_v58 = vld [vmem:[%s19316_s27 + $0x2528] ss:$16 sps:$4 sm:$0xff]   ;;  %v17954_v41 = vld [vmem:[%s19316_s27 + $0x2544] ss:$16 sps:$4 sm:$0xff]  }
 0x503   : > { %12192 = vmatprep.subr.bf16.mxu0 %v17869_v61  ;;  %13340 = vmatprep.subr.bf16.mxu1 %v17872_v62  ;;  %v17957_v61 = vld [vmem:[%s19316_s27 + $0x254c] ss:$16 sps:$4 sm:$0xff]   ;;  %v17952_v62 = vld [vmem:[%s19316_s27 + $0x2540] ss:$16 sps:$4 sm:$0xff]  }
 0x506   : > { %12193 = vmatpush1.bf16.msra.mxu0 %v17867_v0  ;;  %13341 = vmatpush1.bf16.msra.mxu1 %v17870_v46  ;;  %v17955_v0 = vld [vmem:[%s19316_s27 + $0x2548] ss:$16 sps:$4 sm:$0xff]   ;;  %v17960_v46 = vld [vmem:[%s19316_s27 + $0x2564] ss:$16 sps:$4 sm:$0xff]  }
 0x507   : > { %12194 = vmatprep.subr.bf16.mxu0 %v17875_v1  ;;  %13342 = vmatprep.subr.bf16.mxu1 %v17878_v2  ;;  %v17963_v1 = vld [vmem:[%s19316_s27 + $0x256c] ss:$16 sps:$4 sm:$0xff]   ;;  %v17958_v2 = vld [vmem:[%s19316_s27 + $0x2560] ss:$16 sps:$4 sm:$0xff]  }
 0x50a   : > { %12195 = vmatpush1.bf16.msra.mxu0 %v17873_v48  ;;  %13343 = vmatpush1.bf16.msra.mxu1 %v17876_v3  ;;  %v17961_v48 = vld [vmem:[%s19316_s27 + $0x2568] ss:$16 sps:$4 sm:$0xff]   ;;  %v17966_v3 = vld [vmem:[%s19316_s27 + $0x2584] ss:$16 sps:$4 sm:$0xff]  }
 0x50b   : > { %12196 = vmatprep.subr.bf16.mxu0 %v17881_v56  ;;  %13344 = vmatprep.subr.bf16.mxu1 %v17884_v5  ;;  %v17969_v56 = vld [vmem:[%s19316_s27 + $0x258c] ss:$16 sps:$4 sm:$0xff]   ;;  %v17964_v5 = vld [vmem:[%s19316_s27 + $0x2580] ss:$16 sps:$4 sm:$0xff]  }
 0x50e   : > { %12197 = vmatpush1.bf16.msra.mxu0 %v17879_v54  ;;  %13345 = vmatpush1.bf16.msra.mxu1 %v17882_v59  ;;  %v17967_v54 = vld [vmem:[%s19316_s27 + $0x2588] ss:$16 sps:$4 sm:$0xff]   ;;  %v17972_v59 = vld [vmem:[%s19316_s27 + $0x25a4] ss:$16 sps:$4 sm:$0xff]  }
 0x50f   : > { %12198 = vmatprep.subr.bf16.mxu0 %v17887_v8  ;;  %13346 = vmatprep.subr.bf16.mxu1 %v17890_v57  ;;  %v17975_v8 = vld [vmem:[%s19316_s27 + $0x25ac] ss:$16 sps:$4 sm:$0xff]   ;;  %v17970_v57 = vld [vmem:[%s19316_s27 + $0x25a0] ss:$16 sps:$4 sm:$0xff]  }
 0x512   : > { %12199 = vmatpush1.bf16.msra.mxu0 %v17885_v12  ;;  %13347 = vmatpush1.bf16.msra.mxu1 %v17888_v13  ;;  %v17973_v12 = vld [vmem:[%s19316_s27 + $0x25a8] ss:$16 sps:$4 sm:$0xff]   ;;  %v17978_v13 = vld [vmem:[%s19316_s27 + $0x25c4] ss:$16 sps:$4 sm:$0xff]  }
 0x513   : > { %12209 = vmatprep.subr.bf16.mxu0 %v17894_v15  ;;  %13357 = vmatprep.subr.bf16.mxu1 %v17897_v60  ;;  %v17981_v15 = vld [vmem:[%s19316_s27 + $0x25cc] ss:$16 sps:$4 sm:$0xff]   ;;  %v522_v60 = vcombine.high %v20665_v6, %v20665_v6  ;;  %v17982_v6 = vld [vmem:[%s19316_s27 + $0x25e0] ss:$16 sps:$4 sm:$0xff]  }
 0x515   : > { %12201 = vmatmul.mubr.bf16.vlgmr.msra.gmra.mrb[0].mxu0 %v697_v17  ;;  %13349 = vmatmul.mubr.bf16.vlgmr.msra.gmra.mrb[0].mxu1 %v697_v17  ;;  %v17979_v17 = vld [vmem:[%s19316_s27 + $0x25c8] ss:$16 sps:$4 sm:$0xff]  }
 0x516   : > { %12210 = vmatpush1.bf16.msra.mxu0 %v17892_v63  ;;  %13358 = vmatpush1.bf16.msra.mxu1 %v17895_v18  ;;  %v17984_v63 = vld [vmem:[%s19316_s27 + $0x25e4] ss:$16 sps:$4 sm:$0xff]   ;;  %v17987_v18 = vld [vmem:[%s19316_s27 + $0x25ec] ss:$16 sps:$4 sm:$0xff]  }
 0x517   : > { %12211 = vmatprep.subr.bf16.mxu0 %v17900_v19  ;;  %13359 = vmatprep.subr.bf16.mxu1 %v17903_v20  ;;  %v20746_v19 = vrot.slane %v522_v60, %v19393_v50  ;;  %v17985_v20 = vld [vmem:[%s19316_s27 + $0x25e8] ss:$16 sps:$4 sm:$0xff]  }
 0x518   : > { %12241 = vmatprep.mubr.bf16.mxu0 %v700_v21  ;;  %13389 = vmatprep.mubr.bf16.mxu1 %v700_v21  ;;  %v17990_v21 = vld [vmem:[%s19316_s27 + $0x2604] ss:$16 sps:$4 sm:$0xff]   ;;  %v18063_v60 = vld [vmem:[%s19316_s27 + $0x2788] ss:$16 sps:$4 sm:$0xff]  }
 0x51a   : > { %12212 = vmatpush1.bf16.msra.mxu0 %v17898_v4  ;;  %13360 = vmatpush1.bf16.msra.mxu1 %v17901_v9  ;;  %v17993_v4 = vld [vmem:[%s19316_s27 + $0x260c] ss:$16 sps:$4 sm:$0xff]   ;;  %v538_v9 = vcombine.high %v20746_v19, %v20746_v19 }
 0x51b   : > { %12213 = vmatprep.subr.bf16.mxu0 %v17906_v23  ;;  %13361 = vmatprep.subr.bf16.mxu1 %v17909_v7  ;;  %v699_v23 = vpack.c.bf16 %v20673_v11, %v20673_v11  ;;  %v17988_v7 = vld [vmem:[%s19316_s27 + $0x2600] ss:$16 sps:$4 sm:$0xff]  }
 0x51c   : > { %v17994_v11 = vld [vmem:[%s19316_s27 + $0x2620] ss:$16 sps:$4 sm:$0xff]  }
 0x51e   : > { %12214 = vmatpush1.bf16.msra.mxu0 %v17904_v24  ;;  %13362 = vmatpush1.bf16.msra.mxu1 %v17907_v10  ;;  %v17991_v24 = vld [vmem:[%s19316_s27 + $0x2608] ss:$16 sps:$4 sm:$0xff]   ;;  %v17996_v10 = vld [vmem:[%s19316_s27 + $0x2624] ss:$16 sps:$4 sm:$0xff]  }
 0x51f   : > { %12215 = vmatprep.subr.bf16.mxu0 %v17912_v28  ;;  %13363 = vmatprep.subr.bf16.mxu1 %v17915_v31  ;;  %v17999_v28 = vld [vmem:[%s19316_s27 + $0x262c] ss:$16 sps:$4 sm:$0xff]   ;;  %v702_v31 = vpack.c.bf16 %v538_v9, %v538_v9  ;;  %v18075_v9 = vld [vmem:[%s19316_s27 + $0x27c8] ss:$16 sps:$4 sm:$0xff]  }
 0x522   : > { %12216 = vmatpush1.bf16.msra.mxu0 %v17910_v32  ;;  %13364 = vmatpush1.bf16.msra.mxu1 %v17913_v34  ;;  %v17997_v32 = vld [vmem:[%s19316_s27 + $0x2628] ss:$16 sps:$4 sm:$0xff]   ;;  %v18002_v34 = vld [vmem:[%s19316_s27 + $0x2644] ss:$16 sps:$4 sm:$0xff]  }
 0x523   : > { %12217 = vmatprep.subr.bf16.mxu0 %v17918_v14  ;;  %13365 = vmatprep.subr.bf16.mxu1 %v17921_v35  ;;  %v18005_v14 = vld [vmem:[%s19316_s27 + $0x264c] ss:$16 sps:$4 sm:$0xff]   ;;  %v18000_v35 = vld [vmem:[%s19316_s27 + $0x2640] ss:$16 sps:$4 sm:$0xff]  }
 0x526   : > { %12218 = vmatpush1.bf16.msra.mxu0 %v17916_v36  ;;  %13366 = vmatpush1.bf16.msra.mxu1 %v17919_v27  ;;  %v18003_v36 = vld [vmem:[%s19316_s27 + $0x2648] ss:$16 sps:$4 sm:$0xff]   ;;  %v18008_v27 = vld [vmem:[%s19316_s27 + $0x2664] ss:$16 sps:$4 sm:$0xff]  }
 0x527   : > { %12219 = vmatprep.subr.bf16.mxu0 %v17924_v37  ;;  %13367 = vmatprep.subr.bf16.mxu1 %v17927_v25  ;;  %v18011_v37 = vld [vmem:[%s19316_s27 + $0x266c] ss:$16 sps:$4 sm:$0xff]   ;;  %v18006_v25 = vld [vmem:[%s19316_s27 + $0x2660] ss:$16 sps:$4 sm:$0xff]  }
 0x52a   : > { %12220 = vmatpush1.bf16.msra.mxu0 %v17922_v39  ;;  %13368 = vmatpush1.bf16.msra.mxu1 %v17925_v22  ;;  %v18009_v39 = vld [vmem:[%s19316_s27 + $0x2668] ss:$16 sps:$4 sm:$0xff]   ;;  %v18014_v22 = vld [vmem:[%s19316_s27 + $0x2684] ss:$16 sps:$4 sm:$0xff]  }
 0x52b   : > { %12221 = vmatprep.subr.bf16.mxu0 %v17930_v29  ;;  %13369 = vmatprep.subr.bf16.mxu1 %v17933_v42  ;;  %v18017_v29 = vld [vmem:[%s19316_s27 + $0x268c] ss:$16 sps:$4 sm:$0xff]   ;;  %v18012_v42 = vld [vmem:[%s19316_s27 + $0x2680] ss:$16 sps:$4 sm:$0xff]  }
 0x52e   : > { %12222 = vmatpush1.bf16.msra.mxu0 %v17928_v45  ;;  %13370 = vmatpush1.bf16.msra.mxu1 %v17931_v26  ;;  %v18015_v45 = vld [vmem:[%s19316_s27 + $0x2688] ss:$16 sps:$4 sm:$0xff]   ;;  %v18020_v26 = vld [vmem:[%s19316_s27 + $0x26a4] ss:$16 sps:$4 sm:$0xff]  }
 0x52f   : > { %12223 = vmatprep.subr.bf16.mxu0 %v17936_v47  ;;  %13371 = vmatprep.subr.bf16.mxu1 %v17939_v49  ;;  %v18023_v47 = vld [vmem:[%s19316_s27 + $0x26ac] ss:$16 sps:$4 sm:$0xff]   ;;  %v18018_v49 = vld [vmem:[%s19316_s27 + $0x26a0] ss:$16 sps:$4 sm:$0xff]  }
 0x532   : > { %12224 = vmatpush1.bf16.msra.mxu0 %v17934_v30  ;;  %13372 = vmatpush1.bf16.msra.mxu1 %v17937_v51  ;;  %v18021_v30 = vld [vmem:[%s19316_s27 + $0x26a8] ss:$16 sps:$4 sm:$0xff]   ;;  %v18026_v51 = vld [vmem:[%s19316_s27 + $0x26c4] ss:$16 sps:$4 sm:$0xff]  }
 0x533   : > { %12225 = vmatprep.subr.bf16.mxu0 %v17942_v52  ;;  %13373 = vmatprep.subr.bf16.mxu1 %v17945_v33  ;;  %v18029_v52 = vld [vmem:[%s19316_s27 + $0x26cc] ss:$16 sps:$4 sm:$0xff]   ;;  %v18024_v33 = vld [vmem:[%s19316_s27 + $0x26c0] ss:$16 sps:$4 sm:$0xff]  }
 0x536   : > { %12226 = vmatpush1.bf16.msra.mxu0 %v17940_v53  ;;  %13374 = vmatpush1.bf16.msra.mxu1 %v17943_v40  ;;  %v18027_v53 = vld [vmem:[%s19316_s27 + $0x26c8] ss:$16 sps:$4 sm:$0xff]   ;;  %v18032_v40 = vld [vmem:[%s19316_s27 + $0x26e4] ss:$16 sps:$4 sm:$0xff]  }
 0x537   : > { %12227 = vmatprep.subr.bf16.mxu0 %v17948_v55  ;;  %13375 = vmatprep.subr.bf16.mxu1 %v17951_v38  ;;  %v18035_v55 = vld [vmem:[%s19316_s27 + $0x26ec] ss:$16 sps:$4 sm:$0xff]   ;;  %v18030_v38 = vld [vmem:[%s19316_s27 + $0x26e0] ss:$16 sps:$4 sm:$0xff]  }
 0x53a   : > { %12228 = vmatpush1.bf16.msra.mxu0 %v17946_v43  ;;  %13376 = vmatpush1.bf16.msra.mxu1 %v17949_v58  ;;  %v18033_v43 = vld [vmem:[%s19316_s27 + $0x26e8] ss:$16 sps:$4 sm:$0xff]   ;;  %v18038_v58 = vld [vmem:[%s19316_s27 + $0x2704] ss:$16 sps:$4 sm:$0xff]  }
 0x53b   : > { %12229 = vmatprep.subr.bf16.mxu0 %v17954_v41  ;;  %13377 = vmatprep.subr.bf16.mxu1 %v17957_v61  ;;  %v18041_v41 = vld [vmem:[%s19316_s27 + $0x270c] ss:$16 sps:$4 sm:$0xff]   ;;  %v18036_v61 = vld [vmem:[%s19316_s27 + $0x2700] ss:$16 sps:$4 sm:$0xff]  }
 0x53e   : > { %12230 = vmatpush1.bf16.msra.mxu0 %v17952_v62  ;;  %13378 = vmatpush1.bf16.msra.mxu1 %v17955_v0  ;;  %v18039_v62 = vld [vmem:[%s19316_s27 + $0x2708] ss:$16 sps:$4 sm:$0xff]   ;;  %v18044_v0 = vld [vmem:[%s19316_s27 + $0x2724] ss:$16 sps:$4 sm:$0xff]  }
 0x53f   : > { %12231 = vmatprep.subr.bf16.mxu0 %v17960_v46  ;;  %13379 = vmatprep.subr.bf16.mxu1 %v17963_v1  ;;  %v18047_v46 = vld [vmem:[%s19316_s27 + $0x272c] ss:$16 sps:$4 sm:$0xff]   ;;  %v18042_v1 = vld [vmem:[%s19316_s27 + $0x2720] ss:$16 sps:$4 sm:$0xff]  }
 0x542   : > { %12232 = vmatpush1.bf16.msra.mxu0 %v17958_v2  ;;  %13380 = vmatpush1.bf16.msra.mxu1 %v17961_v48  ;;  %v18045_v2 = vld [vmem:[%s19316_s27 + $0x2728] ss:$16 sps:$4 sm:$0xff]   ;;  %v18050_v48 = vld [vmem:[%s19316_s27 + $0x2744] ss:$16 sps:$4 sm:$0xff]  }
 0x543   : > { %12233 = vmatprep.subr.bf16.mxu0 %v17966_v3  ;;  %13381 = vmatprep.subr.bf16.mxu1 %v17969_v56  ;;  %v18053_v3 = vld [vmem:[%s19316_s27 + $0x274c] ss:$16 sps:$4 sm:$0xff]   ;;  %v18048_v56 = vld [vmem:[%s19316_s27 + $0x2740] ss:$16 sps:$4 sm:$0xff]  }
 0x546   : > { %12234 = vmatpush1.bf16.msra.mxu0 %v17964_v5  ;;  %13382 = vmatpush1.bf16.msra.mxu1 %v17967_v54  ;;  %v18051_v5 = vld [vmem:[%s19316_s27 + $0x2748] ss:$16 sps:$4 sm:$0xff]   ;;  %v18056_v54 = vld [vmem:[%s19316_s27 + $0x2764] ss:$16 sps:$4 sm:$0xff]  }
 0x547   : > { %12235 = vmatprep.subr.bf16.mxu0 %v17972_v59  ;;  %13383 = vmatprep.subr.bf16.mxu1 %v17975_v8  ;;  %v18059_v59 = vld [vmem:[%s19316_s27 + $0x276c] ss:$16 sps:$4 sm:$0xff]   ;;  %v18054_v8 = vld [vmem:[%s19316_s27 + $0x2760] ss:$16 sps:$4 sm:$0xff]  }
 0x54a   : > { %12236 = vmatpush1.bf16.msra.mxu0 %v17970_v57  ;;  %13384 = vmatpush1.bf16.msra.mxu1 %v17973_v12  ;;  %v18057_v57 = vld [vmem:[%s19316_s27 + $0x2768] ss:$16 sps:$4 sm:$0xff]   ;;  %v18062_v12 = vld [vmem:[%s19316_s27 + $0x2784] ss:$16 sps:$4 sm:$0xff]  }
 0x54b   : > { %12237 = vmatprep.subr.bf16.mxu0 %v17978_v13  ;;  %13385 = vmatprep.subr.bf16.mxu1 %v17981_v15  ;;  %v18065_v13 = vld [vmem:[%s19316_s27 + $0x278c] ss:$16 sps:$4 sm:$0xff]   ;;  %v18060_v15 = vld [vmem:[%s19316_s27 + $0x2780] ss:$16 sps:$4 sm:$0xff]  }
 0x54e   : > { %12238 = vmatpush1.bf16.msra.mxu0 %v17976_v16  ;;  %13386 = vmatpush1.bf16.msra.mxu1 %v17979_v17  ;;  %v18068_v16 = vld [vmem:[%s19316_s27 + $0x27a4] ss:$16 sps:$4 sm:$0xff]   ;;  %v18071_v17 = vld [vmem:[%s19316_s27 + $0x27ac] ss:$16 sps:$4 sm:$0xff]  }
 0x54f   : > { %12239 = vmatprep.subr.bf16.mxu0 %v17984_v63  ;;  %13387 = vmatprep.subr.bf16.mxu1 %v17987_v18  ;;  %v18066_v63 = vld [vmem:[%s19316_s27 + $0x27a0] ss:$16 sps:$4 sm:$0xff]   ;;  %v18069_v18 = vld [vmem:[%s19316_s27 + $0x27a8] ss:$16 sps:$4 sm:$0xff]  }
 0x552   : > { %12240 = vmatpush1.bf16.msra.mxu0 %v17982_v6  ;;  %13388 = vmatpush1.bf16.msra.mxu1 %v17985_v20  ;;  %v18074_v6 = vld [vmem:[%s19316_s27 + $0x27c4] ss:$16 sps:$4 sm:$0xff]   ;;  %v18077_v20 = vld [vmem:[%s19316_s27 + $0x27cc] ss:$16 sps:$4 sm:$0xff]  }
 0x553   : > { %12250 = vmatprep.subr.bf16.mxu0 %v17990_v21  ;;  %13398 = vmatprep.subr.bf16.mxu1 %v17993_v4  ;;  %v20813_v21 = vld [vmem:[%s19337_s11 + $0x50] sm:$0xff]  ;;  %v18072_v4 = vld [vmem:[%s19316_s27 + $0x27c0] ss:$16 sps:$4 sm:$0xff]  }
 0x555   : > { %12242 = vmatmul.mubr.bf16.vlgmr.msra.gmra.mrb[0].mxu0 %v699_v23  ;;  %13390 = vmatmul.mubr.bf16.vlgmr.msra.gmra.mrb[0].mxu1 %v699_v23  ;;  %v18080_v23 = vld [vmem:[%s19316_s27 + $0x27e4] ss:$16 sps:$4 sm:$0xff]  }
 0x556   : > { %12251 = vmatpush1.bf16.msra.mxu0 %v17988_v7  ;;  %13399 = vmatpush1.bf16.msra.mxu1 %v17991_v24  ;;  %v18083_v7 = vld [vmem:[%s19316_s27 + $0x27ec] ss:$16 sps:$4 sm:$0xff]   ;;  %v20821_v24 = vrot.slane %v20813_v21, %v19393_v50 }
 0x557   : > { %12252 = vmatprep.subr.bf16.mxu0 %v17996_v10  ;;  %13400 = vmatprep.subr.bf16.mxu1 %v17999_v28  ;;  %v18078_v10 = vld [vmem:[%s19316_s27 + $0x27e0] ss:$16 sps:$4 sm:$0xff]   ;;  %v18081_v28 = vld [vmem:[%s19316_s27 + $0x27e8] ss:$16 sps:$4 sm:$0xff]  }
 0x558   : > { %12282 = vmatprep.mubr.bf16.mxu0 %v702_v31  ;;  %13430 = vmatprep.mubr.bf16.mxu1 %v702_v31  ;;  %v18087_v31 = vld [vmem:[%s19316_s27 + $0x2804] ss:$16 sps:$4 sm:$0xff]  }
 0x55a   : > { %12253 = vmatpush1.bf16.msra.mxu0 %v17994_v11  ;;  %13401 = vmatpush1.bf16.msra.mxu1 %v17997_v32  ;;  %v18090_v11 = vld [vmem:[%s19316_s27 + $0x280c] ss:$16 sps:$4 sm:$0xff]   ;;  %v554_v32 = vcombine.high %v20821_v24, %v20821_v24 }
 0x55b   : > { %12254 = vmatprep.subr.bf16.mxu0 %v18002_v34  ;;  %13402 = vmatprep.subr.bf16.mxu1 %v18005_v14  ;;  %v701_v34 = vpack.c.bf16 %v20746_v19, %v20746_v19  ;;  %v18085_v14 = vld [vmem:[%s19316_s27 + $0x2800] ss:$16 sps:$4 sm:$0xff]  }
 0x55c   : > { %v18091_v19 = vld [vmem:[%s19316_s27 + $0x2820] ss:$16 sps:$4 sm:$0xff]  }
 0x55e   : > { %12255 = vmatpush1.bf16.msra.mxu0 %v18000_v35  ;;  %13403 = vmatpush1.bf16.msra.mxu1 %v18003_v36  ;;  %v18088_v35 = vld [vmem:[%s19316_s27 + $0x2808] ss:$16 sps:$4 sm:$0xff]   ;;  %v18093_v36 = vld [vmem:[%s19316_s27 + $0x2824] ss:$16 sps:$4 sm:$0xff]  }
 0x55f   : > { %12256 = vmatprep.subr.bf16.mxu0 %v18008_v27  ;;  %13404 = vmatprep.subr.bf16.mxu1 %v18011_v37  ;;  %v18096_v27 = vld [vmem:[%s19316_s27 + $0x282c] ss:$16 sps:$4 sm:$0xff]   ;;  %v704_v37 = vpack.c.bf16 %v554_v32, %v554_v32  ;;  %v18169_v32 = vld [vmem:[%s19316_s27 + $0x29c0] ss:$16 sps:$4 sm:$0xff]  }
 0x562   : > { %12257 = vmatpush1.bf16.msra.mxu0 %v18006_v25  ;;  %13405 = vmatpush1.bf16.msra.mxu1 %v18009_v39  ;;  %v18094_v25 = vld [vmem:[%s19316_s27 + $0x2828] ss:$16 sps:$4 sm:$0xff]   ;;  %v18099_v39 = vld [vmem:[%s19316_s27 + $0x2844] ss:$16 sps:$4 sm:$0xff]  }
 0x563   : > { %12258 = vmatprep.subr.bf16.mxu0 %v18014_v22  ;;  %13406 = vmatprep.subr.bf16.mxu1 %v18017_v29  ;;  %v18102_v22 = vld [vmem:[%s19316_s27 + $0x284c] ss:$16 sps:$4 sm:$0xff]   ;;  %v18097_v29 = vld [vmem:[%s19316_s27 + $0x2840] ss:$16 sps:$4 sm:$0xff]  }
 0x566   : > { %12259 = vmatpush1.bf16.msra.mxu0 %v18012_v42  ;;  %13407 = vmatpush1.bf16.msra.mxu1 %v18015_v45  ;;  %v18100_v42 = vld [vmem:[%s19316_s27 + $0x2848] ss:$16 sps:$4 sm:$0xff]   ;;  %v18105_v45 = vld [vmem:[%s19316_s27 + $0x2864] ss:$16 sps:$4 sm:$0xff]  }
 0x567   : > { %12260 = vmatprep.subr.bf16.mxu0 %v18020_v26  ;;  %13408 = vmatprep.subr.bf16.mxu1 %v18023_v47  ;;  %v18108_v26 = vld [vmem:[%s19316_s27 + $0x286c] ss:$16 sps:$4 sm:$0xff]   ;;  %v18103_v47 = vld [vmem:[%s19316_s27 + $0x2860] ss:$16 sps:$4 sm:$0xff]  }
 0x56a   : > { %12261 = vmatpush1.bf16.msra.mxu0 %v18018_v49  ;;  %13409 = vmatpush1.bf16.msra.mxu1 %v18021_v30  ;;  %v18106_v49 = vld [vmem:[%s19316_s27 + $0x2868] ss:$16 sps:$4 sm:$0xff]   ;;  %v18111_v30 = vld [vmem:[%s19316_s27 + $0x2884] ss:$16 sps:$4 sm:$0xff]  }
 0x56b   : > { %12262 = vmatprep.subr.bf16.mxu0 %v18026_v51  ;;  %13410 = vmatprep.subr.bf16.mxu1 %v18029_v52  ;;  %v18114_v51 = vld [vmem:[%s19316_s27 + $0x288c] ss:$16 sps:$4 sm:$0xff]   ;;  %v18109_v52 = vld [vmem:[%s19316_s27 + $0x2880] ss:$16 sps:$4 sm:$0xff]  }
 0x56e   : > { %12263 = vmatpush1.bf16.msra.mxu0 %v18024_v33  ;;  %13411 = vmatpush1.bf16.msra.mxu1 %v18027_v53  ;;  %v18112_v33 = vld [vmem:[%s19316_s27 + $0x2888] ss:$16 sps:$4 sm:$0xff]   ;;  %v18117_v53 = vld [vmem:[%s19316_s27 + $0x28a4] ss:$16 sps:$4 sm:$0xff]  }
 0x56f   : > { %12264 = vmatprep.subr.bf16.mxu0 %v18032_v40  ;;  %13412 = vmatprep.subr.bf16.mxu1 %v18035_v55  ;;  %v18120_v40 = vld [vmem:[%s19316_s27 + $0x28ac] ss:$16 sps:$4 sm:$0xff]   ;;  %v18115_v55 = vld [vmem:[%s19316_s27 + $0x28a0] ss:$16 sps:$4 sm:$0xff]  }
 0x572   : > { %12265 = vmatpush1.bf16.msra.mxu0 %v18030_v38  ;;  %13413 = vmatpush1.bf16.msra.mxu1 %v18033_v43  ;;  %v18118_v38 = vld [vmem:[%s19316_s27 + $0x28a8] ss:$16 sps:$4 sm:$0xff]   ;;  %v18123_v43 = vld [vmem:[%s19316_s27 + $0x28c4] ss:$16 sps:$4 sm:$0xff]  }
 0x573   : > { %12266 = vmatprep.subr.bf16.mxu0 %v18038_v58  ;;  %13414 = vmatprep.subr.bf16.mxu1 %v18041_v41  ;;  %v18126_v58 = vld [vmem:[%s19316_s27 + $0x28cc] ss:$16 sps:$4 sm:$0xff]   ;;  %v18121_v41 = vld [vmem:[%s19316_s27 + $0x28c0] ss:$16 sps:$4 sm:$0xff]  }
 0x576   : > { %12267 = vmatpush1.bf16.msra.mxu0 %v18036_v61  ;;  %13415 = vmatpush1.bf16.msra.mxu1 %v18039_v62  ;;  %v18124_v61 = vld [vmem:[%s19316_s27 + $0x28c8] ss:$16 sps:$4 sm:$0xff]   ;;  %v18129_v62 = vld [vmem:[%s19316_s27 + $0x28e4] ss:$16 sps:$4 sm:$0xff]  }
 0x577   : > { %12268 = vmatprep.subr.bf16.mxu0 %v18044_v0  ;;  %13416 = vmatprep.subr.bf16.mxu1 %v18047_v46  ;;  %v18132_v0 = vld [vmem:[%s19316_s27 + $0x28ec] ss:$16 sps:$4 sm:$0xff]   ;;  %v18127_v46 = vld [vmem:[%s19316_s27 + $0x28e0] ss:$16 sps:$4 sm:$0xff]  }
 0x57a   : > { %12269 = vmatpush1.bf16.msra.mxu0 %v18042_v1  ;;  %13417 = vmatpush1.bf16.msra.mxu1 %v18045_v2  ;;  %v18130_v1 = vld [vmem:[%s19316_s27 + $0x28e8] ss:$16 sps:$4 sm:$0xff]   ;;  %v18135_v2 = vld [vmem:[%s19316_s27 + $0x2904] ss:$16 sps:$4 sm:$0xff]  }
 0x57b   : > { %12270 = vmatprep.subr.bf16.mxu0 %v18050_v48  ;;  %13418 = vmatprep.subr.bf16.mxu1 %v18053_v3  ;;  %v18138_v48 = vld [vmem:[%s19316_s27 + $0x290c] ss:$16 sps:$4 sm:$0xff]   ;;  %v18133_v3 = vld [vmem:[%s19316_s27 + $0x2900] ss:$16 sps:$4 sm:$0xff]  }
 0x57e   : > { %12271 = vmatpush1.bf16.msra.mxu0 %v18048_v56  ;;  %13419 = vmatpush1.bf16.msra.mxu1 %v18051_v5  ;;  %v18136_v56 = vld [vmem:[%s19316_s27 + $0x2908] ss:$16 sps:$4 sm:$0xff]   ;;  %v18141_v5 = vld [vmem:[%s19316_s27 + $0x2924] ss:$16 sps:$4 sm:$0xff]  }
 0x57f   : > { %12272 = vmatprep.subr.bf16.mxu0 %v18056_v54  ;;  %13420 = vmatprep.subr.bf16.mxu1 %v18059_v59  ;;  %v18144_v54 = vld [vmem:[%s19316_s27 + $0x292c] ss:$16 sps:$4 sm:$0xff]   ;;  %v18139_v59 = vld [vmem:[%s19316_s27 + $0x2920] ss:$16 sps:$4 sm:$0xff]  }
 0x582   : > { %12273 = vmatpush1.bf16.msra.mxu0 %v18054_v8  ;;  %13421 = vmatpush1.bf16.msra.mxu1 %v18057_v57  ;;  %v18142_v8 = vld [vmem:[%s19316_s27 + $0x2928] ss:$16 sps:$4 sm:$0xff]   ;;  %v18147_v57 = vld [vmem:[%s19316_s27 + $0x2944] ss:$16 sps:$4 sm:$0xff]  }
 0x583   : > { %12274 = vmatprep.subr.bf16.mxu0 %v18062_v12  ;;  %13422 = vmatprep.subr.bf16.mxu1 %v18065_v13  ;;  %v18150_v12 = vld [vmem:[%s19316_s27 + $0x294c] ss:$16 sps:$4 sm:$0xff]   ;;  %v18145_v13 = vld [vmem:[%s19316_s27 + $0x2940] ss:$16 sps:$4 sm:$0xff]  }
 0x586   : > { %12275 = vmatpush1.bf16.msra.mxu0 %v18060_v15  ;;  %13423 = vmatpush1.bf16.msra.mxu1 %v18063_v60  ;;  %v18148_v15 = vld [vmem:[%s19316_s27 + $0x2948] ss:$16 sps:$4 sm:$0xff]   ;;  %v18153_v60 = vld [vmem:[%s19316_s27 + $0x2964] ss:$16 sps:$4 sm:$0xff]  }
 0x587   : > { %12276 = vmatprep.subr.bf16.mxu0 %v18068_v16  ;;  %13424 = vmatprep.subr.bf16.mxu1 %v18071_v17  ;;  %v18156_v16 = vld [vmem:[%s19316_s27 + $0x296c] ss:$16 sps:$4 sm:$0xff]   ;;  %v18151_v17 = vld [vmem:[%s19316_s27 + $0x2960] ss:$16 sps:$4 sm:$0xff]  }
 0x58a   : > { %12277 = vmatpush1.bf16.msra.mxu0 %v18066_v63  ;;  %13425 = vmatpush1.bf16.msra.mxu1 %v18069_v18  ;;  %v18154_v63 = vld [vmem:[%s19316_s27 + $0x2968] ss:$16 sps:$4 sm:$0xff]   ;;  %v18159_v18 = vld [vmem:[%s19316_s27 + $0x2984] ss:$16 sps:$4 sm:$0xff]  }
 0x58b   : > { %12278 = vmatprep.subr.bf16.mxu0 %v18074_v6  ;;  %13426 = vmatprep.subr.bf16.mxu1 %v18077_v20  ;;  %v18162_v6 = vld [vmem:[%s19316_s27 + $0x298c] ss:$16 sps:$4 sm:$0xff]   ;;  %v18157_v20 = vld [vmem:[%s19316_s27 + $0x2980] ss:$16 sps:$4 sm:$0xff]  }
 0x58e   : > { %12279 = vmatpush1.bf16.msra.mxu0 %v18072_v4  ;;  %13427 = vmatpush1.bf16.msra.mxu1 %v18075_v9  ;;  %v18160_v4 = vld [vmem:[%s19316_s27 + $0x2988] ss:$16 sps:$4 sm:$0xff]   ;;  %v18165_v9 = vld [vmem:[%s19316_s27 + $0x29a4] ss:$16 sps:$4 sm:$0xff]  }
 0x58f   : > { %12280 = vmatprep.subr.bf16.mxu0 %v18080_v23  ;;  %13428 = vmatprep.subr.bf16.mxu1 %v18083_v7  ;;  %v18168_v23 = vld [vmem:[%s19316_s27 + $0x29ac] ss:$16 sps:$4 sm:$0xff]   ;;  %v18163_v7 = vld [vmem:[%s19316_s27 + $0x29a0] ss:$16 sps:$4 sm:$0xff]  }
 0x592   : > { %12281 = vmatpush1.bf16.msra.mxu0 %v18078_v10  ;;  %13429 = vmatpush1.bf16.msra.mxu1 %v18081_v28  ;;  %v18166_v10 = vld [vmem:[%s19316_s27 + $0x29a8] ss:$16 sps:$4 sm:$0xff]   ;;  %v18171_v28 = vld [vmem:[%s19316_s27 + $0x29c4] ss:$16 sps:$4 sm:$0xff]  }
 0x593   : > { %12291 = vmatprep.subr.bf16.mxu0 %v18087_v31  ;;  %13439 = vmatprep.subr.bf16.mxu1 %v18090_v11  ;;  %v18174_v31 = vld [vmem:[%s19316_s27 + $0x29cc] ss:$16 sps:$4 sm:$0xff]   ;;  %v539_v11 = vcombine.high %v20813_v21, %v20813_v21  ;;  %v18175_v21 = vld [vmem:[%s19316_s27 + $0x29e0] ss:$16 sps:$4 sm:$0xff]  }
 0x595   : > { %12283 = vmatmul.mubr.bf16.vlgmr.msra.gmra.mrb[0].mxu0 %v701_v34  ;;  %13431 = vmatmul.mubr.bf16.vlgmr.msra.gmra.mrb[0].mxu1 %v701_v34  ;;  %v18172_v34 = vld [vmem:[%s19316_s27 + $0x29c8] ss:$16 sps:$4 sm:$0xff]  }
 0x596   : > { %12292 = vmatpush1.bf16.msra.mxu0 %v18085_v14  ;;  %13440 = vmatpush1.bf16.msra.mxu1 %v18088_v35  ;;  %v18177_v14 = vld [vmem:[%s19316_s27 + $0x29e4] ss:$16 sps:$4 sm:$0xff]   ;;  %v18180_v35 = vld [vmem:[%s19316_s27 + $0x29ec] ss:$16 sps:$4 sm:$0xff]  }
 0x597   : > { %12293 = vmatprep.subr.bf16.mxu0 %v18093_v36  ;;  %13441 = vmatprep.subr.bf16.mxu1 %v18096_v27  ;;  %v20894_v36 = vrot.slane %v539_v11, %v19393_v50  ;;  %v18178_v27 = vld [vmem:[%s19316_s27 + $0x29e8] ss:$16 sps:$4 sm:$0xff]  }
 0x598   : > { %12323 = vmatprep.mubr.bf16.mxu0 %v704_v37  ;;  %13471 = vmatprep.mubr.bf16.mxu1 %v704_v37  ;;  %v18183_v37 = vld [vmem:[%s19316_s27 + $0x2a04] ss:$16 sps:$4 sm:$0xff]   ;;  %v18256_v11 = vld [vmem:[%s19316_s27 + $0x2b88] ss:$16 sps:$4 sm:$0xff]  }
 0x59a   : > { %12294 = vmatpush1.bf16.msra.mxu0 %v18091_v19  ;;  %13442 = vmatpush1.bf16.msra.mxu1 %v18094_v25  ;;  %v18186_v19 = vld [vmem:[%s19316_s27 + $0x2a0c] ss:$16 sps:$4 sm:$0xff]   ;;  %v555_v25 = vcombine.high %v20894_v36, %v20894_v36 }
 0x59b   : > { %12295 = vmatprep.subr.bf16.mxu0 %v18099_v39  ;;  %13443 = vmatprep.subr.bf16.mxu1 %v18102_v22  ;;  %v703_v39 = vpack.c.bf16 %v20821_v24, %v20821_v24  ;;  %v18181_v22 = vld [vmem:[%s19316_s27 + $0x2a00] ss:$16 sps:$4 sm:$0xff]  }
 0x59c   : > { %v18187_v24 = vld [vmem:[%s19316_s27 + $0x2a20] ss:$16 sps:$4 sm:$0xff]  }
 0x59e   : > { %12296 = vmatpush1.bf16.msra.mxu0 %v18097_v29  ;;  %13444 = vmatpush1.bf16.msra.mxu1 %v18100_v42  ;;  %v18184_v29 = vld [vmem:[%s19316_s27 + $0x2a08] ss:$16 sps:$4 sm:$0xff]   ;;  %v18189_v42 = vld [vmem:[%s19316_s27 + $0x2a24] ss:$16 sps:$4 sm:$0xff]  }
 0x59f   : > { %12297 = vmatprep.subr.bf16.mxu0 %v18105_v45  ;;  %13445 = vmatprep.subr.bf16.mxu1 %v18108_v26  ;;  %v18192_v45 = vld [vmem:[%s19316_s27 + $0x2a2c] ss:$16 sps:$4 sm:$0xff]   ;;  %v706_v26 = vpack.c.bf16 %v555_v25, %v555_v25  ;;  %v18268_v25 = vld [vmem:[%s19316_s27 + $0x2bc8] ss:$16 sps:$4 sm:$0xff]  }
 0x5a2   : > { %12298 = vmatpush1.bf16.msra.mxu0 %v18103_v47  ;;  %13446 = vmatpush1.bf16.msra.mxu1 %v18106_v49  ;;  %v18190_v47 = vld [vmem:[%s19316_s27 + $0x2a28] ss:$16 sps:$4 sm:$0xff]   ;;  %v18195_v49 = vld [vmem:[%s19316_s27 + $0x2a44] ss:$16 sps:$4 sm:$0xff]  }
 0x5a3   : > { %12299 = vmatprep.subr.bf16.mxu0 %v18111_v30  ;;  %13447 = vmatprep.subr.bf16.mxu1 %v18114_v51  ;;  %v18198_v30 = vld [vmem:[%s19316_s27 + $0x2a4c] ss:$16 sps:$4 sm:$0xff]   ;;  %v18193_v51 = vld [vmem:[%s19316_s27 + $0x2a40] ss:$16 sps:$4 sm:$0xff]  }
 0x5a6   : > { %12300 = vmatpush1.bf16.msra.mxu0 %v18109_v52  ;;  %13448 = vmatpush1.bf16.msra.mxu1 %v18112_v33  ;;  %v18196_v52 = vld [vmem:[%s19316_s27 + $0x2a48] ss:$16 sps:$4 sm:$0xff]   ;;  %v18201_v33 = vld [vmem:[%s19316_s27 + $0x2a64] ss:$16 sps:$4 sm:$0xff]  }
 0x5a7   : > { %12301 = vmatprep.subr.bf16.mxu0 %v18117_v53  ;;  %13449 = vmatprep.subr.bf16.mxu1 %v18120_v40  ;;  %v18204_v53 = vld [vmem:[%s19316_s27 + $0x2a6c] ss:$16 sps:$4 sm:$0xff]   ;;  %v18199_v40 = vld [vmem:[%s19316_s27 + $0x2a60] ss:$16 sps:$4 sm:$0xff]  }
 0x5aa   : > { %12302 = vmatpush1.bf16.msra.mxu0 %v18115_v55  ;;  %13450 = vmatpush1.bf16.msra.mxu1 %v18118_v38  ;;  %v18202_v55 = vld [vmem:[%s19316_s27 + $0x2a68] ss:$16 sps:$4 sm:$0xff]   ;;  %v18207_v38 = vld [vmem:[%s19316_s27 + $0x2a84] ss:$16 sps:$4 sm:$0xff]  }
 0x5ab   : > { %12303 = vmatprep.subr.bf16.mxu0 %v18123_v43  ;;  %13451 = vmatprep.subr.bf16.mxu1 %v18126_v58  ;;  %v18210_v43 = vld [vmem:[%s19316_s27 + $0x2a8c] ss:$16 sps:$4 sm:$0xff]   ;;  %v18205_v58 = vld [vmem:[%s19316_s27 + $0x2a80] ss:$16 sps:$4 sm:$0xff]  }
 0x5ae   : > { %12304 = vmatpush1.bf16.msra.mxu0 %v18121_v41  ;;  %13452 = vmatpush1.bf16.msra.mxu1 %v18124_v61  ;;  %v18208_v41 = vld [vmem:[%s19316_s27 + $0x2a88] ss:$16 sps:$4 sm:$0xff]   ;;  %v18213_v61 = vld [vmem:[%s19316_s27 + $0x2aa4] ss:$16 sps:$4 sm:$0xff]  }
 0x5af   : > { %12305 = vmatprep.subr.bf16.mxu0 %v18129_v62  ;;  %13453 = vmatprep.subr.bf16.mxu1 %v18132_v0  ;;  %v18216_v62 = vld [vmem:[%s19316_s27 + $0x2aac] ss:$16 sps:$4 sm:$0xff]   ;;  %v18211_v0 = vld [vmem:[%s19316_s27 + $0x2aa0] ss:$16 sps:$4 sm:$0xff]  }
 0x5b2   : > { %12306 = vmatpush1.bf16.msra.mxu0 %v18127_v46  ;;  %13454 = vmatpush1.bf16.msra.mxu1 %v18130_v1  ;;  %v18214_v46 = vld [vmem:[%s19316_s27 + $0x2aa8] ss:$16 sps:$4 sm:$0xff]   ;;  %v18219_v1 = vld [vmem:[%s19316_s27 + $0x2ac4] ss:$16 sps:$4 sm:$0xff]  }
 0x5b3   : > { %12307 = vmatprep.subr.bf16.mxu0 %v18135_v2  ;;  %13455 = vmatprep.subr.bf16.mxu1 %v18138_v48  ;;  %v18222_v2 = vld [vmem:[%s19316_s27 + $0x2acc] ss:$16 sps:$4 sm:$0xff]   ;;  %v18217_v48 = vld [vmem:[%s19316_s27 + $0x2ac0] ss:$16 sps:$4 sm:$0xff]  }
 0x5b6   : > { %12308 = vmatpush1.bf16.msra.mxu0 %v18133_v3  ;;  %13456 = vmatpush1.bf16.msra.mxu1 %v18136_v56  ;;  %v18220_v3 = vld [vmem:[%s19316_s27 + $0x2ac8] ss:$16 sps:$4 sm:$0xff]   ;;  %v18225_v56 = vld [vmem:[%s19316_s27 + $0x2ae4] ss:$16 sps:$4 sm:$0xff]  }
 0x5b7   : > { %12309 = vmatprep.subr.bf16.mxu0 %v18141_v5  ;;  %13457 = vmatprep.subr.bf16.mxu1 %v18144_v54  ;;  %v18228_v5 = vld [vmem:[%s19316_s27 + $0x2aec] ss:$16 sps:$4 sm:$0xff]   ;;  %v18223_v54 = vld [vmem:[%s19316_s27 + $0x2ae0] ss:$16 sps:$4 sm:$0xff]  }
 0x5ba   : > { %12310 = vmatpush1.bf16.msra.mxu0 %v18139_v59  ;;  %13458 = vmatpush1.bf16.msra.mxu1 %v18142_v8  ;;  %v18226_v59 = vld [vmem:[%s19316_s27 + $0x2ae8] ss:$16 sps:$4 sm:$0xff]   ;;  %v18231_v8 = vld [vmem:[%s19316_s27 + $0x2b04] ss:$16 sps:$4 sm:$0xff]  }
 0x5bb   : > { %12311 = vmatprep.subr.bf16.mxu0 %v18147_v57  ;;  %13459 = vmatprep.subr.bf16.mxu1 %v18150_v12  ;;  %v18234_v57 = vld [vmem:[%s19316_s27 + $0x2b0c] ss:$16 sps:$4 sm:$0xff]   ;;  %v18229_v12 = vld [vmem:[%s19316_s27 + $0x2b00] ss:$16 sps:$4 sm:$0xff]  }
 0x5be   : > { %12312 = vmatpush1.bf16.msra.mxu0 %v18145_v13  ;;  %13460 = vmatpush1.bf16.msra.mxu1 %v18148_v15  ;;  %v18232_v13 = vld [vmem:[%s19316_s27 + $0x2b08] ss:$16 sps:$4 sm:$0xff]   ;;  %v18237_v15 = vld [vmem:[%s19316_s27 + $0x2b24] ss:$16 sps:$4 sm:$0xff]  }
 0x5bf   : > { %12313 = vmatprep.subr.bf16.mxu0 %v18153_v60  ;;  %13461 = vmatprep.subr.bf16.mxu1 %v18156_v16  ;;  %v18240_v60 = vld [vmem:[%s19316_s27 + $0x2b2c] ss:$16 sps:$4 sm:$0xff]   ;;  %v18235_v16 = vld [vmem:[%s19316_s27 + $0x2b20] ss:$16 sps:$4 sm:$0xff]  }
 0x5c2   : > { %12314 = vmatpush1.bf16.msra.mxu0 %v18151_v17  ;;  %13462 = vmatpush1.bf16.msra.mxu1 %v18154_v63  ;;  %v18238_v17 = vld [vmem:[%s19316_s27 + $0x2b28] ss:$16 sps:$4 sm:$0xff]   ;;  %v18243_v63 = vld [vmem:[%s19316_s27 + $0x2b44] ss:$16 sps:$4 sm:$0xff]  }
 0x5c3   : > { %12315 = vmatprep.subr.bf16.mxu0 %v18159_v18  ;;  %13463 = vmatprep.subr.bf16.mxu1 %v18162_v6  ;;  %v18246_v18 = vld [vmem:[%s19316_s27 + $0x2b4c] ss:$16 sps:$4 sm:$0xff]   ;;  %v18241_v6 = vld [vmem:[%s19316_s27 + $0x2b40] ss:$16 sps:$4 sm:$0xff]  }
 0x5c6   : > { %12316 = vmatpush1.bf16.msra.mxu0 %v18157_v20  ;;  %13464 = vmatpush1.bf16.msra.mxu1 %v18160_v4  ;;  %v18244_v20 = vld [vmem:[%s19316_s27 + $0x2b48] ss:$16 sps:$4 sm:$0xff]   ;;  %v18249_v4 = vld [vmem:[%s19316_s27 + $0x2b64] ss:$16 sps:$4 sm:$0xff]  }
 0x5c7   : > { %12317 = vmatprep.subr.bf16.mxu0 %v18165_v9  ;;  %13465 = vmatprep.subr.bf16.mxu1 %v18168_v23  ;;  %v18252_v9 = vld [vmem:[%s19316_s27 + $0x2b6c] ss:$16 sps:$4 sm:$0xff]   ;;  %v18247_v23 = vld [vmem:[%s19316_s27 + $0x2b60] ss:$16 sps:$4 sm:$0xff]  }
 0x5ca   : > { %12318 = vmatpush1.bf16.msra.mxu0 %v18163_v7  ;;  %13466 = vmatpush1.bf16.msra.mxu1 %v18166_v10  ;;  %v18250_v7 = vld [vmem:[%s19316_s27 + $0x2b68] ss:$16 sps:$4 sm:$0xff]   ;;  %v18255_v10 = vld [vmem:[%s19316_s27 + $0x2b84] ss:$16 sps:$4 sm:$0xff]  }
 0x5cb   : > { %12319 = vmatprep.subr.bf16.mxu0 %v18171_v28  ;;  %13467 = vmatprep.subr.bf16.mxu1 %v18174_v31  ;;  %v18258_v28 = vld [vmem:[%s19316_s27 + $0x2b8c] ss:$16 sps:$4 sm:$0xff]   ;;  %v18253_v31 = vld [vmem:[%s19316_s27 + $0x2b80] ss:$16 sps:$4 sm:$0xff]  }
 0x5ce   : > { %12320 = vmatpush1.bf16.msra.mxu0 %v18169_v32  ;;  %13468 = vmatpush1.bf16.msra.mxu1 %v18172_v34  ;;  %v18261_v32 = vld [vmem:[%s19316_s27 + $0x2ba4] ss:$16 sps:$4 sm:$0xff]   ;;  %v18264_v34 = vld [vmem:[%s19316_s27 + $0x2bac] ss:$16 sps:$4 sm:$0xff]  }
 0x5cf   : > { %12321 = vmatprep.subr.bf16.mxu0 %v18177_v14  ;;  %13469 = vmatprep.subr.bf16.mxu1 %v18180_v35  ;;  %v18259_v14 = vld [vmem:[%s19316_s27 + $0x2ba0] ss:$16 sps:$4 sm:$0xff]   ;;  %v18262_v35 = vld [vmem:[%s19316_s27 + $0x2ba8] ss:$16 sps:$4 sm:$0xff]  }
 0x5d2   : > { %12322 = vmatpush1.bf16.msra.mxu0 %v18175_v21  ;;  %13470 = vmatpush1.bf16.msra.mxu1 %v18178_v27  ;;  %v18267_v21 = vld [vmem:[%s19316_s27 + $0x2bc4] ss:$16 sps:$4 sm:$0xff]   ;;  %v18270_v27 = vld [vmem:[%s19316_s27 + $0x2bcc] ss:$16 sps:$4 sm:$0xff]  }
 0x5d3   : > { %12332 = vmatprep.subr.bf16.mxu0 %v18183_v37  ;;  %13480 = vmatprep.subr.bf16.mxu1 %v18186_v19  ;;  %v20961_v37 = vld [vmem:[%s19337_s11 + $0x58] sm:$0xff] }
 0x5d4   : > { %v18265_v19 = vld [vmem:[%s19316_s27 + $0x2bc0] ss:$16 sps:$4 sm:$0xff]  }
 0x5d5   : > { %12324 = vmatmul.mubr.bf16.vlgmr.msra.gmra.mrb[0].mxu0 %v703_v39  ;;  %13472 = vmatmul.mubr.bf16.vlgmr.msra.gmra.mrb[0].mxu1 %v703_v39  ;;  %v18273_v39 = vld [vmem:[%s19316_s27 + $0x2be4] ss:$16 sps:$4 sm:$0xff]  }
 0x5d6   : > { %12333 = vmatpush1.bf16.msra.mxu0 %v18181_v22  ;;  %13481 = vmatpush1.bf16.msra.mxu1 %v18184_v29  ;;  %v18276_v22 = vld [vmem:[%s19316_s27 + $0x2bec] ss:$16 sps:$4 sm:$0xff]   ;;  %v20969_v29 = vrot.slane %v20961_v37, %v19393_v50 }
 0x5d7   : > { %12334 = vmatprep.subr.bf16.mxu0 %v18189_v42  ;;  %13482 = vmatprep.subr.bf16.mxu1 %v18192_v45  ;;  %v18271_v42 = vld [vmem:[%s19316_s27 + $0x2be0] ss:$16 sps:$4 sm:$0xff]   ;;  %v18274_v45 = vld [vmem:[%s19316_s27 + $0x2be8] ss:$16 sps:$4 sm:$0xff]  }
 0x5d8   : > { %12364 = vmatprep.mubr.bf16.mxu0 %v706_v26  ;;  %13512 = vmatprep.mubr.bf16.mxu1 %v706_v26  ;;  %v18280_v26 = vld [vmem:[%s19316_s27 + $0x2c04] ss:$16 sps:$4 sm:$0xff]  }
 0x5da   : > { %12335 = vmatpush1.bf16.msra.mxu0 %v18187_v24  ;;  %13483 = vmatpush1.bf16.msra.mxu1 %v18190_v47  ;;  %v18283_v24 = vld [vmem:[%s19316_s27 + $0x2c0c] ss:$16 sps:$4 sm:$0xff]   ;;  %v571_v47 = vcombine.high %v20969_v29, %v20969_v29 }
 0x5db   : > { %12336 = vmatprep.subr.bf16.mxu0 %v18195_v49  ;;  %13484 = vmatprep.subr.bf16.mxu1 %v18198_v30  ;;  %v705_v49 = vpack.c.bf16 %v20894_v36, %v20894_v36  ;;  %v18278_v30 = vld [vmem:[%s19316_s27 + $0x2c00] ss:$16 sps:$4 sm:$0xff]  }
 0x5dc   : > { %v18284_v36 = vld [vmem:[%s19316_s27 + $0x2c20] ss:$16 sps:$4 sm:$0xff]  }
 0x5de   : > { %12337 = vmatpush1.bf16.msra.mxu0 %v18193_v51  ;;  %13485 = vmatpush1.bf16.msra.mxu1 %v18196_v52  ;;  %v18281_v51 = vld [vmem:[%s19316_s27 + $0x2c08] ss:$16 sps:$4 sm:$0xff]   ;;  %v18286_v52 = vld [vmem:[%s19316_s27 + $0x2c24] ss:$16 sps:$4 sm:$0xff]  }
 0x5df   : > { %12338 = vmatprep.subr.bf16.mxu0 %v18201_v33  ;;  %13486 = vmatprep.subr.bf16.mxu1 %v18204_v53  ;;  %v18289_v33 = vld [vmem:[%s19316_s27 + $0x2c2c] ss:$16 sps:$4 sm:$0xff]   ;;  %v708_v53 = vpack.c.bf16 %v571_v47, %v571_v47  ;;  %v18362_v47 = vld [vmem:[%s19316_s27 + $0x2dc0] ss:$16 sps:$4 sm:$0xff]  }
 0x5e2   : > { %12339 = vmatpush1.bf16.msra.mxu0 %v18199_v40  ;;  %13487 = vmatpush1.bf16.msra.mxu1 %v18202_v55  ;;  %v18287_v40 = vld [vmem:[%s19316_s27 + $0x2c28] ss:$16 sps:$4 sm:$0xff]   ;;  %v18292_v55 = vld [vmem:[%s19316_s27 + $0x2c44] ss:$16 sps:$4 sm:$0xff]  }
 0x5e3   : > { %12340 = vmatprep.subr.bf16.mxu0 %v18207_v38  ;;  %13488 = vmatprep.subr.bf16.mxu1 %v18210_v43  ;;  %v18295_v38 = vld [vmem:[%s19316_s27 + $0x2c4c] ss:$16 sps:$4 sm:$0xff]   ;;  %v18290_v43 = vld [vmem:[%s19316_s27 + $0x2c40] ss:$16 sps:$4 sm:$0xff]  }
 0x5e6   : > { %12341 = vmatpush1.bf16.msra.mxu0 %v18205_v58  ;;  %13489 = vmatpush1.bf16.msra.mxu1 %v18208_v41  ;;  %v18293_v58 = vld [vmem:[%s19316_s27 + $0x2c48] ss:$16 sps:$4 sm:$0xff]   ;;  %v18298_v41 = vld [vmem:[%s19316_s27 + $0x2c64] ss:$16 sps:$4 sm:$0xff]  }
 0x5e7   : > { %12342 = vmatprep.subr.bf16.mxu0 %v18213_v61  ;;  %13490 = vmatprep.subr.bf16.mxu1 %v18216_v62  ;;  %v18301_v61 = vld [vmem:[%s19316_s27 + $0x2c6c] ss:$16 sps:$4 sm:$0xff]   ;;  %v18296_v62 = vld [vmem:[%s19316_s27 + $0x2c60] ss:$16 sps:$4 sm:$0xff]  }
 0x5ea   : > { %12343 = vmatpush1.bf16.msra.mxu0 %v18211_v0  ;;  %13491 = vmatpush1.bf16.msra.mxu1 %v18214_v46  ;;  %v18299_v0 = vld [vmem:[%s19316_s27 + $0x2c68] ss:$16 sps:$4 sm:$0xff]   ;;  %v18304_v46 = vld [vmem:[%s19316_s27 + $0x2c84] ss:$16 sps:$4 sm:$0xff]  }
 0x5eb   : > { %12344 = vmatprep.subr.bf16.mxu0 %v18219_v1  ;;  %13492 = vmatprep.subr.bf16.mxu1 %v18222_v2  ;;  %v18307_v1 = vld [vmem:[%s19316_s27 + $0x2c8c] ss:$16 sps:$4 sm:$0xff]   ;;  %v18302_v2 = vld [vmem:[%s19316_s27 + $0x2c80] ss:$16 sps:$4 sm:$0xff]  }
 0x5ee   : > { %12345 = vmatpush1.bf16.msra.mxu0 %v18217_v48  ;;  %13493 = vmatpush1.bf16.msra.mxu1 %v18220_v3  ;;  %v18305_v48 = vld [vmem:[%s19316_s27 + $0x2c88] ss:$16 sps:$4 sm:$0xff]   ;;  %v18310_v3 = vld [vmem:[%s19316_s27 + $0x2ca4] ss:$16 sps:$4 sm:$0xff]  }
 0x5ef   : > { %12346 = vmatprep.subr.bf16.mxu0 %v18225_v56  ;;  %13494 = vmatprep.subr.bf16.mxu1 %v18228_v5  ;;  %v18313_v56 = vld [vmem:[%s19316_s27 + $0x2cac] ss:$16 sps:$4 sm:$0xff]   ;;  %v18308_v5 = vld [vmem:[%s19316_s27 + $0x2ca0] ss:$16 sps:$4 sm:$0xff]  }
 0x5f2   : > { %12347 = vmatpush1.bf16.msra.mxu0 %v18223_v54  ;;  %13495 = vmatpush1.bf16.msra.mxu1 %v18226_v59  ;;  %v18311_v54 = vld [vmem:[%s19316_s27 + $0x2ca8] ss:$16 sps:$4 sm:$0xff]   ;;  %v18316_v59 = vld [vmem:[%s19316_s27 + $0x2cc4] ss:$16 sps:$4 sm:$0xff]  }
 0x5f3   : > { %12348 = vmatprep.subr.bf16.mxu0 %v18231_v8  ;;  %13496 = vmatprep.subr.bf16.mxu1 %v18234_v57  ;;  %v18319_v8 = vld [vmem:[%s19316_s27 + $0x2ccc] ss:$16 sps:$4 sm:$0xff]   ;;  %v18314_v57 = vld [vmem:[%s19316_s27 + $0x2cc0] ss:$16 sps:$4 sm:$0xff]  }
 0x5f6   : > { %12349 = vmatpush1.bf16.msra.mxu0 %v18229_v12  ;;  %13497 = vmatpush1.bf16.msra.mxu1 %v18232_v13  ;;  %v18317_v12 = vld [vmem:[%s19316_s27 + $0x2cc8] ss:$16 sps:$4 sm:$0xff]   ;;  %v18322_v13 = vld [vmem:[%s19316_s27 + $0x2ce4] ss:$16 sps:$4 sm:$0xff]  }
 0x5f7   : > { %12350 = vmatprep.subr.bf16.mxu0 %v18237_v15  ;;  %13498 = vmatprep.subr.bf16.mxu1 %v18240_v60  ;;  %v18325_v15 = vld [vmem:[%s19316_s27 + $0x2cec] ss:$16 sps:$4 sm:$0xff]   ;;  %v18320_v60 = vld [vmem:[%s19316_s27 + $0x2ce0] ss:$16 sps:$4 sm:$0xff]  }
 0x5fa   : > { %12351 = vmatpush1.bf16.msra.mxu0 %v18235_v16  ;;  %13499 = vmatpush1.bf16.msra.mxu1 %v18238_v17  ;;  %v18323_v16 = vld [vmem:[%s19316_s27 + $0x2ce8] ss:$16 sps:$4 sm:$0xff]   ;;  %v18328_v17 = vld [vmem:[%s19316_s27 + $0x2d04] ss:$16 sps:$4 sm:$0xff]  }
 0x5fb   : > { %12352 = vmatprep.subr.bf16.mxu0 %v18243_v63  ;;  %13500 = vmatprep.subr.bf16.mxu1 %v18246_v18  ;;  %v18331_v63 = vld [vmem:[%s19316_s27 + $0x2d0c] ss:$16 sps:$4 sm:$0xff]   ;;  %v18326_v18 = vld [vmem:[%s19316_s27 + $0x2d00] ss:$16 sps:$4 sm:$0xff]  }
 0x5fe   : > { %12353 = vmatpush1.bf16.msra.mxu0 %v18241_v6  ;;  %13501 = vmatpush1.bf16.msra.mxu1 %v18244_v20  ;;  %v18329_v6 = vld [vmem:[%s19316_s27 + $0x2d08] ss:$16 sps:$4 sm:$0xff]   ;;  %v18334_v20 = vld [vmem:[%s19316_s27 + $0x2d24] ss:$16 sps:$4 sm:$0xff]  }
 0x5ff   : > { %12354 = vmatprep.subr.bf16.mxu0 %v18249_v4  ;;  %13502 = vmatprep.subr.bf16.mxu1 %v18252_v9  ;;  %v18337_v4 = vld [vmem:[%s19316_s27 + $0x2d2c] ss:$16 sps:$4 sm:$0xff]   ;;  %v18332_v9 = vld [vmem:[%s19316_s27 + $0x2d20] ss:$16 sps:$4 sm:$0xff]  }
 0x602   : > { %12355 = vmatpush1.bf16.msra.mxu0 %v18247_v23  ;;  %13503 = vmatpush1.bf16.msra.mxu1 %v18250_v7  ;;  %v18335_v23 = vld [vmem:[%s19316_s27 + $0x2d28] ss:$16 sps:$4 sm:$0xff]   ;;  %v18340_v7 = vld [vmem:[%s19316_s27 + $0x2d44] ss:$16 sps:$4 sm:$0xff]  }
 0x603   : > { %12356 = vmatprep.subr.bf16.mxu0 %v18255_v10  ;;  %13504 = vmatprep.subr.bf16.mxu1 %v18258_v28  ;;  %v18343_v10 = vld [vmem:[%s19316_s27 + $0x2d4c] ss:$16 sps:$4 sm:$0xff]   ;;  %v18338_v28 = vld [vmem:[%s19316_s27 + $0x2d40] ss:$16 sps:$4 sm:$0xff]  }
 0x606   : > { %12357 = vmatpush1.bf16.msra.mxu0 %v18253_v31  ;;  %13505 = vmatpush1.bf16.msra.mxu1 %v18256_v11  ;;  %v18341_v31 = vld [vmem:[%s19316_s27 + $0x2d48] ss:$16 sps:$4 sm:$0xff]   ;;  %v18346_v11 = vld [vmem:[%s19316_s27 + $0x2d64] ss:$16 sps:$4 sm:$0xff]  }
 0x607   : > { %12358 = vmatprep.subr.bf16.mxu0 %v18261_v32  ;;  %13506 = vmatprep.subr.bf16.mxu1 %v18264_v34  ;;  %v18349_v32 = vld [vmem:[%s19316_s27 + $0x2d6c] ss:$16 sps:$4 sm:$0xff]   ;;  %v18344_v34 = vld [vmem:[%s19316_s27 + $0x2d60] ss:$16 sps:$4 sm:$0xff]  }
 0x60a   : > { %12359 = vmatpush1.bf16.msra.mxu0 %v18259_v14  ;;  %13507 = vmatpush1.bf16.msra.mxu1 %v18262_v35  ;;  %v18347_v14 = vld [vmem:[%s19316_s27 + $0x2d68] ss:$16 sps:$4 sm:$0xff]   ;;  %v18352_v35 = vld [vmem:[%s19316_s27 + $0x2d84] ss:$16 sps:$4 sm:$0xff]  }
 0x60b   : > { %12360 = vmatprep.subr.bf16.mxu0 %v18267_v21  ;;  %13508 = vmatprep.subr.bf16.mxu1 %v18270_v27  ;;  %v18355_v21 = vld [vmem:[%s19316_s27 + $0x2d8c] ss:$16 sps:$4 sm:$0xff]   ;;  %v18350_v27 = vld [vmem:[%s19316_s27 + $0x2d80] ss:$16 sps:$4 sm:$0xff]  }
 0x60e   : > { %12361 = vmatpush1.bf16.msra.mxu0 %v18265_v19  ;;  %13509 = vmatpush1.bf16.msra.mxu1 %v18268_v25  ;;  %v18353_v19 = vld [vmem:[%s19316_s27 + $0x2d88] ss:$16 sps:$4 sm:$0xff]   ;;  %v18358_v25 = vld [vmem:[%s19316_s27 + $0x2da4] ss:$16 sps:$4 sm:$0xff]  }
 0x60f   : > { %12362 = vmatprep.subr.bf16.mxu0 %v18273_v39  ;;  %13510 = vmatprep.subr.bf16.mxu1 %v18276_v22  ;;  %v18361_v39 = vld [vmem:[%s19316_s27 + $0x2dac] ss:$16 sps:$4 sm:$0xff]   ;;  %v18356_v22 = vld [vmem:[%s19316_s27 + $0x2da0] ss:$16 sps:$4 sm:$0xff]  }
 0x612   : > { %12363 = vmatpush1.bf16.msra.mxu0 %v18271_v42  ;;  %13511 = vmatpush1.bf16.msra.mxu1 %v18274_v45  ;;  %v18359_v42 = vld [vmem:[%s19316_s27 + $0x2da8] ss:$16 sps:$4 sm:$0xff]   ;;  %v18364_v45 = vld [vmem:[%s19316_s27 + $0x2dc4] ss:$16 sps:$4 sm:$0xff]  }
 0x613   : > { %12373 = vmatprep.subr.bf16.mxu0 %v18280_v26  ;;  %13521 = vmatprep.subr.bf16.mxu1 %v18283_v24  ;;  %v18367_v26 = vld [vmem:[%s19316_s27 + $0x2dcc] ss:$16 sps:$4 sm:$0xff]   ;;  %v556_v24 = vcombine.high %v20961_v37, %v20961_v37  ;;  %v18368_v37 = vld [vmem:[%s19316_s27 + $0x2de0] ss:$16 sps:$4 sm:$0xff]  }
 0x615   : > { %12365 = vmatmul.mubr.bf16.vlgmr.msra.gmra.mrb[0].mxu0 %v705_v49  ;;  %13513 = vmatmul.mubr.bf16.vlgmr.msra.gmra.mrb[0].mxu1 %v705_v49  ;;  %v18365_v49 = vld [vmem:[%s19316_s27 + $0x2dc8] ss:$16 sps:$4 sm:$0xff]  }
 0x616   : > { %12374 = vmatpush1.bf16.msra.mxu0 %v18278_v30  ;;  %13522 = vmatpush1.bf16.msra.mxu1 %v18281_v51  ;;  %v18370_v30 = vld [vmem:[%s19316_s27 + $0x2de4] ss:$16 sps:$4 sm:$0xff]   ;;  %v18373_v51 = vld [vmem:[%s19316_s27 + $0x2dec] ss:$16 sps:$4 sm:$0xff]  }
 0x617   : > { %12375 = vmatprep.subr.bf16.mxu0 %v18286_v52  ;;  %13523 = vmatprep.subr.bf16.mxu1 %v18289_v33  ;;  %v21042_v52 = vrot.slane %v556_v24, %v19393_v50  ;;  %v18371_v33 = vld [vmem:[%s19316_s27 + $0x2de8] ss:$16 sps:$4 sm:$0xff]  }
 0x618   : > { %12405 = vmatprep.mubr.bf16.mxu0 %v708_v53  ;;  %13553 = vmatprep.mubr.bf16.mxu1 %v708_v53  ;;  %v18376_v53 = vld [vmem:[%s19316_s27 + $0x2e04] ss:$16 sps:$4 sm:$0xff]   ;;  %v18449_v24 = vld [vmem:[%s19316_s27 + $0x2f88] ss:$16 sps:$4 sm:$0xff]  }
 0x61a   : > { %12376 = vmatpush1.bf16.msra.mxu0 %v18284_v36  ;;  %13524 = vmatpush1.bf16.msra.mxu1 %v18287_v40  ;;  %v18379_v36 = vld [vmem:[%s19316_s27 + $0x2e0c] ss:$16 sps:$4 sm:$0xff]   ;;  %v572_v40 = vcombine.high %v21042_v52, %v21042_v52 }
 0x61b   : > { %12377 = vmatprep.subr.bf16.mxu0 %v18292_v55  ;;  %13525 = vmatprep.subr.bf16.mxu1 %v18295_v38  ;;  %v707_v55 = vpack.c.bf16 %v20969_v29, %v20969_v29  ;;  %v18374_v38 = vld [vmem:[%s19316_s27 + $0x2e00] ss:$16 sps:$4 sm:$0xff]  }
 0x61c   : > { %v18380_v29 = vld [vmem:[%s19316_s27 + $0x2e20] ss:$16 sps:$4 sm:$0xff]  }
 0x61e   : > { %12378 = vmatpush1.bf16.msra.mxu0 %v18290_v43  ;;  %13526 = vmatpush1.bf16.msra.mxu1 %v18293_v58  ;;  %v18377_v43 = vld [vmem:[%s19316_s27 + $0x2e08] ss:$16 sps:$4 sm:$0xff]   ;;  %v18382_v58 = vld [vmem:[%s19316_s27 + $0x2e24] ss:$16 sps:$4 sm:$0xff]  }
 0x61f   : > { %12379 = vmatprep.subr.bf16.mxu0 %v18298_v41  ;;  %13527 = vmatprep.subr.bf16.mxu1 %v18301_v61  ;;  %v18385_v41 = vld [vmem:[%s19316_s27 + $0x2e2c] ss:$16 sps:$4 sm:$0xff]   ;;  %v710_v61 = vpack.c.bf16 %v572_v40, %v572_v40  ;;  %v18461_v40 = vld [vmem:[%s19316_s27 + $0x2fc8] ss:$16 sps:$4 sm:$0xff]  }
 0x622   : > { %12380 = vmatpush1.bf16.msra.mxu0 %v18296_v62  ;;  %13528 = vmatpush1.bf16.msra.mxu1 %v18299_v0  ;;  %v18383_v62 = vld [vmem:[%s19316_s27 + $0x2e28] ss:$16 sps:$4 sm:$0xff]   ;;  %v18388_v0 = vld [vmem:[%s19316_s27 + $0x2e44] ss:$16 sps:$4 sm:$0xff]  }
 0x623   : > { %12381 = vmatprep.subr.bf16.mxu0 %v18304_v46  ;;  %13529 = vmatprep.subr.bf16.mxu1 %v18307_v1  ;;  %v18391_v46 = vld [vmem:[%s19316_s27 + $0x2e4c] ss:$16 sps:$4 sm:$0xff]   ;;  %v18386_v1 = vld [vmem:[%s19316_s27 + $0x2e40] ss:$16 sps:$4 sm:$0xff]  }
 0x626   : > { %12382 = vmatpush1.bf16.msra.mxu0 %v18302_v2  ;;  %13530 = vmatpush1.bf16.msra.mxu1 %v18305_v48  ;;  %v18389_v2 = vld [vmem:[%s19316_s27 + $0x2e48] ss:$16 sps:$4 sm:$0xff]   ;;  %v18394_v48 = vld [vmem:[%s19316_s27 + $0x2e64] ss:$16 sps:$4 sm:$0xff]  }
 0x627   : > { %12383 = vmatprep.subr.bf16.mxu0 %v18310_v3  ;;  %13531 = vmatprep.subr.bf16.mxu1 %v18313_v56  ;;  %v18397_v3 = vld [vmem:[%s19316_s27 + $0x2e6c] ss:$16 sps:$4 sm:$0xff]   ;;  %v18392_v56 = vld [vmem:[%s19316_s27 + $0x2e60] ss:$16 sps:$4 sm:$0xff]  }
 0x62a   : > { %12384 = vmatpush1.bf16.msra.mxu0 %v18308_v5  ;;  %13532 = vmatpush1.bf16.msra.mxu1 %v18311_v54  ;;  %v18395_v5 = vld [vmem:[%s19316_s27 + $0x2e68] ss:$16 sps:$4 sm:$0xff]   ;;  %v18400_v54 = vld [vmem:[%s19316_s27 + $0x2e84] ss:$16 sps:$4 sm:$0xff]  }
 0x62b   : > { %12385 = vmatprep.subr.bf16.mxu0 %v18316_v59  ;;  %13533 = vmatprep.subr.bf16.mxu1 %v18319_v8  ;;  %v18403_v59 = vld [vmem:[%s19316_s27 + $0x2e8c] ss:$16 sps:$4 sm:$0xff]   ;;  %v18398_v8 = vld [vmem:[%s19316_s27 + $0x2e80] ss:$16 sps:$4 sm:$0xff]  }
 0x62e   : > { %12386 = vmatpush1.bf16.msra.mxu0 %v18314_v57  ;;  %13534 = vmatpush1.bf16.msra.mxu1 %v18317_v12  ;;  %v18401_v57 = vld [vmem:[%s19316_s27 + $0x2e88] ss:$16 sps:$4 sm:$0xff]   ;;  %v18406_v12 = vld [vmem:[%s19316_s27 + $0x2ea4] ss:$16 sps:$4 sm:$0xff]  }
 0x62f   : > { %12387 = vmatprep.subr.bf16.mxu0 %v18322_v13  ;;  %13535 = vmatprep.subr.bf16.mxu1 %v18325_v15  ;;  %v18409_v13 = vld [vmem:[%s19316_s27 + $0x2eac] ss:$16 sps:$4 sm:$0xff]   ;;  %v18404_v15 = vld [vmem:[%s19316_s27 + $0x2ea0] ss:$16 sps:$4 sm:$0xff]  }
 0x632   : > { %12388 = vmatpush1.bf16.msra.mxu0 %v18320_v60  ;;  %13536 = vmatpush1.bf16.msra.mxu1 %v18323_v16  ;;  %v18407_v60 = vld [vmem:[%s19316_s27 + $0x2ea8] ss:$16 sps:$4 sm:$0xff]   ;;  %v18412_v16 = vld [vmem:[%s19316_s27 + $0x2ec4] ss:$16 sps:$4 sm:$0xff]  }
 0x633   : > { %12389 = vmatprep.subr.bf16.mxu0 %v18328_v17  ;;  %13537 = vmatprep.subr.bf16.mxu1 %v18331_v63  ;;  %v18415_v17 = vld [vmem:[%s19316_s27 + $0x2ecc] ss:$16 sps:$4 sm:$0xff]   ;;  %v18410_v63 = vld [vmem:[%s19316_s27 + $0x2ec0] ss:$16 sps:$4 sm:$0xff]  }
 0x636   : > { %12390 = vmatpush1.bf16.msra.mxu0 %v18326_v18  ;;  %13538 = vmatpush1.bf16.msra.mxu1 %v18329_v6  ;;  %v18413_v18 = vld [vmem:[%s19316_s27 + $0x2ec8] ss:$16 sps:$4 sm:$0xff]   ;;  %v18418_v6 = vld [vmem:[%s19316_s27 + $0x2ee4] ss:$16 sps:$4 sm:$0xff]  }
 0x637   : > { %12391 = vmatprep.subr.bf16.mxu0 %v18334_v20  ;;  %13539 = vmatprep.subr.bf16.mxu1 %v18337_v4  ;;  %v18421_v20 = vld [vmem:[%s19316_s27 + $0x2eec] ss:$16 sps:$4 sm:$0xff]   ;;  %v18416_v4 = vld [vmem:[%s19316_s27 + $0x2ee0] ss:$16 sps:$4 sm:$0xff]  }
 0x63a   : > { %12392 = vmatpush1.bf16.msra.mxu0 %v18332_v9  ;;  %13540 = vmatpush1.bf16.msra.mxu1 %v18335_v23  ;;  %v18419_v9 = vld [vmem:[%s19316_s27 + $0x2ee8] ss:$16 sps:$4 sm:$0xff]   ;;  %v18424_v23 = vld [vmem:[%s19316_s27 + $0x2f04] ss:$16 sps:$4 sm:$0xff]  }
 0x63b   : > { %12393 = vmatprep.subr.bf16.mxu0 %v18340_v7  ;;  %13541 = vmatprep.subr.bf16.mxu1 %v18343_v10  ;;  %v18427_v7 = vld [vmem:[%s19316_s27 + $0x2f0c] ss:$16 sps:$4 sm:$0xff]   ;;  %v18422_v10 = vld [vmem:[%s19316_s27 + $0x2f00] ss:$16 sps:$4 sm:$0xff]  }
 0x63e   : > { %12394 = vmatpush1.bf16.msra.mxu0 %v18338_v28  ;;  %13542 = vmatpush1.bf16.msra.mxu1 %v18341_v31  ;;  %v18425_v28 = vld [vmem:[%s19316_s27 + $0x2f08] ss:$16 sps:$4 sm:$0xff]   ;;  %v18430_v31 = vld [vmem:[%s19316_s27 + $0x2f24] ss:$16 sps:$4 sm:$0xff]  }
 0x63f   : > { %12395 = vmatprep.subr.bf16.mxu0 %v18346_v11  ;;  %13543 = vmatprep.subr.bf16.mxu1 %v18349_v32  ;;  %v18433_v11 = vld [vmem:[%s19316_s27 + $0x2f2c] ss:$16 sps:$4 sm:$0xff]   ;;  %v18428_v32 = vld [vmem:[%s19316_s27 + $0x2f20] ss:$16 sps:$4 sm:$0xff]  }
 0x642   : > { %12396 = vmatpush1.bf16.msra.mxu0 %v18344_v34  ;;  %13544 = vmatpush1.bf16.msra.mxu1 %v18347_v14  ;;  %v18431_v34 = vld [vmem:[%s19316_s27 + $0x2f28] ss:$16 sps:$4 sm:$0xff]   ;;  %v18436_v14 = vld [vmem:[%s19316_s27 + $0x2f44] ss:$16 sps:$4 sm:$0xff]  }
 0x643   : > { %12397 = vmatprep.subr.bf16.mxu0 %v18352_v35  ;;  %13545 = vmatprep.subr.bf16.mxu1 %v18355_v21  ;;  %v18439_v35 = vld [vmem:[%s19316_s27 + $0x2f4c] ss:$16 sps:$4 sm:$0xff]   ;;  %v18434_v21 = vld [vmem:[%s19316_s27 + $0x2f40] ss:$16 sps:$4 sm:$0xff]  }
 0x646   : > { %12398 = vmatpush1.bf16.msra.mxu0 %v18350_v27  ;;  %13546 = vmatpush1.bf16.msra.mxu1 %v18353_v19  ;;  %v18437_v27 = vld [vmem:[%s19316_s27 + $0x2f48] ss:$16 sps:$4 sm:$0xff]   ;;  %v18442_v19 = vld [vmem:[%s19316_s27 + $0x2f64] ss:$16 sps:$4 sm:$0xff]  }
 0x647   : > { %12399 = vmatprep.subr.bf16.mxu0 %v18358_v25  ;;  %13547 = vmatprep.subr.bf16.mxu1 %v18361_v39  ;;  %v18445_v25 = vld [vmem:[%s19316_s27 + $0x2f6c] ss:$16 sps:$4 sm:$0xff]   ;;  %v18440_v39 = vld [vmem:[%s19316_s27 + $0x2f60] ss:$16 sps:$4 sm:$0xff]  }
 0x64a   : > { %12400 = vmatpush1.bf16.msra.mxu0 %v18356_v22  ;;  %13548 = vmatpush1.bf16.msra.mxu1 %v18359_v42  ;;  %v18443_v22 = vld [vmem:[%s19316_s27 + $0x2f68] ss:$16 sps:$4 sm:$0xff]   ;;  %v18448_v42 = vld [vmem:[%s19316_s27 + $0x2f84] ss:$16 sps:$4 sm:$0xff]  }
 0x64b   : > { %12401 = vmatprep.subr.bf16.mxu0 %v18364_v45  ;;  %13549 = vmatprep.subr.bf16.mxu1 %v18367_v26  ;;  %v18451_v45 = vld [vmem:[%s19316_s27 + $0x2f8c] ss:$16 sps:$4 sm:$0xff]   ;;  %v18446_v26 = vld [vmem:[%s19316_s27 + $0x2f80] ss:$16 sps:$4 sm:$0xff]  }
 0x64e   : > { %12402 = vmatpush1.bf16.msra.mxu0 %v18362_v47  ;;  %13550 = vmatpush1.bf16.msra.mxu1 %v18365_v49  ;;  %v18454_v47 = vld [vmem:[%s19316_s27 + $0x2fa4] ss:$16 sps:$4 sm:$0xff]   ;;  %v18457_v49 = vld [vmem:[%s19316_s27 + $0x2fac] ss:$16 sps:$4 sm:$0xff]  }
 0x64f   : > { %12403 = vmatprep.subr.bf16.mxu0 %v18370_v30  ;;  %13551 = vmatprep.subr.bf16.mxu1 %v18373_v51  ;;  %v18452_v30 = vld [vmem:[%s19316_s27 + $0x2fa0] ss:$16 sps:$4 sm:$0xff]   ;;  %v18455_v51 = vld [vmem:[%s19316_s27 + $0x2fa8] ss:$16 sps:$4 sm:$0xff]  }
 0x652   : > { %12404 = vmatpush1.bf16.msra.mxu0 %v18368_v37  ;;  %13552 = vmatpush1.bf16.msra.mxu1 %v18371_v33  ;;  %v18460_v37 = vld [vmem:[%s19316_s27 + $0x2fc4] ss:$16 sps:$4 sm:$0xff]   ;;  %v18463_v33 = vld [vmem:[%s19316_s27 + $0x2fcc] ss:$16 sps:$4 sm:$0xff]  }
 0x653   : > { %12414 = vmatprep.subr.bf16.mxu0 %v18376_v53  ;;  %13562 = vmatprep.subr.bf16.mxu1 %v18379_v36  ;;  %v21109_v53 = vld [vmem:[%s19337_s11 + $0x60] sm:$0xff]  ;;  %v18458_v36 = vld [vmem:[%s19316_s27 + $0x2fc0] ss:$16 sps:$4 sm:$0xff]  }
 0x655   : > { %12406 = vmatmul.mubr.bf16.vlgmr.msra.gmra.mrb[0].mxu0 %v707_v55  ;;  %13554 = vmatmul.mubr.bf16.vlgmr.msra.gmra.mrb[0].mxu1 %v707_v55  ;;  %v18466_v55 = vld [vmem:[%s19316_s27 + $0x2fe4] ss:$16 sps:$4 sm:$0xff]  }
 0x656   : > { %12415 = vmatpush1.bf16.msra.mxu0 %v18374_v38  ;;  %13563 = vmatpush1.bf16.msra.mxu1 %v18377_v43  ;;  %v18469_v38 = vld [vmem:[%s19316_s27 + $0x2fec] ss:$16 sps:$4 sm:$0xff]   ;;  %v21117_v43 = vrot.slane %v21109_v53, %v19393_v50 }
 0x657   : > { %12416 = vmatprep.subr.bf16.mxu0 %v18382_v58  ;;  %13564 = vmatprep.subr.bf16.mxu1 %v18385_v41  ;;  %v18464_v58 = vld [vmem:[%s19316_s27 + $0x2fe0] ss:$16 sps:$4 sm:$0xff]   ;;  %v18467_v41 = vld [vmem:[%s19316_s27 + $0x2fe8] ss:$16 sps:$4 sm:$0xff]  }
 0x658   : > { %12446 = vmatprep.mubr.bf16.mxu0 %v710_v61  ;;  %13594 = vmatprep.mubr.bf16.mxu1 %v710_v61  ;;  %v18473_v61 = vld [vmem:[%s19316_s27 + $0x3004] ss:$16 sps:$4 sm:$0xff]  }
 0x65a   : > { %12417 = vmatpush1.bf16.msra.mxu0 %v18380_v29  ;;  %13565 = vmatpush1.bf16.msra.mxu1 %v18383_v62  ;;  %v18476_v29 = vld [vmem:[%s19316_s27 + $0x300c] ss:$16 sps:$4 sm:$0xff]   ;;  %v588_v62 = vcombine.high %v21117_v43, %v21117_v43 }
 0x65b   : > { %12418 = vmatprep.subr.bf16.mxu0 %v18388_v0  ;;  %13566 = vmatprep.subr.bf16.mxu1 %v18391_v46  ;;  %v709_v0 = vpack.c.bf16 %v21042_v52, %v21042_v52  ;;  %v18471_v46 = vld [vmem:[%s19316_s27 + $0x3000] ss:$16 sps:$4 sm:$0xff]  }
 0x65c   : > { %v18477_v52 = vld [vmem:[%s19316_s27 + $0x3020] ss:$16 sps:$4 sm:$0xff]  }
 0x65e   : > { %12419 = vmatpush1.bf16.msra.mxu0 %v18386_v1  ;;  %13567 = vmatpush1.bf16.msra.mxu1 %v18389_v2  ;;  %v18474_v1 = vld [vmem:[%s19316_s27 + $0x3008] ss:$16 sps:$4 sm:$0xff]   ;;  %v18479_v2 = vld [vmem:[%s19316_s27 + $0x3024] ss:$16 sps:$4 sm:$0xff]  }
 0x65f   : > { %12420 = vmatprep.subr.bf16.mxu0 %v18394_v48  ;;  %13568 = vmatprep.subr.bf16.mxu1 %v18397_v3  ;;  %v18482_v48 = vld [vmem:[%s19316_s27 + $0x302c] ss:$16 sps:$4 sm:$0xff]   ;;  %v712_v3 = vpack.c.bf16 %v588_v62, %v588_v62  ;;  %v18555_v62 = vld [vmem:[%s19316_s27 + $0x31c0] ss:$16 sps:$4 sm:$0xff]  }
 0x662   : > { %12421 = vmatpush1.bf16.msra.mxu0 %v18392_v56  ;;  %13569 = vmatpush1.bf16.msra.mxu1 %v18395_v5  ;;  %v18480_v56 = vld [vmem:[%s19316_s27 + $0x3028] ss:$16 sps:$4 sm:$0xff]   ;;  %v18485_v5 = vld [vmem:[%s19316_s27 + $0x3044] ss:$16 sps:$4 sm:$0xff]  }
 0x663   : > { %12422 = vmatprep.subr.bf16.mxu0 %v18400_v54  ;;  %13570 = vmatprep.subr.bf16.mxu1 %v18403_v59  ;;  %v18488_v54 = vld [vmem:[%s19316_s27 + $0x304c] ss:$16 sps:$4 sm:$0xff]   ;;  %v18483_v59 = vld [vmem:[%s19316_s27 + $0x3040] ss:$16 sps:$4 sm:$0xff]  }
 0x666   : > { %12423 = vmatpush1.bf16.msra.mxu0 %v18398_v8  ;;  %13571 = vmatpush1.bf16.msra.mxu1 %v18401_v57  ;;  %v18486_v8 = vld [vmem:[%s19316_s27 + $0x3048] ss:$16 sps:$4 sm:$0xff]   ;;  %v18491_v57 = vld [vmem:[%s19316_s27 + $0x3064] ss:$16 sps:$4 sm:$0xff]  }
 0x667   : > { %12424 = vmatprep.subr.bf16.mxu0 %v18406_v12  ;;  %13572 = vmatprep.subr.bf16.mxu1 %v18409_v13  ;;  %v18494_v12 = vld [vmem:[%s19316_s27 + $0x306c] ss:$16 sps:$4 sm:$0xff]   ;;  %v18489_v13 = vld [vmem:[%s19316_s27 + $0x3060] ss:$16 sps:$4 sm:$0xff]  }
 0x66a   : > { %12425 = vmatpush1.bf16.msra.mxu0 %v18404_v15  ;;  %13573 = vmatpush1.bf16.msra.mxu1 %v18407_v60  ;;  %v18492_v15 = vld [vmem:[%s19316_s27 + $0x3068] ss:$16 sps:$4 sm:$0xff]   ;;  %v18497_v60 = vld [vmem:[%s19316_s27 + $0x3084] ss:$16 sps:$4 sm:$0xff]  }
 0x66b   : > { %12426 = vmatprep.subr.bf16.mxu0 %v18412_v16  ;;  %13574 = vmatprep.subr.bf16.mxu1 %v18415_v17  ;;  %v18500_v16 = vld [vmem:[%s19316_s27 + $0x308c] ss:$16 sps:$4 sm:$0xff]   ;;  %v18495_v17 = vld [vmem:[%s19316_s27 + $0x3080] ss:$16 sps:$4 sm:$0xff]  }
 0x66e   : > { %12427 = vmatpush1.bf16.msra.mxu0 %v18410_v63  ;;  %13575 = vmatpush1.bf16.msra.mxu1 %v18413_v18  ;;  %v18498_v63 = vld [vmem:[%s19316_s27 + $0x3088] ss:$16 sps:$4 sm:$0xff]   ;;  %v18503_v18 = vld [vmem:[%s19316_s27 + $0x30a4] ss:$16 sps:$4 sm:$0xff]  }
 0x66f   : > { %12428 = vmatprep.subr.bf16.mxu0 %v18418_v6  ;;  %13576 = vmatprep.subr.bf16.mxu1 %v18421_v20  ;;  %v18506_v6 = vld [vmem:[%s19316_s27 + $0x30ac] ss:$16 sps:$4 sm:$0xff]   ;;  %v18501_v20 = vld [vmem:[%s19316_s27 + $0x30a0] ss:$16 sps:$4 sm:$0xff]  }
 0x672   : > { %12429 = vmatpush1.bf16.msra.mxu0 %v18416_v4  ;;  %13577 = vmatpush1.bf16.msra.mxu1 %v18419_v9  ;;  %v18504_v4 = vld [vmem:[%s19316_s27 + $0x30a8] ss:$16 sps:$4 sm:$0xff]   ;;  %v18509_v9 = vld [vmem:[%s19316_s27 + $0x30c4] ss:$16 sps:$4 sm:$0xff]  }
 0x673   : > { %12430 = vmatprep.subr.bf16.mxu0 %v18424_v23  ;;  %13578 = vmatprep.subr.bf16.mxu1 %v18427_v7  ;;  %v18512_v23 = vld [vmem:[%s19316_s27 + $0x30cc] ss:$16 sps:$4 sm:$0xff]   ;;  %v18507_v7 = vld [vmem:[%s19316_s27 + $0x30c0] ss:$16 sps:$4 sm:$0xff]  }
 0x676   : > { %12431 = vmatpush1.bf16.msra.mxu0 %v18422_v10  ;;  %13579 = vmatpush1.bf16.msra.mxu1 %v18425_v28  ;;  %v18510_v10 = vld [vmem:[%s19316_s27 + $0x30c8] ss:$16 sps:$4 sm:$0xff]   ;;  %v18515_v28 = vld [vmem:[%s19316_s27 + $0x30e4] ss:$16 sps:$4 sm:$0xff]  }
 0x677   : > { %12432 = vmatprep.subr.bf16.mxu0 %v18430_v31  ;;  %13580 = vmatprep.subr.bf16.mxu1 %v18433_v11  ;;  %v18518_v31 = vld [vmem:[%s19316_s27 + $0x30ec] ss:$16 sps:$4 sm:$0xff]   ;;  %v18513_v11 = vld [vmem:[%s19316_s27 + $0x30e0] ss:$16 sps:$4 sm:$0xff]  }
 0x67a   : > { %12433 = vmatpush1.bf16.msra.mxu0 %v18428_v32  ;;  %13581 = vmatpush1.bf16.msra.mxu1 %v18431_v34  ;;  %v18516_v32 = vld [vmem:[%s19316_s27 + $0x30e8] ss:$16 sps:$4 sm:$0xff]   ;;  %v18521_v34 = vld [vmem:[%s19316_s27 + $0x3104] ss:$16 sps:$4 sm:$0xff]  }
 0x67b   : > { %12434 = vmatprep.subr.bf16.mxu0 %v18436_v14  ;;  %13582 = vmatprep.subr.bf16.mxu1 %v18439_v35  ;;  %v18524_v14 = vld [vmem:[%s19316_s27 + $0x310c] ss:$16 sps:$4 sm:$0xff]   ;;  %v18519_v35 = vld [vmem:[%s19316_s27 + $0x3100] ss:$16 sps:$4 sm:$0xff]  }
 0x67e   : > { %12435 = vmatpush1.bf16.msra.mxu0 %v18434_v21  ;;  %13583 = vmatpush1.bf16.msra.mxu1 %v18437_v27  ;;  %v18522_v21 = vld [vmem:[%s19316_s27 + $0x3108] ss:$16 sps:$4 sm:$0xff]   ;;  %v18527_v27 = vld [vmem:[%s19316_s27 + $0x3124] ss:$16 sps:$4 sm:$0xff]  }
 0x67f   : > { %12436 = vmatprep.subr.bf16.mxu0 %v18442_v19  ;;  %13584 = vmatprep.subr.bf16.mxu1 %v18445_v25  ;;  %v18530_v19 = vld [vmem:[%s19316_s27 + $0x312c] ss:$16 sps:$4 sm:$0xff]   ;;  %v18525_v25 = vld [vmem:[%s19316_s27 + $0x3120] ss:$16 sps:$4 sm:$0xff]  }
 0x682   : > { %12437 = vmatpush1.bf16.msra.mxu0 %v18440_v39  ;;  %13585 = vmatpush1.bf16.msra.mxu1 %v18443_v22  ;;  %v18528_v39 = vld [vmem:[%s19316_s27 + $0x3128] ss:$16 sps:$4 sm:$0xff]   ;;  %v18533_v22 = vld [vmem:[%s19316_s27 + $0x3144] ss:$16 sps:$4 sm:$0xff]  }
 0x683   : > { %12438 = vmatprep.subr.bf16.mxu0 %v18448_v42  ;;  %13586 = vmatprep.subr.bf16.mxu1 %v18451_v45  ;;  %v18536_v42 = vld [vmem:[%s19316_s27 + $0x314c] ss:$16 sps:$4 sm:$0xff]   ;;  %v18531_v45 = vld [vmem:[%s19316_s27 + $0x3140] ss:$16 sps:$4 sm:$0xff]  }
 0x686   : > { %12439 = vmatpush1.bf16.msra.mxu0 %v18446_v26  ;;  %13587 = vmatpush1.bf16.msra.mxu1 %v18449_v24  ;;  %v18534_v26 = vld [vmem:[%s19316_s27 + $0x3148] ss:$16 sps:$4 sm:$0xff]   ;;  %v18539_v24 = vld [vmem:[%s19316_s27 + $0x3164] ss:$16 sps:$4 sm:$0xff]  }
 0x687   : > { %12440 = vmatprep.subr.bf16.mxu0 %v18454_v47  ;;  %13588 = vmatprep.subr.bf16.mxu1 %v18457_v49  ;;  %v18542_v47 = vld [vmem:[%s19316_s27 + $0x316c] ss:$16 sps:$4 sm:$0xff]   ;;  %v18537_v49 = vld [vmem:[%s19316_s27 + $0x3160] ss:$16 sps:$4 sm:$0xff]  }
 0x68a   : > { %12441 = vmatpush1.bf16.msra.mxu0 %v18452_v30  ;;  %13589 = vmatpush1.bf16.msra.mxu1 %v18455_v51  ;;  %v18540_v30 = vld [vmem:[%s19316_s27 + $0x3168] ss:$16 sps:$4 sm:$0xff]   ;;  %v18545_v51 = vld [vmem:[%s19316_s27 + $0x3184] ss:$16 sps:$4 sm:$0xff]  }
 0x68b   : > { %12442 = vmatprep.subr.bf16.mxu0 %v18460_v37  ;;  %13590 = vmatprep.subr.bf16.mxu1 %v18463_v33  ;;  %v18548_v37 = vld [vmem:[%s19316_s27 + $0x318c] ss:$16 sps:$4 sm:$0xff]   ;;  %v18543_v33 = vld [vmem:[%s19316_s27 + $0x3180] ss:$16 sps:$4 sm:$0xff]  }
 0x68e   : > { %12443 = vmatpush1.bf16.msra.mxu0 %v18458_v36  ;;  %13591 = vmatpush1.bf16.msra.mxu1 %v18461_v40  ;;  %v18546_v36 = vld [vmem:[%s19316_s27 + $0x3188] ss:$16 sps:$4 sm:$0xff]   ;;  %v18551_v40 = vld [vmem:[%s19316_s27 + $0x31a4] ss:$16 sps:$4 sm:$0xff]  }
 0x68f   : > { %12444 = vmatprep.subr.bf16.mxu0 %v18466_v55  ;;  %13592 = vmatprep.subr.bf16.mxu1 %v18469_v38  ;;  %v18554_v55 = vld [vmem:[%s19316_s27 + $0x31ac] ss:$16 sps:$4 sm:$0xff]   ;;  %v18549_v38 = vld [vmem:[%s19316_s27 + $0x31a0] ss:$16 sps:$4 sm:$0xff]  }
 0x692   : > { %12445 = vmatpush1.bf16.msra.mxu0 %v18464_v58  ;;  %13593 = vmatpush1.bf16.msra.mxu1 %v18467_v41  ;;  %v18552_v58 = vld [vmem:[%s19316_s27 + $0x31a8] ss:$16 sps:$4 sm:$0xff]   ;;  %v18557_v41 = vld [vmem:[%s19316_s27 + $0x31c4] ss:$16 sps:$4 sm:$0xff]  }
 0x693   : > { %12455 = vmatprep.subr.bf16.mxu0 %v18473_v61  ;;  %13603 = vmatprep.subr.bf16.mxu1 %v18476_v29  ;;  %v18560_v61 = vld [vmem:[%s19316_s27 + $0x31cc] ss:$16 sps:$4 sm:$0xff]   ;;  %v573_v29 = vcombine.high %v21109_v53, %v21109_v53  ;;  %v18561_v53 = vld [vmem:[%s19316_s27 + $0x31e0] ss:$16 sps:$4 sm:$0xff]  }
 0x695   : > { %12447 = vmatmul.mubr.bf16.vlgmr.msra.gmra.mrb[0].mxu0 %v709_v0  ;;  %13595 = vmatmul.mubr.bf16.vlgmr.msra.gmra.mrb[0].mxu1 %v709_v0  ;;  %v18558_v0 = vld [vmem:[%s19316_s27 + $0x31c8] ss:$16 sps:$4 sm:$0xff]  }
 0x696   : > { %12456 = vmatpush1.bf16.msra.mxu0 %v18471_v46  ;;  %13604 = vmatpush1.bf16.msra.mxu1 %v18474_v1  ;;  %v18563_v46 = vld [vmem:[%s19316_s27 + $0x31e4] ss:$16 sps:$4 sm:$0xff]   ;;  %v18566_v1 = vld [vmem:[%s19316_s27 + $0x31ec] ss:$16 sps:$4 sm:$0xff]  }
 0x697   : > { %12457 = vmatprep.subr.bf16.mxu0 %v18479_v2  ;;  %13605 = vmatprep.subr.bf16.mxu1 %v18482_v48  ;;  %v21190_v2 = vrot.slane %v573_v29, %v19393_v50  ;;  %v18564_v48 = vld [vmem:[%s19316_s27 + $0x31e8] ss:$16 sps:$4 sm:$0xff]  }
 0x698   : > { %12487 = vmatprep.mubr.bf16.mxu0 %v712_v3  ;;  %13635 = vmatprep.mubr.bf16.mxu1 %v712_v3  ;;  %v18569_v3 = vld [vmem:[%s19316_s27 + $0x3204] ss:$16 sps:$4 sm:$0xff]   ;;  %v18642_v29 = vld [vmem:[%s19316_s27 + $0x3388] ss:$16 sps:$4 sm:$0xff]  }
 0x69a   : > { %12458 = vmatpush1.bf16.msra.mxu0 %v18477_v52  ;;  %13606 = vmatpush1.bf16.msra.mxu1 %v18480_v56  ;;  %v18572_v52 = vld [vmem:[%s19316_s27 + $0x320c] ss:$16 sps:$4 sm:$0xff]   ;;  %v589_v56 = vcombine.high %v21190_v2, %v21190_v2 }
 0x69b   : > { %12459 = vmatprep.subr.bf16.mxu0 %v18485_v5  ;;  %13607 = vmatprep.subr.bf16.mxu1 %v18488_v54  ;;  %v711_v5 = vpack.c.bf16 %v21117_v43, %v21117_v43  ;;  %v18567_v54 = vld [vmem:[%s19316_s27 + $0x3200] ss:$16 sps:$4 sm:$0xff]  }
 0x69c   : > { %v18573_v43 = vld [vmem:[%s19316_s27 + $0x3220] ss:$16 sps:$4 sm:$0xff]  }
 0x69e   : > { %12460 = vmatpush1.bf16.msra.mxu0 %v18483_v59  ;;  %13608 = vmatpush1.bf16.msra.mxu1 %v18486_v8  ;;  %v18570_v59 = vld [vmem:[%s19316_s27 + $0x3208] ss:$16 sps:$4 sm:$0xff]   ;;  %v18575_v8 = vld [vmem:[%s19316_s27 + $0x3224] ss:$16 sps:$4 sm:$0xff]  }
 0x69f   : > { %12461 = vmatprep.subr.bf16.mxu0 %v18491_v57  ;;  %13609 = vmatprep.subr.bf16.mxu1 %v18494_v12  ;;  %v18578_v57 = vld [vmem:[%s19316_s27 + $0x322c] ss:$16 sps:$4 sm:$0xff]   ;;  %v714_v12 = vpack.c.bf16 %v589_v56, %v589_v56  ;;  %v18654_v56 = vld [vmem:[%s19316_s27 + $0x33c8] ss:$16 sps:$4 sm:$0xff]  }
 0x6a2   : > { %12462 = vmatpush1.bf16.msra.mxu0 %v18489_v13  ;;  %13610 = vmatpush1.bf16.msra.mxu1 %v18492_v15  ;;  %v18576_v13 = vld [vmem:[%s19316_s27 + $0x3228] ss:$16 sps:$4 sm:$0xff]   ;;  %v18581_v15 = vld [vmem:[%s19316_s27 + $0x3244] ss:$16 sps:$4 sm:$0xff]  }
 0x6a3   : > { %12463 = vmatprep.subr.bf16.mxu0 %v18497_v60  ;;  %13611 = vmatprep.subr.bf16.mxu1 %v18500_v16  ;;  %v18584_v60 = vld [vmem:[%s19316_s27 + $0x324c] ss:$16 sps:$4 sm:$0xff]   ;;  %v18579_v16 = vld [vmem:[%s19316_s27 + $0x3240] ss:$16 sps:$4 sm:$0xff]  }
 0x6a6   : > { %12464 = vmatpush1.bf16.msra.mxu0 %v18495_v17  ;;  %13612 = vmatpush1.bf16.msra.mxu1 %v18498_v63  ;;  %v18582_v17 = vld [vmem:[%s19316_s27 + $0x3248] ss:$16 sps:$4 sm:$0xff]   ;;  %v18587_v63 = vld [vmem:[%s19316_s27 + $0x3264] ss:$16 sps:$4 sm:$0xff]  }
 0x6a7   : > { %12465 = vmatprep.subr.bf16.mxu0 %v18503_v18  ;;  %13613 = vmatprep.subr.bf16.mxu1 %v18506_v6  ;;  %v18590_v18 = vld [vmem:[%s19316_s27 + $0x326c] ss:$16 sps:$4 sm:$0xff]   ;;  %v18585_v6 = vld [vmem:[%s19316_s27 + $0x3260] ss:$16 sps:$4 sm:$0xff]  }
 0x6aa   : > { %12466 = vmatpush1.bf16.msra.mxu0 %v18501_v20  ;;  %13614 = vmatpush1.bf16.msra.mxu1 %v18504_v4  ;;  %v18588_v20 = vld [vmem:[%s19316_s27 + $0x3268] ss:$16 sps:$4 sm:$0xff]   ;;  %v18593_v4 = vld [vmem:[%s19316_s27 + $0x3284] ss:$16 sps:$4 sm:$0xff]  }
 0x6ab   : > { %12467 = vmatprep.subr.bf16.mxu0 %v18509_v9  ;;  %13615 = vmatprep.subr.bf16.mxu1 %v18512_v23  ;;  %v18596_v9 = vld [vmem:[%s19316_s27 + $0x328c] ss:$16 sps:$4 sm:$0xff]   ;;  %v18591_v23 = vld [vmem:[%s19316_s27 + $0x3280] ss:$16 sps:$4 sm:$0xff]  }
 0x6ae   : > { %12468 = vmatpush1.bf16.msra.mxu0 %v18507_v7  ;;  %13616 = vmatpush1.bf16.msra.mxu1 %v18510_v10  ;;  %v18594_v7 = vld [vmem:[%s19316_s27 + $0x3288] ss:$16 sps:$4 sm:$0xff]   ;;  %v18599_v10 = vld [vmem:[%s19316_s27 + $0x32a4] ss:$16 sps:$4 sm:$0xff]  }
 0x6af   : > { %12469 = vmatprep.subr.bf16.mxu0 %v18515_v28  ;;  %13617 = vmatprep.subr.bf16.mxu1 %v18518_v31  ;;  %v18602_v28 = vld [vmem:[%s19316_s27 + $0x32ac] ss:$16 sps:$4 sm:$0xff]   ;;  %v18597_v31 = vld [vmem:[%s19316_s27 + $0x32a0] ss:$16 sps:$4 sm:$0xff]  }
 0x6b2   : > { %12470 = vmatpush1.bf16.msra.mxu0 %v18513_v11  ;;  %13618 = vmatpush1.bf16.msra.mxu1 %v18516_v32  ;;  %v18600_v11 = vld [vmem:[%s19316_s27 + $0x32a8] ss:$16 sps:$4 sm:$0xff]   ;;  %v18605_v32 = vld [vmem:[%s19316_s27 + $0x32c4] ss:$16 sps:$4 sm:$0xff]  }
 0x6b3   : > { %12471 = vmatprep.subr.bf16.mxu0 %v18521_v34  ;;  %13619 = vmatprep.subr.bf16.mxu1 %v18524_v14  ;;  %v18608_v34 = vld [vmem:[%s19316_s27 + $0x32cc] ss:$16 sps:$4 sm:$0xff]   ;;  %v18603_v14 = vld [vmem:[%s19316_s27 + $0x32c0] ss:$16 sps:$4 sm:$0xff]  }
 0x6b6   : > { %12472 = vmatpush1.bf16.msra.mxu0 %v18519_v35  ;;  %13620 = vmatpush1.bf16.msra.mxu1 %v18522_v21  ;;  %v18606_v35 = vld [vmem:[%s19316_s27 + $0x32c8] ss:$16 sps:$4 sm:$0xff]   ;;  %v18611_v21 = vld [vmem:[%s19316_s27 + $0x32e4] ss:$16 sps:$4 sm:$0xff]  }
 0x6b7   : > { %12473 = vmatprep.subr.bf16.mxu0 %v18527_v27  ;;  %13621 = vmatprep.subr.bf16.mxu1 %v18530_v19  ;;  %v18614_v27 = vld [vmem:[%s19316_s27 + $0x32ec] ss:$16 sps:$4 sm:$0xff]   ;;  %v18609_v19 = vld [vmem:[%s19316_s27 + $0x32e0] ss:$16 sps:$4 sm:$0xff]  }
 0x6ba   : > { %12474 = vmatpush1.bf16.msra.mxu0 %v18525_v25  ;;  %13622 = vmatpush1.bf16.msra.mxu1 %v18528_v39  ;;  %v18612_v25 = vld [vmem:[%s19316_s27 + $0x32e8] ss:$16 sps:$4 sm:$0xff]   ;;  %v18617_v39 = vld [vmem:[%s19316_s27 + $0x3304] ss:$16 sps:$4 sm:$0xff]  }
 0x6bb   : > { %12475 = vmatprep.subr.bf16.mxu0 %v18533_v22  ;;  %13623 = vmatprep.subr.bf16.mxu1 %v18536_v42  ;;  %v18620_v22 = vld [vmem:[%s19316_s27 + $0x330c] ss:$16 sps:$4 sm:$0xff]   ;;  %v18615_v42 = vld [vmem:[%s19316_s27 + $0x3300] ss:$16 sps:$4 sm:$0xff]  }
 0x6be   : > { %12476 = vmatpush1.bf16.msra.mxu0 %v18531_v45  ;;  %13624 = vmatpush1.bf16.msra.mxu1 %v18534_v26  ;;  %v18618_v45 = vld [vmem:[%s19316_s27 + $0x3308] ss:$16 sps:$4 sm:$0xff]   ;;  %v18623_v26 = vld [vmem:[%s19316_s27 + $0x3324] ss:$16 sps:$4 sm:$0xff]  }
 0x6bf   : > { %12477 = vmatprep.subr.bf16.mxu0 %v18539_v24  ;;  %13625 = vmatprep.subr.bf16.mxu1 %v18542_v47  ;;  %v18626_v24 = vld [vmem:[%s19316_s27 + $0x332c] ss:$16 sps:$4 sm:$0xff]   ;;  %v18621_v47 = vld [vmem:[%s19316_s27 + $0x3320] ss:$16 sps:$4 sm:$0xff]  }
 0x6c2   : > { %12478 = vmatpush1.bf16.msra.mxu0 %v18537_v49  ;;  %13626 = vmatpush1.bf16.msra.mxu1 %v18540_v30  ;;  %v18624_v49 = vld [vmem:[%s19316_s27 + $0x3328] ss:$16 sps:$4 sm:$0xff]   ;;  %v18629_v30 = vld [vmem:[%s19316_s27 + $0x3344] ss:$16 sps:$4 sm:$0xff]  }
 0x6c3   : > { %12479 = vmatprep.subr.bf16.mxu0 %v18545_v51  ;;  %13627 = vmatprep.subr.bf16.mxu1 %v18548_v37  ;;  %v18632_v51 = vld [vmem:[%s19316_s27 + $0x334c] ss:$16 sps:$4 sm:$0xff]   ;;  %v18627_v37 = vld [vmem:[%s19316_s27 + $0x3340] ss:$16 sps:$4 sm:$0xff]  }
 0x6c6   : > { %12480 = vmatpush1.bf16.msra.mxu0 %v18543_v33  ;;  %13628 = vmatpush1.bf16.msra.mxu1 %v18546_v36  ;;  %v18630_v33 = vld [vmem:[%s19316_s27 + $0x3348] ss:$16 sps:$4 sm:$0xff]   ;;  %v18635_v36 = vld [vmem:[%s19316_s27 + $0x3364] ss:$16 sps:$4 sm:$0xff]  }
 0x6c7   : > { %12481 = vmatprep.subr.bf16.mxu0 %v18551_v40  ;;  %13629 = vmatprep.subr.bf16.mxu1 %v18554_v55  ;;  %v18638_v40 = vld [vmem:[%s19316_s27 + $0x336c] ss:$16 sps:$4 sm:$0xff]   ;;  %v18633_v55 = vld [vmem:[%s19316_s27 + $0x3360] ss:$16 sps:$4 sm:$0xff]  }
 0x6ca   : > { %12482 = vmatpush1.bf16.msra.mxu0 %v18549_v38  ;;  %13630 = vmatpush1.bf16.msra.mxu1 %v18552_v58  ;;  %v18636_v38 = vld [vmem:[%s19316_s27 + $0x3368] ss:$16 sps:$4 sm:$0xff]   ;;  %v18641_v58 = vld [vmem:[%s19316_s27 + $0x3384] ss:$16 sps:$4 sm:$0xff]  }
 0x6cb   : > { %12483 = vmatprep.subr.bf16.mxu0 %v18557_v41  ;;  %13631 = vmatprep.subr.bf16.mxu1 %v18560_v61  ;;  %v18644_v41 = vld [vmem:[%s19316_s27 + $0x338c] ss:$16 sps:$4 sm:$0xff]   ;;  %v18639_v61 = vld [vmem:[%s19316_s27 + $0x3380] ss:$16 sps:$4 sm:$0xff]  }
 0x6ce   : > { %12484 = vmatpush1.bf16.msra.mxu0 %v18555_v62  ;;  %13632 = vmatpush1.bf16.msra.mxu1 %v18558_v0  ;;  %v18647_v62 = vld [vmem:[%s19316_s27 + $0x33a4] ss:$16 sps:$4 sm:$0xff]   ;;  %v18650_v0 = vld [vmem:[%s19316_s27 + $0x33ac] ss:$16 sps:$4 sm:$0xff]  }
 0x6cf   : > { %12485 = vmatprep.subr.bf16.mxu0 %v18563_v46  ;;  %13633 = vmatprep.subr.bf16.mxu1 %v18566_v1  ;;  %v18645_v46 = vld [vmem:[%s19316_s27 + $0x33a0] ss:$16 sps:$4 sm:$0xff]   ;;  %v18648_v1 = vld [vmem:[%s19316_s27 + $0x33a8] ss:$16 sps:$4 sm:$0xff]  }
 0x6d2   : > { %12486 = vmatpush1.bf16.msra.mxu0 %v18561_v53  ;;  %13634 = vmatpush1.bf16.msra.mxu1 %v18564_v48  ;;  %v18653_v53 = vld [vmem:[%s19316_s27 + $0x33c4] ss:$16 sps:$4 sm:$0xff]   ;;  %v18656_v48 = vld [vmem:[%s19316_s27 + $0x33cc] ss:$16 sps:$4 sm:$0xff]  }
 0x6d3   : > { %12496 = vmatprep.subr.bf16.mxu0 %v18569_v3  ;;  %13644 = vmatprep.subr.bf16.mxu1 %v18572_v52  ;;  %v21257_v3 = vld [vmem:[%s19337_s11 + $0x68] sm:$0xff] }
 0x6d4   : > { %v18651_v52 = vld [vmem:[%s19316_s27 + $0x33c0] ss:$16 sps:$4 sm:$0xff]  }
 0x6d5   : > { %12488 = vmatmul.mubr.bf16.vlgmr.msra.gmra.mrb[0].mxu0 %v711_v5  ;;  %13636 = vmatmul.mubr.bf16.vlgmr.msra.gmra.mrb[0].mxu1 %v711_v5  ;;  %v18659_v5 = vld [vmem:[%s19316_s27 + $0x33e4] ss:$16 sps:$4 sm:$0xff]  }
 0x6d6   : > { %12497 = vmatpush1.bf16.msra.mxu0 %v18567_v54  ;;  %13645 = vmatpush1.bf16.msra.mxu1 %v18570_v59  ;;  %v18662_v54 = vld [vmem:[%s19316_s27 + $0x33ec] ss:$16 sps:$4 sm:$0xff]   ;;  %v21265_v59 = vrot.slane %v21257_v3, %v19393_v50 }
 0x6d7   : > { %12498 = vmatprep.subr.bf16.mxu0 %v18575_v8  ;;  %13646 = vmatprep.subr.bf16.mxu1 %v18578_v57  ;;  %v18657_v8 = vld [vmem:[%s19316_s27 + $0x33e0] ss:$16 sps:$4 sm:$0xff]   ;;  %v18660_v57 = vld [vmem:[%s19316_s27 + $0x33e8] ss:$16 sps:$4 sm:$0xff]  }
 0x6d8   : > { %12528 = vmatprep.mubr.bf16.mxu0 %v714_v12  ;;  %13676 = vmatprep.mubr.bf16.mxu1 %v714_v12  ;;  %v18666_v12 = vld [vmem:[%s19316_s27 + $0x3404] ss:$16 sps:$4 sm:$0xff]  }
 0x6da   : > { %12499 = vmatpush1.bf16.msra.mxu0 %v18573_v43  ;;  %13647 = vmatpush1.bf16.msra.mxu1 %v18576_v13  ;;  %v18669_v43 = vld [vmem:[%s19316_s27 + $0x340c] ss:$16 sps:$4 sm:$0xff]   ;;  %v605_v13 = vcombine.high %v21265_v59, %v21265_v59 }
 0x6db   : > { %12500 = vmatprep.subr.bf16.mxu0 %v18581_v15  ;;  %13648 = vmatprep.subr.bf16.mxu1 %v18584_v60  ;;  %v713_v15 = vpack.c.bf16 %v21190_v2, %v21190_v2  ;;  %v18664_v60 = vld [vmem:[%s19316_s27 + $0x3400] ss:$16 sps:$4 sm:$0xff]  }
 0x6dc   : > { %v18670_v2 = vld [vmem:[%s19316_s27 + $0x3420] ss:$16 sps:$4 sm:$0xff]  }
 0x6de   : > { %12501 = vmatpush1.bf16.msra.mxu0 %v18579_v16  ;;  %13649 = vmatpush1.bf16.msra.mxu1 %v18582_v17  ;;  %v18667_v16 = vld [vmem:[%s19316_s27 + $0x3408] ss:$16 sps:$4 sm:$0xff]   ;;  %v18672_v17 = vld [vmem:[%s19316_s27 + $0x3424] ss:$16 sps:$4 sm:$0xff]  }
 0x6df   : > { %12502 = vmatprep.subr.bf16.mxu0 %v18587_v63  ;;  %13650 = vmatprep.subr.bf16.mxu1 %v18590_v18  ;;  %v18675_v63 = vld [vmem:[%s19316_s27 + $0x342c] ss:$16 sps:$4 sm:$0xff]   ;;  %v716_v18 = vpack.c.bf16 %v605_v13, %v605_v13  ;;  %v18748_v13 = vld [vmem:[%s19316_s27 + $0x35c0] ss:$16 sps:$4 sm:$0xff]  }
 0x6e2   : > { %12503 = vmatpush1.bf16.msra.mxu0 %v18585_v6  ;;  %13651 = vmatpush1.bf16.msra.mxu1 %v18588_v20  ;;  %v18673_v6 = vld [vmem:[%s19316_s27 + $0x3428] ss:$16 sps:$4 sm:$0xff]   ;;  %v18678_v20 = vld [vmem:[%s19316_s27 + $0x3444] ss:$16 sps:$4 sm:$0xff]  }
 0x6e3   : > { %12504 = vmatprep.subr.bf16.mxu0 %v18593_v4  ;;  %13652 = vmatprep.subr.bf16.mxu1 %v18596_v9  ;;  %v18681_v4 = vld [vmem:[%s19316_s27 + $0x344c] ss:$16 sps:$4 sm:$0xff]   ;;  %v18676_v9 = vld [vmem:[%s19316_s27 + $0x3440] ss:$16 sps:$4 sm:$0xff]  }
 0x6e6   : > { %12505 = vmatpush1.bf16.msra.mxu0 %v18591_v23  ;;  %13653 = vmatpush1.bf16.msra.mxu1 %v18594_v7  ;;  %v18679_v23 = vld [vmem:[%s19316_s27 + $0x3448] ss:$16 sps:$4 sm:$0xff]   ;;  %v18684_v7 = vld [vmem:[%s19316_s27 + $0x3464] ss:$16 sps:$4 sm:$0xff]  }
 0x6e7   : > { %12506 = vmatprep.subr.bf16.mxu0 %v18599_v10  ;;  %13654 = vmatprep.subr.bf16.mxu1 %v18602_v28  ;;  %v18687_v10 = vld [vmem:[%s19316_s27 + $0x346c] ss:$16 sps:$4 sm:$0xff]   ;;  %v18682_v28 = vld [vmem:[%s19316_s27 + $0x3460] ss:$16 sps:$4 sm:$0xff]  }
 0x6ea   : > { %12507 = vmatpush1.bf16.msra.mxu0 %v18597_v31  ;;  %13655 = vmatpush1.bf16.msra.mxu1 %v18600_v11  ;;  %v18685_v31 = vld [vmem:[%s19316_s27 + $0x3468] ss:$16 sps:$4 sm:$0xff]   ;;  %v18690_v11 = vld [vmem:[%s19316_s27 + $0x3484] ss:$16 sps:$4 sm:$0xff]  }
 0x6eb   : > { %12508 = vmatprep.subr.bf16.mxu0 %v18605_v32  ;;  %13656 = vmatprep.subr.bf16.mxu1 %v18608_v34  ;;  %v18693_v32 = vld [vmem:[%s19316_s27 + $0x348c] ss:$16 sps:$4 sm:$0xff]   ;;  %v18688_v34 = vld [vmem:[%s19316_s27 + $0x3480] ss:$16 sps:$4 sm:$0xff]  }
 0x6ee   : > { %12509 = vmatpush1.bf16.msra.mxu0 %v18603_v14  ;;  %13657 = vmatpush1.bf16.msra.mxu1 %v18606_v35  ;;  %v18691_v14 = vld [vmem:[%s19316_s27 + $0x3488] ss:$16 sps:$4 sm:$0xff]   ;;  %v18696_v35 = vld [vmem:[%s19316_s27 + $0x34a4] ss:$16 sps:$4 sm:$0xff]  }
 0x6ef   : > { %12510 = vmatprep.subr.bf16.mxu0 %v18611_v21  ;;  %13658 = vmatprep.subr.bf16.mxu1 %v18614_v27  ;;  %v18699_v21 = vld [vmem:[%s19316_s27 + $0x34ac] ss:$16 sps:$4 sm:$0xff]   ;;  %v18694_v27 = vld [vmem:[%s19316_s27 + $0x34a0] ss:$16 sps:$4 sm:$0xff]  }
 0x6f2   : > { %12511 = vmatpush1.bf16.msra.mxu0 %v18609_v19  ;;  %13659 = vmatpush1.bf16.msra.mxu1 %v18612_v25  ;;  %v18697_v19 = vld [vmem:[%s19316_s27 + $0x34a8] ss:$16 sps:$4 sm:$0xff]   ;;  %v18702_v25 = vld [vmem:[%s19316_s27 + $0x34c4] ss:$16 sps:$4 sm:$0xff]  }
 0x6f3   : > { %12512 = vmatprep.subr.bf16.mxu0 %v18617_v39  ;;  %13660 = vmatprep.subr.bf16.mxu1 %v18620_v22  ;;  %v18705_v39 = vld [vmem:[%s19316_s27 + $0x34cc] ss:$16 sps:$4 sm:$0xff]   ;;  %v18700_v22 = vld [vmem:[%s19316_s27 + $0x34c0] ss:$16 sps:$4 sm:$0xff]  }
 0x6f6   : > { %12513 = vmatpush1.bf16.msra.mxu0 %v18615_v42  ;;  %13661 = vmatpush1.bf16.msra.mxu1 %v18618_v45  ;;  %v18703_v42 = vld [vmem:[%s19316_s27 + $0x34c8] ss:$16 sps:$4 sm:$0xff]   ;;  %v18708_v45 = vld [vmem:[%s19316_s27 + $0x34e4] ss:$16 sps:$4 sm:$0xff]  }
 0x6f7   : > { %12514 = vmatprep.subr.bf16.mxu0 %v18623_v26  ;;  %13662 = vmatprep.subr.bf16.mxu1 %v18626_v24  ;;  %v18711_v26 = vld [vmem:[%s19316_s27 + $0x34ec] ss:$16 sps:$4 sm:$0xff]   ;;  %v18706_v24 = vld [vmem:[%s19316_s27 + $0x34e0] ss:$16 sps:$4 sm:$0xff]  }
 0x6fa   : > { %12515 = vmatpush1.bf16.msra.mxu0 %v18621_v47  ;;  %13663 = vmatpush1.bf16.msra.mxu1 %v18624_v49  ;;  %v18709_v47 = vld [vmem:[%s19316_s27 + $0x34e8] ss:$16 sps:$4 sm:$0xff]   ;;  %v18714_v49 = vld [vmem:[%s19316_s27 + $0x3504] ss:$16 sps:$4 sm:$0xff]  }
 0x6fb   : > { %12516 = vmatprep.subr.bf16.mxu0 %v18629_v30  ;;  %13664 = vmatprep.subr.bf16.mxu1 %v18632_v51  ;;  %v18717_v30 = vld [vmem:[%s19316_s27 + $0x350c] ss:$16 sps:$4 sm:$0xff]   ;;  %v18712_v51 = vld [vmem:[%s19316_s27 + $0x3500] ss:$16 sps:$4 sm:$0xff]  }
 0x6fe   : > { %12517 = vmatpush1.bf16.msra.mxu0 %v18627_v37  ;;  %13665 = vmatpush1.bf16.msra.mxu1 %v18630_v33  ;;  %v18715_v37 = vld [vmem:[%s19316_s27 + $0x3508] ss:$16 sps:$4 sm:$0xff]   ;;  %v18720_v33 = vld [vmem:[%s19316_s27 + $0x3524] ss:$16 sps:$4 sm:$0xff]  }
 0x6ff   : > { %12518 = vmatprep.subr.bf16.mxu0 %v18635_v36  ;;  %13666 = vmatprep.subr.bf16.mxu1 %v18638_v40  ;;  %v18723_v36 = vld [vmem:[%s19316_s27 + $0x352c] ss:$16 sps:$4 sm:$0xff]   ;;  %v18718_v40 = vld [vmem:[%s19316_s27 + $0x3520] ss:$16 sps:$4 sm:$0xff]  }
 0x702   : > { %12519 = vmatpush1.bf16.msra.mxu0 %v18633_v55  ;;  %13667 = vmatpush1.bf16.msra.mxu1 %v18636_v38  ;;  %v18721_v55 = vld [vmem:[%s19316_s27 + $0x3528] ss:$16 sps:$4 sm:$0xff]   ;;  %v18726_v38 = vld [vmem:[%s19316_s27 + $0x3544] ss:$16 sps:$4 sm:$0xff]  }
 0x703   : > { %12520 = vmatprep.subr.bf16.mxu0 %v18641_v58  ;;  %13668 = vmatprep.subr.bf16.mxu1 %v18644_v41  ;;  %v18729_v58 = vld [vmem:[%s19316_s27 + $0x354c] ss:$16 sps:$4 sm:$0xff]   ;;  %v18724_v41 = vld [vmem:[%s19316_s27 + $0x3540] ss:$16 sps:$4 sm:$0xff]  }
 0x706   : > { %12521 = vmatpush1.bf16.msra.mxu0 %v18639_v61  ;;  %13669 = vmatpush1.bf16.msra.mxu1 %v18642_v29  ;;  %v18727_v61 = vld [vmem:[%s19316_s27 + $0x3548] ss:$16 sps:$4 sm:$0xff]   ;;  %v18732_v29 = vld [vmem:[%s19316_s27 + $0x3564] ss:$16 sps:$4 sm:$0xff]  }
 0x707   : > { %12522 = vmatprep.subr.bf16.mxu0 %v18647_v62  ;;  %13670 = vmatprep.subr.bf16.mxu1 %v18650_v0  ;;  %v18735_v62 = vld [vmem:[%s19316_s27 + $0x356c] ss:$16 sps:$4 sm:$0xff]   ;;  %v18730_v0 = vld [vmem:[%s19316_s27 + $0x3560] ss:$16 sps:$4 sm:$0xff]  }
 0x70a   : > { %12523 = vmatpush1.bf16.msra.mxu0 %v18645_v46  ;;  %13671 = vmatpush1.bf16.msra.mxu1 %v18648_v1  ;;  %v18733_v46 = vld [vmem:[%s19316_s27 + $0x3568] ss:$16 sps:$4 sm:$0xff]   ;;  %v18738_v1 = vld [vmem:[%s19316_s27 + $0x3584] ss:$16 sps:$4 sm:$0xff]  }
 0x70b   : > { %12524 = vmatprep.subr.bf16.mxu0 %v18653_v53  ;;  %13672 = vmatprep.subr.bf16.mxu1 %v18656_v48  ;;  %v18741_v53 = vld [vmem:[%s19316_s27 + $0x358c] ss:$16 sps:$4 sm:$0xff]   ;;  %v18736_v48 = vld [vmem:[%s19316_s27 + $0x3580] ss:$16 sps:$4 sm:$0xff]  }
 0x70e   : > { %12525 = vmatpush1.bf16.msra.mxu0 %v18651_v52  ;;  %13673 = vmatpush1.bf16.msra.mxu1 %v18654_v56  ;;  %v18739_v52 = vld [vmem:[%s19316_s27 + $0x3588] ss:$16 sps:$4 sm:$0xff]   ;;  %v18744_v56 = vld [vmem:[%s19316_s27 + $0x35a4] ss:$16 sps:$4 sm:$0xff]  }
 0x70f   : > { %12526 = vmatprep.subr.bf16.mxu0 %v18659_v5  ;;  %13674 = vmatprep.subr.bf16.mxu1 %v18662_v54  ;;  %v18747_v5 = vld [vmem:[%s19316_s27 + $0x35ac] ss:$16 sps:$4 sm:$0xff]   ;;  %v18742_v54 = vld [vmem:[%s19316_s27 + $0x35a0] ss:$16 sps:$4 sm:$0xff]  }
 0x712   : > { %12527 = vmatpush1.bf16.msra.mxu0 %v18657_v8  ;;  %13675 = vmatpush1.bf16.msra.mxu1 %v18660_v57  ;;  %v18745_v8 = vld [vmem:[%s19316_s27 + $0x35a8] ss:$16 sps:$4 sm:$0xff]   ;;  %v18750_v57 = vld [vmem:[%s19316_s27 + $0x35c4] ss:$16 sps:$4 sm:$0xff]  }
 0x713   : > { %12537 = vmatprep.subr.bf16.mxu0 %v18666_v12  ;;  %13685 = vmatprep.subr.bf16.mxu1 %v18669_v43  ;;  %v18753_v12 = vld [vmem:[%s19316_s27 + $0x35cc] ss:$16 sps:$4 sm:$0xff]   ;;  %v590_v43 = vcombine.high %v21257_v3, %v21257_v3  ;;  %v18754_v3 = vld [vmem:[%s19316_s27 + $0x35e0] ss:$16 sps:$4 sm:$0xff]  }
 0x715   : > { %12529 = vmatmul.mubr.bf16.vlgmr.msra.gmra.mrb[0].mxu0 %v713_v15  ;;  %13677 = vmatmul.mubr.bf16.vlgmr.msra.gmra.mrb[0].mxu1 %v713_v15  ;;  %v18751_v15 = vld [vmem:[%s19316_s27 + $0x35c8] ss:$16 sps:$4 sm:$0xff]  }
 0x716   : > { %12538 = vmatpush1.bf16.msra.mxu0 %v18664_v60  ;;  %13686 = vmatpush1.bf16.msra.mxu1 %v18667_v16  ;;  %v18756_v60 = vld [vmem:[%s19316_s27 + $0x35e4] ss:$16 sps:$4 sm:$0xff]   ;;  %v18759_v16 = vld [vmem:[%s19316_s27 + $0x35ec] ss:$16 sps:$4 sm:$0xff]  }
 0x717   : > { %12539 = vmatprep.subr.bf16.mxu0 %v18672_v17  ;;  %13687 = vmatprep.subr.bf16.mxu1 %v18675_v63  ;;  %v21338_v17 = vrot.slane %v590_v43, %v19393_v50  ;;  %v18757_v63 = vld [vmem:[%s19316_s27 + $0x35e8] ss:$16 sps:$4 sm:$0xff]  }
 0x718   : > { %12569 = vmatprep.mubr.bf16.mxu0 %v716_v18  ;;  %13717 = vmatprep.mubr.bf16.mxu1 %v716_v18  ;;  %v18762_v18 = vld [vmem:[%s19316_s27 + $0x3604] ss:$16 sps:$4 sm:$0xff]   ;;  %v18835_v43 = vld [vmem:[%s19316_s27 + $0x3788] ss:$16 sps:$4 sm:$0xff]  }
 0x71a   : > { %12540 = vmatpush1.bf16.msra.mxu0 %v18670_v2  ;;  %13688 = vmatpush1.bf16.msra.mxu1 %v18673_v6  ;;  %v18765_v2 = vld [vmem:[%s19316_s27 + $0x360c] ss:$16 sps:$4 sm:$0xff]   ;;  %v606_v6 = vcombine.high %v21338_v17, %v21338_v17 }
 0x71b   : > { %12541 = vmatprep.subr.bf16.mxu0 %v18678_v20  ;;  %13689 = vmatprep.subr.bf16.mxu1 %v18681_v4  ;;  %v715_v20 = vpack.c.bf16 %v21265_v59, %v21265_v59  ;;  %v18760_v4 = vld [vmem:[%s19316_s27 + $0x3600] ss:$16 sps:$4 sm:$0xff]  }
 0x71c   : > { %v18766_v59 = vld [vmem:[%s19316_s27 + $0x3620] ss:$16 sps:$4 sm:$0xff]  }
 0x71e   : > { %12542 = vmatpush1.bf16.msra.mxu0 %v18676_v9  ;;  %13690 = vmatpush1.bf16.msra.mxu1 %v18679_v23  ;;  %v18763_v9 = vld [vmem:[%s19316_s27 + $0x3608] ss:$16 sps:$4 sm:$0xff]   ;;  %v18768_v23 = vld [vmem:[%s19316_s27 + $0x3624] ss:$16 sps:$4 sm:$0xff]  }
 0x71f   : > { %12543 = vmatprep.subr.bf16.mxu0 %v18684_v7  ;;  %13691 = vmatprep.subr.bf16.mxu1 %v18687_v10  ;;  %v18771_v7 = vld [vmem:[%s19316_s27 + $0x362c] ss:$16 sps:$4 sm:$0xff]   ;;  %v718_v10 = vpack.c.bf16 %v606_v6, %v606_v6  ;;  %v18852_v6 = vld [vmem:[%s19316_s27 + $0x37e4] ss:$16 sps:$4 sm:$0xff]  }
 0x722   : > { %12544 = vmatpush1.bf16.msra.mxu0 %v18682_v28  ;;  %13692 = vmatpush1.bf16.msra.mxu1 %v18685_v31  ;;  %v18769_v28 = vld [vmem:[%s19316_s27 + $0x3628] ss:$16 sps:$4 sm:$0xff]   ;;  %v18774_v31 = vld [vmem:[%s19316_s27 + $0x3644] ss:$16 sps:$4 sm:$0xff]  }
 0x723   : > { %12545 = vmatprep.subr.bf16.mxu0 %v18690_v11  ;;  %13693 = vmatprep.subr.bf16.mxu1 %v18693_v32  ;;  %v18777_v11 = vld [vmem:[%s19316_s27 + $0x364c] ss:$16 sps:$4 sm:$0xff]   ;;  %v18772_v32 = vld [vmem:[%s19316_s27 + $0x3640] ss:$16 sps:$4 sm:$0xff]  }
 0x726   : > { %12546 = vmatpush1.bf16.msra.mxu0 %v18688_v34  ;;  %13694 = vmatpush1.bf16.msra.mxu1 %v18691_v14  ;;  %v18775_v34 = vld [vmem:[%s19316_s27 + $0x3648] ss:$16 sps:$4 sm:$0xff]   ;;  %v18780_v14 = vld [vmem:[%s19316_s27 + $0x3664] ss:$16 sps:$4 sm:$0xff]  }
 0x727   : > { %12547 = vmatprep.subr.bf16.mxu0 %v18696_v35  ;;  %13695 = vmatprep.subr.bf16.mxu1 %v18699_v21  ;;  %v18783_v35 = vld [vmem:[%s19316_s27 + $0x366c] ss:$16 sps:$4 sm:$0xff]   ;;  %v18778_v21 = vld [vmem:[%s19316_s27 + $0x3660] ss:$16 sps:$4 sm:$0xff]  }
 0x72a   : > { %12548 = vmatpush1.bf16.msra.mxu0 %v18694_v27  ;;  %13696 = vmatpush1.bf16.msra.mxu1 %v18697_v19  ;;  %v18781_v27 = vld [vmem:[%s19316_s27 + $0x3668] ss:$16 sps:$4 sm:$0xff]   ;;  %v18786_v19 = vld [vmem:[%s19316_s27 + $0x3684] ss:$16 sps:$4 sm:$0xff]  }
 0x72b   : > { %12549 = vmatprep.subr.bf16.mxu0 %v18702_v25  ;;  %13697 = vmatprep.subr.bf16.mxu1 %v18705_v39  ;;  %v18789_v25 = vld [vmem:[%s19316_s27 + $0x368c] ss:$16 sps:$4 sm:$0xff]   ;;  %v18784_v39 = vld [vmem:[%s19316_s27 + $0x3680] ss:$16 sps:$4 sm:$0xff]  }
 0x72e   : > { %12550 = vmatpush1.bf16.msra.mxu0 %v18700_v22  ;;  %13698 = vmatpush1.bf16.msra.mxu1 %v18703_v42  ;;  %v18787_v22 = vld [vmem:[%s19316_s27 + $0x3688] ss:$16 sps:$4 sm:$0xff]   ;;  %v18792_v42 = vld [vmem:[%s19316_s27 + $0x36a4] ss:$16 sps:$4 sm:$0xff]  }
 0x72f   : > { %12551 = vmatprep.subr.bf16.mxu0 %v18708_v45  ;;  %13699 = vmatprep.subr.bf16.mxu1 %v18711_v26  ;;  %v18795_v45 = vld [vmem:[%s19316_s27 + $0x36ac] ss:$16 sps:$4 sm:$0xff]   ;;  %v18790_v26 = vld [vmem:[%s19316_s27 + $0x36a0] ss:$16 sps:$4 sm:$0xff]  }
 0x732   : > { %12552 = vmatpush1.bf16.msra.mxu0 %v18706_v24  ;;  %13700 = vmatpush1.bf16.msra.mxu1 %v18709_v47  ;;  %v18793_v24 = vld [vmem:[%s19316_s27 + $0x36a8] ss:$16 sps:$4 sm:$0xff]   ;;  %v18798_v47 = vld [vmem:[%s19316_s27 + $0x36c4] ss:$16 sps:$4 sm:$0xff]  }
 0x733   : > { %12553 = vmatprep.subr.bf16.mxu0 %v18714_v49  ;;  %13701 = vmatprep.subr.bf16.mxu1 %v18717_v30  ;;  %v18801_v49 = vld [vmem:[%s19316_s27 + $0x36cc] ss:$16 sps:$4 sm:$0xff]   ;;  %v18796_v30 = vld [vmem:[%s19316_s27 + $0x36c0] ss:$16 sps:$4 sm:$0xff]  }
 0x736   : > { %12554 = vmatpush1.bf16.msra.mxu0 %v18712_v51  ;;  %13702 = vmatpush1.bf16.msra.mxu1 %v18715_v37  ;;  %v18799_v51 = vld [vmem:[%s19316_s27 + $0x36c8] ss:$16 sps:$4 sm:$0xff]   ;;  %v18804_v37 = vld [vmem:[%s19316_s27 + $0x36e4] ss:$16 sps:$4 sm:$0xff]  }
 0x737   : > { %12555 = vmatprep.subr.bf16.mxu0 %v18720_v33  ;;  %13703 = vmatprep.subr.bf16.mxu1 %v18723_v36  ;;  %v18807_v33 = vld [vmem:[%s19316_s27 + $0x36ec] ss:$16 sps:$4 sm:$0xff]   ;;  %v18802_v36 = vld [vmem:[%s19316_s27 + $0x36e0] ss:$16 sps:$4 sm:$0xff]  }
 0x73a   : > { %12556 = vmatpush1.bf16.msra.mxu0 %v18718_v40  ;;  %13704 = vmatpush1.bf16.msra.mxu1 %v18721_v55  ;;  %v18805_v40 = vld [vmem:[%s19316_s27 + $0x36e8] ss:$16 sps:$4 sm:$0xff]   ;;  %v18810_v55 = vld [vmem:[%s19316_s27 + $0x3704] ss:$16 sps:$4 sm:$0xff]  }
 0x73b   : > { %12557 = vmatprep.subr.bf16.mxu0 %v18726_v38  ;;  %13705 = vmatprep.subr.bf16.mxu1 %v18729_v58  ;;  %v18813_v38 = vld [vmem:[%s19316_s27 + $0x370c] ss:$16 sps:$4 sm:$0xff]   ;;  %v18808_v58 = vld [vmem:[%s19316_s27 + $0x3700] ss:$16 sps:$4 sm:$0xff]  }
 0x73e   : > { %12558 = vmatpush1.bf16.msra.mxu0 %v18724_v41  ;;  %13706 = vmatpush1.bf16.msra.mxu1 %v18727_v61  ;;  %v18811_v41 = vld [vmem:[%s19316_s27 + $0x3708] ss:$16 sps:$4 sm:$0xff]   ;;  %v18816_v61 = vld [vmem:[%s19316_s27 + $0x3724] ss:$16 sps:$4 sm:$0xff]  }
 0x73f   : > { %12559 = vmatprep.subr.bf16.mxu0 %v18732_v29  ;;  %13707 = vmatprep.subr.bf16.mxu1 %v18735_v62  ;;  %v18819_v29 = vld [vmem:[%s19316_s27 + $0x372c] ss:$16 sps:$4 sm:$0xff]   ;;  %v18814_v62 = vld [vmem:[%s19316_s27 + $0x3720] ss:$16 sps:$4 sm:$0xff]  }
 0x742   : > { %12560 = vmatpush1.bf16.msra.mxu0 %v18730_v0  ;;  %13708 = vmatpush1.bf16.msra.mxu1 %v18733_v46  ;;  %v18817_v0 = vld [vmem:[%s19316_s27 + $0x3728] ss:$16 sps:$4 sm:$0xff]   ;;  %v18822_v46 = vld [vmem:[%s19316_s27 + $0x3744] ss:$16 sps:$4 sm:$0xff]  }
 0x743   : > { %12561 = vmatprep.subr.bf16.mxu0 %v18738_v1  ;;  %13709 = vmatprep.subr.bf16.mxu1 %v18741_v53  ;;  %v18825_v1 = vld [vmem:[%s19316_s27 + $0x374c] ss:$16 sps:$4 sm:$0xff]   ;;  %v18820_v53 = vld [vmem:[%s19316_s27 + $0x3740] ss:$16 sps:$4 sm:$0xff]  }
 0x746   : > { %12562 = vmatpush1.bf16.msra.mxu0 %v18736_v48  ;;  %13710 = vmatpush1.bf16.msra.mxu1 %v18739_v52  ;;  %v18823_v48 = vld [vmem:[%s19316_s27 + $0x3748] ss:$16 sps:$4 sm:$0xff]   ;;  %v18828_v52 = vld [vmem:[%s19316_s27 + $0x3764] ss:$16 sps:$4 sm:$0xff]  }
 0x747   : > { %12563 = vmatprep.subr.bf16.mxu0 %v18744_v56  ;;  %13711 = vmatprep.subr.bf16.mxu1 %v18747_v5  ;;  %v18831_v56 = vld [vmem:[%s19316_s27 + $0x376c] ss:$16 sps:$4 sm:$0xff]   ;;  %v18826_v5 = vld [vmem:[%s19316_s27 + $0x3760] ss:$16 sps:$4 sm:$0xff]  }
 0x74a   : > { %12564 = vmatpush1.bf16.msra.mxu0 %v18742_v54  ;;  %13712 = vmatpush1.bf16.msra.mxu1 %v18745_v8  ;;  %v18829_v54 = vld [vmem:[%s19316_s27 + $0x3768] ss:$16 sps:$4 sm:$0xff]   ;;  %v18834_v8 = vld [vmem:[%s19316_s27 + $0x3784] ss:$16 sps:$4 sm:$0xff]  }
 0x74b   : > { %12565 = vmatprep.subr.bf16.mxu0 %v18750_v57  ;;  %13713 = vmatprep.subr.bf16.mxu1 %v18753_v12  ;;  %v18837_v57 = vld [vmem:[%s19316_s27 + $0x378c] ss:$16 sps:$4 sm:$0xff]   ;;  %v18832_v12 = vld [vmem:[%s19316_s27 + $0x3780] ss:$16 sps:$4 sm:$0xff]  }
 0x74e   : > { %12566 = vmatpush1.bf16.msra.mxu0 %v18748_v13  ;;  %13714 = vmatpush1.bf16.msra.mxu1 %v18751_v15  ;;  %v18840_v13 = vld [vmem:[%s19316_s27 + $0x37a4] ss:$16 sps:$4 sm:$0xff]   ;;  %v18843_v15 = vld [vmem:[%s19316_s27 + $0x37ac] ss:$16 sps:$4 sm:$0xff]  }
 0x74f   : > { %12567 = vmatprep.subr.bf16.mxu0 %v18756_v60  ;;  %13715 = vmatprep.subr.bf16.mxu1 %v18759_v16  ;;  %v18838_v60 = vld [vmem:[%s19316_s27 + $0x37a0] ss:$16 sps:$4 sm:$0xff]   ;;  %v18841_v16 = vld [vmem:[%s19316_s27 + $0x37a8] ss:$16 sps:$4 sm:$0xff]  }
 0x752   : > { %12568 = vmatpush1.bf16.msra.mxu0 %v18754_v3  ;;  %13716 = vmatpush1.bf16.msra.mxu1 %v18757_v63  ;;  %v18846_v3 = vld [vmem:[%s19316_s27 + $0x37c4] ss:$16 sps:$4 sm:$0xff]   ;;  %v18849_v63 = vld [vmem:[%s19316_s27 + $0x37cc] ss:$16 sps:$4 sm:$0xff]  }
 0x753   : > { %12578 = vmatprep.subr.bf16.mxu0 %v18762_v18  ;;  %13726 = vmatprep.subr.bf16.mxu1 %v18765_v2  ;;  %v18844_v18 = vld [vmem:[%s19316_s27 + $0x37c0] ss:$16 sps:$4 sm:$0xff]   ;;  %v18847_v2 = vld [vmem:[%s19316_s27 + $0x37c8] ss:$16 sps:$4 sm:$0xff]  }
 0x755   : > { %12570 = vmatmul.mubr.bf16.vlgmr.msra.gmra.mrb[0].mxu0 %v715_v20  ;;  %13718 = vmatmul.mubr.bf16.vlgmr.msra.gmra.mrb[0].mxu1 %v715_v20  ;;  %v18855_v20 = vld [vmem:[%s19316_s27 + $0x37ec] ss:$16 sps:$4 sm:$0xff]  }
 0x756   : > { %12579 = vmatpush1.bf16.msra.mxu0 %v18760_v4  ;;  %13727 = vmatpush1.bf16.msra.mxu1 %v18763_v9  ;;  %v18850_v4 = vld [vmem:[%s19316_s27 + $0x37e0] ss:$16 sps:$4 sm:$0xff]   ;;  %v18853_v9 = vld [vmem:[%s19316_s27 + $0x37e8] ss:$16 sps:$4 sm:$0xff]  }
 0x757   : > { %12580 = vmatprep.subr.bf16.mxu0 %v18768_v23  ;;  %13728 = vmatprep.subr.bf16.mxu1 %v18771_v7  ;;  %v717_v23 = vpack.c.bf16 %v21338_v17, %v21338_v17 }
 0x758   : > { %12610 = vmatprep.mubr.bf16.mxu0 %v718_v10  ;;  %13758 = vmatprep.mubr.bf16.mxu1 %v718_v10 }
 0x75a   : > { %12581 = vmatpush1.bf16.msra.mxu0 %v18766_v59  ;;  %13729 = vmatpush1.bf16.msra.mxu1 %v18769_v28 }
 0x75b   : > { %12582 = vmatprep.subr.bf16.mxu0 %v18774_v31  ;;  %13730 = vmatprep.subr.bf16.mxu1 %v18777_v11 }
 0x75e   : > { %12583 = vmatpush1.bf16.msra.mxu0 %v18772_v32  ;;  %13731 = vmatpush1.bf16.msra.mxu1 %v18775_v34 }
 0x75f   : > { %12584 = vmatprep.subr.bf16.mxu0 %v18780_v14  ;;  %13732 = vmatprep.subr.bf16.mxu1 %v18783_v35 }
 0x762   : > { %12585 = vmatpush1.bf16.msra.mxu0 %v18778_v21  ;;  %13733 = vmatpush1.bf16.msra.mxu1 %v18781_v27 }
 0x763   : > { %12586 = vmatprep.subr.bf16.mxu0 %v18786_v19  ;;  %13734 = vmatprep.subr.bf16.mxu1 %v18789_v25  ;;  %v340_v19 = vld [vmem:[#allocation2] sm:$0xff] }
 0x766   : > { %12587 = vmatpush1.bf16.msra.mxu0 %v18784_v39  ;;  %13735 = vmatpush1.bf16.msra.mxu1 %v18787_v22  ;;  %v13796_v39 = vld [vmem:[%s270_s17] sm:$0xf] (!%p15821_p6)  ;;  %v13800_v22 = vsub.s32 (!%p15821_p6), 0, %v19385_v44 }
 0x767   : > { %12588 = vmatprep.subr.bf16.mxu0 %v18792_v42  ;;  %13736 = vmatprep.subr.bf16.mxu1 %v18795_v45  ;;  %v13804_v42 = vsub.s32 (!%p15821_p6), 1, %v19385_v44  ;;  %v13808_v45 = vsub.s32 (!%p15821_p6), 2, %v19385_v44 }
 0x76a   : > { %12589 = vmatpush1.bf16.msra.mxu0 %v18790_v26  ;;  %13737 = vmatpush1.bf16.msra.mxu1 %v18793_v24  ;;  %v13812_v26 = vsub.s32 (!%p15821_p6), 3, %v19385_v44  ;;  %v13833_v24 = vld [vmem:[%s279_s6] sm:$0xf] (!%p15821_p6) }
 0x76b   : > { %12590 = vmatprep.subr.bf16.mxu0 %v18798_v47  ;;  %13738 = vmatprep.subr.bf16.mxu1 %v18801_v49  ;;  %v13801_v47 = vrot.slane (!%p15821_p6), %v13796_v39, %v13800_v22  ;;  %v13805_v49 = vrot.slane (!%p15821_p6), %v13796_v39, %v13804_v42 }
 0x76e   : > { %12591 = vmatpush1.bf16.msra.mxu0 %v18796_v30  ;;  %13739 = vmatpush1.bf16.msra.mxu1 %v18799_v51  ;;  %v13809_v30 = vrot.slane (!%p15821_p6), %v13796_v39, %v13808_v45  ;;  %v13838_v51 = vrot.slane (!%p15821_p6), %v13833_v24, %v13800_v22 }
 0x76f   : > { %12592 = vmatprep.subr.bf16.mxu0 %v18804_v37  ;;  %13740 = vmatprep.subr.bf16.mxu1 %v18807_v33  ;;  %v13813_v37 = vrot.slane (!%p15821_p6), %v13796_v39, %v13812_v26  ;;  %v13842_v33 = vrot.slane (!%p15821_p6), %v13833_v24, %v13804_v42 }
 0x772   : > { %12593 = vmatpush1.bf16.msra.mxu0 %v18802_v36  ;;  %13741 = vmatpush1.bf16.msra.mxu1 %v18805_v40  ;;  %v13846_v36 = vrot.slane (!%p15821_p6), %v13833_v24, %v13808_v45  ;;  %v13850_v40 = vrot.slane (!%p15821_p6), %v13833_v24, %v13812_v26 }
 0x773   : > { %12594 = vmatprep.subr.bf16.mxu0 %v18810_v55  ;;  %13742 = vmatprep.subr.bf16.mxu1 %v18813_v38  ;;  %v13814_v55 = vcombine.low (!%p15821_p6), %v13801_v47, %v13805_v49  ;;  %v13815_v38 = vcombine.low (!%p15821_p6), %v13809_v30, %v13813_v37 }
 0x776   : > { %12595 = vmatpush1.bf16.msra.mxu0 %v18808_v58  ;;  %13743 = vmatpush1.bf16.msra.mxu1 %v18811_v41  ;;  %v13851_v58 = vcombine.low (!%p15821_p6), %v13838_v51, %v13842_v33  ;;  %v13852_v41 = vcombine.low (!%p15821_p6), %v13846_v36, %v13850_v40 }
 0x777   : > { %12596 = vmatprep.subr.bf16.mxu0 %v18816_v61  ;;  %13744 = vmatprep.subr.bf16.mxu1 %v18819_v29  ;;  %v13822_v61 = vrot.slane (!%p15821_p6), %v13814_v55, %v19393_v50  ;;  %v13829_v29 = vrot.slane (!%p15821_p6), %v13815_v38, %v19393_v50 }
 0x778   : > { %v13859_v44 = vrot.slane (!%p15821_p6), %v13851_v58, %v19393_v50 }
 0x77a   : > { %12597 = vmatpush1.bf16.msra.mxu0 %v18814_v62  ;;  %13745 = vmatpush1.bf16.msra.mxu1 %v18817_v0  ;;  %v13866_v62 = vrot.slane (!%p15821_p6), %v13852_v41, %v19393_v50 }
 0x77b   : > { %12598 = vmatprep.subr.bf16.mxu0 %v18822_v46  ;;  %13746 = vmatprep.subr.bf16.mxu1 %v18825_v1  ;;  %v13830_v46 = vcombine.low (!%p15821_p6), %v13822_v61, %v13829_v29 }
 0x77c   : > { %v13867_v1 = vcombine.low (!%p15821_p6), %v13859_v44, %v13866_v62 }
 0x77e   : > { %12599 = vmatpush1.bf16.msra.mxu0 %v18820_v53  ;;  %13747 = vmatpush1.bf16.msra.mxu1 %v18823_v48 }
 0x77f   : > { %12600 = vmatprep.subr.bf16.mxu0 %v18828_v52  ;;  %13748 = vmatprep.subr.bf16.mxu1 %v18831_v56 }
 0x782   : > { %12601 = vmatpush1.bf16.msra.mxu0 %v18826_v5  ;;  %13749 = vmatpush1.bf16.msra.mxu1 %v18829_v54 }
 0x783   : > { %12602 = vmatprep.subr.bf16.mxu0 %v18834_v8  ;;  %13750 = vmatprep.subr.bf16.mxu1 %v18837_v57 }
 0x786   : > { %12603 = vmatpush1.bf16.msra.mxu0 %v18832_v12  ;;  %13751 = vmatpush1.bf16.msra.mxu1 %v18835_v43 }
 0x787   : > { %12604 = vmatprep.subr.bf16.mxu0 %v18840_v13  ;;  %13752 = vmatprep.subr.bf16.mxu1 %v18843_v15 }
 0x78a   : > { %12605 = vmatpush1.bf16.msra.mxu0 %v18838_v60  ;;  %13753 = vmatpush1.bf16.msra.mxu1 %v18841_v16 }
 0x78b   : > { %12606 = vmatprep.subr.bf16.mxu0 %v18846_v3  ;;  %13754 = vmatprep.subr.bf16.mxu1 %v18849_v63 }
 0x78e   : > { %12607 = vmatpush1.bf16.msra.mxu0 %v18844_v18  ;;  %13755 = vmatpush1.bf16.msra.mxu1 %v18847_v2 }
 0x78f   : > { %12608 = vmatprep.subr.bf16.mxu0 %v18852_v6  ;;  %13756 = vmatprep.subr.bf16.mxu1 %v18855_v20 }
 0x792   : > { %12609 = vmatpush1.bf16.msra.mxu0 %v18850_v4  ;;  %13757 = vmatpush1.bf16.msra.mxu1 %v18853_v9 }
 0x795   : > { %12611 = vmatmul.mubr.bf16.vlgmr.msra.gmra.mrb[0].mxu0 %v717_v23  ;;  %13759 = vmatmul.mubr.bf16.vlgmr.msra.gmra.mrb[0].mxu1 %v717_v23 }
 0x868   : > { %v12612_v7 = vpop.f32.mrb[0].mxu0  ;;  %v13760_v10 = vpop.f32.mrb[0].mxu1 }
 0x869   : > { %v12614_v59 = vpop.f32.mrb[1].mxu0  ;;  %v13762_v28 = vpop.f32.mrb[1].mxu1 }
 0x86a   : > { %v13771_v31 = vcombine.low %v12612_v7, %v12614_v59  ;;  %v13772_v11 = vcombine.low %v13760_v10, %v13762_v28  ;;  %v12616_v32 = vpop.f32.mrb[2].mxu0  ;;  %v13764_v34 = vpop.f32.mrb[2].mxu1 }
 0x86b   : > { %v12617_v14 = vpop.f32.mrb[3].mxu0  ;;  %v13765_v35 = vpop.f32.mrb[3].mxu1 }
 0x86c   : > { %v13779_v21 = vrot.slane %v13771_v31, %v19393_v50  ;;  %v13786_v27 = vrot.slane %v13772_v11, %v19393_v50  ;;  %13794 = sbr.rel (%p15821_p6) target bundleno = 2177 (0x881), region = 56 }
 0x86e   : > { %v13787_v17 = vcombine.low %v13779_v21, %v13786_v27 }
 0x870   : > { %v13789_v25 = vadd.f32 %v13787_v17, %v340_v19 }
 0x872   : > { %13790 = vst [vmem:[#allocation2] sm:$0xff] %v13789_v25 }
 0x879   : > { %v13795_v0 = vld [vmem:[#allocation2] sm:$0xff] }
 0x87a   : > { %v13832_v53 = vmul.f32 %v13830_v46, %v13795_v0 }
 0x87c   : > { %v13869_v48 = vadd.f32 %v13867_v1, %v13832_v53 }
 0x87e   : > { %v13870_v52 = vmax.f32 %v13869_v48, 0.0 }
 0x880   : > { %13871 = vst [vmem:[%s19342_s10] sm:$0xff] %v13870_v52 }
 0x881 PF: > { %s20_s25 = sadd.s32 1, %s19041_s25   ;;  %s21501_s21 = sld [smem:[#allocation10_spill]] }
 0x882   : > { %p17_p9 = scmp.ge.s32.totalorder %s20_s25, 8   ;;  %s21502_s17 = sld [smem:[#allocation14_spill]] }
 0x883   : > { %s21503_s22 = sld [smem:[#allocation15_spill]]  ;;  %s21504_s1 = sld [smem:[#allocation11_spill]] }
 0x884   : > { %s21505_s5 = sld [smem:[#allocation12_spill]]  ;;  %s21506_s24 = sld [smem:[#allocation13_spill]] }
 0x885   : > { %s21507_s15 = smov %s19005_s16  ;;  %s21509_s18 = smov %s19017_s19 }
 0x886   : > { %s21510_s19 = smov %s19021_s20  ;;  %19 = sbr.rel (!%p17_p9) target bundleno = 13 (0xd), region = 111 }
 0x887   : > { %s21508_s16 = smov %s21501_s21  ;;  %s21512_s21 = smov %s19033_s23 }
 0x889   : > { %s21511_s20 = smov %s21503_s22  ;;  %s21513_s22 = smov %s21504_s1 }
 0x88a   : > { %s21514_s23 = smov %s21505_s5 }
 0x88d   :  { %13894 = vsyncpa [#allocation4], 1 }
 0x88e   :  { %13896 = vsyncpa [#allocation4 + $0x1], 1 }
 0x88f   :  { %13897 = vsyncpa [#allocation6], 1 }
 0x890   :  { %13899 = vsyncpa [#allocation6 + $0x1], 1 }

</bundles_post_ra>
